<compile_context>
chip_gen: v7x
topology: tpu7x:2x2x1
jax: 0.10.0
libtpu: 0.0.40
codegen_flags: <defaults>
</compile_context>

<pallas_src>
import functools
import math

import jax
import jax.numpy as jnp
from jax.experimental import pallas as pl
from jax.experimental.pallas import tpu as pltpu


# ---------------------------------------------------------------------------
# Pallas kernel 1: tiled matmul + bias + activation (conv-as-im2col path)
# ---------------------------------------------------------------------------
def _mm_bias_act_kernel(a_ref, w_ref, b_ref, o_ref, *, act):
    acc = jnp.dot(a_ref[...], w_ref[...], preferred_element_type=jnp.float32)
    acc = acc + b_ref[...]                       # (1, N) f32 broadcast
    if act == "relu":
        acc = jnp.maximum(acc, 0.0)
    elif act == "sigmoid":
        acc = jax.nn.sigmoid(acc)
    o_ref[...] = acc.astype(o_ref.dtype)


def matmul_bias_act(a, w, b, act="relu", out_dtype=None, tm_max=256):
    """a: [M, K], w: [K, N], b: [N] -> [M, N], bias + activation fused."""
    M, K = a.shape
    K2, N = w.shape
    assert K == K2, (K, K2)
    out_dtype = out_dtype or a.dtype
    b2 = b.reshape(1, N).astype(jnp.float32)

    # Largest tile <= tm_max dividing M; fall back to a single block if it
    # would violate the (8,128) sublane constraint.
    tm = math.gcd(M, min(M, tm_max))
    if tm != M and tm % 8 != 0:
        tm = M
    grid = (M // tm,)

    return pl.pallas_call(
        functools.partial(_mm_bias_act_kernel, act=act),
        out_shape=jax.ShapeDtypeStruct((M, N), out_dtype),
        grid=grid,
        in_specs=[
            pl.BlockSpec((tm, K), lambda i: (i, 0)),   # patches: streamed M tiles
            pl.BlockSpec((K, N), lambda i: (0, 0)),    # weights: VMEM resident
            pl.BlockSpec((1, N), lambda i: (0, 0)),    # bias: VMEM resident
        ],
        out_specs=pl.BlockSpec((tm, N), lambda i: (i, 0)),
        compiler_params=pltpu.CompilerParams(
            dimension_semantics=("parallel",)),        # megacore split on v7x
    )(a, w, b2)


# ---------------------------------------------------------------------------
# Pallas kernel 2: the whole linear tail fused into one call.
# Intermediates ((B,128) activations) never leave VMEM.
# ---------------------------------------------------------------------------
def _linear_tail_kernel(
        xf_ref, yf_ref,
        l1w, l1b, l2w, l2b, l3w, l3b,
        c1w, c1b, c2w, c2b, c3w, c3b, c4w, c4b, c5w, c5b,
        xout_ref, yout_ref, encp_ref, ency_ref):

    def dense(a, w_ref, b_ref, act):
        acc = jnp.dot(a.astype(w_ref.dtype), w_ref[...],
                      preferred_element_type=jnp.float32)
        acc = acc + b_ref[...]                   # (1, Fout) f32
        if act == "relu":
            acc = jnp.maximum(acc, 0.0)
        elif act == "sigmoid":
            acc = jax.nn.sigmoid(acc)
        return acc                               # f32

    # point-cloud branch
    x = dense(xf_ref[...], l1w, l1b, "relu")                    # (B,128) enc_pcl
    encp_ref[...] = x.astype(encp_ref.dtype)
    x1 = dense(x, l2w, l2b, "relu")                             # (B,128)
    xout_ref[...] = dense(x1, l3w, l3b, "none").astype(xout_ref.dtype)

    # color branch
    y = dense(yf_ref[...], c1w, c1b, "relu")                    # (B,128)
    ency_ref[...] = y.astype(ency_ref.dtype)
    y = dense(y, c2w, c2b, "relu")
    y = dense(y, c3w, c3b, "relu")
    # color_linear4(concat([x1, y], dim=1)) == x1 @ W[:128] + y @ W[128:] + b
    acc4 = (jnp.dot(x1.astype(c4w.dtype), c4w[0:128, :],
                    preferred_element_type=jnp.float32)
            + jnp.dot(y.astype(c4w.dtype), c4w[128:256, :],
                      preferred_element_type=jnp.float32)
            + c4b[...])
    y = jnp.maximum(acc4, 0.0)
    yout_ref[...] = dense(y, c5w, c5b, "sigmoid").astype(yout_ref.dtype)


def _vmem_limit(arrays, out_shapes, headroom=4 << 20, cap=30 << 20):
    need = 0
    for a in tuple(arrays) + tuple(out_shapes):
        need += math.prod(a.shape) * jnp.dtype(a.dtype).itemsize
    return int(min(cap, 2 * need + headroom))


def linear_tail(x_flat, y_flat, p, B):
    def b2(name):
        return p[name + "_b"].reshape(1, -1)

    ins = (x_flat, y_flat,
           p["lin1_w"], b2("lin1"), p["lin2_w"], b2("lin2"),
           p["lin3_w"], b2("lin3"),
           p["clin1_w"], b2("clin1"), p["clin2_w"], b2("clin2"),
           p["clin3_w"], b2("clin3"), p["clin4_w"], b2("clin4"),
           p["clin5_w"], b2("clin5"))
    out_shape = (
        jax.ShapeDtypeStruct((B, 3 * 1024), jnp.float32),   # x_out
        jax.ShapeDtypeStruct((B, 3 * 1024), jnp.float32),   # y_out (pre-reshape)
        jax.ShapeDtypeStruct((B, 128), jnp.float32),        # enc_pcl
        jax.ShapeDtypeStruct((B, 128), jnp.float32),        # color enc feature
    )
    return pl.pallas_call(
        _linear_tail_kernel,
        out_shape=out_shape,
        compiler_params=pltpu.CompilerParams(
            vmem_limit_bytes=_vmem_limit(ins, out_shape)),
    )(*ins)


# ---------------------------------------------------------------------------
# Glue: im2col (pad + strided slices only) so conv becomes a Pallas matmul
# ---------------------------------------------------------------------------
def _im2col(x_nhwc, k=3, stride=2, pad=1):
    B, H, W, C = x_nhwc.shape
    xp = jnp.pad(x_nhwc, ((0, 0), (pad, pad), (pad, pad), (0, 0)))
    Ho = (H + 2 * pad - k) // stride + 1
    Wo = (W + 2 * pad - k) // stride + 1
    cols = []
    for kh in range(k):
        for kw in range(k):
            cols.append(
                xp[:, kh:kh + stride * Ho:stride, kw:kw + stride * Wo:stride, :])
    patches = jnp.concatenate(cols, axis=-1)        # (B,Ho,Wo,k*k*C), (kh,kw,c)
    return patches.reshape(B * Ho * Wo, k * k * C), (B, Ho, Wo)


def conv2d_s2(x_nhwc, w_mat, b, act="relu"):
    """3x3 / stride 2 / pad 1 conv as im2col + tiled Pallas matmul."""
    cout = w_mat.shape[1]
    patches, (B, Ho, Wo) = _im2col(x_nhwc)
    out = matmul_bias_act(patches, w_mat, b, act=act)
    return out.reshape(B, Ho, Wo, cout)


# ---------------------------------------------------------------------------
# Parameters (deterministic synthetic, generated in torch layout then
# statically re-laid-out for the NHWC / im2col kernels)
# ---------------------------------------------------------------------------
def init_params(key, wdtype=jnp.bfloat16):
    conv_defs = {  # name: (cin, cout)
        "cnn1": (3, 32), "cnn2": (32, 64), "cnn3": (64, 128), "cnn4": (128, 256),
        "ccnn1": (3, 32), "ccnn2": (32, 64),
    }
    lin_defs = {   # name: (fin, fout)
        "lin1": (256 * 4 * 4, 128), "lin2": (128, 128), "lin3": (128, 1024 * 3),
        "clin1": (64 * 16 * 16, 128), "clin2": (128, 128), "clin3": (128, 128),
        "clin4": (256, 128), "clin5": (128, 1024 * 3),
    }
    keys = jax.random.split(key, len(conv_defs) + len(lin_defs))
    p = {}
    i = 0
    for name, (cin, cout) in conv_defs.items():
        fan_in = 9 * cin
        w_oihw = (jax.random.normal(keys[i], (cout, cin, 3, 3), jnp.float32)
                  / jnp.sqrt(float(fan_in)))
        # OIHW -> HWIO -> (kh*kw*cin, cout); matches im2col's (kh,kw,c) order.
        w_mat = jnp.transpose(w_oihw, (2, 3, 1, 0)).reshape(9 * cin, cout)
        p[name + "_w"] = w_mat.astype(wdtype)
        p[name + "_b"] = jnp.zeros((cout,), jnp.float32)
        i += 1
    for name, (fin, fout) in lin_defs.items():
        w = (jax.random.normal(keys[i], (fin, fout), jnp.float32)
             / jnp.sqrt(float(fin)))
        # Pre-permute rows from torch's channel-major (c,h,w) flatten order
        # to NHWC (h,w,c) so no runtime transpose is needed before flatten.
        if name == "lin1":        # conv4 output is (B,4,4,256) NHWC
            w = w.reshape(256, 4, 4, fout).transpose(1, 2, 0, 3).reshape(fin, fout)
        if name == "clin1":       # color_cnn2 output is (B,16,16,64) NHWC
            w = w.reshape(64, 16, 16, fout).transpose(1, 2, 0, 3).reshape(fin, fout)
        p[name + "_w"] = w.astype(wdtype)
        p[name + "_b"] = jnp.zeros((fout,), jnp.float32)
        i += 1
    # cnn1 / color_cnn1 share the same im2col patches -> fuse along N.
    p["c1fused_w"] = jnp.concatenate([p["cnn1_w"], p["ccnn1_w"]], axis=1)
    p["c1fused_b"] = jnp.concatenate([p["cnn1_b"], p["ccnn1_b"]], axis=0)
    return p


# ---------------------------------------------------------------------------
# Forward pass (mirrors ReconstructionNet.forward)
# ---------------------------------------------------------------------------
def reconstruction_net_forward(img_nchw, p, return_feat=False):
    B = img_nchw.shape[0]
    x_nhwc = jnp.transpose(img_nchw, (0, 2, 3, 1)).astype(jnp.bfloat16)

    # fused first conv of both branches (identical im2col patches)
    patches0, (_, Ho, Wo) = _im2col(x_nhwc)                       # (B*32*32, 27)
    fused0 = matmul_bias_act(patches0, p["c1fused_w"], p["c1fused_b"], "relu")
    fused0 = fused0.reshape(B, Ho, Wo, 64)
    x = fused0[..., :32]                                          # cnn1 out
    yc = fused0[..., 32:]                                         # color_cnn1 out

    # point-cloud conv trunk
    x = conv2d_s2(x, p["cnn2_w"], p["cnn2_b"])                    # (B,16,16,64)
    x = conv2d_s2(x, p["cnn3_w"], p["cnn3_b"])                    # (B, 8, 8,128)
    x = conv2d_s2(x, p["cnn4_w"], p["cnn4_b"])                    # (B, 4, 4,256)
    x_flat = x.reshape(B, -1)        # NHWC flatten (lin1_w rows pre-permuted)

    # color conv trunk
    yc = conv2d_s2(yc, p["ccnn2_w"], p["ccnn2_b"])                # (B,16,16,64)
    y_flat = yc.reshape(B, -1)       # NHWC flatten (clin1_w rows pre-permuted)

    # fused linear tail: one Pallas call, activations stay in VMEM
    x_out, y_out, enc_pcl, enc_col = linear_tail(x_flat, y_flat, p, B)
    x_out = x_out.reshape(B, 3, 1024)
    y_out = y_out.reshape(B, 3, 1024)

    if return_feat:
        # torch.concat([enc_pcl, y], axis=0) -> (2B, 128)
        enc_feat = jnp.concatenate([enc_pcl, enc_col], axis=0)
        return x_out, y_out, enc_feat
    return x_out, y_out


if __name__ == "__main__":
    key = jax.random.PRNGKey(0)
    pkey, xkey = jax.random.split(key)
    params = init_params(pkey)
    # spatial size must be 64x64 so the 256*4*4 / 64*16*16 flatten sizes match
    img = jax.random.normal(xkey, (2, 3, 64, 64), jnp.float32)

    fwd = jax.jit(functools.partial(reconstruction_net_forward, return_feat=False))
    x_out, y_out = fwd(img, params)
    jax.block_until_ready((x_out, y_out))

    assert x_out.shape == (2, 3, 1024) and x_out.dtype == jnp.float32
    assert y_out.shape == (2, 3, 1024) and y_out.dtype == jnp.float32
    assert bool(jnp.all(jnp.isfinite(x_out))) and bool(jnp.all(jnp.isfinite(y_out)))
    assert bool(jnp.all((y_out >= 0.0) & (y_out <= 1.0)))   # sigmoid range
    print("KERNEL_OK")
</pallas_src>

<mosaic_0001>
module attributes {stable_mosaic.version = 11 : i64} {
  func.func @_mm_bias_act_kernel(%arg0: i32, %arg1: memref<256x27xbf16, #tpu.memory_space<vmem>>, %arg2: memref<27x64xbf16, #tpu.memory_space<vmem>>, %arg3: memref<1x64xf32, #tpu.memory_space<vmem>>, %arg4: memref<256x64xbf16, #tpu.memory_space<vmem>>) attributes {dimension_semantics = [#tpu.dimension_semantics<parallel>], iteration_bounds = array<i64: 8>, scalar_prefetch = 0 : i64, scratch_operands = 0 : i64, tpu.core_type = #tpu.core_type<tc>, window_params = [{transform_indices = @transform_0, window_bounds = array<i64: 256, 27>}, {pipeline_mode = #tpu.pipeline_mode<synchronous>, transform_indices = @transform_1, window_bounds = array<i64: 27, 64>}, {pipeline_mode = #tpu.pipeline_mode<synchronous>, transform_indices = @transform_2, window_bounds = array<i64: 1, 64>}, {transform_indices = @transform_3, window_bounds = array<i64: 256, 64>}]} {
    %c0 = arith.constant 0 : index
    %c0_0 = arith.constant 0 : index
    %0 = vector.load %arg1[%c0, %c0_0] : memref<256x27xbf16, #tpu.memory_space<vmem>>, vector<256x27xbf16>
    %c0_1 = arith.constant 0 : index
    %c0_2 = arith.constant 0 : index
    %1 = vector.load %arg2[%c0_1, %c0_2] : memref<27x64xbf16, #tpu.memory_space<vmem>>, vector<27x64xbf16>
    %cst = arith.constant dense<0.000000e+00> : vector<256x64xf32>
    %2 = tpu.matmul %0, %1, %cst {dimension_numbers = #tpu.dot_dimension_numbers<[1], [0], [0], [1], [0, 0, 1, 1], [], []>} : vector<256x27xbf16>, vector<27x64xbf16>, vector<256x64xf32> -> vector<256x64xf32>
    %c0_3 = arith.constant 0 : index
    %c0_4 = arith.constant 0 : index
    %3 = vector.load %arg3[%c0_3, %c0_4] : memref<1x64xf32, #tpu.memory_space<vmem>>, vector<1x64xf32>
    %4 = vector.broadcast %3 : vector<1x64xf32> to vector<256x64xf32>
    %5 = arith.addf %2, %4 : vector<256x64xf32>
    %cst_5 = arith.constant 0.000000e+00 : f32
    %6 = vector.broadcast %cst_5 : f32 to vector<256x64xf32>
    %7 = arith.maximumf %5, %6 : vector<256x64xf32>
    %8 = arith.truncf %7 : vector<256x64xf32> to vector<256x64xbf16>
    %c0_6 = arith.constant 0 : index
    %c0_7 = arith.constant 0 : index
    %9 = vector.load %arg4[%c0_6, %c0_7] : memref<256x64xbf16, #tpu.memory_space<vmem>>, vector<256x64xbf16>
    tpu.vector_store %arg4[%c0_6, %c0_7], %8 {strides = array<i32>} : memref<256x64xbf16, #tpu.memory_space<vmem>>, vector<256x64xbf16>,
    return
  }
  func.func @transform_0(%arg0: i32) -> (i32, i32) {
    %c0_i32 = arith.constant 0 : i32
    %c0_i32_0 = arith.constant 0 : i32
    return %arg0, %c0_i32 : i32, i32
  }
  func.func @transform_1(%arg0: i32) -> (i32, i32) {
    %c0_i32 = arith.constant 0 : i32
    %c0_i32_0 = arith.constant 0 : i32
    %c0_i32_1 = arith.constant 0 : i32
    return %c0_i32, %c0_i32_0 : i32, i32
  }
  func.func @transform_2(%arg0: i32) -> (i32, i32) {
    %c0_i32 = arith.constant 0 : i32
    %c0_i32_0 = arith.constant 0 : i32
    %c0_i32_1 = arith.constant 0 : i32
    return %c0_i32, %c0_i32_0 : i32, i32
  }
  func.func @transform_3(%arg0: i32) -> (i32, i32) {
    %c0_i32 = arith.constant 0 : i32
    %c0_i32_0 = arith.constant 0 : i32
    return %arg0, %c0_i32 : i32, i32
  }
}

module attributes {stable_mosaic.version = 11 : i64} {
  func.func @_mm_bias_act_kernel(%arg0: i32, %arg1: memref<256x288xbf16, #tpu.memory_space<vmem>>, %arg2: memref<288x64xbf16, #tpu.memory_space<vmem>>, %arg3: memref<1x64xf32, #tpu.memory_space<vmem>>, %arg4: memref<256x64xbf16, #tpu.memory_space<vmem>>) attributes {dimension_semantics = [#tpu.dimension_semantics<parallel>], iteration_bounds = array<i64: 2>, scalar_prefetch = 0 : i64, scratch_operands = 0 : i64, tpu.core_type = #tpu.core_type<tc>, window_params = [{transform_indices = @transform_0, window_bounds = array<i64: 256, 288>}, {pipeline_mode = #tpu.pipeline_mode<synchronous>, transform_indices = @transform_1, window_bounds = array<i64: 288, 64>}, {pipeline_mode = #tpu.pipeline_mode<synchronous>, transform_indices = @transform_2, window_bounds = array<i64: 1, 64>}, {transform_indices = @transform_3, window_bounds = array<i64: 256, 64>}]} {
    %c0 = arith.constant 0 : index
    %c0_0 = arith.constant 0 : index
    %0 = vector.load %arg1[%c0, %c0_0] : memref<256x288xbf16, #tpu.memory_space<vmem>>, vector<256x288xbf16>
    %c0_1 = arith.constant 0 : index
    %c0_2 = arith.constant 0 : index
    %1 = vector.load %arg2[%c0_1, %c0_2] : memref<288x64xbf16, #tpu.memory_space<vmem>>, vector<288x64xbf16>
    %cst = arith.constant dense<0.000000e+00> : vector<256x64xf32>
    %2 = tpu.matmul %0, %1, %cst {dimension_numbers = #tpu.dot_dimension_numbers<[1], [0], [0], [1], [0, 0, 1, 1], [], []>} : vector<256x288xbf16>, vector<288x64xbf16>, vector<256x64xf32> -> vector<256x64xf32>
    %c0_3 = arith.constant 0 : index
    %c0_4 = arith.constant 0 : index
    %3 = vector.load %arg3[%c0_3, %c0_4] : memref<1x64xf32, #tpu.memory_space<vmem>>, vector<1x64xf32>
    %4 = vector.broadcast %3 : vector<1x64xf32> to vector<256x64xf32>
    %5 = arith.addf %2, %4 : vector<256x64xf32>
    %cst_5 = arith.constant 0.000000e+00 : f32
    %6 = vector.broadcast %cst_5 : f32 to vector<256x64xf32>
    %7 = arith.maximumf %5, %6 : vector<256x64xf32>
    %8 = arith.truncf %7 : vector<256x64xf32> to vector<256x64xbf16>
    %c0_6 = arith.constant 0 : index
    %c0_7 = arith.constant 0 : index
    %9 = vector.load %arg4[%c0_6, %c0_7] : memref<256x64xbf16, #tpu.memory_space<vmem>>, vector<256x64xbf16>
    tpu.vector_store %arg4[%c0_6, %c0_7], %8 {strides = array<i32>} : memref<256x64xbf16, #tpu.memory_space<vmem>>, vector<256x64xbf16>,
    return
  }
  func.func @transform_0(%arg0: i32) -> (i32, i32) {
    %c0_i32 = arith.constant 0 : i32
    %c0_i32_0 = arith.constant 0 : i32
    return %arg0, %c0_i32 : i32, i32
  }
  func.func @transform_1(%arg0: i32) -> (i32, i32) {
    %c0_i32 = arith.constant 0 : i32
    %c0_i32_0 = arith.constant 0 : i32
    %c0_i32_1 = arith.constant 0 : i32
    return %c0_i32, %c0_i32_0 : i32, i32
  }
  func.func @transform_2(%arg0: i32) -> (i32, i32) {
    %c0_i32 = arith.constant 0 : i32
    %c0_i32_0 = arith.constant 0 : i32
    %c0_i32_1 = arith.constant 0 : i32
    return %c0_i32, %c0_i32_0 : i32, i32
  }
  func.func @transform_3(%arg0: i32) -> (i32, i32) {
    %c0_i32 = arith.constant 0 : i32
    %c0_i32_0 = arith.constant 0 : i32
    return %arg0, %c0_i32 : i32, i32
  }
}

module attributes {stable_mosaic.version = 11 : i64} {
  func.func @_mm_bias_act_kernel(%arg0: i32, %arg1: memref<128x576xbf16, #tpu.memory_space<vmem>>, %arg2: memref<576x128xbf16, #tpu.memory_space<vmem>>, %arg3: memref<1x128xf32, #tpu.memory_space<vmem>>, %arg4: memref<128x128xbf16, #tpu.memory_space<vmem>>) attributes {dimension_semantics = [#tpu.dimension_semantics<parallel>], iteration_bounds = array<i64: 1>, scalar_prefetch = 0 : i64, scratch_operands = 0 : i64, tpu.core_type = #tpu.core_type<tc>, window_params = [{transform_indices = @transform_0, window_bounds = array<i64: 128, 576>}, {pipeline_mode = #tpu.pipeline_mode<synchronous>, transform_indices = @transform_1, window_bounds = array<i64: 576, 128>}, {pipeline_mode = #tpu.pipeline_mode<synchronous>, transform_indices = @transform_2, window_bounds = array<i64: 1, 128>}, {transform_indices = @transform_3, window_bounds = array<i64: 128, 128>}]} {
    %c0 = arith.constant 0 : index
    %c0_0 = arith.constant 0 : index
    %0 = vector.load %arg1[%c0, %c0_0] : memref<128x576xbf16, #tpu.memory_space<vmem>>, vector<128x576xbf16>
    %c0_1 = arith.constant 0 : index
    %c0_2 = arith.constant 0 : index
    %1 = vector.load %arg2[%c0_1, %c0_2] : memref<576x128xbf16, #tpu.memory_space<vmem>>, vector<576x128xbf16>
    %cst = arith.constant dense<0.000000e+00> : vector<128x128xf32>
    %2 = tpu.matmul %0, %1, %cst {dimension_numbers = #tpu.dot_dimension_numbers<[1], [0], [0], [1], [0, 0, 1, 1], [], []>} : vector<128x576xbf16>, vector<576x128xbf16>, vector<128x128xf32> -> vector<128x128xf32>
    %c0_3 = arith.constant 0 : index
    %c0_4 = arith.constant 0 : index
    %3 = vector.load %arg3[%c0_3, %c0_4] : memref<1x128xf32, #tpu.memory_space<vmem>>, vector<1x128xf32>
    %4 = vector.broadcast %3 : vector<1x128xf32> to vector<128x128xf32>
    %5 = arith.addf %2, %4 : vector<128x128xf32>
    %cst_5 = arith.constant 0.000000e+00 : f32
    %6 = vector.broadcast %cst_5 : f32 to vector<128x128xf32>
    %7 = arith.maximumf %5, %6 : vector<128x128xf32>
    %8 = arith.truncf %7 : vector<128x128xf32> to vector<128x128xbf16>
    %c0_6 = arith.constant 0 : index
    %c0_7 = arith.constant 0 : index
    %9 = vector.load %arg4[%c0_6, %c0_7] : memref<128x128xbf16, #tpu.memory_space<vmem>>, vector<128x128xbf16>
    tpu.vector_store %arg4[%c0_6, %c0_7], %8 {strides = array<i32>} : memref<128x128xbf16, #tpu.memory_space<vmem>>, vector<128x128xbf16>,
    return
  }
  func.func @transform_0(%arg0: i32) -> (i32, i32) {
    %c0_i32 = arith.constant 0 : i32
    %c0_i32_0 = arith.constant 0 : i32
    return %arg0, %c0_i32 : i32, i32
  }
  func.func @transform_1(%arg0: i32) -> (i32, i32) {
    %c0_i32 = arith.constant 0 : i32
    %c0_i32_0 = arith.constant 0 : i32
    %c0_i32_1 = arith.constant 0 : i32
    return %c0_i32, %c0_i32_0 : i32, i32
  }
  func.func @transform_2(%arg0: i32) -> (i32, i32) {
    %c0_i32 = arith.constant 0 : i32
    %c0_i32_0 = arith.constant 0 : i32
    %c0_i32_1 = arith.constant 0 : i32
    return %c0_i32, %c0_i32_0 : i32, i32
  }
  func.func @transform_3(%arg0: i32) -> (i32, i32) {
    %c0_i32 = arith.constant 0 : i32
    %c0_i32_0 = arith.constant 0 : i32
    return %arg0, %c0_i32 : i32, i32
  }
}

module attributes {stable_mosaic.version = 11 : i64} {
  func.func @_mm_bias_act_kernel(%arg0: i32, %arg1: memref<32x1152xbf16, #tpu.memory_space<vmem>>, %arg2: memref<1152x256xbf16, #tpu.memory_space<vmem>>, %arg3: memref<1x256xf32, #tpu.memory_space<vmem>>, %arg4: memref<32x256xbf16, #tpu.memory_space<vmem>>) attributes {dimension_semantics = [#tpu.dimension_semantics<parallel>], iteration_bounds = array<i64: 1>, scalar_prefetch = 0 : i64, scratch_operands = 0 : i64, tpu.core_type = #tpu.core_type<tc>, window_params = [{transform_indices = @transform_0, window_bounds = array<i64: 32, 1152>}, {pipeline_mode = #tpu.pipeline_mode<synchronous>, transform_indices = @transform_1, window_bounds = array<i64: 1152, 256>}, {pipeline_mode = #tpu.pipeline_mode<synchronous>, transform_indices = @transform_2, window_bounds = array<i64: 1, 256>}, {transform_indices = @transform_3, window_bounds = array<i64: 32, 256>}]} {
    %c0 = arith.constant 0 : index
    %c0_0 = arith.constant 0 : index
    %0 = vector.load %arg1[%c0, %c0_0] : memref<32x1152xbf16, #tpu.memory_space<vmem>>, vector<32x1152xbf16>
    %c0_1 = arith.constant 0 : index
    %c0_2 = arith.constant 0 : index
    %1 = vector.load %arg2[%c0_1, %c0_2] : memref<1152x256xbf16, #tpu.memory_space<vmem>>, vector<1152x256xbf16>
    %cst = arith.constant dense<0.000000e+00> : vector<32x256xf32>
    %2 = tpu.matmul %0, %1, %cst {dimension_numbers = #tpu.dot_dimension_numbers<[1], [0], [0], [1], [0, 0, 1, 1], [], []>} : vector<32x1152xbf16>, vector<1152x256xbf16>, vector<32x256xf32> -> vector<32x256xf32>
    %c0_3 = arith.constant 0 : index
    %c0_4 = arith.constant 0 : index
    %3 = vector.load %arg3[%c0_3, %c0_4] : memref<1x256xf32, #tpu.memory_space<vmem>>, vector<1x256xf32>
    %4 = vector.broadcast %3 : vector<1x256xf32> to vector<32x256xf32>
    %5 = arith.addf %2, %4 : vector<32x256xf32>
    %cst_5 = arith.constant 0.000000e+00 : f32
    %6 = vector.broadcast %cst_5 : f32 to vector<32x256xf32>
    %7 = arith.maximumf %5, %6 : vector<32x256xf32>
    %8 = arith.truncf %7 : vector<32x256xf32> to vector<32x256xbf16>
    %c0_6 = arith.constant 0 : index
    %c0_7 = arith.constant 0 : index
    %9 = vector.load %arg4[%c0_6, %c0_7] : memref<32x256xbf16, #tpu.memory_space<vmem>>, vector<32x256xbf16>
    tpu.vector_store %arg4[%c0_6, %c0_7], %8 {strides = array<i32>} : memref<32x256xbf16, #tpu.memory_space<vmem>>, vector<32x256xbf16>,
    return
  }
  func.func @transform_0(%arg0: i32) -> (i32, i32) {
    %c0_i32 = arith.constant 0 : i32
    %c0_i32_0 = arith.constant 0 : i32
    return %arg0, %c0_i32 : i32, i32
  }
  func.func @transform_1(%arg0: i32) -> (i32, i32) {
    %c0_i32 = arith.constant 0 : i32
    %c0_i32_0 = arith.constant 0 : i32
    %c0_i32_1 = arith.constant 0 : i32
    return %c0_i32, %c0_i32_0 : i32, i32
  }
  func.func @transform_2(%arg0: i32) -> (i32, i32) {
    %c0_i32 = arith.constant 0 : i32
    %c0_i32_0 = arith.constant 0 : i32
    %c0_i32_1 = arith.constant 0 : i32
    return %c0_i32, %c0_i32_0 : i32, i32
  }
  func.func @transform_3(%arg0: i32) -> (i32, i32) {
    %c0_i32 = arith.constant 0 : i32
    %c0_i32_0 = arith.constant 0 : i32
    return %arg0, %c0_i32 : i32, i32
  }
}

module attributes {stable_mosaic.version = 11 : i64} {
  func.func @_linear_tail_kernel(%arg0: memref<2x4096xbf16, #tpu.memory_space<vmem>>, %arg1: memref<2x16384xbf16, #tpu.memory_space<vmem>>, %arg2: memref<4096x128xbf16, #tpu.memory_space<vmem>>, %arg3: memref<1x128xf32, #tpu.memory_space<vmem>>, %arg4: memref<128x128xbf16, #tpu.memory_space<vmem>>, %arg5: memref<1x128xf32, #tpu.memory_space<vmem>>, %arg6: memref<128x3072xbf16, #tpu.memory_space<vmem>>, %arg7: memref<1x3072xf32, #tpu.memory_space<vmem>>, %arg8: memref<16384x128xbf16, #tpu.memory_space<vmem>>, %arg9: memref<1x128xf32, #tpu.memory_space<vmem>>, %arg10: memref<128x128xbf16, #tpu.memory_space<vmem>>, %arg11: memref<1x128xf32, #tpu.memory_space<vmem>>, %arg12: memref<128x128xbf16, #tpu.memory_space<vmem>>, %arg13: memref<1x128xf32, #tpu.memory_space<vmem>>, %arg14: memref<256x128xbf16, #tpu.memory_space<vmem>>, %arg15: memref<1x128xf32, #tpu.memory_space<vmem>>, %arg16: memref<128x3072xbf16, #tpu.memory_space<vmem>>, %arg17: memref<1x3072xf32, #tpu.memory_space<vmem>>, %arg18: memref<2x3072xf32, #tpu.memory_space<vmem>>, %arg19: memref<2x3072xf32, #tpu.memory_space<vmem>>, %arg20: memref<2x128xf32, #tpu.memory_space<vmem>>, %arg21: memref<2x128xf32, #tpu.memory_space<vmem>>) attributes {dimension_semantics = [], scalar_prefetch = 0 : i64, scratch_operands = 0 : i64, tpu.core_type = #tpu.core_type<tc>} {
    %c0 = arith.constant 0 : index
    %c0_0 = arith.constant 0 : index
    %0 = vector.load %arg0[%c0, %c0_0] : memref<2x4096xbf16, #tpu.memory_space<vmem>>, vector<2x4096xbf16>
    %c0_1 = arith.constant 0 : index
    %c0_2 = arith.constant 0 : index
    %1 = vector.load %arg2[%c0_1, %c0_2] : memref<4096x128xbf16, #tpu.memory_space<vmem>>, vector<4096x128xbf16>
    %cst = arith.constant dense<0.000000e+00> : vector<2x128xf32>
    %2 = tpu.matmul %0, %1, %cst {dimension_numbers = #tpu.dot_dimension_numbers<[1], [0], [0], [1], [0, 0, 1, 1], [], []>} : vector<2x4096xbf16>, vector<4096x128xbf16>, vector<2x128xf32> -> vector<2x128xf32>
    %c0_3 = arith.constant 0 : index
    %c0_4 = arith.constant 0 : index
    %3 = vector.load %arg3[%c0_3, %c0_4] : memref<1x128xf32, #tpu.memory_space<vmem>>, vector<1x128xf32>
    %4 = vector.broadcast %3 : vector<1x128xf32> to vector<2x128xf32>
    %5 = arith.addf %2, %4 : vector<2x128xf32>
    %cst_5 = arith.constant 0.000000e+00 : f32
    %6 = vector.broadcast %cst_5 : f32 to vector<2x128xf32>
    %7 = arith.maximumf %5, %6 : vector<2x128xf32>
    %c0_6 = arith.constant 0 : index
    %c0_7 = arith.constant 0 : index
    %8 = vector.load %arg20[%c0_6, %c0_7] : memref<2x128xf32, #tpu.memory_space<vmem>>, vector<2x128xf32>
    tpu.vector_store %arg20[%c0_6, %c0_7], %7 {strides = array<i32>} : memref<2x128xf32, #tpu.memory_space<vmem>>, vector<2x128xf32>,
    %9 = arith.truncf %7 : vector<2x128xf32> to vector<2x128xbf16>
    %c0_8 = arith.constant 0 : index
    %c0_9 = arith.constant 0 : index
    %10 = vector.load %arg4[%c0_8, %c0_9] : memref<128x128xbf16, #tpu.memory_space<vmem>>, vector<128x128xbf16>
    %cst_10 = arith.constant dense<0.000000e+00> : vector<2x128xf32>
    %11 = tpu.matmul %9, %10, %cst_10 {dimension_numbers = #tpu.dot_dimension_numbers<[1], [0], [0], [1], [0, 0, 1, 1], [], []>} : vector<2x128xbf16>, vector<128x128xbf16>, vector<2x128xf32> -> vector<2x128xf32>
    %c0_11 = arith.constant 0 : index
    %c0_12 = arith.constant 0 : index
    %12 = vector.load %arg5[%c0_11, %c0_12] : memref<1x128xf32, #tpu.memory_space<vmem>>, vector<1x128xf32>
    %13 = vector.broadcast %12 : vector<1x128xf32> to vector<2x128xf32>
    %14 = arith.addf %11, %13 : vector<2x128xf32>
    %cst_13 = arith.constant 0.000000e+00 : f32
    %15 = vector.broadcast %cst_13 : f32 to vector<2x128xf32>
    %16 = arith.maximumf %14, %15 : vector<2x128xf32>
    %17 = arith.truncf %16 : vector<2x128xf32> to vector<2x128xbf16>
    %c0_14 = arith.constant 0 : index
    %c0_15 = arith.constant 0 : index
    %18 = vector.load %arg6[%c0_14, %c0_15] : memref<128x3072xbf16, #tpu.memory_space<vmem>>, vector<128x3072xbf16>
    %cst_16 = arith.constant dense<0.000000e+00> : vector<2x3072xf32>
    %19 = tpu.matmul %17, %18, %cst_16 {dimension_numbers = #tpu.dot_dimension_numbers<[1], [0], [0], [1], [0, 0, 1, 1], [], []>} : vector<2x128xbf16>, vector<128x3072xbf16>, vector<2x3072xf32> -> vector<2x3072xf32>
    %c0_17 = arith.constant 0 : index
    %c0_18 = arith.constant 0 : index
    %20 = vector.load %arg7[%c0_17, %c0_18] : memref<1x3072xf32, #tpu.memory_space<vmem>>, vector<1x3072xf32>
    %21 = vector.broadcast %20 : vector<1x3072xf32> to vector<2x3072xf32>
    %22 = arith.addf %19, %21 : vector<2x3072xf32>
    %c0_19 = arith.constant 0 : index
    %c0_20 = arith.constant 0 : index
    %23 = vector.load %arg18[%c0_19, %c0_20] : memref<2x3072xf32, #tpu.memory_space<vmem>>, vector<2x3072xf32>
    tpu.vector_store %arg18[%c0_19, %c0_20], %22 {strides = array<i32>} : memref<2x3072xf32, #tpu.memory_space<vmem>>, vector<2x3072xf32>,
    %c0_21 = arith.constant 0 : index
    %c0_22 = arith.constant 0 : index
    %24 = vector.load %arg1[%c0_21, %c0_22] : memref<2x16384xbf16, #tpu.memory_space<vmem>>, vector<2x16384xbf16>
    %c0_23 = arith.constant 0 : index
    %c0_24 = arith.constant 0 : index
    %25 = vector.load %arg8[%c0_23, %c0_24] : memref<16384x128xbf16, #tpu.memory_space<vmem>>, vector<16384x128xbf16>
    %cst_25 = arith.constant dense<0.000000e+00> : vector<2x128xf32>
    %26 = tpu.matmul %24, %25, %cst_25 {dimension_numbers = #tpu.dot_dimension_numbers<[1], [0], [0], [1], [0, 0, 1, 1], [], []>} : vector<2x16384xbf16>, vector<16384x128xbf16>, vector<2x128xf32> -> vector<2x128xf32>
    %c0_26 = arith.constant 0 : index
    %c0_27 = arith.constant 0 : index
    %27 = vector.load %arg9[%c0_26, %c0_27] : memref<1x128xf32, #tpu.memory_space<vmem>>, vector<1x128xf32>
    %28 = vector.broadcast %27 : vector<1x128xf32> to vector<2x128xf32>
    %29 = arith.addf %26, %28 : vector<2x128xf32>
    %cst_28 = arith.constant 0.000000e+00 : f32
    %30 = vector.broadcast %cst_28 : f32 to vector<2x128xf32>
    %31 = arith.maximumf %29, %30 : vector<2x128xf32>
    %c0_29 = arith.constant 0 : index
    %c0_30 = arith.constant 0 : index
    %32 = vector.load %arg21[%c0_29, %c0_30] : memref<2x128xf32, #tpu.memory_space<vmem>>, vector<2x128xf32>
    tpu.vector_store %arg21[%c0_29, %c0_30], %31 {strides = array<i32>} : memref<2x128xf32, #tpu.memory_space<vmem>>, vector<2x128xf32>,
    %33 = arith.truncf %31 : vector<2x128xf32> to vector<2x128xbf16>
    %c0_31 = arith.constant 0 : index
    %c0_32 = arith.constant 0 : index
    %34 = vector.load %arg10[%c0_31, %c0_32] : memref<128x128xbf16, #tpu.memory_space<vmem>>, vector<128x128xbf16>
    %cst_33 = arith.constant dense<0.000000e+00> : vector<2x128xf32>
    %35 = tpu.matmul %33, %34, %cst_33 {dimension_numbers = #tpu.dot_dimension_numbers<[1], [0], [0], [1], [0, 0, 1, 1], [], []>} : vector<2x128xbf16>, vector<128x128xbf16>, vector<2x128xf32> -> vector<2x128xf32>
    %c0_34 = arith.constant 0 : index
    %c0_35 = arith.constant 0 : index
    %36 = vector.load %arg11[%c0_34, %c0_35] : memref<1x128xf32, #tpu.memory_space<vmem>>, vector<1x128xf32>
    %37 = vector.broadcast %36 : vector<1x128xf32> to vector<2x128xf32>
    %38 = arith.addf %35, %37 : vector<2x128xf32>
    %cst_36 = arith.constant 0.000000e+00 : f32
    %39 = vector.broadcast %cst_36 : f32 to vector<2x128xf32>
    %40 = arith.maximumf %38, %39 : vector<2x128xf32>
    %41 = arith.truncf %40 : vector<2x128xf32> to vector<2x128xbf16>
    %c0_37 = arith.constant 0 : index
    %c0_38 = arith.constant 0 : index
    %42 = vector.load %arg12[%c0_37, %c0_38] : memref<128x128xbf16, #tpu.memory_space<vmem>>, vector<128x128xbf16>
    %cst_39 = arith.constant dense<0.000000e+00> : vector<2x128xf32>
    %43 = tpu.matmul %41, %42, %cst_39 {dimension_numbers = #tpu.dot_dimension_numbers<[1], [0], [0], [1], [0, 0, 1, 1], [], []>} : vector<2x128xbf16>, vector<128x128xbf16>, vector<2x128xf32> -> vector<2x128xf32>
    %c0_40 = arith.constant 0 : index
    %c0_41 = arith.constant 0 : index
    %44 = vector.load %arg13[%c0_40, %c0_41] : memref<1x128xf32, #tpu.memory_space<vmem>>, vector<1x128xf32>
    %45 = vector.broadcast %44 : vector<1x128xf32> to vector<2x128xf32>
    %46 = arith.addf %43, %45 : vector<2x128xf32>
    %cst_42 = arith.constant 0.000000e+00 : f32
    %47 = vector.broadcast %cst_42 : f32 to vector<2x128xf32>
    %48 = arith.maximumf %46, %47 : vector<2x128xf32>
    %49 = arith.truncf %16 : vector<2x128xf32> to vector<2x128xbf16>
    %c0_43 = arith.constant 0 : index
    %c0_44 = arith.constant 0 : index
    %50 = vector.load %arg14[%c0_43, %c0_44] : memref<256x128xbf16, #tpu.memory_space<vmem>>, vector<128x128xbf16>
    %cst_45 = arith.constant dense<0.000000e+00> : vector<2x128xf32>
    %51 = tpu.matmul %49, %50, %cst_45 {dimension_numbers = #tpu.dot_dimension_numbers<[1], [0], [0], [1], [0, 0, 1, 1], [], []>} : vector<2x128xbf16>, vector<128x128xbf16>, vector<2x128xf32> -> vector<2x128xf32>
    %52 = arith.truncf %48 : vector<2x128xf32> to vector<2x128xbf16>
    %c128 = arith.constant 128 : index
    %c0_46 = arith.constant 0 : index
    %53 = vector.load %arg14[%c128, %c0_46] : memref<256x128xbf16, #tpu.memory_space<vmem>>, vector<128x128xbf16>
    %cst_47 = arith.constant dense<0.000000e+00> : vector<2x128xf32>
    %54 = tpu.matmul %52, %53, %cst_47 {dimension_numbers = #tpu.dot_dimension_numbers<[1], [0], [0], [1], [0, 0, 1, 1], [], []>} : vector<2x128xbf16>, vector<128x128xbf16>, vector<2x128xf32> -> vector<2x128xf32>
    %55 = arith.addf %51, %54 : vector<2x128xf32>
    %c0_48 = arith.constant 0 : index
    %c0_49 = arith.constant 0 : index
    %56 = vector.load %arg15[%c0_48, %c0_49] : memref<1x128xf32, #tpu.memory_space<vmem>>, vector<1x128xf32>
    %57 = vector.broadcast %56 : vector<1x128xf32> to vector<2x128xf32>
    %58 = arith.addf %55, %57 : vector<2x128xf32>
    %cst_50 = arith.constant 0.000000e+00 : f32
    %59 = vector.broadcast %cst_50 : f32 to vector<2x128xf32>
    %60 = arith.maximumf %58, %59 : vector<2x128xf32>
    %61 = arith.truncf %60 : vector<2x128xf32> to vector<2x128xbf16>
    %c0_51 = arith.constant 0 : index
    %c0_52 = arith.constant 0 : index
    %62 = vector.load %arg16[%c0_51, %c0_52] : memref<128x3072xbf16, #tpu.memory_space<vmem>>, vector<128x3072xbf16>
    %cst_53 = arith.constant dense<0.000000e+00> : vector<2x3072xf32>
    %63 = tpu.matmul %61, %62, %cst_53 {dimension_numbers = #tpu.dot_dimension_numbers<[1], [0], [0], [1], [0, 0, 1, 1], [], []>} : vector<2x128xbf16>, vector<128x3072xbf16>, vector<2x3072xf32> -> vector<2x3072xf32>
    %c0_54 = arith.constant 0 : index
    %c0_55 = arith.constant 0 : index
    %64 = vector.load %arg17[%c0_54, %c0_55] : memref<1x3072xf32, #tpu.memory_space<vmem>>, vector<1x3072xf32>
    %65 = vector.broadcast %64 : vector<1x3072xf32> to vector<2x3072xf32>
    %66 = arith.addf %63, %65 : vector<2x3072xf32>
    %67 = arith.negf %66 : vector<2x3072xf32>
    %68 = math.exp %67 : vector<2x3072xf32>
    %cst_56 = arith.constant 1.000000e+00 : f32
    %69 = vector.broadcast %cst_56 : f32 to vector<2x3072xf32>
    %70 = arith.addf %69, %68 : vector<2x3072xf32>
    %71 = arith.divf %69, %70 : vector<2x3072xf32>
    %c0_57 = arith.constant 0 : index
    %c0_58 = arith.constant 0 : index
    %72 = vector.load %arg19[%c0_57, %c0_58] : memref<2x3072xf32, #tpu.memory_space<vmem>>, vector<2x3072xf32>
    tpu.vector_store %arg19[%c0_57, %c0_58], %71 {strides = array<i32>} : memref<2x3072xf32, #tpu.memory_space<vmem>>, vector<2x3072xf32>,
    return
  }
}

</mosaic_0001>

<bundles_post_ra>
// kernel: reconstruction_net_forward.6
= control target key start
LH: loop header
LB: loop body
LE: loop exit
PB: predicated region body
PF: predicated region fallthrough
CT: control target
= control target key end

     0   :  { %8 = vsyncpa [#allocation3], 0  ;;  %s1382_s0 = inlined_call_operand.vmem [shape: bf16[2048,27], index: 0, kind: input, shape index: {}]   ;;  %s1383_s1 = inlined_call_operand.hbm [shape: bf16[27,64], index: 1, kind: input, shape index: {}]   ;;  %s1384_s2 = inlined_call_operand.hbm [shape: f32[1,64], index: 2, kind: input, shape index: {}]   ;;  %s1385_s3 = inlined_call_operand.vmem [shape: bf16[2048,64], index: 3, kind: output, shape index: {}]  }
   0x1   :  { %9 = vsyncpa [#allocation5], 0  ;;  %s1144_s12 = smov 0  }
   0x2 LB: > { %s825_s13 = sadd.s32 4294967295, %s1117_s12   ;;  %p827_p0 = scmp.ge.s32.totalorder %s1117_s12, 1  ;;  %s1117_s12 = sphi %s1144_s12, %s15_s12  }
   0x3   : > { %p114_p1 = scmp.lt.s32.totalorder %s1117_s12, 9  ;;  %s1119_s14 = smov [#allocation2]  }
   0x4   : > { %s126_s15 = sshll.u32 %s1119_s14, 4  ;;  %p1158_p3 = scmp.eq.s32.totalorder %s825_s13, 0  ;;  %s127_s15 = int_to_ptr.vmem [resolvable:$true] %s126_s15 }
   0x5   : > { %p1152_p2 = pnand %p827_p0, %p114_p1  ;;  %s1120_s18 = smov [#allocation4]  }
   0x6   : > { %s1390_s17 = scalar_select %p1158_p3, 1, 0 }
   0x7   : > { %s1389_s16 = scalar_select %p1152_p2, 1, 0 }
   0x8   : > { %p1005_p4 = pneg %p1152_p2  ;;  %s140_s19 = sshll.u32 %s1120_s18, 4  ;;  %s1170_s19 = int_to_ptr.vmem [resolvable:$true] %s140_s19 }
   0x9   : > { %s1047_s23 = scalar_lea.hbm %s1383_s1, 256 }
   0xa   : > { %p1166_p5 = pnand %p1158_p3, %p1005_p4  ;;  %p1048_p6 = scmp.ne.s32.totalorder %s1383_s1, %s1047_s23 }
   0xb   : > { %p1054_p10 = scmp.lt.u32.totalorder %s1047_s23, %s1383_s1 }
   0xc   : > { %p1049_p7 = pneg %p1166_p5 }
   0xe   : > { %p1050_p8 = pnand %p1049_p7, %p1048_p6 }
  0x10   : > { %p1051_p9 = pneg %p1050_p8 }
  0x12   : > { %p1056_p11 = pnand %p1054_p10, %p1051_p9 }
  0x14   : > { %1059 = shalt.err (!%p1056_p11)
}
  0x15   : > { %s1060_s28 = scalar_lea.vmem %s127_s15, 256  ;;  %p1068_p1 = scmp.lt.s32.totalorder %s127_s15, %s127_s15 }
  0x16   : > { %p1061_p12 = scmp.ne.s32.totalorder %s127_s15, %s1060_s28  ;;  %p1069_p4 = scmp.lt.s32.totalorder %s1060_s28, %s1060_s28 }
  0x18   : > { %p1063_p13 = pnand %p1061_p12, %p1049_p7  ;;  %p1070_p3 = por %p1069_p4, %p1068_p1 }
  0x1a   : > { %p1064_p0 = pneg %p1063_p13 }
  0x1c   : > { %p1071_p2 = pnand %p1070_p3, %p1064_p0 }
  0x1e   : > { %1074 = shalt.err (!%p1071_p2)
}
  0x1f   : > { %s1121_s29 = smov 64   ;;  %s1122_s30 = smov 4  }
  0x20   : > { %1008 = dma.hbm_to_vmem [thread:$0]  (!%p1166_p5), %s1383_s1, 256, %s127_s15, [#allocation3], %s1121_s29, %s1121_s29, %s1122_s30  }
  0x21   : > { %s1075_s8 = scalar_lea.hbm %s1384_s2, 16 }
  0x22   : > { %p1076_p6 = scmp.ne.s32.totalorder %s1384_s2, %s1075_s8  ;;  %p1082_p8 = scmp.lt.u32.totalorder %s1075_s8, %s1384_s2 }
  0x24   : > { %p1078_p2 = pnand %p1076_p6, %p1049_p7 }
  0x26   : > { %p1079_p3 = pneg %p1078_p2 }
  0x28   : > { %p1084_p9 = pnand %p1082_p8, %p1079_p3 }
  0x2a   : > { %1087 = shalt.err (!%p1084_p9)
}
  0x2b   : > { %s1088_s15 = scalar_lea.vmem %s1170_s19, 16  ;;  %s1095_s18 = scalar_lea.vmem %s1170_s19, 32 }
  0x2c   : > { %p1089_p10 = scmp.ne.s32.totalorder %s1170_s19, %s1088_s15  ;;  %p1096_p13 = scmp.lt.s32.totalorder %s1170_s19, %s1170_s19 }
  0x2d   : > { %p1097_p0 = scmp.lt.s32.totalorder %s1095_s18, %s1088_s15 }
  0x2e   : > { %p1091_p11 = pnand %p1089_p10, %p1049_p7 }
  0x2f   : > { %p1098_p1 = por %p1097_p0, %p1096_p13 }
  0x30   : > { %p1092_p12 = pneg %p1091_p11 }
  0x32   : > { %p1099_p4 = pnand %p1098_p1, %p1092_p12 }
  0x34   : > { %1102 = shalt.err (!%p1099_p4)
}
  0x35   : > { %1011 = dma.hbm_to_vmem [thread:$0]  (!%p1166_p5), %s1384_s2, 16, %s1170_s19, [#allocation5]  }
  0x36   : > { %p1392_p6 = scmp.ne.s32.totalorder %s1389_s16, 0 }
  0x37   : > { %p1393_p7 = scmp.ne.s32.totalorder (!%p1392_p6), %s1390_s17, 0 }
  0x38   : > { %162 = sbr.rel (%p1392_p6) target bundleno = 323 (0x143), region = 32 }
  0x3f   : > { %1108 = dma.done.wait (%p1393_p7), [#allocation3], 256  }
  0x40   : > { %1110 = vsyncadd (%p1393_p7), [#allocation3], 4294967040 }
  0x41   : > { %1112 = dma.done.wait (%p1393_p7), [#allocation5], 16  }
  0x42   : > { %1114 = vsyncadd (%p1393_p7), [#allocation5], 4294967280  ;;  %s834_s20 = sshll.u32 %s825_s13, 5  ;;  %vm386_vm0 = vcmask 1044480   ;;  %vm387_vm1 = vcmask 1045504   ;;  %v1123_v0 = vmov 65535  }
  0x43   : > { %p191_p5 = scmp.lt.s32.totalorder %s834_s20, 255  ;;  %v388_v1 = vsel %vm386_vm0, 4294967295, %v1123_v0  ;;  %vm337_vm2 = vcmask 220160   ;;  %v1029_v2 = vld [vmem:[#allocation2] sm:$0xff]   ;;  %v1030_v4 = vld [vmem:[#allocation2 + $0x8] sm:$0x3f]  }
  0x44   : > { %v389_v3 = vsel %vm387_vm1, %v388_v1, 0  ;;  %957 = vmatprep.subr.bf16.mxu0 %v1029_v2  ;;  %993 = vmatprep.subr.bf16.mxu1 %v1029_v2  ;;  %v1274_v22 = vld [vmem:[#allocation4] ss:$0 sm:$0xff]  ;;  %vm714_vm3 = vcmask 519168  }
  0x45   : > { %s1395_s20 = smov (!%p191_p5, %s834_s20), 255  ;;  %958 = vmatpush3.bf16.msra.mxu0 %v1029_v2  ;;  %995 = vmatpush3.bf16.msra.mxu1 %v1029_v2  ;;  %v391_v6 = vand.u32 %v1030_v4, %v389_v3 }
  0x46   : > { %s835_s16 = sshll.u32 %s1395_s20, 2 }
  0x47   : > { %s1240_s24 = scalar_lea.vmem %s1382_s0, %s835_s16  ;;  %959 = vmatprep.subr.bf16.mxu0 %v391_v6  ;;  %994 = vmatprep.subr.bf16.mxu1 %v391_v6  ;;  %s1287_s25 = scalar_lea.vmem %s1385_s3, %s835_s16 }
  0x48   : > { %v1031_v5 = vld [vmem:[%s1240_s24] sm:$0xff]   ;;  %v1033_v8 = vld [vmem:[%s1240_s24 + $0x8] sm:$0xff]   ;;  %v1035_v10 = vld [vmem:[%s1240_s24 + $0x10] sm:$0xff]  }
  0x49   : > { %v1032_v7 = vld [vmem:[%s1240_s24 + $0x40] sm:$0xff]   ;;  %961 = vmatprep.mubr.msk.bf16.mxu0 %vm337_vm2, %v1031_v5  ;;  %v1034_v9 = vld [vmem:[%s1240_s24 + $0x48] sm:$0xff]   ;;  %960 = vmatpush3.bf16.msra.mxu0 %v391_v6  ;;  %v1036_v11 = vld [vmem:[%s1240_s24 + $0x50] sm:$0xff]  }
  0x4a   : > { %977 = vmatprep.mubr.msk.bf16.mxu1 %vm337_vm2, %v1032_v7  ;;  %996 = vmatpush3.bf16.msra.mxu1 %v391_v6  ;;  %v1037_v12 = vld [vmem:[%s1240_s24 + $0x18] sm:$0xff]   ;;  %v1039_v14 = vld [vmem:[%s1240_s24 + $0x20] sm:$0xff]   ;;  %v1041_v16 = vld [vmem:[%s1240_s24 + $0x28] sm:$0xff]  }
  0x4b   : > { %v1038_v13 = vld [vmem:[%s1240_s24 + $0x58] sm:$0xff]   ;;  %v1040_v15 = vld [vmem:[%s1240_s24 + $0x60] sm:$0xff]   ;;  %v1042_v17 = vld [vmem:[%s1240_s24 + $0x68] sm:$0xff]  }
  0x4c   : > { %962 = vmatmul.mubr.msk.bf16.vlgmr.msra.gmra.mrb[0].mxu0 %vm337_vm2, %v1033_v8  ;;  %v1043_v18 = vld [vmem:[%s1240_s24 + $0x30] sm:$0xff]   ;;  %v1045_v20 = vld [vmem:[%s1240_s24 + $0x38] sm:$0xff]  }
  0x4d   : > { %978 = vmatmul.mubr.msk.bf16.vlgmr.msra.gmra.mrb[0].mxu1 %vm337_vm2, %v1034_v9  ;;  %965 = vmatprep.mubr.msk.bf16.mxu0 %vm337_vm2, %v1035_v10  ;;  %v1044_v19 = vld [vmem:[%s1240_s24 + $0x70] sm:$0xff]   ;;  %v1046_v21 = vld [vmem:[%s1240_s24 + $0x78] sm:$0xff]  }
  0x4e   : > { %981 = vmatprep.mubr.msk.bf16.mxu1 %vm337_vm2, %v1036_v11 }
  0x54   : > { %966 = vmatmul.mubr.msk.bf16.gmra.mrb[4].mxu0 %vm337_vm2, %v1037_v12 }
  0x55   : > { %982 = vmatmul.mubr.msk.bf16.gmra.mrb[4].mxu1 %vm337_vm2, %v1038_v13  ;;  %969 = vmatprep.mubr.msk.bf16.mxu0 %vm337_vm2, %v1039_v14 }
  0x56   : > { %985 = vmatprep.mubr.msk.bf16.mxu1 %vm337_vm2, %v1040_v15 }
  0x5c   : > { %970 = vmatmul.mubr.msk.bf16.gmra.mrb[8].mxu0 %vm337_vm2, %v1041_v16 }
  0x5d   : > { %986 = vmatmul.mubr.msk.bf16.gmra.mrb[8].mxu1 %vm337_vm2, %v1042_v17  ;;  %973 = vmatprep.mubr.msk.bf16.mxu0 %vm337_vm2, %v1043_v18 }
  0x5e   : > { %989 = vmatprep.mubr.msk.bf16.mxu1 %vm337_vm2, %v1044_v19 }
  0x64   : > { %974 = vmatmul.mubr.msk.bf16.gmra.mrb[12].mxu0 %vm337_vm2, %v1045_v20 }
  0x65   : > { %990 = vmatmul.mubr.msk.bf16.gmra.mrb[12].mxu1 %vm337_vm2, %v1046_v21 }
 0x11f   : > { %v963_v23 = vpop.f32.mrb[0].mxu0 }
 0x120   : > { %v979_v24 = vpop.f32.mrb[0].mxu1  ;;  %v436_v25 = vadd.f32 %v963_v23, %v1274_v22  ;;  %v427_v27 = vpop.f32.mrb[1].mxu0 }
 0x121   : > { %v500_v26 = vadd.f32 %v979_v24, %v1274_v22  ;;  %v491_v28 = vpop.f32.mrb[1].mxu1  ;;  %v428_v29 = vadd.f32 %v1274_v22, %v427_v27  ;;  %v964_v31 = vpop.f32.mrb[2].mxu0 }
 0x122   : > { %v492_v30 = vadd.f32 %v1274_v22, %v491_v28  ;;  %v980_v32 = vpop.f32.mrb[2].mxu1  ;;  %v556_v33 = vmax.f32 %v436_v25, 0.0  ;;  %v439_v35 = vadd.f32 %v964_v31, %v1274_v22  ;;  %v430_v37 = vpop.f32.mrb[3].mxu0 }
 0x123   : > { %v572_v34 = vmax.f32 %v500_v26, 0.0  ;;  %v503_v36 = vadd.f32 %v980_v32, %v1274_v22  ;;  %v494_v38 = vpop.f32.mrb[3].mxu1  ;;  %v554_v39 = vmax.f32 %v428_v29, 0.0  ;;  %v431_v41 = vadd.f32 %v1274_v22, %v430_v37 }
 0x124   : > { %v570_v40 = vmax.f32 %v492_v30, 0.0  ;;  %v495_v42 = vadd.f32 %v1274_v22, %v494_v38  ;;  %v909_v43 = vpack.c.bf16 %v556_v33, %v556_v33  ;;  %v557_v45 = vmax.f32 %v439_v35, 0.0 }
 0x125   : > { %v925_v44 = vpack.c.bf16 %v572_v34, %v572_v34  ;;  %v573_v46 = vmax.f32 %v503_v36, 0.0  ;;  %v907_v47 = vpack.c.bf16 %v554_v39, %v554_v39  ;;  %v555_v49 = vmax.f32 %v431_v41, 0.0 }
 0x126   : > { %v923_v48 = vpack.c.bf16 %v570_v40, %v570_v40  ;;  %v571_v50 = vmax.f32 %v495_v42, 0.0  ;;  %717 = vst.msk [vmem:[%s1287_s25 + $0x8] sm:$0xf] %vm714_vm3, %v909_v43  ;;  %v910_v51 = vpack.c.bf16 %v557_v45, %v557_v45 }
 0x127   : > { %733 = vst.msk [vmem:[%s1287_s25 + $0x48] sm:$0xf] %vm714_vm3, %v925_v44  ;;  %v926_v52 = vpack.c.bf16 %v573_v46, %v573_v46  ;;  %715 = vst.msk [vmem:[%s1287_s25] sm:$0xf] %vm714_vm3, %v907_v47  ;;  %v908_v53 = vpack.c.bf16 %v555_v49, %v555_v49  ;;  %v967_v55 = vpop.f32.mrb[4].mxu0 }
 0x128   : > { %731 = vst.msk [vmem:[%s1287_s25 + $0x40] sm:$0xf] %vm714_vm3, %v923_v48  ;;  %v924_v54 = vpack.c.bf16 %v571_v50, %v571_v50  ;;  %v983_v56 = vpop.f32.mrb[4].mxu1  ;;  %718 = vst.msk [vmem:[%s1287_s25 + $0xc] sm:$0xf] %vm714_vm3, %v910_v51  ;;  %v452_v57 = vadd.f32 %v967_v55, %v1274_v22  ;;  %v443_v59 = vpop.f32.mrb[5].mxu0 }
 0x129   : > { %734 = vst.msk [vmem:[%s1287_s25 + $0x4c] sm:$0xf] %vm714_vm3, %v926_v52  ;;  %v516_v58 = vadd.f32 %v983_v56, %v1274_v22  ;;  %v507_v60 = vpop.f32.mrb[5].mxu1  ;;  %716 = vst.msk [vmem:[%s1287_s25 + $0x4] sm:$0xf] %vm714_vm3, %v908_v53  ;;  %v444_v61 = vadd.f32 %v1274_v22, %v443_v59  ;;  %v968_v63 = vpop.f32.mrb[6].mxu0 }
 0x12a   : > { %732 = vst.msk [vmem:[%s1287_s25 + $0x44] sm:$0xf] %vm714_vm3, %v924_v54  ;;  %v508_v62 = vadd.f32 %v1274_v22, %v507_v60  ;;  %v984_v0 = vpop.f32.mrb[6].mxu1  ;;  %v560_v1 = vmax.f32 %v452_v57, 0.0  ;;  %v455_v3 = vadd.f32 %v968_v63, %v1274_v22  ;;  %v446_v5 = vpop.f32.mrb[7].mxu0 }
 0x12b   : > { %v576_v2 = vmax.f32 %v516_v58, 0.0  ;;  %v519_v4 = vadd.f32 %v984_v0, %v1274_v22  ;;  %v510_v6 = vpop.f32.mrb[7].mxu1  ;;  %v558_v7 = vmax.f32 %v444_v61, 0.0  ;;  %v447_v9 = vadd.f32 %v1274_v22, %v446_v5 }
 0x12c   : > { %v574_v8 = vmax.f32 %v508_v62, 0.0  ;;  %v511_v10 = vadd.f32 %v1274_v22, %v510_v6  ;;  %v913_v11 = vpack.c.bf16 %v560_v1, %v560_v1  ;;  %v561_v13 = vmax.f32 %v455_v3, 0.0 }
 0x12d   : > { %v929_v12 = vpack.c.bf16 %v576_v2, %v576_v2  ;;  %v577_v14 = vmax.f32 %v519_v4, 0.0  ;;  %v911_v15 = vpack.c.bf16 %v558_v7, %v558_v7  ;;  %v559_v17 = vmax.f32 %v447_v9, 0.0 }
 0x12e   : > { %v927_v16 = vpack.c.bf16 %v574_v8, %v574_v8  ;;  %v575_v18 = vmax.f32 %v511_v10, 0.0  ;;  %721 = vst.msk [vmem:[%s1287_s25 + $0x18] sm:$0xf] %vm714_vm3, %v913_v11  ;;  %v914_v19 = vpack.c.bf16 %v561_v13, %v561_v13 }
 0x12f   : > { %737 = vst.msk [vmem:[%s1287_s25 + $0x58] sm:$0xf] %vm714_vm3, %v929_v12  ;;  %v930_v20 = vpack.c.bf16 %v577_v14, %v577_v14  ;;  %719 = vst.msk [vmem:[%s1287_s25 + $0x10] sm:$0xf] %vm714_vm3, %v911_v15  ;;  %v912_v21 = vpack.c.bf16 %v559_v17, %v559_v17  ;;  %v971_v24 = vpop.f32.mrb[8].mxu0 }
 0x130   : > { %735 = vst.msk [vmem:[%s1287_s25 + $0x50] sm:$0xf] %vm714_vm3, %v927_v16  ;;  %v928_v23 = vpack.c.bf16 %v575_v18, %v575_v18  ;;  %v987_v25 = vpop.f32.mrb[8].mxu1  ;;  %722 = vst.msk [vmem:[%s1287_s25 + $0x1c] sm:$0xf] %vm714_vm3, %v914_v19  ;;  %v468_v26 = vadd.f32 %v971_v24, %v1274_v22  ;;  %v459_v28 = vpop.f32.mrb[9].mxu0 }
 0x131   : > { %738 = vst.msk [vmem:[%s1287_s25 + $0x5c] sm:$0xf] %vm714_vm3, %v930_v20  ;;  %v532_v27 = vadd.f32 %v987_v25, %v1274_v22  ;;  %v523_v29 = vpop.f32.mrb[9].mxu1  ;;  %720 = vst.msk [vmem:[%s1287_s25 + $0x14] sm:$0xf] %vm714_vm3, %v912_v21  ;;  %v460_v30 = vadd.f32 %v1274_v22, %v459_v28  ;;  %v972_v32 = vpop.f32.mrb[10].mxu0 }
 0x132   : > { %736 = vst.msk [vmem:[%s1287_s25 + $0x54] sm:$0xf] %vm714_vm3, %v928_v23  ;;  %v524_v31 = vadd.f32 %v1274_v22, %v523_v29  ;;  %v988_v33 = vpop.f32.mrb[10].mxu1  ;;  %v564_v34 = vmax.f32 %v468_v26, 0.0  ;;  %v471_v36 = vadd.f32 %v972_v32, %v1274_v22  ;;  %v462_v38 = vpop.f32.mrb[11].mxu0 }
 0x133   : > { %v580_v35 = vmax.f32 %v532_v27, 0.0  ;;  %v535_v37 = vadd.f32 %v988_v33, %v1274_v22  ;;  %v526_v39 = vpop.f32.mrb[11].mxu1  ;;  %v562_v40 = vmax.f32 %v460_v30, 0.0  ;;  %v463_v42 = vadd.f32 %v1274_v22, %v462_v38 }
 0x134   : > { %v578_v41 = vmax.f32 %v524_v31, 0.0  ;;  %v527_v43 = vadd.f32 %v1274_v22, %v526_v39  ;;  %v917_v44 = vpack.c.bf16 %v564_v34, %v564_v34  ;;  %v565_v46 = vmax.f32 %v471_v36, 0.0 }
 0x135   : > { %v933_v45 = vpack.c.bf16 %v580_v35, %v580_v35  ;;  %v581_v47 = vmax.f32 %v535_v37, 0.0  ;;  %v915_v48 = vpack.c.bf16 %v562_v40, %v562_v40  ;;  %v563_v50 = vmax.f32 %v463_v42, 0.0 }
 0x136   : > { %v931_v49 = vpack.c.bf16 %v578_v41, %v578_v41  ;;  %v579_v51 = vmax.f32 %v527_v43, 0.0  ;;  %725 = vst.msk [vmem:[%s1287_s25 + $0x28] sm:$0xf] %vm714_vm3, %v917_v44  ;;  %v918_v52 = vpack.c.bf16 %v565_v46, %v565_v46 }
 0x137   : > { %741 = vst.msk [vmem:[%s1287_s25 + $0x68] sm:$0xf] %vm714_vm3, %v933_v45  ;;  %v934_v53 = vpack.c.bf16 %v581_v47, %v581_v47  ;;  %723 = vst.msk [vmem:[%s1287_s25 + $0x20] sm:$0xf] %vm714_vm3, %v915_v48  ;;  %v916_v54 = vpack.c.bf16 %v563_v50, %v563_v50  ;;  %v975_v56 = vpop.f32.mrb[12].mxu0 }
 0x138   : > { %739 = vst.msk [vmem:[%s1287_s25 + $0x60] sm:$0xf] %vm714_vm3, %v931_v49  ;;  %v932_v55 = vpack.c.bf16 %v579_v51, %v579_v51  ;;  %v991_v57 = vpop.f32.mrb[12].mxu1  ;;  %726 = vst.msk [vmem:[%s1287_s25 + $0x2c] sm:$0xf] %vm714_vm3, %v918_v52  ;;  %v484_v58 = vadd.f32 %v975_v56, %v1274_v22  ;;  %v475_v60 = vpop.f32.mrb[13].mxu0 }
 0x139   : > { %742 = vst.msk [vmem:[%s1287_s25 + $0x6c] sm:$0xf] %vm714_vm3, %v934_v53  ;;  %v548_v59 = vadd.f32 %v991_v57, %v1274_v22  ;;  %v539_v61 = vpop.f32.mrb[13].mxu1  ;;  %724 = vst.msk [vmem:[%s1287_s25 + $0x24] sm:$0xf] %vm714_vm3, %v916_v54  ;;  %v476_v62 = vadd.f32 %v1274_v22, %v475_v60  ;;  %v976_v0 = vpop.f32.mrb[14].mxu0 }
 0x13a   : > { %740 = vst.msk [vmem:[%s1287_s25 + $0x64] sm:$0xf] %vm714_vm3, %v932_v55  ;;  %v540_v63 = vadd.f32 %v1274_v22, %v539_v61  ;;  %v992_v1 = vpop.f32.mrb[14].mxu1  ;;  %v568_v2 = vmax.f32 %v484_v58, 0.0  ;;  %v487_v4 = vadd.f32 %v976_v0, %v1274_v22  ;;  %v478_v6 = vpop.f32.mrb[15].mxu0 }
 0x13b   : > { %v584_v3 = vmax.f32 %v548_v59, 0.0  ;;  %v551_v5 = vadd.f32 %v992_v1, %v1274_v22  ;;  %v542_v7 = vpop.f32.mrb[15].mxu1  ;;  %v566_v8 = vmax.f32 %v476_v62, 0.0  ;;  %v479_v10 = vadd.f32 %v1274_v22, %v478_v6 }
 0x13c   : > { %v582_v9 = vmax.f32 %v540_v63, 0.0  ;;  %v543_v11 = vadd.f32 %v1274_v22, %v542_v7  ;;  %v921_v12 = vpack.c.bf16 %v568_v2, %v568_v2  ;;  %v569_v14 = vmax.f32 %v487_v4, 0.0 }
 0x13d   : > { %v937_v13 = vpack.c.bf16 %v584_v3, %v584_v3  ;;  %v585_v15 = vmax.f32 %v551_v5, 0.0  ;;  %v919_v16 = vpack.c.bf16 %v566_v8, %v566_v8  ;;  %v567_v18 = vmax.f32 %v479_v10, 0.0 }
 0x13e   : > { %v935_v17 = vpack.c.bf16 %v582_v9, %v582_v9  ;;  %v583_v19 = vmax.f32 %v543_v11, 0.0  ;;  %729 = vst.msk [vmem:[%s1287_s25 + $0x38] sm:$0xf] %vm714_vm3, %v921_v12  ;;  %v922_v20 = vpack.c.bf16 %v569_v14, %v569_v14 }
 0x13f   : > { %745 = vst.msk [vmem:[%s1287_s25 + $0x78] sm:$0xf] %vm714_vm3, %v937_v13  ;;  %v938_v21 = vpack.c.bf16 %v585_v15, %v585_v15  ;;  %727 = vst.msk [vmem:[%s1287_s25 + $0x30] sm:$0xf] %vm714_vm3, %v919_v16  ;;  %v920_v22 = vpack.c.bf16 %v567_v18, %v567_v18 }
 0x140   : > { %743 = vst.msk [vmem:[%s1287_s25 + $0x70] sm:$0xf] %vm714_vm3, %v935_v17  ;;  %v936_v23 = vpack.c.bf16 %v583_v19, %v583_v19  ;;  %730 = vst.msk [vmem:[%s1287_s25 + $0x3c] sm:$0xf] %vm714_vm3, %v922_v20 }
 0x141   : > { %746 = vst.msk [vmem:[%s1287_s25 + $0x7c] sm:$0xf] %vm714_vm3, %v938_v21  ;;  %728 = vst.msk [vmem:[%s1287_s25 + $0x34] sm:$0xf] %vm714_vm3, %v920_v22 }
 0x142   : > { %744 = vst.msk [vmem:[%s1287_s25 + $0x74] sm:$0xf] %vm714_vm3, %v936_v23 }
 0x143 PF: > { %s15_s12 = sadd.s32 1, %s1117_s12  }
 0x144   : > { %p12_p2 = scmp.ge.s32.totalorder %s15_s12, 10  }
 0x146   :  { %14 = sbr.rel (!%p12_p2) target bundleno = 2 (0x2), region = 71 }
 0x14d   :  { %769 = vsyncpa [#allocation3], 1 }
 0x14e   :  { %771 = vsyncpa [#allocation3 + $0x1], 1 }
 0x14f   :  { %772 = vsyncpa [#allocation5], 1 }

// kernel: reconstruction_net_forward.10
= control target key start
LH: loop header
LB: loop body
LE: loop exit
PB: predicated region body
PF: predicated region fallthrough
CT: control target
= control target key end

     0   :  { %s1712_s12 = smov 0   ;;  %s1986_s0 = inlined_call_operand.vmem [shape: bf16[512,288], index: 0, kind: input, shape index: {}]   ;;  %s1987_s1 = inlined_call_operand.vmem [shape: bf16[288,64], index: 1, kind: input, shape index: {}]   ;;  %s1988_s2 = inlined_call_operand.vmem [shape: f32[1,64], index: 2, kind: input, shape index: {}]   ;;  %s1989_s3 = inlined_call_operand.vmem [shape: bf16[512,64], index: 3, kind: output, shape index: {}]  }
   0x1 LB: > { %s1253_s13 = sadd.s32 4294967295, %s1690_s12   ;;  %p1257_p0 = scmp.ge.s32.totalorder %s1690_s12, 1  ;;  %s1690_s12 = sphi %s1712_s12, %s13_s12  }
   0x2   : > { %p139_p1 = scmp.lt.s32.totalorder %s1690_s12, 3 }
   0x4   : > { %p140_p2 = pnand %p1257_p0, %p139_p1 }
   0x5   : > { %v1602_v0 = vld [vmem:[%s1987_s1 + $0x40] sm:$0xff] (!%p140_p2)   ;;  %s1258_s16 = sshll.u32 (!%p140_p2), %s1253_s13, 5  ;;  %v1604_v2 = vld [vmem:[%s1987_s1 + $0x48] sm:$0xff] (!%p140_p2)   ;;  %v1606_v4 = vld [vmem:[%s1987_s1 + $0x50] sm:$0xff] (!%p140_p2)   ;;  %vm633_vm0 = vcmask (!%p140_p2), 261120   ;;  %vm1164_vm1 = vcmask (!%p140_p2), 519168  }
   0x6   : > { %143 = sbr.rel (%p140_p2) target bundleno = 352 (0x160), region = 32  ;;  %v1603_v1 = vld [vmem:[%s1987_s1] sm:$0xff] (!%p140_p2)   ;;  %1411 = vmatprep.subr.bf16.mxu0 (!%p140_p2), %v1602_v0  ;;  %1577 = vmatprep.subr.bf16.mxu1 (!%p140_p2), %v1602_v0  ;;  %p165_p3 = scmp.lt.s32.totalorder (!%p140_p2), %s1258_s16, 63  ;;  %v1605_v3 = vld [vmem:[%s1987_s1 + $0x8] sm:$0xff] (!%p140_p2)   ;;  %v1607_v5 = vld [vmem:[%s1987_s1 + $0x10] sm:$0xff] (!%p140_p2)  }
   0x7   : > { %1412 = vmatpush3.bf16.msra.mxu0 (!%p140_p2), %v1603_v1  ;;  %1585 = vmatpush3.bf16.msra.mxu1 (!%p140_p2), %v1603_v1  ;;  %v1608_v6 = vld [vmem:[%s1987_s1 + $0x58] sm:$0xff] (!%p140_p2)   ;;  %v1610_v8 = vld [vmem:[%s1987_s1 + $0x60] sm:$0xff] (!%p140_p2)   ;;  %v1612_v10 = vld [vmem:[%s1987_s1 + $0x68] sm:$0xff] (!%p140_p2)  }
   0x8   : > { %1413 = vmatprep.subr.bf16.mxu0 (!%p140_p2), %v1604_v2  ;;  %1578 = vmatprep.subr.bf16.mxu1 (!%p140_p2), %v1604_v2  ;;  %v1609_v7 = vld [vmem:[%s1987_s1 + $0x18] sm:$0xff] (!%p140_p2)   ;;  %v1611_v9 = vld [vmem:[%s1987_s1 + $0x20] sm:$0xff] (!%p140_p2)   ;;  %v1613_v13 = vld [vmem:[%s1987_s1 + $0x28] sm:$0xff] (!%p140_p2)  }
   0x9   : > { %v1614_v14 = vld [vmem:[%s1987_s1 + $0x70] sm:$0xff] (!%p140_p2)   ;;  %v1616_v16 = vld [vmem:[%s1987_s1 + $0x78] sm:$0xff] (!%p140_p2)   ;;  %v1624_v18 = vld [vmem:[%s1987_s1 + $0x80] sm:$0xff] (!%p140_p2)  }
   0xa   : > { %v1615_v15 = vld [vmem:[%s1987_s1 + $0x30] sm:$0xff] (!%p140_p2)   ;;  %v1617_v17 = vld [vmem:[%s1987_s1 + $0x38] sm:$0xff] (!%p140_p2)   ;;  %v1637_v23 = vld [vmem:[%s1987_s1 + $0x88] sm:$0xff] (!%p140_p2)  }
   0xb   : > { %1414 = vmatpush3.bf16.msra.mxu0 (!%p140_p2), %v1605_v3  ;;  %1586 = vmatpush3.bf16.msra.mxu1 (!%p140_p2), %v1605_v3 }
   0xc   : > { %1415 = vmatprep.subr.bf16.mxu0 (!%p140_p2), %v1606_v4  ;;  %1579 = vmatprep.subr.bf16.mxu1 (!%p140_p2), %v1606_v4 }
   0xd   : > { %s1991_s16 = smov (!%p165_p3, %s1258_s16), 63 }
   0xe   : > { %s1593_s29 = smul.u32 12, %s1991_s16  ;;  %s1261_s5 = sshll.u32 %s1991_s16, 2 }
   0xf   : > { %1416 = vmatpush3.bf16.msra.mxu0 %v1607_v5  ;;  %1587 = vmatpush3.bf16.msra.mxu1 %v1607_v5  ;;  %s1875_s8 = scalar_lea.vmem %s1989_s3, %s1261_s5 }
  0x10   : > { %1417 = vmatprep.subr.bf16.mxu0 %v1608_v6  ;;  %1580 = vmatprep.subr.bf16.mxu1 %v1608_v6  ;;  %s1753_s9 = scalar_lea.vmem %s1986_s0, %s1593_s29 }
  0x11   : > { %v1620_v11 = vld [vmem:[%s1753_s9 + $0x4] ss:$12 sps:$4 sm:$0xff]   ;;  %v1618_v19 = vld [vmem:[%s1753_s9] ss:$12 sps:$4 sm:$0xff]   ;;  %v1625_v21 = vld [vmem:[%s1753_s9 + $0x1c] ss:$12 sps:$4 sm:$0xff]  }
  0x12   : > { %v1623_v12 = vld [vmem:[%s1753_s9 + $0x124] ss:$12 sps:$4 sm:$0xff]   ;;  %714 = vmatprep.mubr.bf16.mxu0 %v1620_v11  ;;  %v1621_v20 = vld [vmem:[%s1753_s9 + $0x120] ss:$12 sps:$4 sm:$0xff]   ;;  %v1627_v22 = vld [vmem:[%s1753_s9 + $0x13c] ss:$12 sps:$4 sm:$0xff]  }
  0x13   : > { %1418 = vmatpush3.bf16.msra.mxu0 %v1609_v7  ;;  %1588 = vmatpush3.bf16.msra.mxu1 %v1609_v7  ;;  %v1629_v24 = vld [vmem:[%s1753_s9 + $0x18] ss:$12 sps:$4 sm:$0xff]   ;;  %v1631_v26 = vld [vmem:[%s1753_s9 + $0x34] ss:$12 sps:$4 sm:$0xff]   ;;  %v1635_v28 = vld [vmem:[%s1753_s9 + $0x30] ss:$12 sps:$4 sm:$0xff]  }
  0x14   : > { %1419 = vmatprep.subr.bf16.mxu0 %v1610_v8  ;;  %1581 = vmatprep.subr.bf16.mxu1 %v1610_v8  ;;  %v1630_v25 = vld [vmem:[%s1753_s9 + $0x138] ss:$12 sps:$4 sm:$0xff]   ;;  %v1633_v27 = vld [vmem:[%s1753_s9 + $0x154] ss:$12 sps:$4 sm:$0xff]   ;;  %v1636_v29 = vld [vmem:[%s1753_s9 + $0x150] ss:$12 sps:$4 sm:$0xff]  }
  0x15   : > { %810 = vmatprep.mubr.bf16.mxu1 %v1623_v12  ;;  %v1638_v30 = vld [vmem:[%s1753_s9 + $0x4c] ss:$12 sps:$4 sm:$0xff]   ;;  %v1642_v32 = vld [vmem:[%s1753_s9 + $0x48] ss:$12 sps:$4 sm:$0xff]   ;;  %v1644_v34 = vld [vmem:[%s1753_s9 + $0x64] ss:$12 sps:$4 sm:$0xff]  }
  0x16   : > { %v1640_v31 = vld [vmem:[%s1753_s9 + $0x16c] ss:$12 sps:$4 sm:$0xff]   ;;  %v1643_v33 = vld [vmem:[%s1753_s9 + $0x168] ss:$12 sps:$4 sm:$0xff]   ;;  %v1653_v41 = vld [vmem:[%s1753_s9 + $0x50] ss:$12 sps:$4 sm:$0xff]  }
  0x17   : > { %1420 = vmatpush3.bf16.msra.mxu0 %v1611_v9  ;;  %1589 = vmatpush3.bf16.msra.mxu1 %v1611_v9  ;;  %v1646_v35 = vld [vmem:[%s1753_s9 + $0x8] ss:$12 sps:$4 sm:$0xff]   ;;  %v1647_v36 = vld [vmem:[%s1753_s9 + $0x60] ss:$12 sps:$4 sm:$0xff]   ;;  %v1651_v39 = vld [vmem:[%s1753_s9 + $0x38] ss:$12 sps:$4 sm:$0xff]  }
  0x18   : > { %1421 = vmatprep.subr.bf16.mxu0 %v1612_v10  ;;  %1582 = vmatprep.subr.bf16.mxu1 %v1612_v10  ;;  %v1648_v37 = vld [vmem:[%s1753_s9 + $0x20] ss:$12 sps:$4 sm:$0xff]   ;;  %v1649_v38 = vld [vmem:[%s1753_s9 + $0x7c] ss:$12 sps:$4 sm:$0xff]   ;;  %v1652_v40 = vld [vmem:[%s1753_s9 + $0x78] ss:$12 sps:$4 sm:$0xff]  }
  0x19   : > { %v1654_v42 = vld [vmem:[%s1753_s9 + $0x94] ss:$12 sps:$4 sm:$0xff]   ;;  %v1657_v44 = vld [vmem:[%s1753_s9 + $0x90] ss:$12 sps:$4 sm:$0xff]   ;;  %v1659_v46 = vld [vmem:[%s1753_s9 + $0xac] ss:$12 sps:$4 sm:$0xff]  }
  0x1a   : > { %v1656_v43 = vld [vmem:[%s1753_s9 + $0x68] ss:$12 sps:$4 sm:$0xff]   ;;  %v1658_v45 = vld [vmem:[%s1753_s9 + $0x80] ss:$12 sps:$4 sm:$0xff]   ;;  %v1661_v47 = vld [vmem:[%s1753_s9 + $0x98] ss:$12 sps:$4 sm:$0xff]  }
  0x1b   : > { %1422 = vmatpush3.bf16.msra.mxu0 %v1613_v13  ;;  %1590 = vmatpush3.bf16.msra.mxu1 %v1613_v13  ;;  %v1662_v48 = vld [vmem:[%s1753_s9 + $0xa8] ss:$12 sps:$4 sm:$0xff]   ;;  %v1663_v49 = vld [vmem:[%s1753_s9 + $0xb0] ss:$12 sps:$4 sm:$0xff]   ;;  %v1667_v52 = vld [vmem:[%s1753_s9 + $0xc0] ss:$12 sps:$4 sm:$0xff]  }
  0x1c   : > { %1423 = vmatprep.subr.bf16.mxu0 %v1614_v14  ;;  %1583 = vmatprep.subr.bf16.mxu1 %v1614_v14  ;;  %v1664_v50 = vld [vmem:[%s1753_s9 + $0xc4] ss:$12 sps:$4 sm:$0xff]   ;;  %v1666_v51 = vld [vmem:[%s1753_s9 + $0xc8] ss:$12 sps:$4 sm:$0xff]   ;;  %v1668_v53 = vld [vmem:[%s1753_s9 + $0xe0] ss:$12 sps:$4 sm:$0xff]  }
  0x1d   : > { %v1669_v54 = vld [vmem:[%s1753_s9 + $0xdc] ss:$12 sps:$4 sm:$0xff]   ;;  %v1671_v55 = vld [vmem:[%s1753_s9 + $0xf8] ss:$12 sps:$4 sm:$0xff]   ;;  %v1674_v58 = vld [vmem:[%s1753_s9 + $0xf4] ss:$12 sps:$4 sm:$0xff]  }
  0x1e   : > { %v1672_v56 = vld [vmem:[%s1753_s9 + $0xd8] ss:$12 sps:$4 sm:$0xff]   ;;  %v1673_v57 = vld [vmem:[%s1753_s9 + $0x110] ss:$12 sps:$4 sm:$0xff]   ;;  %v1676_v59 = vld [vmem:[%s1753_s9 + $0x128] ss:$12 sps:$4 sm:$0xff]  }
  0x1f   : > { %1424 = vmatpush3.bf16.msra.mxu0 %v1615_v15  ;;  %1591 = vmatpush3.bf16.msra.mxu1 %v1615_v15  ;;  %v1677_v60 = vld [vmem:[%s1753_s9 + $0xf0] ss:$12 sps:$4 sm:$0xff]   ;;  %v1678_v61 = vld [vmem:[%s1753_s9 + $0x140] ss:$12 sps:$4 sm:$0xff]   ;;  %v1681_v63 = vld [vmem:[%s1753_s9 + $0x158] ss:$12 sps:$4 sm:$0xff]  }
  0x20   : > { %1425 = vmatprep.subr.bf16.mxu0 %v1616_v16  ;;  %1584 = vmatprep.subr.bf16.mxu1 %v1616_v16  ;;  %v1679_v62 = vld [vmem:[%s1753_s9 + $0x10c] ss:$12 sps:$4 sm:$0xff]   ;;  %v1682_v0 = vld [vmem:[%s1753_s9 + $0x108] ss:$12 sps:$4 sm:$0xff]   ;;  %v1683_v1 = vld [vmem:[%s1753_s9 + $0x170] ss:$12 sps:$4 sm:$0xff]  }
  0x23   : > { %1426 = vmatpush3.bf16.msra.mxu0 %v1617_v17  ;;  %1592 = vmatpush3.bf16.msra.mxu1 %v1617_v17 }
  0x24   : > { %1541 = vmatprep.subr.bf16.mxu1 %v1624_v18 }
  0x26   : > { %715 = vmatmul.mubr.bf16.vlgmr.msra.gmra.mrb[0].mxu0 %v1618_v19  ;;  %811 = vmatmul.mubr.bf16.vlgmr.msra.gmra.mrb[0].mxu1 %v1621_v20 }
  0x27   : > { %1542 = vmatpush3.bf16.msra.mxu1 %v1624_v18  ;;  %722 = vmatprep.mubr.bf16.mxu0 %v1625_v21 }
  0x28   : > { %818 = vmatprep.mubr.bf16.mxu1 %v1627_v22  ;;  %1543 = vmatprep.subr.bf16.mxu1 %v1637_v23 }
  0x2b   : > { %1544 = vmatpush3.bf16.msra.mxu1 %v1637_v23 }
  0x2e   : > { %723 = vmatmul.mubr.bf16.gmra.mrb[4].mxu0 %v1629_v24  ;;  %819 = vmatmul.mubr.bf16.gmra.mrb[4].mxu1 %v1630_v25 }
  0x2f   : > { %730 = vmatprep.mubr.bf16.mxu0 %v1631_v26  ;;  %826 = vmatprep.mubr.bf16.mxu1 %v1633_v27 }
  0x36   : > { %731 = vmatmul.mubr.bf16.gmra.mrb[8].mxu0 %v1635_v28  ;;  %827 = vmatmul.mubr.bf16.gmra.mrb[8].mxu1 %v1636_v29 }
  0x37   : > { %738 = vmatprep.mubr.bf16.mxu0 %v1638_v30  ;;  %834 = vmatprep.mubr.bf16.mxu1 %v1640_v31 }
  0x3e   : > { %739 = vmatmul.mubr.bf16.gmra.mrb[12].mxu0 %v1642_v32  ;;  %835 = vmatmul.mubr.bf16.gmra.mrb[12].mxu1 %v1643_v33 }
  0x3f   : > { %746 = vmatprep.mubr.bf16.mxu0 %v1644_v34  ;;  %1545 = vmatprep.mubr.msk.bf16.mxu1 %vm633_vm0, %v1646_v35 }
  0x46   : > { %747 = vmatmul.mubr.bf16.gmra.mrb[16].mxu0 %v1647_v36  ;;  %1546 = vmatmul.mubr.msk.bf16.vlgmr.msra.gmra.mrb[16].mxu1 %vm633_vm0, %v1648_v37 }
  0x47   : > { %754 = vmatprep.mubr.bf16.mxu0 %v1649_v38  ;;  %1549 = vmatprep.mubr.msk.bf16.mxu1 %vm633_vm0, %v1651_v39 }
  0x4e   : > { %755 = vmatmul.mubr.bf16.gmra.mrb[20].mxu0 %v1652_v40  ;;  %1550 = vmatmul.mubr.msk.bf16.gmra.mrb[20].mxu1 %vm633_vm0, %v1653_v41 }
  0x4f   : > { %762 = vmatprep.mubr.bf16.mxu0 %v1654_v42  ;;  %1553 = vmatprep.mubr.msk.bf16.mxu1 %vm633_vm0, %v1656_v43 }
  0x56   : > { %763 = vmatmul.mubr.bf16.gmra.mrb[24].mxu0 %v1657_v44  ;;  %1554 = vmatmul.mubr.msk.bf16.gmra.mrb[24].mxu1 %vm633_vm0, %v1658_v45 }
  0x57   : > { %770 = vmatprep.mubr.bf16.mxu0 %v1659_v46  ;;  %1557 = vmatprep.mubr.msk.bf16.mxu1 %vm633_vm0, %v1661_v47 }
  0x5e   : > { %771 = vmatmul.mubr.bf16.gmra.mrb[28].mxu0 %v1662_v48  ;;  %1558 = vmatmul.mubr.msk.bf16.gmra.mrb[28].mxu1 %vm633_vm0, %v1663_v49 }
  0x5f   : > { %778 = vmatprep.mubr.bf16.mxu0 %v1664_v50  ;;  %1561 = vmatprep.mubr.msk.bf16.mxu1 %vm633_vm0, %v1666_v51  ;;  %v1865_v50 = vld [vmem:[%s1988_s2] ss:$0 sm:$0xff] }
  0x66   : > { %779 = vmatmul.mubr.bf16.gmra.mrb[32].mxu0 %v1667_v52  ;;  %1562 = vmatmul.mubr.msk.bf16.gmra.mrb[32].mxu1 %vm633_vm0, %v1668_v53 }
  0x67   : > { %786 = vmatprep.mubr.bf16.mxu0 %v1669_v54  ;;  %1565 = vmatprep.mubr.msk.bf16.mxu1 %vm633_vm0, %v1671_v55 }
  0x6e   : > { %787 = vmatmul.mubr.bf16.gmra.mrb[36].mxu0 %v1672_v56  ;;  %1566 = vmatmul.mubr.msk.bf16.gmra.mrb[36].mxu1 %vm633_vm0, %v1673_v57 }
  0x6f   : > { %794 = vmatprep.mubr.bf16.mxu0 %v1674_v58  ;;  %1569 = vmatprep.mubr.msk.bf16.mxu1 %vm633_vm0, %v1676_v59 }
  0x76   : > { %795 = vmatmul.mubr.bf16.gmra.mrb[40].mxu0 %v1677_v60  ;;  %1570 = vmatmul.mubr.msk.bf16.gmra.mrb[40].mxu1 %vm633_vm0, %v1678_v61 }
  0x77   : > { %802 = vmatprep.mubr.bf16.mxu0 %v1679_v62  ;;  %1573 = vmatprep.mubr.msk.bf16.mxu1 %vm633_vm0, %v1681_v63 }
  0x7e   : > { %803 = vmatmul.mubr.bf16.gmra.mrb[44].mxu0 %v1682_v0  ;;  %1574 = vmatmul.mubr.msk.bf16.gmra.mrb[44].mxu1 %vm633_vm0, %v1683_v1 }
  0xf9   : > { %v1427_v2 = vpop.f32.mrb[0].mxu0  ;;  %v1499_v3 = vpop.f32.mrb[0].mxu1 }
  0xfa   : > { %v1428_v4 = vpop.f32.mrb[1].mxu0  ;;  %v1500_v5 = vpop.f32.mrb[1].mxu1 }
  0xfb   : > { %v1429_v6 = vadd.f32 %v1428_v4, %v1427_v2  ;;  %v1430_v7 = vpop.f32.mrb[2].mxu0  ;;  %v1846_v8 = vadd.f32 %v1500_v5, %v1499_v3  ;;  %v1502_v9 = vpop.f32.mrb[2].mxu1 }
  0xfc   : > { %v1431_v10 = vpop.f32.mrb[3].mxu0  ;;  %v1503_v11 = vpop.f32.mrb[3].mxu1 }
  0xfd   : > { %v1432_v12 = vadd.f32 %v1431_v10, %v1430_v7  ;;  %v1848_v13 = vadd.f32 %v1503_v11, %v1502_v9  ;;  %v717_v54 = vadd.f32 %v1429_v6, %v1865_v50 }
  0xff   : > { %v720_v63 = vadd.f32 %v1432_v12, %v1865_v50 }
 0x101   : > { %v1433_v14 = vpop.f32.mrb[4].mxu0  ;;  %v1505_v15 = vpop.f32.mrb[4].mxu1 }
 0x102   : > { %v1434_v16 = vpop.f32.mrb[5].mxu0  ;;  %v1506_v17 = vpop.f32.mrb[5].mxu1 }
 0x103   : > { %v1435_v18 = vadd.f32 %v1434_v16, %v1433_v14  ;;  %v1436_v19 = vpop.f32.mrb[6].mxu0  ;;  %v1850_v20 = vadd.f32 %v1506_v17, %v1505_v15  ;;  %v1508_v21 = vpop.f32.mrb[6].mxu1 }
 0x104   : > { %v1437_v22 = vpop.f32.mrb[7].mxu0  ;;  %v1509_v23 = vpop.f32.mrb[7].mxu1 }
 0x105   : > { %v1438_v24 = vadd.f32 %v1437_v22, %v1436_v19  ;;  %v1852_v25 = vadd.f32 %v1509_v23, %v1508_v21  ;;  %v725_v51 = vadd.f32 %v1435_v18, %v1865_v50 }
 0x107   : > { %v728_v58 = vadd.f32 %v1438_v24, %v1865_v50 }
 0x109   : > { %v1439_v26 = vpop.f32.mrb[8].mxu0  ;;  %v1511_v27 = vpop.f32.mrb[8].mxu1 }
 0x10a   : > { %v1440_v28 = vpop.f32.mrb[9].mxu0  ;;  %v1512_v29 = vpop.f32.mrb[9].mxu1 }
 0x10b   : > { %v1441_v30 = vadd.f32 %v1440_v28, %v1439_v26  ;;  %v1442_v31 = vpop.f32.mrb[10].mxu0  ;;  %v1854_v32 = vadd.f32 %v1512_v29, %v1511_v27  ;;  %v1514_v33 = vpop.f32.mrb[10].mxu1 }
 0x10c   : > { %v1443_v34 = vpop.f32.mrb[11].mxu0  ;;  %v1515_v35 = vpop.f32.mrb[11].mxu1 }
 0x10d   : > { %v1444_v36 = vadd.f32 %v1443_v34, %v1442_v31  ;;  %v1856_v37 = vadd.f32 %v1515_v35, %v1514_v33  ;;  %v733_v18 = vadd.f32 %v1441_v30, %v1865_v50 }
 0x10f   : > { %v736_v29 = vadd.f32 %v1444_v36, %v1865_v50 }
 0x111   : > { %v1445_v38 = vpop.f32.mrb[12].mxu0  ;;  %v1517_v39 = vpop.f32.mrb[12].mxu1 }
 0x112   : > { %v1446_v40 = vpop.f32.mrb[13].mxu0  ;;  %v1518_v41 = vpop.f32.mrb[13].mxu1 }
 0x113   : > { %v1447_v42 = vadd.f32 %v1446_v40, %v1445_v38  ;;  %v1448_v43 = vpop.f32.mrb[14].mxu0  ;;  %v1858_v44 = vadd.f32 %v1518_v41, %v1517_v39  ;;  %v1520_v45 = vpop.f32.mrb[14].mxu1 }
 0x114   : > { %v1449_v46 = vpop.f32.mrb[15].mxu0  ;;  %v1521_v47 = vpop.f32.mrb[15].mxu1 }
 0x115   : > { %v1450_v48 = vadd.f32 %v1449_v46, %v1448_v43  ;;  %v1860_v49 = vadd.f32 %v1521_v47, %v1520_v45  ;;  %v741_v14 = vadd.f32 %v1447_v42, %v1865_v50 }
 0x117   : > { %v744_v23 = vadd.f32 %v1450_v48, %v1865_v50 }
 0x119   : > { %v1451_v52 = vpop.f32.mrb[16].mxu0  ;;  %v1547_v53 = vpop.f32.mrb[16].mxu1 }
 0x11a   : > { %v886_v55 = vadd.f32 %v1547_v53, %v725_v51  ;;  %v1452_v56 = vpop.f32.mrb[17].mxu0  ;;  %v877_v57 = vpop.f32.mrb[17].mxu1 }
 0x11b   : > { %v1453_v59 = vadd.f32 %v1452_v56, %v1451_v52  ;;  %v878_v60 = vadd.f32 %v877_v57, %v717_v54  ;;  %v1454_v61 = vpop.f32.mrb[18].mxu0  ;;  %v1548_v62 = vpop.f32.mrb[18].mxu1 }
 0x11c   : > { %v1006_v0 = vmax.f32 %v886_v55, 0.0  ;;  %v889_v1 = vadd.f32 %v1548_v62, %v728_v58  ;;  %v1455_v2 = vpop.f32.mrb[19].mxu0  ;;  %v880_v3 = vpop.f32.mrb[19].mxu1 }
 0x11d   : > { %v1004_v4 = vmax.f32 %v878_v60, 0.0  ;;  %v1456_v5 = vadd.f32 %v1455_v2, %v1454_v61  ;;  %v881_v6 = vadd.f32 %v880_v3, %v720_v63  ;;  %v749_v51 = vadd.f32 %v1453_v59, %v1865_v50 }
 0x11e   : > { %v1381_v7 = vpack.c.bf16 %v1006_v0, %v1006_v0  ;;  %v1007_v9 = vmax.f32 %v889_v1, 0.0 }
 0x11f   : > { %v1379_v10 = vpack.c.bf16 %v1004_v4, %v1004_v4  ;;  %v1005_v11 = vmax.f32 %v881_v6, 0.0  ;;  %v752_v61 = vadd.f32 %v1456_v5, %v1865_v50 }
 0x120   : > { %1167 = vst.msk [vmem:[%s1875_s8 + $0x8] sm:$0xf] %vm1164_vm1, %v1381_v7  ;;  %v1382_v12 = vpack.c.bf16 %v1007_v9, %v1007_v9 }
 0x121   : > { %1165 = vst.msk [vmem:[%s1875_s8] sm:$0xf] %vm1164_vm1, %v1379_v10  ;;  %v1380_v15 = vpack.c.bf16 %v1005_v11, %v1005_v11  ;;  %v1457_v16 = vpop.f32.mrb[20].mxu0  ;;  %v1551_v17 = vpop.f32.mrb[20].mxu1 }
 0x122   : > { %1168 = vst.msk [vmem:[%s1875_s8 + $0xc] sm:$0xf] %vm1164_vm1, %v1382_v12  ;;  %v902_v19 = vadd.f32 %v1551_v17, %v741_v14  ;;  %v1458_v21 = vpop.f32.mrb[21].mxu0  ;;  %v893_v22 = vpop.f32.mrb[21].mxu1 }
 0x123   : > { %1166 = vst.msk [vmem:[%s1875_s8 + $0x4] sm:$0xf] %vm1164_vm1, %v1380_v15  ;;  %v1459_v24 = vadd.f32 %v1458_v21, %v1457_v16  ;;  %v894_v26 = vadd.f32 %v893_v22, %v733_v18  ;;  %v1460_v27 = vpop.f32.mrb[22].mxu0  ;;  %v1552_v28 = vpop.f32.mrb[22].mxu1 }
 0x124   : > { %v1010_v31 = vmax.f32 %v902_v19, 0.0  ;;  %v905_v33 = vadd.f32 %v1552_v28, %v744_v23  ;;  %v1461_v30 = vpop.f32.mrb[23].mxu0  ;;  %v896_v34 = vpop.f32.mrb[23].mxu1 }
 0x125   : > { %v1008_v35 = vmax.f32 %v894_v26, 0.0  ;;  %v1462_v38 = vadd.f32 %v1461_v30, %v1460_v27  ;;  %v897_v39 = vadd.f32 %v896_v34, %v736_v29  ;;  %v757_v46 = vadd.f32 %v1459_v24, %v1865_v50 }
 0x126   : > { %v1385_v40 = vpack.c.bf16 %v1010_v31, %v1010_v31  ;;  %v1011_v41 = vmax.f32 %v905_v33, 0.0 }
 0x127   : > { %v1383_v42 = vpack.c.bf16 %v1008_v35, %v1008_v35  ;;  %v1009_v43 = vmax.f32 %v897_v39, 0.0  ;;  %v760_v55 = vadd.f32 %v1462_v38, %v1865_v50 }
 0x128   : > { %1171 = vst.msk [vmem:[%s1875_s8 + $0x18] sm:$0xf] %vm1164_vm1, %v1385_v40  ;;  %v1386_v45 = vpack.c.bf16 %v1011_v41, %v1011_v41 }
 0x129   : > { %1169 = vst.msk [vmem:[%s1875_s8 + $0x10] sm:$0xf] %vm1164_vm1, %v1383_v42  ;;  %v1384_v36 = vpack.c.bf16 %v1009_v43, %v1009_v43  ;;  %v1463_v47 = vpop.f32.mrb[24].mxu0  ;;  %v1555_v48 = vpop.f32.mrb[24].mxu1 }
 0x12a   : > { %1172 = vst.msk [vmem:[%s1875_s8 + $0x1c] sm:$0xf] %vm1164_vm1, %v1386_v45  ;;  %v918_v52 = vadd.f32 %v1555_v48, %v757_v46  ;;  %v1464_v53 = vpop.f32.mrb[25].mxu0  ;;  %v909_v54 = vpop.f32.mrb[25].mxu1 }
 0x12b   : > { %1170 = vst.msk [vmem:[%s1875_s8 + $0x14] sm:$0xf] %vm1164_vm1, %v1384_v36  ;;  %v1465_v56 = vadd.f32 %v1464_v53, %v1463_v47  ;;  %v910_v57 = vadd.f32 %v909_v54, %v749_v51  ;;  %v1466_v58 = vpop.f32.mrb[26].mxu0  ;;  %v1556_v60 = vpop.f32.mrb[26].mxu1 }
 0x12c   : > { %v1014_v62 = vmax.f32 %v918_v52, 0.0  ;;  %v921_v63 = vadd.f32 %v1556_v60, %v760_v55  ;;  %v1467_v59 = vpop.f32.mrb[27].mxu0  ;;  %v912_v0 = vpop.f32.mrb[27].mxu1 }
 0x12d   : > { %v1012_v1 = vmax.f32 %v910_v57, 0.0  ;;  %v1468_v2 = vadd.f32 %v1467_v59, %v1466_v58  ;;  %v913_v3 = vadd.f32 %v912_v0, %v752_v61  ;;  %v765_v14 = vadd.f32 %v1465_v56, %v1865_v50 }
 0x12e   : > { %v1389_v4 = vpack.c.bf16 %v1014_v62, %v1014_v62  ;;  %v1015_v6 = vmax.f32 %v921_v63, 0.0 }
 0x12f   : > { %v1387_v7 = vpack.c.bf16 %v1012_v1, %v1012_v1  ;;  %v1013_v9 = vmax.f32 %v913_v3, 0.0  ;;  %v768_v22 = vadd.f32 %v1468_v2, %v1865_v50 }
 0x130   : > { %1175 = vst.msk [vmem:[%s1875_s8 + $0x28] sm:$0xf] %vm1164_vm1, %v1389_v4  ;;  %v1390_v10 = vpack.c.bf16 %v1015_v6, %v1015_v6 }
 0x131   : > { %1173 = vst.msk [vmem:[%s1875_s8 + $0x20] sm:$0xf] %vm1164_vm1, %v1387_v7  ;;  %v1388_v11 = vpack.c.bf16 %v1013_v9, %v1013_v9  ;;  %v1469_v5 = vpop.f32.mrb[28].mxu0  ;;  %v1559_v12 = vpop.f32.mrb[28].mxu1 }
 0x132   : > { %1176 = vst.msk [vmem:[%s1875_s8 + $0x2c] sm:$0xf] %vm1164_vm1, %v1390_v10  ;;  %v1470_v15 = vpop.f32.mrb[29].mxu0  ;;  %v925_v16 = vpop.f32.mrb[29].mxu1 }
 0x133   : > { %1174 = vst.msk [vmem:[%s1875_s8 + $0x24] sm:$0xf] %vm1164_vm1, %v1388_v11  ;;  %v1471_v17 = vadd.f32 %v1470_v15, %v1469_v5  ;;  %v926_v18 = vadd.f32 %v925_v16, %v765_v14  ;;  %v1472_v19 = vpop.f32.mrb[30].mxu0  ;;  %v1560_v21 = vpop.f32.mrb[30].mxu1  ;;  %v821_v14 = vadd.f32 %v1850_v20, %v1865_v50 }
 0x134   : > { %v1473_v23 = vpop.f32.mrb[31].mxu0  ;;  %v928_v24 = vpop.f32.mrb[31].mxu1 }
 0x135   : > { %v773_v26 = vadd.f32 %v1471_v17, %v1865_v50  ;;  %v1016_v27 = vmax.f32 %v926_v18, 0.0  ;;  %v1474_v28 = vadd.f32 %v1473_v23, %v1472_v19  ;;  %v929_v29 = vadd.f32 %v928_v24, %v768_v22 }
 0x136   : > { %v813_v19 = vadd.f32 %v1846_v8, %v1865_v50  ;;  %v824_v24 = vadd.f32 %v1852_v25, %v1865_v50  ;;  %v816_v8 = vadd.f32 %v1848_v13, %v1865_v50 }
 0x137   : > { %v934_v31 = vadd.f32 %v1559_v12, %v773_v26  ;;  %v1391_v33 = vpack.c.bf16 %v1016_v27, %v1016_v27  ;;  %v776_v30 = vadd.f32 %v1474_v28, %v1865_v50  ;;  %v1017_v34 = vmax.f32 %v929_v29, 0.0 }
 0x139   : > { %v1018_v35 = vmax.f32 %v934_v31, 0.0  ;;  %1177 = vst.msk [vmem:[%s1875_s8 + $0x30] sm:$0xf] %vm1164_vm1, %v1391_v33  ;;  %v937_v38 = vadd.f32 %v1560_v21, %v776_v30  ;;  %v1392_v39 = vpack.c.bf16 %v1017_v34, %v1017_v34  ;;  %v1475_v40 = vpop.f32.mrb[32].mxu0  ;;  %v1563_v41 = vpop.f32.mrb[32].mxu1 }
 0x13a   : > { %v1476_v42 = vpop.f32.mrb[33].mxu0  ;;  %v941_v43 = vpop.f32.mrb[33].mxu1 }
 0x13b   : > { %v1393_v45 = vpack.c.bf16 %v1018_v35, %v1018_v35  ;;  %v1019_v46 = vmax.f32 %v937_v38, 0.0  ;;  %1178 = vst.msk [vmem:[%s1875_s8 + $0x34] sm:$0xf] %vm1164_vm1, %v1392_v39  ;;  %v1477_v36 = vadd.f32 %v1476_v42, %v1475_v40  ;;  %v1478_v47 = vpop.f32.mrb[34].mxu0  ;;  %v1564_v48 = vpop.f32.mrb[34].mxu1 }
 0x13c   : > { %v1479_v51 = vpop.f32.mrb[35].mxu0  ;;  %v944_v52 = vpop.f32.mrb[35].mxu1 }
 0x13d   : > { %1179 = vst.msk [vmem:[%s1875_s8 + $0x38] sm:$0xf] %vm1164_vm1, %v1393_v45  ;;  %v1394_v53 = vpack.c.bf16 %v1019_v46, %v1019_v46  ;;  %v781_v54 = vadd.f32 %v1477_v36, %v1865_v50  ;;  %v1480_v55 = vadd.f32 %v1479_v51, %v1478_v47 }
 0x13f   : > { %1180 = vst.msk [vmem:[%s1875_s8 + $0x3c] sm:$0xf] %vm1164_vm1, %v1394_v53  ;;  %v942_v56 = vadd.f32 %v941_v43, %v781_v54  ;;  %v784_v57 = vadd.f32 %v1480_v55, %v1865_v50  ;;  %v829_v55 = vadd.f32 %v1854_v32, %v1865_v50 }
 0x141   : > { %v1020_v58 = vmax.f32 %v942_v56, 0.0  ;;  %v945_v60 = vadd.f32 %v944_v52, %v784_v57  ;;  %v1481_v61 = vpop.f32.mrb[36].mxu0  ;;  %v1923_v62 = vpop.f32.mrb[36].mxu1 }
 0x142   : > { %v1482_v63 = vpop.f32.mrb[37].mxu0  ;;  %v957_v59 = vpop.f32.mrb[37].mxu1 }
 0x143   : > { %v1395_v0 = vpack.c.bf16 %v1020_v58, %v1020_v58  ;;  %v1021_v1 = vmax.f32 %v945_v60, 0.0  ;;  %v1483_v2 = vadd.f32 %v1482_v63, %v1481_v61  ;;  %v1484_v3 = vpop.f32.mrb[38].mxu0  ;;  %v1925_v4 = vpop.f32.mrb[38].mxu1 }
 0x144   : > { %v1485_v6 = vpop.f32.mrb[39].mxu0  ;;  %v960_v7 = vpop.f32.mrb[39].mxu1 }
 0x145   : > { %1181 = vst.msk [vmem:[%s1875_s8 + $0x40] sm:$0xf] %vm1164_vm1, %v1395_v0  ;;  %v1396_v9 = vpack.c.bf16 %v1021_v1, %v1021_v1  ;;  %v789_v10 = vadd.f32 %v1483_v2, %v1865_v50  ;;  %v1486_v11 = vadd.f32 %v1485_v6, %v1484_v3 }
 0x147   : > { %1182 = vst.msk [vmem:[%s1875_s8 + $0x44] sm:$0xf] %vm1164_vm1, %v1396_v9  ;;  %v950_v5 = vadd.f32 %v1563_v41, %v789_v10  ;;  %v792_v12 = vadd.f32 %v1486_v11, %v1865_v50 }
 0x149   : > { %v1022_v15 = vmax.f32 %v950_v5, 0.0  ;;  %v953_v16 = vadd.f32 %v1564_v48, %v792_v12  ;;  %v1487_v17 = vpop.f32.mrb[40].mxu0  ;;  %v1571_v18 = vpop.f32.mrb[40].mxu1  ;;  %v837_v48 = vadd.f32 %v1858_v44, %v1865_v50  ;;  %v840_v44 = vadd.f32 %v1860_v49, %v1865_v50 }
 0x14a   : > { %v982_v21 = vadd.f32 %v1571_v18, %v821_v14  ;;  %v1488_v22 = vpop.f32.mrb[41].mxu0  ;;  %v973_v23 = vpop.f32.mrb[41].mxu1 }
 0x14b   : > { %v1397_v26 = vpack.c.bf16 %v1022_v15, %v1022_v15  ;;  %v1023_v27 = vmax.f32 %v953_v16, 0.0  ;;  %v1489_v28 = vadd.f32 %v1488_v22, %v1487_v17  ;;  %v974_v29 = vadd.f32 %v973_v23, %v813_v19  ;;  %v1490_v20 = vpop.f32.mrb[42].mxu0  ;;  %v1572_v31 = vpop.f32.mrb[42].mxu1 }
 0x14c   : > { %v1030_v33 = vmax.f32 %v982_v21, 0.0  ;;  %v985_v30 = vadd.f32 %v1572_v31, %v824_v24  ;;  %v1491_v34 = vpop.f32.mrb[43].mxu0  ;;  %v976_v35 = vpop.f32.mrb[43].mxu1 }
 0x14d   : > { %1183 = vst.msk [vmem:[%s1875_s8 + $0x48] sm:$0xf] %vm1164_vm1, %v1397_v26  ;;  %v1398_v38 = vpack.c.bf16 %v1023_v27, %v1023_v27  ;;  %v797_v25 = vadd.f32 %v1489_v28, %v1865_v50  ;;  %v1028_v39 = vmax.f32 %v974_v29, 0.0  ;;  %v1492_v40 = vadd.f32 %v1491_v34, %v1490_v20 }
 0x14e   : > { %v1405_v41 = vpack.c.bf16 %v1030_v33, %v1030_v33  ;;  %v1031_v42 = vmax.f32 %v985_v30, 0.0  ;;  %v977_v43 = vadd.f32 %v976_v35, %v816_v8 }
 0x14f   : > { %1184 = vst.msk [vmem:[%s1875_s8 + $0x4c] sm:$0xf] %vm1164_vm1, %v1398_v38  ;;  %v958_v45 = vadd.f32 %v957_v59, %v797_v25  ;;  %v1403_v46 = vpack.c.bf16 %v1028_v39, %v1028_v39  ;;  %v800_v36 = vadd.f32 %v1492_v40, %v1865_v50 }
 0x150   : > { %1191 = vst.msk [vmem:[%s1875_s8 + $0x68] sm:$0xf] %vm1164_vm1, %v1405_v41  ;;  %v1406_v13 = vpack.c.bf16 %v1031_v42, %v1031_v42  ;;  %v1029_v47 = vmax.f32 %v977_v43, 0.0 }
 0x151   : > { %v1024_v51 = vmax.f32 %v958_v45, 0.0  ;;  %1189 = vst.msk [vmem:[%s1875_s8 + $0x60] sm:$0xf] %vm1164_vm1, %v1403_v46  ;;  %v961_v52 = vadd.f32 %v960_v7, %v800_v36  ;;  %v1493_v53 = vpop.f32.mrb[44].mxu0  ;;  %v1575_v54 = vpop.f32.mrb[44].mxu1  ;;  %v832_v7 = vadd.f32 %v1856_v37, %v1865_v50 }
 0x152   : > { %1192 = vst.msk [vmem:[%s1875_s8 + $0x6c] sm:$0xf] %vm1164_vm1, %v1406_v13  ;;  %v1404_v56 = vpack.c.bf16 %v1029_v47, %v1029_v47  ;;  %v998_v57 = vadd.f32 %v1575_v54, %v837_v48  ;;  %v1494_v58 = vpop.f32.mrb[45].mxu0  ;;  %v989_v60 = vpop.f32.mrb[45].mxu1 }
 0x153   : > { %v1399_v61 = vpack.c.bf16 %v1024_v51, %v1024_v51  ;;  %v1025_v63 = vmax.f32 %v961_v52, 0.0  ;;  %v1495_v59 = vadd.f32 %v1494_v58, %v1493_v53  ;;  %v990_v0 = vadd.f32 %v989_v60, %v829_v55  ;;  %v1496_v1 = vpop.f32.mrb[46].mxu0  ;;  %v1576_v2 = vpop.f32.mrb[46].mxu1 }
 0x154   : > { %1190 = vst.msk [vmem:[%s1875_s8 + $0x64] sm:$0xf] %vm1164_vm1, %v1404_v56  ;;  %v1034_v32 = vmax.f32 %v998_v57, 0.0  ;;  %v1001_v3 = vadd.f32 %v1576_v2, %v840_v44  ;;  %v1497_v6 = vpop.f32.mrb[47].mxu0  ;;  %v992_v9 = vpop.f32.mrb[47].mxu1 }
 0x155   : > { %1185 = vst.msk [vmem:[%s1875_s8 + $0x50] sm:$0xf] %vm1164_vm1, %v1399_v61  ;;  %v1400_v49 = vpack.c.bf16 %v1025_v63, %v1025_v63  ;;  %v805_v10 = vadd.f32 %v1495_v59, %v1865_v50  ;;  %v1032_v11 = vmax.f32 %v990_v0, 0.0  ;;  %v1498_v5 = vadd.f32 %v1497_v6, %v1496_v1 }
 0x156   : > { %v1409_v12 = vpack.c.bf16 %v1034_v32, %v1034_v32  ;;  %v1035_v14 = vmax.f32 %v1001_v3, 0.0  ;;  %v993_v15 = vadd.f32 %v992_v9, %v832_v7 }
 0x157   : > { %1186 = vst.msk [vmem:[%s1875_s8 + $0x54] sm:$0xf] %vm1164_vm1, %v1400_v49  ;;  %v966_v16 = vadd.f32 %v1923_v62, %v805_v10  ;;  %v1407_v37 = vpack.c.bf16 %v1032_v11, %v1032_v11  ;;  %v808_v17 = vadd.f32 %v1498_v5, %v1865_v50 }
 0x158   : > { %1195 = vst.msk [vmem:[%s1875_s8 + $0x78] sm:$0xf] %vm1164_vm1, %v1409_v12  ;;  %v1410_v18 = vpack.c.bf16 %v1035_v14, %v1035_v14  ;;  %v1033_v19 = vmax.f32 %v993_v15, 0.0 }
 0x159   : > { %v1026_v21 = vmax.f32 %v966_v16, 0.0  ;;  %1193 = vst.msk [vmem:[%s1875_s8 + $0x70] sm:$0xf] %vm1164_vm1, %v1407_v37  ;;  %v969_v22 = vadd.f32 %v1925_v4, %v808_v17 }
 0x15a   : > { %1196 = vst.msk [vmem:[%s1875_s8 + $0x7c] sm:$0xf] %vm1164_vm1, %v1410_v18  ;;  %v1408_v23 = vpack.c.bf16 %v1033_v19, %v1033_v19 }
 0x15b   : > { %v1401_v24 = vpack.c.bf16 %v1026_v21, %v1026_v21  ;;  %v1027_v26 = vmax.f32 %v969_v22, 0.0 }
 0x15c   : > { %1194 = vst.msk [vmem:[%s1875_s8 + $0x74] sm:$0xf] %vm1164_vm1, %v1408_v23 }
 0x15d   : > { %1187 = vst.msk [vmem:[%s1875_s8 + $0x58] sm:$0xf] %vm1164_vm1, %v1401_v24  ;;  %v1402_v62 = vpack.c.bf16 %v1027_v26, %v1027_v26 }
 0x15f   : > { %1188 = vst.msk [vmem:[%s1875_s8 + $0x5c] sm:$0xf] %vm1164_vm1, %v1402_v62 }
 0x160 PF: > { %s13_s12 = sadd.s32 1, %s1690_s12  }
 0x161   : > { %p10_p4 = scmp.ge.s32.totalorder %s13_s12, 4  }
 0x163   :  { %12 = sbr.rel (!%p10_p4) target bundleno = 1 (0x1), region = 62 }

// kernel: reconstruction_net_forward.8
= control target key start
LH: loop header
LB: loop body
LE: loop exit
PB: predicated region body
PF: predicated region fallthrough
CT: control target
= control target key end

     0   :  { %vm558_vm0 = vcmask 523264   ;;  %s1733_s1 = inlined_call_operand.vmem [shape: bf16[576,128], index: 1, kind: input, shape index: {}]   ;;  %s1734_s0 = inlined_call_operand.vmem [shape: bf16[128,576], index: 0, kind: input, shape index: {}]   ;;  %s1735_s2 = inlined_call_operand.vmem [shape: f32[1,128], index: 2, kind: input, shape index: {}]   ;;  %s1736_s3 = inlined_call_operand.vmem [shape: bf16[128,128], index: 3, kind: output, shape index: {}]  }
   0x1   :  { %v1310_v0 = vld [vmem:[%s1733_s1 + $0x40] sm:$0xff]   ;;  %v1314_v4 = vld [vmem:[%s1733_s1 + $0x48] sm:$0xff]   ;;  %v1318_v8 = vld [vmem:[%s1733_s1 + $0x50] sm:$0xff]  }
   0x2   :  { %v1311_v1 = vld [vmem:[%s1733_s1 + $0xc0] sm:$0xff]   ;;  %1138 = vmatprep.subr.bf16.mxu0 %v1310_v0  ;;  %v1315_v5 = vld [vmem:[%s1733_s1 + $0xc8] sm:$0xff]   ;;  %v1319_v9 = vld [vmem:[%s1733_s1 + $0xd0] sm:$0xff]  }
   0x3   :  { %v1312_v2 = vld [vmem:[%s1733_s1] sm:$0xff]   ;;  %1202 = vmatprep.subr.bf16.mxu1 %v1311_v1  ;;  %v1316_v6 = vld [vmem:[%s1733_s1 + $0x8] sm:$0xff]   ;;  %v1320_v10 = vld [vmem:[%s1733_s1 + $0x10] sm:$0xff]  }
   0x4   :  { %v1313_v3 = vld [vmem:[%s1733_s1 + $0x80] sm:$0xff]   ;;  %1139 = vmatpush3.bf16.msra.mxu0 %v1312_v2  ;;  %v1317_v7 = vld [vmem:[%s1733_s1 + $0x88] sm:$0xff]   ;;  %v1321_v11 = vld [vmem:[%s1733_s1 + $0x90] sm:$0xff]  }
   0x5   :  { %1203 = vmatpush3.bf16.msra.mxu1 %v1313_v3  ;;  %1140 = vmatprep.subr.bf16.mxu0 %v1314_v4  ;;  %v1322_v12 = vld [vmem:[%s1733_s1 + $0x58] sm:$0xff]   ;;  %v1326_v16 = vld [vmem:[%s1733_s1 + $0x60] sm:$0xff]   ;;  %v1330_v20 = vld [vmem:[%s1733_s1 + $0x68] sm:$0xff]  }
   0x6   :  { %1204 = vmatprep.subr.bf16.mxu1 %v1315_v5  ;;  %v1323_v13 = vld [vmem:[%s1733_s1 + $0xd8] sm:$0xff]   ;;  %v1327_v17 = vld [vmem:[%s1733_s1 + $0xe0] sm:$0xff]   ;;  %v1331_v21 = vld [vmem:[%s1733_s1 + $0xe8] sm:$0xff]  }
   0x7   :  { %v1324_v14 = vld [vmem:[%s1733_s1 + $0x18] sm:$0xff]   ;;  %v1328_v18 = vld [vmem:[%s1733_s1 + $0x20] sm:$0xff]   ;;  %v1332_v22 = vld [vmem:[%s1733_s1 + $0x28] sm:$0xff]  }
   0x8   :  { %1141 = vmatpush3.bf16.msra.mxu0 %v1316_v6  ;;  %v1325_v15 = vld [vmem:[%s1733_s1 + $0x98] sm:$0xff]   ;;  %v1329_v19 = vld [vmem:[%s1733_s1 + $0xa0] sm:$0xff]   ;;  %v1333_v23 = vld [vmem:[%s1733_s1 + $0xa8] sm:$0xff]  }
   0x9   :  { %1205 = vmatpush3.bf16.msra.mxu1 %v1317_v7  ;;  %1142 = vmatprep.subr.bf16.mxu0 %v1318_v8  ;;  %v1334_v24 = vld [vmem:[%s1733_s1 + $0x70] sm:$0xff]   ;;  %v1338_v28 = vld [vmem:[%s1733_s1 + $0x78] sm:$0xff]   ;;  %v1347_v35 = vld [vmem:[%s1734_s0 + $0xc] ss:$20 sps:$4 sm:$0xff]  }
   0xa   :  { %1206 = vmatprep.subr.bf16.mxu1 %v1319_v9  ;;  %v1335_v25 = vld [vmem:[%s1733_s1 + $0xf0] sm:$0xff]   ;;  %v1339_v29 = vld [vmem:[%s1733_s1 + $0xf8] sm:$0xff]   ;;  %v1348_v36 = vld [vmem:[%s1733_s1 + $0x100] sm:$0xff]   ;;  %712 = vmatprep.mubr.bf16.mxu1 %v1347_v35 }
   0xb   :  { %v1336_v26 = vld [vmem:[%s1733_s1 + $0x30] sm:$0xff]   ;;  %v1340_v30 = vld [vmem:[%s1733_s1 + $0x38] sm:$0xff]   ;;  %v1349_v37 = vld [vmem:[%s1734_s0 + $0x2c] ss:$20 sps:$4 sm:$0xff]  }
   0xc   :  { %1143 = vmatpush3.bf16.msra.mxu0 %v1320_v10  ;;  %v1337_v27 = vld [vmem:[%s1733_s1 + $0xb0] sm:$0xff]   ;;  %v1341_v31 = vld [vmem:[%s1733_s1 + $0xb8] sm:$0xff]   ;;  %v1361_v42 = vld [vmem:[%s1733_s1 + $0x108] sm:$0xff]  }
   0xd   :  { %1207 = vmatpush3.bf16.msra.mxu1 %v1321_v11  ;;  %1144 = vmatprep.subr.bf16.mxu0 %v1322_v12  ;;  %v1342_v32 = vld [vmem:[%s1734_s0] ss:$20 sps:$4 sm:$0xff]   ;;  %v1344_v33 = vld [vmem:[%s1734_s0 + $0x4] ss:$20 sps:$4 sm:$0xff]   ;;  %v1345_v34 = vld [vmem:[%s1734_s0 + $0x8] ss:$20 sps:$4 sm:$0xff]  }
   0xe   :  { %1208 = vmatprep.subr.bf16.mxu1 %v1323_v13  ;;  %615 = vmatprep.mubr.bf16.mxu0 %v1344_v33  ;;  %v1351_v38 = vld [vmem:[%s1734_s0 + $0x34] ss:$20 sps:$4 sm:$0xff]   ;;  %v1354_v40 = vld [vmem:[%s1734_s0 + $0x30] ss:$20 sps:$4 sm:$0xff]   ;;  %v1360_v45 = vld [vmem:[%s1734_s0 + $0x58] ss:$20 sps:$4 sm:$0xff]  }
   0xf   :  { %v1353_v39 = vld [vmem:[%s1734_s0 + $0x28] ss:$20 sps:$4 sm:$0xff]   ;;  %v1359_v44 = vld [vmem:[%s1734_s0 + $0x50] ss:$20 sps:$4 sm:$0xff]   ;;  %v1366_v50 = vld [vmem:[%s1734_s0 + $0x78] ss:$20 sps:$4 sm:$0xff]  }
  0x10   :  { %1145 = vmatpush3.bf16.msra.mxu0 %v1324_v14  ;;  %v1355_v41 = vld [vmem:[%s1734_s0 + $0x54] ss:$20 sps:$4 sm:$0xff]   ;;  %v1357_v43 = vld [vmem:[%s1734_s0 + $0x5c] ss:$20 sps:$4 sm:$0xff]   ;;  %v1364_v48 = vld [vmem:[%s1734_s0 + $0x84] ss:$20 sps:$4 sm:$0xff]  }
  0x11   :  { %1209 = vmatpush3.bf16.msra.mxu1 %v1325_v15  ;;  %1146 = vmatprep.subr.bf16.mxu0 %v1326_v16  ;;  %v1374_v46 = vld [vmem:[%s1733_s1 + $0x110] sm:$0xff]   ;;  %v1387_v49 = vld [vmem:[%s1733_s1 + $0x118] sm:$0xff]   ;;  %v1370_v53 = vld [vmem:[%s1734_s0 + $0xac] ss:$20 sps:$4 sm:$0xff]  }
  0x12   :  { %1210 = vmatprep.subr.bf16.mxu1 %v1327_v17  ;;  %v1362_v47 = vld [vmem:[%s1734_s0 + $0x7c] ss:$20 sps:$4 sm:$0xff]   ;;  %v1367_v51 = vld [vmem:[%s1734_s0 + $0x80] ss:$20 sps:$4 sm:$0xff]   ;;  %v1368_v52 = vld [vmem:[%s1734_s0 + $0xa4] ss:$20 sps:$4 sm:$0xff]  }
  0x13   :  { %v1372_v54 = vld [vmem:[%s1734_s0 + $0xa0] ss:$20 sps:$4 sm:$0xff]   ;;  %v1373_v55 = vld [vmem:[%s1734_s0 + $0xa8] ss:$20 sps:$4 sm:$0xff]   ;;  %v1380_v59 = vld [vmem:[%s1734_s0 + $0xd0] ss:$20 sps:$4 sm:$0xff]  }
  0x14   :  { %1147 = vmatpush3.bf16.msra.mxu0 %v1328_v18  ;;  %v1375_v56 = vld [vmem:[%s1734_s0 + $0xcc] ss:$20 sps:$4 sm:$0xff]   ;;  %v1377_v57 = vld [vmem:[%s1734_s0 + $0xd4] ss:$20 sps:$4 sm:$0xff]   ;;  %v1383_v61 = vld [vmem:[%s1734_s0 + $0xfc] ss:$20 sps:$4 sm:$0xff]  }
  0x15   :  { %1211 = vmatpush3.bf16.msra.mxu1 %v1329_v19  ;;  %1148 = vmatprep.subr.bf16.mxu0 %v1330_v20  ;;  %v1379_v58 = vld [vmem:[%s1734_s0 + $0xc8] ss:$20 sps:$4 sm:$0xff]   ;;  %v1385_v62 = vld [vmem:[%s1734_s0 + $0xf0] ss:$20 sps:$4 sm:$0xff]   ;;  %v1386_v63 = vld [vmem:[%s1734_s0 + $0xf8] ss:$20 sps:$4 sm:$0xff]  }
  0x16   :  { %1212 = vmatprep.subr.bf16.mxu1 %v1331_v21  ;;  %v1381_v60 = vld [vmem:[%s1734_s0 + $0xf4] ss:$20 sps:$4 sm:$0xff]   ;;  %v1388_v0 = vld [vmem:[%s1734_s0 + $0x11c] ss:$20 sps:$4 sm:$0xff]   ;;  %v1390_v1 = vld [vmem:[%s1734_s0 + $0x124] ss:$20 sps:$4 sm:$0xff]  }
  0x17   :  { %v1392_v2 = vld [vmem:[%s1734_s0 + $0x118] ss:$20 sps:$4 sm:$0xff]   ;;  %v1393_v3 = vld [vmem:[%s1734_s0 + $0x120] ss:$20 sps:$4 sm:$0xff]   ;;  %v1394_v4 = vld [vmem:[%s1734_s0 + $0x10] ss:$20 sps:$4 sm:$0xff]  }
  0x18   :  { %1149 = vmatpush3.bf16.msra.mxu0 %v1332_v22  ;;  %v1395_v5 = vld [vmem:[%s1734_s0 + $0xb0] ss:$20 sps:$4 sm:$0xff]   ;;  %v1396_v6 = vld [vmem:[%s1734_s0 + $0x38] ss:$20 sps:$4 sm:$0xff]   ;;  %v1398_v8 = vld [vmem:[%s1734_s0 + $0x60] ss:$20 sps:$4 sm:$0xff]  }
  0x19   :  { %1213 = vmatpush3.bf16.msra.mxu1 %v1333_v23  ;;  %1150 = vmatprep.subr.bf16.mxu0 %v1334_v24  ;;  %v1397_v7 = vld [vmem:[%s1734_s0 + $0xd8] ss:$20 sps:$4 sm:$0xff]   ;;  %v1399_v9 = vld [vmem:[%s1734_s0 + $0x100] ss:$20 sps:$4 sm:$0xff]   ;;  %v1400_v10 = vld [vmem:[%s1734_s0 + $0x88] ss:$20 sps:$4 sm:$0xff]  }
  0x1a   :  { %1214 = vmatprep.subr.bf16.mxu1 %v1335_v25  ;;  %v1401_v11 = vld [vmem:[%s1734_s0 + $0x128] ss:$20 sps:$4 sm:$0xff]   ;;  %v1661_v14 = vld [vmem:[%s1735_s2] ss:$0 sm:$0xff] }
  0x1c   :  { %1151 = vmatpush3.bf16.msra.mxu0 %v1336_v26 }
  0x1d   :  { %1215 = vmatpush3.bf16.msra.mxu1 %v1337_v27  ;;  %1152 = vmatprep.subr.bf16.mxu0 %v1338_v28 }
  0x1e   :  { %1216 = vmatprep.subr.bf16.mxu1 %v1339_v29 }
  0x20   :  { %1153 = vmatpush3.bf16.msra.mxu0 %v1340_v30 }
  0x21   :  { %1217 = vmatpush3.bf16.msra.mxu1 %v1341_v31  ;;  %1278 = vmatprep.subr.bf16.mxu0 %v1348_v36 }
  0x22   :  { %1302 = vmatprep.subr.bf16.mxu1 %v1348_v36 }
  0x23   :  { %616 = vmatmul.mubr.bf16.vlgmr.msra.gmra.mrb[0].mxu0 %v1342_v32 }
  0x24   :  { %713 = vmatmul.mubr.bf16.vlgmr.msra.gmra.mrb[0].mxu1 %v1345_v34  ;;  %1279 = vmatpush3.bf16.msra.mxu0 %v1348_v36 }
  0x25   :  { %1306 = vmatpush3.bf16.msra.mxu1 %v1348_v36  ;;  %623 = vmatprep.mubr.bf16.mxu0 %v1349_v37 }
  0x26   :  { %720 = vmatprep.mubr.bf16.mxu1 %v1351_v38  ;;  %1280 = vmatprep.subr.bf16.mxu0 %v1361_v42 }
  0x27   :  { %1303 = vmatprep.subr.bf16.mxu1 %v1361_v42 }
  0x28   :  { %1281 = vmatpush3.bf16.msra.mxu0 %v1361_v42 }
  0x29   :  { %1307 = vmatpush3.bf16.msra.mxu1 %v1361_v42  ;;  %1282 = vmatprep.subr.bf16.mxu0 %v1374_v46 }
  0x2a   :  { %1304 = vmatprep.subr.bf16.mxu1 %v1374_v46 }
  0x2b   :  { %624 = vmatmul.mubr.bf16.gmra.mrb[4].mxu0 %v1353_v39 }
  0x2c   :  { %721 = vmatmul.mubr.bf16.gmra.mrb[4].mxu1 %v1354_v40  ;;  %631 = vmatprep.mubr.bf16.mxu0 %v1355_v41 }
  0x2d   :  { %728 = vmatprep.mubr.bf16.mxu1 %v1357_v43  ;;  %1283 = vmatpush3.bf16.msra.mxu0 %v1374_v46 }
  0x2e   :  { %1308 = vmatpush3.bf16.msra.mxu1 %v1374_v46  ;;  %1284 = vmatprep.subr.bf16.mxu0 %v1387_v49 }
  0x2f   :  { %1305 = vmatprep.subr.bf16.mxu1 %v1387_v49 }
  0x31   :  { %1285 = vmatpush3.bf16.msra.mxu0 %v1387_v49 }
  0x32   :  { %1309 = vmatpush3.bf16.msra.mxu1 %v1387_v49 }
  0x33   :  { %632 = vmatmul.mubr.bf16.gmra.mrb[8].mxu0 %v1359_v44 }
  0x34   :  { %729 = vmatmul.mubr.bf16.gmra.mrb[8].mxu1 %v1360_v45  ;;  %639 = vmatprep.mubr.bf16.mxu0 %v1362_v47 }
  0x35   :  { %736 = vmatprep.mubr.bf16.mxu1 %v1364_v48 }
  0x3b   :  { %640 = vmatmul.mubr.bf16.gmra.mrb[12].mxu0 %v1366_v50 }
  0x3c   :  { %737 = vmatmul.mubr.bf16.gmra.mrb[12].mxu1 %v1367_v51  ;;  %647 = vmatprep.mubr.bf16.mxu0 %v1368_v52 }
  0x3d   :  { %744 = vmatprep.mubr.bf16.mxu1 %v1370_v53 }
  0x43   :  { %648 = vmatmul.mubr.bf16.gmra.mrb[16].mxu0 %v1372_v54 }
  0x44   :  { %745 = vmatmul.mubr.bf16.gmra.mrb[16].mxu1 %v1373_v55  ;;  %655 = vmatprep.mubr.bf16.mxu0 %v1375_v56 }
  0x45   :  { %752 = vmatprep.mubr.bf16.mxu1 %v1377_v57 }
  0x4b   :  { %656 = vmatmul.mubr.bf16.gmra.mrb[20].mxu0 %v1379_v58 }
  0x4c   :  { %753 = vmatmul.mubr.bf16.gmra.mrb[20].mxu1 %v1380_v59  ;;  %663 = vmatprep.mubr.bf16.mxu0 %v1381_v60 }
  0x4d   :  { %760 = vmatprep.mubr.bf16.mxu1 %v1383_v61 }
  0x53   :  { %664 = vmatmul.mubr.bf16.gmra.mrb[24].mxu0 %v1385_v62 }
  0x54   :  { %761 = vmatmul.mubr.bf16.gmra.mrb[24].mxu1 %v1386_v63  ;;  %671 = vmatprep.mubr.bf16.mxu0 %v1388_v0 }
  0x55   :  { %768 = vmatprep.mubr.bf16.mxu1 %v1390_v1 }
  0x5b   :  { %672 = vmatmul.mubr.bf16.gmra.mrb[28].mxu0 %v1392_v2 }
  0x5c   :  { %769 = vmatmul.mubr.bf16.gmra.mrb[28].mxu1 %v1393_v3  ;;  %1286 = vmatprep.mubr.msk.bf16.mxu0 %vm558_vm0, %v1394_v4 }
  0x5d   :  { %1294 = vmatprep.mubr.msk.bf16.mxu1 %vm558_vm0, %v1395_v5 }
  0x63   :  { %1287 = vmatmul.mubr.msk.bf16.vlgmr.msra.gmra.mrb[32].mxu0 %vm558_vm0, %v1396_v6 }
  0x64   :  { %1295 = vmatmul.mubr.msk.bf16.vlgmr.msra.gmra.mrb[32].mxu1 %vm558_vm0, %v1397_v7  ;;  %1290 = vmatprep.mubr.msk.bf16.mxu0 %vm558_vm0, %v1398_v8 }
  0x65   :  { %1298 = vmatprep.mubr.msk.bf16.mxu1 %vm558_vm0, %v1399_v9 }
  0x6b   :  { %1291 = vmatmul.mubr.msk.bf16.gmra.mrb[36].mxu0 %vm558_vm0, %v1400_v10 }
  0x6c   :  { %1299 = vmatmul.mubr.msk.bf16.gmra.mrb[36].mxu1 %vm558_vm0, %v1401_v11 }
  0xf6   :  { %v1154_v12 = vpop.f32.mrb[0].mxu0 }
  0xf7   :  { %v1218_v13 = vpop.f32.mrb[0].mxu1  ;;  %v1155_v15 = vpop.f32.mrb[1].mxu0 }
  0xf8   :  { %v1156_v16 = vadd.f32 %v1155_v15, %v1154_v12  ;;  %v1219_v17 = vpop.f32.mrb[1].mxu1  ;;  %v1157_v18 = vpop.f32.mrb[2].mxu0 }
  0xf9   :  { %v1220_v19 = vadd.f32 %v1219_v17, %v1218_v13  ;;  %v1221_v20 = vpop.f32.mrb[2].mxu1  ;;  %v1158_v21 = vpop.f32.mrb[3].mxu0 }
  0xfa   :  { %v618_v22 = vadd.f32 %v1156_v16, %v1661_v14  ;;  %v1159_v23 = vadd.f32 %v1158_v21, %v1157_v18  ;;  %v1222_v24 = vpop.f32.mrb[3].mxu1 }
  0xfb   :  { %v1223_v25 = vadd.f32 %v1222_v24, %v1221_v20 }
  0xfc   :  { %v621_v26 = vadd.f32 %v1159_v23, %v1661_v14  ;;  %v1665_v27 = vadd.f32 %v1220_v19, %v618_v22 }
  0xfe   :  { %v1160_v28 = vpop.f32.mrb[4].mxu0  ;;  %v1667_v29 = vadd.f32 %v1223_v25, %v621_v26 }
  0xff   :  { %v1224_v30 = vpop.f32.mrb[4].mxu1  ;;  %v1161_v31 = vpop.f32.mrb[5].mxu0 }
 0x100   :  { %v1162_v32 = vadd.f32 %v1161_v31, %v1160_v28  ;;  %v1225_v33 = vpop.f32.mrb[5].mxu1  ;;  %v1163_v34 = vpop.f32.mrb[6].mxu0 }
 0x101   :  { %v1226_v35 = vadd.f32 %v1225_v33, %v1224_v30  ;;  %v1227_v36 = vpop.f32.mrb[6].mxu1  ;;  %v1164_v37 = vpop.f32.mrb[7].mxu0 }
 0x102   :  { %v626_v38 = vadd.f32 %v1162_v32, %v1661_v14  ;;  %v1165_v39 = vadd.f32 %v1164_v37, %v1163_v34  ;;  %v1228_v40 = vpop.f32.mrb[7].mxu1 }
 0x103   :  { %v1229_v41 = vadd.f32 %v1228_v40, %v1227_v36 }
 0x104   :  { %v629_v42 = vadd.f32 %v1165_v39, %v1661_v14  ;;  %v1671_v43 = vadd.f32 %v1226_v35, %v626_v38 }
 0x106   :  { %v1166_v44 = vpop.f32.mrb[8].mxu0  ;;  %v1673_v45 = vadd.f32 %v1229_v41, %v629_v42 }
 0x107   :  { %v1230_v46 = vpop.f32.mrb[8].mxu1  ;;  %v1167_v47 = vpop.f32.mrb[9].mxu0 }
 0x108   :  { %v1168_v48 = vadd.f32 %v1167_v47, %v1166_v44  ;;  %v1231_v49 = vpop.f32.mrb[9].mxu1  ;;  %v1169_v50 = vpop.f32.mrb[10].mxu0 }
 0x109   :  { %v1232_v51 = vadd.f32 %v1231_v49, %v1230_v46  ;;  %v1233_v52 = vpop.f32.mrb[10].mxu1  ;;  %v1170_v53 = vpop.f32.mrb[11].mxu0 }
 0x10a   :  { %v634_v54 = vadd.f32 %v1168_v48, %v1661_v14  ;;  %v1171_v55 = vadd.f32 %v1170_v53, %v1169_v50  ;;  %v1234_v56 = vpop.f32.mrb[11].mxu1 }
 0x10b   :  { %v1235_v57 = vadd.f32 %v1234_v56, %v1233_v52 }
 0x10c   :  { %v637_v58 = vadd.f32 %v1171_v55, %v1661_v14  ;;  %v1677_v59 = vadd.f32 %v1232_v51, %v634_v54 }
 0x10e   :  { %v1172_v60 = vpop.f32.mrb[12].mxu0  ;;  %v1679_v61 = vadd.f32 %v1235_v57, %v637_v58 }
 0x10f   :  { %v1236_v62 = vpop.f32.mrb[12].mxu1  ;;  %v1173_v63 = vpop.f32.mrb[13].mxu0 }
 0x110   :  { %v1174_v0 = vadd.f32 %v1173_v63, %v1172_v60  ;;  %v1237_v1 = vpop.f32.mrb[13].mxu1  ;;  %v1175_v2 = vpop.f32.mrb[14].mxu0 }
 0x111   :  { %v1238_v3 = vadd.f32 %v1237_v1, %v1236_v62  ;;  %v1239_v4 = vpop.f32.mrb[14].mxu1  ;;  %v1176_v5 = vpop.f32.mrb[15].mxu0 }
 0x112   :  { %v642_v6 = vadd.f32 %v1174_v0, %v1661_v14  ;;  %v1177_v7 = vadd.f32 %v1176_v5, %v1175_v2  ;;  %v1240_v8 = vpop.f32.mrb[15].mxu1 }
 0x113   :  { %v1241_v9 = vadd.f32 %v1240_v8, %v1239_v4 }
 0x114   :  { %v645_v10 = vadd.f32 %v1177_v7, %v1661_v14  ;;  %v1683_v11 = vadd.f32 %v1238_v3, %v642_v6 }
 0x116   :  { %v1178_v12 = vpop.f32.mrb[16].mxu0  ;;  %v1685_v13 = vadd.f32 %v1241_v9, %v645_v10 }
 0x117   :  { %v1242_v15 = vpop.f32.mrb[16].mxu1  ;;  %v1179_v16 = vpop.f32.mrb[17].mxu0 }
 0x118   :  { %v1180_v17 = vadd.f32 %v1179_v16, %v1178_v12  ;;  %v1243_v18 = vpop.f32.mrb[17].mxu1  ;;  %v1181_v19 = vpop.f32.mrb[18].mxu0 }
 0x119   :  { %v1244_v20 = vadd.f32 %v1243_v18, %v1242_v15  ;;  %v1245_v21 = vpop.f32.mrb[18].mxu1  ;;  %v1182_v22 = vpop.f32.mrb[19].mxu0 }
 0x11a   :  { %v650_v23 = vadd.f32 %v1180_v17, %v1661_v14  ;;  %v1183_v24 = vadd.f32 %v1182_v22, %v1181_v19  ;;  %v1246_v25 = vpop.f32.mrb[19].mxu1 }
 0x11b   :  { %v1247_v26 = vadd.f32 %v1246_v25, %v1245_v21 }
 0x11c   :  { %v653_v28 = vadd.f32 %v1183_v24, %v1661_v14  ;;  %v747_v30 = vadd.f32 %v1244_v20, %v650_v23 }
 0x11e   :  { %v1184_v31 = vpop.f32.mrb[20].mxu0  ;;  %v1689_v32 = vadd.f32 %v1247_v26, %v653_v28 }
 0x11f   :  { %v1248_v33 = vpop.f32.mrb[20].mxu1  ;;  %v1185_v34 = vpop.f32.mrb[21].mxu0 }
 0x120   :  { %v1186_v35 = vadd.f32 %v1185_v34, %v1184_v31  ;;  %v1249_v36 = vpop.f32.mrb[21].mxu1  ;;  %v1187_v37 = vpop.f32.mrb[22].mxu0 }
 0x121   :  { %v1250_v38 = vadd.f32 %v1249_v36, %v1248_v33  ;;  %v1251_v39 = vpop.f32.mrb[22].mxu1  ;;  %v1188_v40 = vpop.f32.mrb[23].mxu0 }
 0x122   :  { %v658_v41 = vadd.f32 %v1186_v35, %v1661_v14  ;;  %v1189_v42 = vadd.f32 %v1188_v40, %v1187_v37  ;;  %v1252_v44 = vpop.f32.mrb[23].mxu1 }
 0x123   :  { %v1253_v46 = vadd.f32 %v1252_v44, %v1251_v39 }
 0x124   :  { %v661_v47 = vadd.f32 %v1189_v42, %v1661_v14  ;;  %v755_v48 = vadd.f32 %v1250_v38, %v658_v41 }
 0x126   :  { %v1190_v49 = vpop.f32.mrb[24].mxu0  ;;  %v758_v50 = vadd.f32 %v1253_v46, %v661_v47 }
 0x127   :  { %v1254_v51 = vpop.f32.mrb[24].mxu1  ;;  %v1191_v52 = vpop.f32.mrb[25].mxu0 }
 0x128   :  { %v1192_v53 = vadd.f32 %v1191_v52, %v1190_v49  ;;  %v1255_v54 = vpop.f32.mrb[25].mxu1  ;;  %v1193_v55 = vpop.f32.mrb[26].mxu0 }
 0x129   :  { %v1256_v56 = vadd.f32 %v1255_v54, %v1254_v51  ;;  %v1257_v57 = vpop.f32.mrb[26].mxu1  ;;  %v1194_v58 = vpop.f32.mrb[27].mxu0 }
 0x12a   :  { %v666_v60 = vadd.f32 %v1192_v53, %v1661_v14  ;;  %v1195_v62 = vadd.f32 %v1194_v58, %v1193_v55  ;;  %v1258_v63 = vpop.f32.mrb[27].mxu1 }
 0x12b   :  { %v1259_v0 = vadd.f32 %v1258_v63, %v1257_v57 }
 0x12c   :  { %v669_v1 = vadd.f32 %v1195_v62, %v1661_v14  ;;  %v763_v2 = vadd.f32 %v1256_v56, %v666_v60 }
 0x12e   :  { %v1196_v3 = vpop.f32.mrb[28].mxu0  ;;  %v1695_v4 = vadd.f32 %v1259_v0, %v669_v1 }
 0x12f   :  { %v1260_v5 = vpop.f32.mrb[28].mxu1  ;;  %v1197_v6 = vpop.f32.mrb[29].mxu0 }
 0x130   :  { %v1198_v7 = vadd.f32 %v1197_v6, %v1196_v3  ;;  %v1261_v8 = vpop.f32.mrb[29].mxu1  ;;  %v1199_v9 = vpop.f32.mrb[30].mxu0 }
 0x131   :  { %v1262_v10 = vadd.f32 %v1261_v8, %v1260_v5  ;;  %v1263_v12 = vpop.f32.mrb[30].mxu1  ;;  %v1200_v15 = vpop.f32.mrb[31].mxu0 }
 0x132   :  { %v674_v16 = vadd.f32 %v1198_v7, %v1661_v14  ;;  %v1201_v17 = vadd.f32 %v1200_v15, %v1199_v9  ;;  %v1264_v18 = vpop.f32.mrb[31].mxu1 }
 0x133   :  { %v1265_v19 = vadd.f32 %v1264_v18, %v1263_v12 }
 0x134   :  { %v677_v20 = vadd.f32 %v1201_v17, %v1661_v14  ;;  %v771_v21 = vadd.f32 %v1262_v10, %v674_v16 }
 0x136   :  { %v1288_v22 = vpop.f32.mrb[32].mxu0  ;;  %v774_v23 = vadd.f32 %v1265_v19, %v677_v20 }
 0x137   :  { %v820_v24 = vadd.f32 %v1288_v22, %v1671_v43  ;;  %v1296_v25 = vpop.f32.mrb[32].mxu1  ;;  %v811_v26 = vpop.f32.mrb[33].mxu0 }
 0x138   :  { %v852_v28 = vadd.f32 %v1296_v25, %v755_v48  ;;  %v812_v31 = vadd.f32 %v811_v26, %v1665_v27  ;;  %v843_v33 = vpop.f32.mrb[33].mxu1  ;;  %v1289_v34 = vpop.f32.mrb[34].mxu0 }
 0x139   :  { %v844_v35 = vadd.f32 %v843_v33, %v747_v30  ;;  %v823_v36 = vadd.f32 %v1289_v34, %v1673_v45  ;;  %v1297_v37 = vpop.f32.mrb[34].mxu1  ;;  %v814_v38 = vpop.f32.mrb[35].mxu0  ;;  %v876_v41 = vmax.f32 %v820_v24, 0.0 }
 0x13a   :  { %v855_v39 = vadd.f32 %v1297_v37, %v758_v50  ;;  %v815_v14 = vadd.f32 %v814_v38, %v1667_v29  ;;  %v846_v40 = vpop.f32.mrb[35].mxu1  ;;  %v884_v44 = vmax.f32 %v852_v28, 0.0  ;;  %v874_v46 = vmax.f32 %v812_v31, 0.0 }
 0x13b   :  { %v877_v42 = vmax.f32 %v823_v36, 0.0  ;;  %v847_v43 = vadd.f32 %v846_v40, %v1689_v32  ;;  %v882_v27 = vmax.f32 %v844_v35, 0.0 }
 0x13c   :  { %v885_v47 = vmax.f32 %v855_v39, 0.0  ;;  %v875_v48 = vmax.f32 %v815_v14, 0.0 }
 0x13d   :  { %v1099_v49 = vpack.c.bf16 %v877_v42, %v876_v41  ;;  %v883_v51 = vmax.f32 %v847_v43, 0.0 }
 0x13e   :  { %v1119_v30 = vpack.c.bf16 %v885_v47, %v884_v44  ;;  %v1094_v52 = vpack.c.bf16 %v875_v48, %v874_v46  ;;  %v1292_v45 = vpop.f32.mrb[36].mxu0 }
 0x13f   :  { %1131 = vst [vmem:[%s1736_s3 + $0x8] sm:$0xff] %v1099_v49   ;;  %v1114_v29 = vpack.c.bf16 %v883_v51, %v882_v27  ;;  %v836_v50 = vadd.f32 %v1292_v45, %v1683_v11  ;;  %v1300_v53 = vpop.f32.mrb[36].mxu1  ;;  %v827_v54 = vpop.f32.mrb[37].mxu0 }
 0x140   :  { %1135 = vst [vmem:[%s1736_s3 + $0x28] sm:$0xff] %v1119_v30   ;;  %1095 = vst [vmem:[%s1736_s3] sm:$0xff] %v1094_v52   ;;  %v868_v32 = vadd.f32 %v1300_v53, %v771_v21  ;;  %v828_v55 = vadd.f32 %v827_v54, %v1677_v59  ;;  %v859_v56 = vpop.f32.mrb[37].mxu1  ;;  %v1293_v57 = vpop.f32.mrb[38].mxu0 }
 0x141   :  { %1134 = vst [vmem:[%s1736_s3 + $0x20] sm:$0xff] %v1114_v29   ;;  %v860_v11 = vadd.f32 %v859_v56, %v763_v2  ;;  %v839_v58 = vadd.f32 %v1293_v57, %v1685_v13  ;;  %v1301_v60 = vpop.f32.mrb[38].mxu1  ;;  %v830_v62 = vpop.f32.mrb[39].mxu0  ;;  %v880_v3 = vmax.f32 %v836_v50, 0.0 }
 0x142   :  { %v871_v63 = vadd.f32 %v1301_v60, %v774_v23  ;;  %v831_v0 = vadd.f32 %v830_v62, %v1679_v61  ;;  %v862_v1 = vpop.f32.mrb[39].mxu1  ;;  %v888_v59 = vmax.f32 %v868_v32, 0.0  ;;  %v878_v7 = vmax.f32 %v828_v55, 0.0 }
 0x143   :  { %v881_v5 = vmax.f32 %v839_v58, 0.0  ;;  %v863_v6 = vadd.f32 %v862_v1, %v1695_v4  ;;  %v886_v10 = vmax.f32 %v860_v11, 0.0 }
 0x144   :  { %v889_v8 = vmax.f32 %v871_v63, 0.0  ;;  %v879_v9 = vmax.f32 %v831_v0, 0.0 }
 0x145   :  { %v1109_v12 = vpack.c.bf16 %v881_v5, %v880_v3  ;;  %v887_v15 = vmax.f32 %v863_v6, 0.0 }
 0x146   :  { %v1129_v2 = vpack.c.bf16 %v889_v8, %v888_v59  ;;  %v1104_v16 = vpack.c.bf16 %v879_v9, %v878_v7 }
 0x147   :  { %1133 = vst [vmem:[%s1736_s3 + $0x18] sm:$0xff] %v1109_v12   ;;  %v1124_v13 = vpack.c.bf16 %v887_v15, %v886_v10 }
 0x148   :  { %1137 = vst [vmem:[%s1736_s3 + $0x38] sm:$0xff] %v1129_v2   ;;  %1132 = vst [vmem:[%s1736_s3 + $0x10] sm:$0xff] %v1104_v16  }
 0x149   :  { %1136 = vst [vmem:[%s1736_s3 + $0x30] sm:$0xff] %v1124_v13  }

// kernel: reconstruction_net_forward.9
= control target key start
LH: loop header
LB: loop body
LE: loop exit
PB: predicated region body
PF: predicated region fallthrough
CT: control target
= control target key end

     0   :  { %s2299_s1 = inlined_call_operand.vmem [shape: bf16[1152,256], index: 1, kind: input, shape index: {}]   ;;  %s2300_s0 = inlined_call_operand.vmem [shape: bf16[32,1152], index: 0, kind: input, shape index: {}]   ;;  %s2301_s2 = inlined_call_operand.vmem [shape: f32[1,256], index: 2, kind: input, shape index: {}]   ;;  %s2302_s3 = inlined_call_operand.vmem [shape: bf16[32,256], index: 3, kind: output, shape index: {}]  }
   0x1   :  { %v1535_v0 = vld [vmem:[%s2299_s1 + $0x4] ss:$8 sps:$4 sm:$0xff]   ;;  %v1539_v2 = vld [vmem:[%s2299_s1] ss:$8 sps:$4 sm:$0xff]   ;;  %v1541_v4 = vld [vmem:[%s2299_s1 + $0x14] ss:$8 sps:$4 sm:$0xff]  }
   0x2   :  { %v1537_v1 = vld [vmem:[%s2299_s1 + $0x204] ss:$8 sps:$4 sm:$0xff]   ;;  %1003 = vmatprep.subr.bf16.mxu1 %v1535_v0  ;;  %v1540_v3 = vld [vmem:[%s2299_s1 + $0x200] ss:$8 sps:$4 sm:$0xff]   ;;  %v1543_v5 = vld [vmem:[%s2299_s1 + $0x214] ss:$8 sps:$4 sm:$0xff]  }
   0x3   :  { %1109 = vmatprep.subr.bf16.mxu0 %v1537_v1  ;;  %1004 = vmatpush1.bf16.msra.mxu1 %v1539_v2  ;;  %v1545_v6 = vld [vmem:[%s2299_s1 + $0x10] ss:$8 sps:$4 sm:$0xff]   ;;  %v1547_v8 = vld [vmem:[%s2299_s1 + $0x24] ss:$8 sps:$4 sm:$0xff]   ;;  %v1551_v10 = vld [vmem:[%s2299_s1 + $0x20] ss:$8 sps:$4 sm:$0xff]  }
   0x4   :  { %1110 = vmatpush1.bf16.msra.mxu0 %v1540_v3  ;;  %1005 = vmatprep.subr.bf16.mxu1 %v1541_v4  ;;  %v1546_v7 = vld [vmem:[%s2299_s1 + $0x210] ss:$8 sps:$4 sm:$0xff]   ;;  %v1549_v9 = vld [vmem:[%s2299_s1 + $0x224] ss:$8 sps:$4 sm:$0xff]   ;;  %v1552_v11 = vld [vmem:[%s2299_s1 + $0x220] ss:$8 sps:$4 sm:$0xff]  }
   0x5   :  { %1111 = vmatprep.subr.bf16.mxu0 %v1543_v5  ;;  %v1553_v12 = vld [vmem:[%s2299_s1 + $0x34] ss:$8 sps:$4 sm:$0xff]   ;;  %v1557_v14 = vld [vmem:[%s2299_s1 + $0x30] ss:$8 sps:$4 sm:$0xff]   ;;  %v1559_v16 = vld [vmem:[%s2299_s1 + $0x44] ss:$8 sps:$4 sm:$0xff]  }
   0x6   :  { %v1555_v13 = vld [vmem:[%s2299_s1 + $0x234] ss:$8 sps:$4 sm:$0xff]   ;;  %v1558_v15 = vld [vmem:[%s2299_s1 + $0x230] ss:$8 sps:$4 sm:$0xff]   ;;  %v1561_v17 = vld [vmem:[%s2299_s1 + $0x244] ss:$8 sps:$4 sm:$0xff]  }
   0x7   :  { %1006 = vmatpush1.bf16.msra.mxu1 %v1545_v6  ;;  %v1563_v18 = vld [vmem:[%s2299_s1 + $0x40] ss:$8 sps:$4 sm:$0xff]   ;;  %v1565_v20 = vld [vmem:[%s2299_s1 + $0x54] ss:$8 sps:$4 sm:$0xff]   ;;  %v1569_v22 = vld [vmem:[%s2299_s1 + $0x50] ss:$8 sps:$4 sm:$0xff]  }
   0x8   :  { %1112 = vmatpush1.bf16.msra.mxu0 %v1546_v7  ;;  %1007 = vmatprep.subr.bf16.mxu1 %v1547_v8  ;;  %v1564_v19 = vld [vmem:[%s2299_s1 + $0x240] ss:$8 sps:$4 sm:$0xff]   ;;  %v1567_v21 = vld [vmem:[%s2299_s1 + $0x254] ss:$8 sps:$4 sm:$0xff]   ;;  %v1570_v23 = vld [vmem:[%s2299_s1 + $0x250] ss:$8 sps:$4 sm:$0xff]  }
   0x9   :  { %1113 = vmatprep.subr.bf16.mxu0 %v1549_v9  ;;  %v1571_v24 = vld [vmem:[%s2299_s1 + $0x64] ss:$8 sps:$4 sm:$0xff]   ;;  %v1575_v26 = vld [vmem:[%s2299_s1 + $0x60] ss:$8 sps:$4 sm:$0xff]   ;;  %v1577_v28 = vld [vmem:[%s2299_s1 + $0x74] ss:$8 sps:$4 sm:$0xff]  }
   0xa   :  { %v1573_v25 = vld [vmem:[%s2299_s1 + $0x264] ss:$8 sps:$4 sm:$0xff]   ;;  %v1576_v27 = vld [vmem:[%s2299_s1 + $0x260] ss:$8 sps:$4 sm:$0xff]   ;;  %v1579_v29 = vld [vmem:[%s2299_s1 + $0x274] ss:$8 sps:$4 sm:$0xff]  }
   0xb   :  { %1008 = vmatpush1.bf16.msra.mxu1 %v1551_v10  ;;  %v1581_v30 = vld [vmem:[%s2299_s1 + $0x70] ss:$8 sps:$4 sm:$0xff]   ;;  %v1583_v32 = vld [vmem:[%s2299_s1 + $0x84] ss:$8 sps:$4 sm:$0xff]   ;;  %v1587_v34 = vld [vmem:[%s2299_s1 + $0x80] ss:$8 sps:$4 sm:$0xff]  }
   0xc   :  { %1114 = vmatpush1.bf16.msra.mxu0 %v1552_v11  ;;  %1009 = vmatprep.subr.bf16.mxu1 %v1553_v12  ;;  %v1582_v31 = vld [vmem:[%s2299_s1 + $0x270] ss:$8 sps:$4 sm:$0xff]   ;;  %v1585_v33 = vld [vmem:[%s2299_s1 + $0x284] ss:$8 sps:$4 sm:$0xff]   ;;  %v1588_v35 = vld [vmem:[%s2299_s1 + $0x280] ss:$8 sps:$4 sm:$0xff]  }
   0xd   :  { %1115 = vmatprep.subr.bf16.mxu0 %v1555_v13  ;;  %v1589_v36 = vld [vmem:[%s2299_s1 + $0x94] ss:$8 sps:$4 sm:$0xff]   ;;  %v1593_v38 = vld [vmem:[%s2299_s1 + $0x90] ss:$8 sps:$4 sm:$0xff]   ;;  %v1595_v40 = vld [vmem:[%s2299_s1 + $0xa4] ss:$8 sps:$4 sm:$0xff]  }
   0xe   :  { %v1591_v37 = vld [vmem:[%s2299_s1 + $0x294] ss:$8 sps:$4 sm:$0xff]   ;;  %v1594_v39 = vld [vmem:[%s2299_s1 + $0x290] ss:$8 sps:$4 sm:$0xff]   ;;  %v1597_v41 = vld [vmem:[%s2299_s1 + $0x2a4] ss:$8 sps:$4 sm:$0xff]  }
   0xf   :  { %1010 = vmatpush1.bf16.msra.mxu1 %v1557_v14  ;;  %v1599_v42 = vld [vmem:[%s2299_s1 + $0xa0] ss:$8 sps:$4 sm:$0xff]   ;;  %v1601_v44 = vld [vmem:[%s2299_s1 + $0xb4] ss:$8 sps:$4 sm:$0xff]   ;;  %v1605_v46 = vld [vmem:[%s2299_s1 + $0xb0] ss:$8 sps:$4 sm:$0xff]  }
  0x10   :  { %1116 = vmatpush1.bf16.msra.mxu0 %v1558_v15  ;;  %1011 = vmatprep.subr.bf16.mxu1 %v1559_v16  ;;  %v1600_v43 = vld [vmem:[%s2299_s1 + $0x2a0] ss:$8 sps:$4 sm:$0xff]   ;;  %v1603_v45 = vld [vmem:[%s2299_s1 + $0x2b4] ss:$8 sps:$4 sm:$0xff]   ;;  %v1606_v47 = vld [vmem:[%s2299_s1 + $0x2b0] ss:$8 sps:$4 sm:$0xff]  }
  0x11   :  { %1117 = vmatprep.subr.bf16.mxu0 %v1561_v17  ;;  %v1633_v48 = vld [vmem:[%s2300_s0 + $0x4] ss:$36 sps:$4 sm:$0xff]   ;;  %v1639_v51 = vld [vmem:[%s2300_s0 + $0x14] ss:$36 sps:$4 sm:$0xff]  }
  0x12   :  { %v1607_v49 = vld [vmem:[%s2299_s1 + $0xc4] ss:$8 sps:$4 sm:$0xff]   ;;  %1035 = vmatprep.mubr.bf16.mxu1 %v1633_v48  ;;  %v1611_v52 = vld [vmem:[%s2299_s1 + $0xc0] ss:$8 sps:$4 sm:$0xff]   ;;  %v1613_v54 = vld [vmem:[%s2299_s1 + $0xd4] ss:$8 sps:$4 sm:$0xff]   ;;  %1141 = vmatprep.mubr.bf16.mxu0 %v1639_v51 }
  0x13   :  { %1012 = vmatpush1.bf16.msra.mxu1 %v1563_v18  ;;  %v1609_v50 = vld [vmem:[%s2299_s1 + $0x2c4] ss:$8 sps:$4 sm:$0xff]   ;;  %v1612_v53 = vld [vmem:[%s2299_s1 + $0x2c0] ss:$8 sps:$4 sm:$0xff]   ;;  %v1615_v55 = vld [vmem:[%s2299_s1 + $0x2d4] ss:$8 sps:$4 sm:$0xff]  }
  0x14   :  { %1118 = vmatpush1.bf16.msra.mxu0 %v1564_v19  ;;  %1013 = vmatprep.subr.bf16.mxu1 %v1565_v20  ;;  %v1617_v56 = vld [vmem:[%s2299_s1 + $0xd0] ss:$8 sps:$4 sm:$0xff]   ;;  %v1619_v58 = vld [vmem:[%s2299_s1 + $0xe4] ss:$8 sps:$4 sm:$0xff]   ;;  %v1623_v60 = vld [vmem:[%s2299_s1 + $0xe0] ss:$8 sps:$4 sm:$0xff]  }
  0x15   :  { %1119 = vmatprep.subr.bf16.mxu0 %v1567_v21  ;;  %v1618_v57 = vld [vmem:[%s2299_s1 + $0x2d0] ss:$8 sps:$4 sm:$0xff]   ;;  %v1621_v59 = vld [vmem:[%s2299_s1 + $0x2e4] ss:$8 sps:$4 sm:$0xff]   ;;  %v1624_v61 = vld [vmem:[%s2299_s1 + $0x2e0] ss:$8 sps:$4 sm:$0xff]  }
  0x16   :  { %v1625_v62 = vld [vmem:[%s2299_s1 + $0xf4] ss:$8 sps:$4 sm:$0xff]   ;;  %v1629_v0 = vld [vmem:[%s2299_s1 + $0xf0] ss:$8 sps:$4 sm:$0xff]   ;;  %v1636_v2 = vld [vmem:[%s2299_s1 + $0x104] ss:$8 sps:$4 sm:$0xff]  }
  0x17   :  { %1014 = vmatpush1.bf16.msra.mxu1 %v1569_v22  ;;  %v1627_v63 = vld [vmem:[%s2299_s1 + $0x2f4] ss:$8 sps:$4 sm:$0xff]   ;;  %v1630_v1 = vld [vmem:[%s2299_s1 + $0x2f0] ss:$8 sps:$4 sm:$0xff]   ;;  %v1642_v3 = vld [vmem:[%s2299_s1 + $0x304] ss:$8 sps:$4 sm:$0xff]  }
  0x18   :  { %1120 = vmatpush1.bf16.msra.mxu0 %v1570_v23  ;;  %1015 = vmatprep.subr.bf16.mxu1 %v1571_v24  ;;  %v1631_v4 = vld [vmem:[%s2300_s0] ss:$36 sps:$4 sm:$0xff]   ;;  %v1637_v6 = vld [vmem:[%s2300_s0 + $0x10] ss:$36 sps:$4 sm:$0xff]  }
  0x19   :  { %1121 = vmatprep.subr.bf16.mxu0 %v1573_v25  ;;  %v1634_v5 = vld [vmem:[%s2299_s1 + $0x100] ss:$8 sps:$4 sm:$0xff]   ;;  %v1645_v8 = vld [vmem:[%s2299_s1 + $0x114] ss:$8 sps:$4 sm:$0xff]   ;;  %v1643_v10 = vld [vmem:[%s2299_s1 + $0x110] ss:$8 sps:$4 sm:$0xff]  }
  0x1a   :  { %v1640_v7 = vld [vmem:[%s2299_s1 + $0x300] ss:$8 sps:$4 sm:$0xff]   ;;  %v1648_v9 = vld [vmem:[%s2299_s1 + $0x314] ss:$8 sps:$4 sm:$0xff]   ;;  %v1646_v11 = vld [vmem:[%s2299_s1 + $0x310] ss:$8 sps:$4 sm:$0xff]  }
  0x1b   :  { %1016 = vmatpush1.bf16.msra.mxu1 %v1575_v26  ;;  %v1651_v12 = vld [vmem:[%s2299_s1 + $0x124] ss:$8 sps:$4 sm:$0xff]   ;;  %v1649_v14 = vld [vmem:[%s2299_s1 + $0x120] ss:$8 sps:$4 sm:$0xff]   ;;  %v1657_v16 = vld [vmem:[%s2299_s1 + $0x134] ss:$8 sps:$4 sm:$0xff]  }
  0x1c   :  { %1122 = vmatpush1.bf16.msra.mxu0 %v1576_v27  ;;  %1017 = vmatprep.subr.bf16.mxu1 %v1577_v28  ;;  %v1654_v13 = vld [vmem:[%s2299_s1 + $0x324] ss:$8 sps:$4 sm:$0xff]   ;;  %v1652_v15 = vld [vmem:[%s2299_s1 + $0x320] ss:$8 sps:$4 sm:$0xff]   ;;  %v1660_v17 = vld [vmem:[%s2299_s1 + $0x334] ss:$8 sps:$4 sm:$0xff]  }
  0x1d   :  { %1123 = vmatprep.subr.bf16.mxu0 %v1579_v29  ;;  %v1655_v18 = vld [vmem:[%s2299_s1 + $0x130] ss:$8 sps:$4 sm:$0xff]   ;;  %v1663_v20 = vld [vmem:[%s2299_s1 + $0x144] ss:$8 sps:$4 sm:$0xff]   ;;  %v1661_v22 = vld [vmem:[%s2299_s1 + $0x140] ss:$8 sps:$4 sm:$0xff]  }
  0x1e   :  { %v1658_v19 = vld [vmem:[%s2299_s1 + $0x330] ss:$8 sps:$4 sm:$0xff]   ;;  %v1666_v21 = vld [vmem:[%s2299_s1 + $0x344] ss:$8 sps:$4 sm:$0xff]   ;;  %v1664_v23 = vld [vmem:[%s2299_s1 + $0x340] ss:$8 sps:$4 sm:$0xff]  }
  0x1f   :  { %1018 = vmatpush1.bf16.msra.mxu1 %v1581_v30  ;;  %v1669_v24 = vld [vmem:[%s2299_s1 + $0x154] ss:$8 sps:$4 sm:$0xff]   ;;  %v1667_v26 = vld [vmem:[%s2299_s1 + $0x150] ss:$8 sps:$4 sm:$0xff]   ;;  %v1675_v28 = vld [vmem:[%s2299_s1 + $0x164] ss:$8 sps:$4 sm:$0xff]  }
  0x20   :  { %1124 = vmatpush1.bf16.msra.mxu0 %v1582_v31  ;;  %1019 = vmatprep.subr.bf16.mxu1 %v1583_v32  ;;  %v1672_v25 = vld [vmem:[%s2299_s1 + $0x354] ss:$8 sps:$4 sm:$0xff]   ;;  %v1670_v27 = vld [vmem:[%s2299_s1 + $0x350] ss:$8 sps:$4 sm:$0xff]   ;;  %v1725_v31 = vld [vmem:[%s2300_s0 + $0x48] ss:$36 sps:$4 sm:$0xff]  }
  0x21   :  { %1125 = vmatprep.subr.bf16.mxu0 %v1585_v33  ;;  %v1721_v29 = vld [vmem:[%s2300_s0 + $0x4c] ss:$36 sps:$4 sm:$0xff]   ;;  %v1723_v30 = vld [vmem:[%s2300_s0 + $0x5c] ss:$36 sps:$4 sm:$0xff]  }
  0x22   :  { %v1678_v32 = vld [vmem:[%s2299_s1 + $0x364] ss:$8 sps:$4 sm:$0xff]   ;;  %v1729_v33 = vld [vmem:[%s2300_s0 + $0x58] ss:$36 sps:$4 sm:$0xff]  }
  0x23   :  { %1020 = vmatpush1.bf16.msra.mxu1 %v1587_v34  ;;  %v1673_v34 = vld [vmem:[%s2299_s1 + $0x160] ss:$8 sps:$4 sm:$0xff]   ;;  %v1691_v48 = vld [vmem:[%s2299_s1 + $0x190] ss:$8 sps:$4 sm:$0xff]   ;;  %v1702_v51 = vld [vmem:[%s2299_s1 + $0x3a4] ss:$8 sps:$4 sm:$0xff]  }
  0x24   :  { %1126 = vmatpush1.bf16.msra.mxu0 %v1588_v35  ;;  %1021 = vmatprep.subr.bf16.mxu1 %v1589_v36  ;;  %v1676_v35 = vld [vmem:[%s2299_s1 + $0x360] ss:$8 sps:$4 sm:$0xff]   ;;  %v1681_v36 = vld [vmem:[%s2299_s1 + $0x174] ss:$8 sps:$4 sm:$0xff]  }
  0x25   :  { %1127 = vmatprep.subr.bf16.mxu0 %v1591_v37  ;;  %v1684_v37 = vld [vmem:[%s2299_s1 + $0x374] ss:$8 sps:$4 sm:$0xff]  }
  0x27   :  { %1022 = vmatpush1.bf16.msra.mxu1 %v1593_v38  ;;  %v1679_v38 = vld [vmem:[%s2299_s1 + $0x170] ss:$8 sps:$4 sm:$0xff]  }
  0x28   :  { %1128 = vmatpush1.bf16.msra.mxu0 %v1594_v39  ;;  %1023 = vmatprep.subr.bf16.mxu1 %v1595_v40  ;;  %v1682_v39 = vld [vmem:[%s2299_s1 + $0x370] ss:$8 sps:$4 sm:$0xff]   ;;  %v1687_v40 = vld [vmem:[%s2299_s1 + $0x184] ss:$8 sps:$4 sm:$0xff]  }
  0x29   :  { %1129 = vmatprep.subr.bf16.mxu0 %v1597_v41  ;;  %v1741_v41 = vld [vmem:[%s2300_s0 + $0xc] ss:$36 sps:$4 sm:$0xff]  }
  0x2b   :  { %1024 = vmatpush1.bf16.msra.mxu1 %v1599_v42  ;;  %v1690_v42 = vld [vmem:[%s2299_s1 + $0x384] ss:$8 sps:$4 sm:$0xff]  }
  0x2c   :  { %1130 = vmatpush1.bf16.msra.mxu0 %v1600_v43  ;;  %1025 = vmatprep.subr.bf16.mxu1 %v1601_v44  ;;  %v1744_v43 = vld [vmem:[%s2300_s0 + $0x1c] ss:$36 sps:$4 sm:$0xff]  }
  0x2d   :  { %1131 = vmatprep.subr.bf16.mxu0 %v1603_v45  ;;  %v1685_v44 = vld [vmem:[%s2299_s1 + $0x180] ss:$8 sps:$4 sm:$0xff]  }
  0x2e   :  { %v1688_v45 = vld [vmem:[%s2299_s1 + $0x380] ss:$8 sps:$4 sm:$0xff]  }
  0x2f   :  { %1026 = vmatpush1.bf16.msra.mxu1 %v1605_v46  ;;  %v1693_v46 = vld [vmem:[%s2299_s1 + $0x194] ss:$8 sps:$4 sm:$0xff]  }
  0x30   :  { %1132 = vmatpush1.bf16.msra.mxu0 %v1606_v47  ;;  %1027 = vmatprep.subr.bf16.mxu1 %v1607_v49  ;;  %v1696_v47 = vld [vmem:[%s2299_s1 + $0x394] ss:$8 sps:$4 sm:$0xff]   ;;  %v1694_v49 = vld [vmem:[%s2299_s1 + $0x390] ss:$8 sps:$4 sm:$0xff]  }
  0x31   :  { %1133 = vmatprep.subr.bf16.mxu0 %v1609_v50  ;;  %v1699_v50 = vld [vmem:[%s2299_s1 + $0x1a4] ss:$8 sps:$4 sm:$0xff]  }
  0x33   :  { %1028 = vmatpush1.bf16.msra.mxu1 %v1611_v52  ;;  %v1697_v52 = vld [vmem:[%s2299_s1 + $0x1a0] ss:$8 sps:$4 sm:$0xff]  }
  0x34   :  { %1134 = vmatpush1.bf16.msra.mxu0 %v1612_v53  ;;  %1029 = vmatprep.subr.bf16.mxu1 %v1613_v54  ;;  %v1700_v53 = vld [vmem:[%s2299_s1 + $0x3a0] ss:$8 sps:$4 sm:$0xff]   ;;  %v1705_v54 = vld [vmem:[%s2299_s1 + $0x1b4] ss:$8 sps:$4 sm:$0xff]  }
  0x35   :  { %1135 = vmatprep.subr.bf16.mxu0 %v1615_v55  ;;  %v1708_v55 = vld [vmem:[%s2299_s1 + $0x3b4] ss:$8 sps:$4 sm:$0xff]  }
  0x37   :  { %1030 = vmatpush1.bf16.msra.mxu1 %v1617_v56  ;;  %v1703_v56 = vld [vmem:[%s2299_s1 + $0x1b0] ss:$8 sps:$4 sm:$0xff]  }
  0x38   :  { %1136 = vmatpush1.bf16.msra.mxu0 %v1618_v57  ;;  %1031 = vmatprep.subr.bf16.mxu1 %v1619_v58  ;;  %v1706_v57 = vld [vmem:[%s2299_s1 + $0x3b0] ss:$8 sps:$4 sm:$0xff]   ;;  %v1711_v58 = vld [vmem:[%s2299_s1 + $0x1c4] ss:$8 sps:$4 sm:$0xff]  }
  0x39   :  { %1137 = vmatprep.subr.bf16.mxu0 %v1621_v59  ;;  %v1714_v59 = vld [vmem:[%s2299_s1 + $0x3c4] ss:$8 sps:$4 sm:$0xff]  }
  0x3b   :  { %1032 = vmatpush1.bf16.msra.mxu1 %v1623_v60  ;;  %v1709_v60 = vld [vmem:[%s2299_s1 + $0x1c0] ss:$8 sps:$4 sm:$0xff]  }
  0x3c   :  { %1138 = vmatpush1.bf16.msra.mxu0 %v1624_v61  ;;  %1033 = vmatprep.subr.bf16.mxu1 %v1625_v62  ;;  %v1712_v61 = vld [vmem:[%s2299_s1 + $0x3c0] ss:$8 sps:$4 sm:$0xff]   ;;  %v1717_v62 = vld [vmem:[%s2299_s1 + $0x1d4] ss:$8 sps:$4 sm:$0xff]  }
  0x3d   :  { %1139 = vmatprep.subr.bf16.mxu0 %v1627_v63  ;;  %v1720_v63 = vld [vmem:[%s2299_s1 + $0x3d4] ss:$8 sps:$4 sm:$0xff]  }
  0x3f   :  { %1034 = vmatpush1.bf16.msra.mxu1 %v1629_v0  ;;  %v1715_v0 = vld [vmem:[%s2299_s1 + $0x1d0] ss:$8 sps:$4 sm:$0xff]  }
  0x40   :  { %1140 = vmatpush1.bf16.msra.mxu0 %v1630_v1  ;;  %1056 = vmatprep.subr.bf16.mxu1 %v1636_v2  ;;  %v1718_v1 = vld [vmem:[%s2299_s1 + $0x3d0] ss:$8 sps:$4 sm:$0xff]   ;;  %v1728_v2 = vld [vmem:[%s2299_s1 + $0x1e4] ss:$8 sps:$4 sm:$0xff]  }
  0x41   :  { %1162 = vmatprep.subr.bf16.mxu0 %v1642_v3  ;;  %v1732_v3 = vld [vmem:[%s2299_s1 + $0x3e4] ss:$8 sps:$4 sm:$0xff]  }
  0x42   :  { %1036 = vmatmul.mubr.bf16.vlgmr.msra.gmra.mrb[0].mxu1 %v1631_v4  ;;  %v1726_v4 = vld [vmem:[%s2299_s1 + $0x1e0] ss:$8 sps:$4 sm:$0xff]  }
  0x43   :  { %1142 = vmatmul.mubr.bf16.vlgmr.msra.gmra.mrb[0].mxu0 %v1637_v6  ;;  %1057 = vmatpush1.bf16.msra.mxu1 %v1634_v5  ;;  %v1730_v5 = vld [vmem:[%s2299_s1 + $0x3e0] ss:$8 sps:$4 sm:$0xff]   ;;  %v1735_v6 = vld [vmem:[%s2299_s1 + $0x1f4] ss:$8 sps:$4 sm:$0xff]  }
  0x44   :  { %1163 = vmatpush1.bf16.msra.mxu0 %v1640_v7  ;;  %1058 = vmatprep.subr.bf16.mxu1 %v1645_v8  ;;  %v1738_v7 = vld [vmem:[%s2299_s1 + $0x3f4] ss:$8 sps:$4 sm:$0xff]   ;;  %v1733_v8 = vld [vmem:[%s2299_s1 + $0x1f0] ss:$8 sps:$4 sm:$0xff]  }
  0x45   :  { %1164 = vmatprep.subr.bf16.mxu0 %v1648_v9  ;;  %1045 = vmatprep.mubr.bf16.mxu1 %v1721_v29  ;;  %v1736_v9 = vld [vmem:[%s2299_s1 + $0x3f0] ss:$8 sps:$4 sm:$0xff]   ;;  %v1771_v29 = vld [vmem:[%s2299_s1 + $0x464] ss:$8 sps:$4 sm:$0xff]  }
  0x46   :  { %1151 = vmatprep.mubr.bf16.mxu0 %v1723_v30  ;;  %v1769_v30 = vld [vmem:[%s2299_s1 + $0x460] ss:$8 sps:$4 sm:$0xff]  }
  0x47   :  { %1059 = vmatpush1.bf16.msra.mxu1 %v1643_v10  ;;  %v1747_v10 = vld [vmem:[%s2299_s1 + $0x404] ss:$8 sps:$4 sm:$0xff]  }
  0x48   :  { %1165 = vmatpush1.bf16.msra.mxu0 %v1646_v11  ;;  %1060 = vmatprep.subr.bf16.mxu1 %v1651_v12  ;;  %v1739_v11 = vld [vmem:[%s2300_s0 + $0x8] ss:$36 sps:$4 sm:$0xff]   ;;  %v1742_v12 = vld [vmem:[%s2300_s0 + $0x18] ss:$36 sps:$4 sm:$0xff]  }
  0x49   :  { %1166 = vmatprep.subr.bf16.mxu0 %v1654_v13  ;;  %v1745_v13 = vld [vmem:[%s2299_s1 + $0x400] ss:$8 sps:$4 sm:$0xff]  }
  0x4a   :  { %1046 = vmatmul.mubr.bf16.gmra.mrb[4].mxu1 %v1725_v31  ;;  %v1774_v31 = vld [vmem:[%s2299_s1 + $0x474] ss:$8 sps:$4 sm:$0xff]  }
  0x4b   :  { %1061 = vmatpush1.bf16.msra.mxu1 %v1649_v14  ;;  %1152 = vmatmul.mubr.bf16.gmra.mrb[4].mxu0 %v1729_v33  ;;  %v1750_v14 = vld [vmem:[%s2299_s1 + $0x414] ss:$8 sps:$4 sm:$0xff]   ;;  %v1775_v33 = vld [vmem:[%s2300_s0 + $0x20] ss:$36 sps:$4 sm:$0xff]  }
  0x4c   :  { %1167 = vmatpush1.bf16.msra.mxu0 %v1652_v15  ;;  %1062 = vmatprep.subr.bf16.mxu1 %v1657_v16  ;;  %v1751_v15 = vld [vmem:[%s2300_s0 + $0x54] ss:$36 sps:$4 sm:$0xff]   ;;  %v1753_v16 = vld [vmem:[%s2300_s0 + $0x64] ss:$36 sps:$4 sm:$0xff]  }
  0x4d   :  { %1168 = vmatprep.subr.bf16.mxu0 %v1660_v17  ;;  %1088 = vmatprep.mubr.bf16.mxu1 %v1741_v41  ;;  %v1748_v17 = vld [vmem:[%s2299_s1 + $0x410] ss:$8 sps:$4 sm:$0xff]  }
  0x4e   :  { %1194 = vmatprep.mubr.bf16.mxu0 %v1744_v43 }
  0x4f   :  { %1063 = vmatpush1.bf16.msra.mxu1 %v1655_v18  ;;  %v1759_v18 = vld [vmem:[%s2299_s1 + $0x424] ss:$8 sps:$4 sm:$0xff]  }
  0x50   :  { %1169 = vmatpush1.bf16.msra.mxu0 %v1658_v19  ;;  %1064 = vmatprep.subr.bf16.mxu1 %v1663_v20  ;;  %v1755_v19 = vld [vmem:[%s2300_s0 + $0x50] ss:$36 sps:$4 sm:$0xff]   ;;  %v1756_v20 = vld [vmem:[%s2300_s0 + $0x60] ss:$36 sps:$4 sm:$0xff]  }
  0x51   :  { %1170 = vmatprep.subr.bf16.mxu0 %v1666_v21  ;;  %v1757_v21 = vld [vmem:[%s2299_s1 + $0x420] ss:$8 sps:$4 sm:$0xff]  }
  0x53   :  { %1065 = vmatpush1.bf16.msra.mxu1 %v1661_v22  ;;  %v1762_v22 = vld [vmem:[%s2299_s1 + $0x434] ss:$8 sps:$4 sm:$0xff]  }
  0x54   :  { %1171 = vmatpush1.bf16.msra.mxu0 %v1664_v23  ;;  %1066 = vmatprep.subr.bf16.mxu1 %v1669_v24  ;;  %v1760_v23 = vld [vmem:[%s2299_s1 + $0x430] ss:$8 sps:$4 sm:$0xff]   ;;  %v1765_v24 = vld [vmem:[%s2299_s1 + $0x444] ss:$8 sps:$4 sm:$0xff]  }
  0x55   :  { %1172 = vmatprep.subr.bf16.mxu0 %v1672_v25  ;;  %v1777_v25 = vmov 0  }
  0x57   :  { %1067 = vmatpush1.bf16.msra.mxu1 %v1667_v26  ;;  %v1763_v26 = vld [vmem:[%s2299_s1 + $0x440] ss:$8 sps:$4 sm:$0xff]  }
  0x58   :  { %1173 = vmatpush1.bf16.msra.mxu0 %v1670_v27  ;;  %1068 = vmatprep.subr.bf16.mxu1 %v1675_v28  ;;  %v1768_v27 = vld [vmem:[%s2299_s1 + $0x454] ss:$8 sps:$4 sm:$0xff]   ;;  %v1766_v28 = vld [vmem:[%s2299_s1 + $0x450] ss:$8 sps:$4 sm:$0xff]  }
  0x59   :  { %1174 = vmatprep.subr.bf16.mxu0 %v1678_v32  ;;  %v1772_v32 = vld [vmem:[%s2299_s1 + $0x470] ss:$8 sps:$4 sm:$0xff]  }
  0x5b   :  { %1069 = vmatpush1.bf16.msra.mxu1 %v1673_v34  ;;  %v1776_v34 = vld [vmem:[%s2300_s0 + $0x68] ss:$36 sps:$4 sm:$0xff]  }
  0x5c   :  { %1175 = vmatpush1.bf16.msra.mxu0 %v1676_v35  ;;  %1070 = vmatprep.subr.bf16.mxu1 %v1681_v36  ;;  %v181_v35 = vlaneseq }
  0x5d   :  { %1176 = vmatprep.subr.bf16.mxu0 %v1684_v37 }
  0x5e   :  { %v182_v36 = vshrl.u32 %v181_v35, 7 }
  0x5f   :  { %1071 = vmatpush1.bf16.msra.mxu1 %v1679_v38 }
  0x60   :  { %1177 = vmatpush1.bf16.msra.mxu0 %v1682_v39  ;;  %1072 = vmatprep.subr.bf16.mxu1 %v1687_v40  ;;  %v183_v40 = vsub.s32 0, %v182_v36  ;;  %v187_v43 = vsub.s32 1, %v182_v36 }
  0x61   :  { %1178 = vmatprep.subr.bf16.mxu0 %v1690_v42  ;;  %v179_v42 = vld [vmem:[%s2301_s2] sm:$0x3] }
  0x63   :  { %1073 = vmatpush1.bf16.msra.mxu1 %v1685_v44  ;;  %v184_v44 = vrot.slane %v179_v42, %v183_v40 }
  0x64   :  { %1179 = vmatpush1.bf16.msra.mxu0 %v1688_v45  ;;  %1074 = vmatprep.subr.bf16.mxu1 %v1693_v46  ;;  %v188_v45 = vrot.slane %v179_v42, %v187_v43 }
  0x65   :  { %1180 = vmatprep.subr.bf16.mxu0 %v1696_v47 }
  0x67   :  { %1075 = vmatpush1.bf16.msra.mxu1 %v1691_v48 }
  0x68   :  { %1181 = vmatpush1.bf16.msra.mxu0 %v1694_v49  ;;  %1076 = vmatprep.subr.bf16.mxu1 %v1699_v50 }
  0x69   :  { %1182 = vmatprep.subr.bf16.mxu0 %v1702_v51 }
  0x6b   :  { %1077 = vmatpush1.bf16.msra.mxu1 %v1697_v52 }
  0x6c   :  { %1183 = vmatpush1.bf16.msra.mxu0 %v1700_v53  ;;  %1078 = vmatprep.subr.bf16.mxu1 %v1705_v54 }
  0x6d   :  { %1184 = vmatprep.subr.bf16.mxu0 %v1708_v55 }
  0x6f   :  { %1079 = vmatpush1.bf16.msra.mxu1 %v1703_v56 }
  0x70   :  { %1185 = vmatpush1.bf16.msra.mxu0 %v1706_v57  ;;  %1080 = vmatprep.subr.bf16.mxu1 %v1711_v58 }
  0x71   :  { %1186 = vmatprep.subr.bf16.mxu0 %v1714_v59 }
  0x73   :  { %1081 = vmatpush1.bf16.msra.mxu1 %v1709_v60 }
  0x74   :  { %1187 = vmatpush1.bf16.msra.mxu0 %v1712_v61  ;;  %1082 = vmatprep.subr.bf16.mxu1 %v1717_v62 }
  0x75   :  { %1188 = vmatprep.subr.bf16.mxu0 %v1720_v63 }
  0x77   :  { %1083 = vmatpush1.bf16.msra.mxu1 %v1715_v0 }
  0x78   :  { %1189 = vmatpush1.bf16.msra.mxu0 %v1718_v1  ;;  %1084 = vmatprep.subr.bf16.mxu1 %v1728_v2 }
  0x79   :  { %1190 = vmatprep.subr.bf16.mxu0 %v1732_v3 }
  0x7b   :  { %1085 = vmatpush1.bf16.msra.mxu1 %v1726_v4 }
  0x7c   :  { %1191 = vmatpush1.bf16.msra.mxu0 %v1730_v5  ;;  %1086 = vmatprep.subr.bf16.mxu1 %v1735_v6 }
  0x7d   :  { %1192 = vmatprep.subr.bf16.mxu0 %v1738_v7 }
  0x7f   :  { %1087 = vmatpush1.bf16.msra.mxu1 %v1733_v8 }
  0x80   :  { %1193 = vmatpush1.bf16.msra.mxu0 %v1736_v9  ;;  %1478 = vmatprep.subr.bf16.mxu1 %v1747_v10 }
  0x81   :  { %1215 = vmatprep.subr.bf16.mxu0 %v1747_v10 }
  0x82   :  { %1089 = vmatmul.mubr.bf16.vlgmr.msra.gmra.mrb[0].mxu1 %v1739_v11 }
  0x83   :  { %1195 = vmatmul.mubr.bf16.vlgmr.msra.gmra.mrb[0].mxu0 %v1742_v12  ;;  %1486 = vmatpush1.bf16.msra.mxu1 %v1745_v13 }
  0x84   :  { %1216 = vmatpush1.bf16.msra.mxu0 %v1745_v13  ;;  %1479 = vmatprep.subr.bf16.mxu1 %v1750_v14 }
  0x85   :  { %1217 = vmatprep.subr.bf16.mxu0 %v1750_v14  ;;  %1098 = vmatprep.mubr.bf16.mxu1 %v1751_v15 }
  0x86   :  { %1204 = vmatprep.mubr.bf16.mxu0 %v1753_v16 }
  0x87   :  { %1487 = vmatpush1.bf16.msra.mxu1 %v1748_v17 }
  0x88   :  { %1218 = vmatpush1.bf16.msra.mxu0 %v1748_v17  ;;  %1480 = vmatprep.subr.bf16.mxu1 %v1759_v18 }
  0x89   :  { %1219 = vmatprep.subr.bf16.mxu0 %v1759_v18 }
  0x8a   :  { %1099 = vmatmul.mubr.bf16.gmra.mrb[4].mxu1 %v1755_v19 }
  0x8b   :  { %1205 = vmatmul.mubr.bf16.gmra.mrb[4].mxu0 %v1756_v20  ;;  %1488 = vmatpush1.bf16.msra.mxu1 %v1757_v21 }
  0x8c   :  { %1220 = vmatpush1.bf16.msra.mxu0 %v1757_v21  ;;  %1481 = vmatprep.subr.bf16.mxu1 %v1762_v22 }
  0x8d   :  { %1221 = vmatprep.subr.bf16.mxu0 %v1762_v22  ;;  %1247 = vmatprep.mubr.bf16.mxu0 %v1777_v25 }
  0x8e   :  { %1257 = vmatprep.mubr.bf16.mxu1 %v1777_v25 }
  0x8f   :  { %1489 = vmatpush1.bf16.msra.mxu1 %v1760_v23 }
  0x90   :  { %1222 = vmatpush1.bf16.msra.mxu0 %v1760_v23  ;;  %1482 = vmatprep.subr.bf16.mxu1 %v1765_v24 }
  0x91   :  { %1223 = vmatprep.subr.bf16.mxu0 %v1765_v24 }
  0x93   :  { %1490 = vmatpush1.bf16.msra.mxu1 %v1763_v26 }
  0x94   :  { %1224 = vmatpush1.bf16.msra.mxu0 %v1763_v26  ;;  %1483 = vmatprep.subr.bf16.mxu1 %v1768_v27 }
  0x95   :  { %1225 = vmatprep.subr.bf16.mxu0 %v1768_v27 }
  0x97   :  { %1491 = vmatpush1.bf16.msra.mxu1 %v1766_v28 }
  0x98   :  { %1226 = vmatpush1.bf16.msra.mxu0 %v1766_v28  ;;  %1484 = vmatprep.subr.bf16.mxu1 %v1771_v29 }
  0x99   :  { %1227 = vmatprep.subr.bf16.mxu0 %v1771_v29 }
  0x9b   :  { %1492 = vmatpush1.bf16.msra.mxu1 %v1769_v30 }
  0x9c   :  { %1228 = vmatpush1.bf16.msra.mxu0 %v1769_v30  ;;  %1485 = vmatprep.subr.bf16.mxu1 %v1774_v31 }
  0x9d   :  { %1229 = vmatprep.subr.bf16.mxu0 %v1774_v31 }
  0x9f   :  { %1493 = vmatpush1.bf16.msra.mxu1 %v1772_v32 }
  0xa0   :  { %1230 = vmatpush1.bf16.msra.mxu0 %v1772_v32 }
  0xa2   :  { %1258 = vmatmul.mubr.bf16.vlgmr.msra.gmra.mrb[8].mxu1 %v1776_v34 }
  0xa3   :  { %1248 = vmatmul.mubr.bf16.vlgmr.msra.gmra.mrb[0].mxu0 %v1775_v33 }
 0x155   :  { %v1090_v37 = vpop.f32.mrb[0].mxu1 }
 0x156   :  { %v1092_v38 = vpop.f32.mrb[1].mxu1  ;;  %v1494_v62 = vadd.f32 %v1090_v37, %v184_v44 }
 0x157   :  { %v1094_v39 = vpop.f32.mrb[2].mxu1  ;;  %v1496_v63 = vadd.f32 %v1092_v38, %v188_v45 }
 0x158   :  { %v1096_v41 = vpop.f32.mrb[3].mxu1  ;;  %v1498_v2 = vadd.f32 %v1094_v39, %v184_v44 }
 0x159   :  { %v1500_v7 = vadd.f32 %v1096_v41, %v188_v45 }
 0x15d   :  { %v1100_v46 = vpop.f32.mrb[4].mxu1 }
 0x15e   :  { %v1206_v47 = vpop.f32.mrb[4].mxu0  ;;  %v1502_v48 = vadd.f32 %v1100_v46, %v184_v44  ;;  %v1102_v49 = vpop.f32.mrb[5].mxu1 }
 0x15f   :  { %v1208_v50 = vpop.f32.mrb[5].mxu0  ;;  %v1505_v51 = vadd.f32 %v1102_v49, %v188_v45  ;;  %v1104_v52 = vpop.f32.mrb[6].mxu1 }
 0x160   :  { %v1210_v53 = vpop.f32.mrb[6].mxu0  ;;  %v1503_v54 = vadd.f32 %v1502_v48, %v1206_v47  ;;  %v1508_v55 = vadd.f32 %v1104_v52, %v184_v44  ;;  %v1106_v56 = vpop.f32.mrb[7].mxu1 }
 0x161   :  { %v1212_v57 = vpop.f32.mrb[7].mxu0  ;;  %v1506_v58 = vadd.f32 %v1505_v51, %v1208_v50  ;;  %v1511_v59 = vadd.f32 %v1106_v56, %v188_v45 }
 0x162   :  { %v1509_v60 = vadd.f32 %v1508_v55, %v1210_v53 }
 0x163   :  { %v1512_v61 = vadd.f32 %v1511_v59, %v1212_v57 }
 0x175   :  { %v1259_v1 = vpop.f32.mrb[8].mxu1 }
 0x176   :  { %v1249_v0 = vpop.f32.mrb[0].mxu0  ;;  %v1504_v4 = vadd.f32 %v1503_v54, %v1259_v1  ;;  %v1261_v6 = vpop.f32.mrb[9].mxu1 }
 0x177   :  { %v1495_v3 = vadd.f32 %v1494_v62, %v1249_v0  ;;  %v1251_v5 = vpop.f32.mrb[1].mxu0  ;;  %v1507_v9 = vadd.f32 %v1506_v58, %v1261_v6  ;;  %v1263_v11 = vpop.f32.mrb[10].mxu1 }
 0x178   :  { %v1497_v8 = vadd.f32 %v1496_v63, %v1251_v5  ;;  %v1253_v10 = vpop.f32.mrb[2].mxu0  ;;  %v1272_v13 = vmax.f32 %v1504_v4, 0.0  ;;  %v1510_v15 = vadd.f32 %v1509_v60, %v1263_v11  ;;  %v1265_v17 = vpop.f32.mrb[11].mxu1 }
 0x179   :  { %v1268_v12 = vmax.f32 %v1495_v3, 0.0  ;;  %v1499_v14 = vadd.f32 %v1498_v2, %v1253_v10  ;;  %v1255_v16 = vpop.f32.mrb[3].mxu0  ;;  %v1273_v19 = vmax.f32 %v1507_v9, 0.0  ;;  %v1513_v21 = vadd.f32 %v1512_v61, %v1265_v17 }
 0x17a   :  { %v1269_v18 = vmax.f32 %v1497_v8, 0.0  ;;  %v1501_v20 = vadd.f32 %v1500_v7, %v1255_v16  ;;  %v1274_v23 = vmax.f32 %v1510_v15, 0.0 }
 0x17b   :  { %v1270_v22 = vmax.f32 %v1499_v14, 0.0  ;;  %v1476_v25 = vpack.c.bf16 %v1273_v19, %v1272_v13  ;;  %v1275_v27 = vmax.f32 %v1513_v21, 0.0 }
 0x17c   :  { %v1474_v24 = vpack.c.bf16 %v1269_v18, %v1268_v12  ;;  %v1271_v26 = vmax.f32 %v1501_v20, 0.0 }
 0x17d   :  { %1302 = vst [vmem:[%s2302_s3 + $0x10] sm:$0xff] %v1476_v25  ;;  %v1477_v29 = vpack.c.bf16 %v1275_v27, %v1274_v23 }
 0x17e   :  { %1300 = vst [vmem:[%s2302_s3] sm:$0xff] %v1474_v24  ;;  %v1475_v28 = vpack.c.bf16 %v1271_v26, %v1270_v22 }
 0x17f   :  { %1303 = vst [vmem:[%s2302_s3 + $0x18] sm:$0xff] %v1477_v29 }
 0x180   :  { %1301 = vst [vmem:[%s2302_s3 + $0x8] sm:$0xff] %v1475_v28 }

// kernel: reconstruction_net_forward.11
= control target key start
LH: loop header
LB: loop body
LE: loop exit
PB: predicated region body
PF: predicated region fallthrough
CT: control target
= control target key end

     0   :  { %s30552_s0 = inlined_call_operand.vmem [shape: bf16[2,4096], index: 0, kind: input, shape index: {}]   ;;  %s30553_s1 = inlined_call_operand.vmem [shape: bf16[2,16384], index: 1, kind: input, shape index: {}]   ;;  %s30554_s2 = inlined_call_operand.vmem [shape: bf16[4096,128], index: 2, kind: input, shape index: {}]   ;;  %s30555_s3 = inlined_call_operand.vmem [shape: f32[1,128], index: 3, kind: input, shape index: {}]   ;;  %s30556_s4 = inlined_call_operand.vmem [shape: bf16[128,128], index: 4, kind: input, shape index: {}]   ;;  %s30557_s5 = inlined_call_operand.vmem [shape: f32[1,128], index: 5, kind: input, shape index: {}]   ;;  %s30558_s6 = inlined_call_operand.vmem [shape: bf16[128,3072], index: 6, kind: input, shape index: {}]   ;;  %s30559_s7 = inlined_call_operand.vmem [shape: f32[1,3072], index: 7, kind: input, shape index: {}]   ;;  %s30560_s8 = inlined_call_operand.vmem [shape: bf16[16384,128], index: 8, kind: input, shape index: {}]   ;;  %s30561_s9 = inlined_call_operand.vmem [shape: f32[1,128], index: 9, kind: input, shape index: {}]   ;;  %s30562_s10 = inlined_call_operand.vmem [shape: bf16[128,128], index: 10, kind: input, shape index: {}]   ;;  %s30563_s11 = inlined_call_operand.vmem [shape: f32[1,128], index: 11, kind: input, shape index: {}]   ;;  %s30564_s12 = inlined_call_operand.vmem [shape: bf16[128,128], index: 12, kind: input, shape index: {}]   ;;  %s30565_s13 = inlined_call_operand.vmem [shape: f32[1,128], index: 13, kind: input, shape index: {}]   ;;  %s30566_s14 = inlined_call_operand.vmem [shape: bf16[256,128], index: 14, kind: input, shape index: {}]   ;;  %s30567_s15 = inlined_call_operand.vmem [shape: f32[1,128], index: 15, kind: input, shape index: {}]   ;;  %s30568_s16 = inlined_call_operand.vmem [shape: bf16[128,3072], index: 16, kind: input, shape index: {}]   ;;  %s30569_s17 = inlined_call_operand.vmem [shape: f32[1,3072], index: 17, kind: input, shape index: {}]   ;;  %s30570_s18 = inlined_call_operand.hbm [shape: f32[2,3072], index: 18, kind: output, shape index: {0}]   ;;  %s30571_s19 = inlined_call_operand.hbm [shape: f32[2,3072], index: 19, kind: output, shape index: {1}]   ;;  %s30572_s20 = inlined_call_operand.hbm [shape: f32[2,128], index: 20, kind: output, shape index: {2}]   ;;  %s30573_s21 = inlined_call_operand.hbm [shape: f32[2,128], index: 21, kind: output, shape index: {3}]  }
   0x1   :  { %30578 = sst [smem:[#allocation12_spill]] %s30552_s0 }
   0x2   :  { %30579 = sst [smem:[#allocation13_spill]] %s30553_s1 }
   0x3   :  { %30580 = sst [smem:[#allocation14_spill]] %s30554_s2 }
   0x4   :  { %30581 = sst [smem:[#allocation15_spill]] %s30555_s3 }
   0x5   :  { %30582 = sst [smem:[#allocation16_spill]] %s30556_s4 }
   0x6   :  { %30583 = sst [smem:[#allocation17_spill]] %s30557_s5 }
   0x7   :  { %27 = vsyncpa [#allocation3], 0 }
   0x8   :  { %28 = vsyncpa [#allocation5], 0  ;;  %s30584_s26 = sld [smem:[#allocation14_spill]]  ;;  %v598_v28 = vlaneseq  ;;  %s30585_s22 = sld [smem:[#allocation12_spill]]  ;;  %v24457_v36 = vmov 1966171168  }
   0x9   :  { %v596_v37 = vunpack.c.l.s4 %v24457_v36  ;;  %s30586_s29 = sld [smem:[#allocation15_spill]]  ;;  %s30587_s4 = sld [smem:[#allocation16_spill]]  ;;  %vm24459_vm0 = vmmov 0  }
   0xa   :  { %v24672_v33 = vshrl.u32 %v598_v28, 7  ;;  %s30588_s0 = sld [smem:[#allocation17_spill]] }
   0xb   :  { %v597_v40 = vunpack.c.0.s8 %v596_v37 }
   0xd   :  { %v24684_v41 = vsub.s32 %v597_v40, %v24672_v33 }
   0xe   :  { %v22927_v0 = vld [vmem:[%s30584_s26 + $0x40] sm:$0xff]   ;;  %v22931_v4 = vld [vmem:[%s30584_s26 + $0x48] sm:$0xff]   ;;  %v22935_v8 = vld [vmem:[%s30584_s26 + $0x50] sm:$0xff]  }
   0xf   :  { %v22928_v1 = vld [vmem:[%s30584_s26 + $0xc0] sm:$0xff]   ;;  %21013 = vmatprep.subr.bf16.mxu0 %v22927_v0  ;;  %v22932_v5 = vld [vmem:[%s30584_s26 + $0xc8] sm:$0xff]   ;;  %v22936_v9 = vld [vmem:[%s30584_s26 + $0xd0] sm:$0xff]  }
  0x10   :  { %v22929_v2 = vld [vmem:[%s30584_s26] sm:$0xff]   ;;  %21035 = vmatprep.subr.bf16.mxu1 %v22928_v1  ;;  %v22933_v6 = vld [vmem:[%s30584_s26 + $0x8] sm:$0xff]   ;;  %v22937_v10 = vld [vmem:[%s30584_s26 + $0x10] sm:$0xff]  }
  0x11   :  { %v22930_v3 = vld [vmem:[%s30584_s26 + $0x80] sm:$0xff]   ;;  %21014 = vmatpush3.bf16.msra.mxu0 %v22929_v2  ;;  %v22934_v7 = vld [vmem:[%s30584_s26 + $0x88] sm:$0xff]   ;;  %v22938_v11 = vld [vmem:[%s30584_s26 + $0x90] sm:$0xff]  }
  0x12   :  { %21036 = vmatpush3.bf16.msra.mxu1 %v22930_v3  ;;  %21015 = vmatprep.subr.bf16.mxu0 %v22931_v4  ;;  %v22939_v12 = vld [vmem:[%s30584_s26 + $0x58] sm:$0xff]   ;;  %v22943_v16 = vld [vmem:[%s30584_s26 + $0x60] sm:$0xff]   ;;  %v22947_v20 = vld [vmem:[%s30584_s26 + $0x68] sm:$0xff]  }
  0x13   :  { %21037 = vmatprep.subr.bf16.mxu1 %v22932_v5  ;;  %v22940_v13 = vld [vmem:[%s30584_s26 + $0xd8] sm:$0xff]   ;;  %v22944_v17 = vld [vmem:[%s30584_s26 + $0xe0] sm:$0xff]   ;;  %v22948_v21 = vld [vmem:[%s30584_s26 + $0xe8] sm:$0xff]  }
  0x14   :  { %v22941_v14 = vld [vmem:[%s30584_s26 + $0x18] sm:$0xff]   ;;  %v22945_v18 = vld [vmem:[%s30584_s26 + $0x20] sm:$0xff]   ;;  %v22949_v22 = vld [vmem:[%s30584_s26 + $0x28] sm:$0xff]  }
  0x15   :  { %21016 = vmatpush3.bf16.msra.mxu0 %v22933_v6  ;;  %v22942_v15 = vld [vmem:[%s30584_s26 + $0x98] sm:$0xff]   ;;  %v22946_v19 = vld [vmem:[%s30584_s26 + $0xa0] sm:$0xff]   ;;  %v22950_v23 = vld [vmem:[%s30584_s26 + $0xa8] sm:$0xff]  }
  0x16   :  { %21038 = vmatpush3.bf16.msra.mxu1 %v22934_v7  ;;  %21017 = vmatprep.subr.bf16.mxu0 %v22935_v8  ;;  %v22951_v24 = vld [vmem:[%s30584_s26 + $0x70] sm:$0xff]   ;;  %v22955_v29 = vld [vmem:[%s30584_s26 + $0x78] sm:$0xff]   ;;  %v67_v34 = vld [vmem:[%s30585_s22] sm:$0xff] }
  0x17   :  { %21039 = vmatprep.subr.bf16.mxu1 %v22936_v9  ;;  %v22952_v25 = vld [vmem:[%s30584_s26 + $0xf0] sm:$0xff]   ;;  %v22956_v30 = vld [vmem:[%s30584_s26 + $0xf8] sm:$0xff]   ;;  %v22960_v35 = vld [vmem:[%s30584_s26 + $0x140] sm:$0xff]   ;;  %v594_v39 = vcombine.high %v67_v34, %v67_v34  ;;  %v601_v42 = vrot.slane %v67_v34, %v24684_v41 }
  0x18   :  { %v22953_v26 = vld [vmem:[%s30584_s26 + $0x30] sm:$0xff]   ;;  %v22957_v31 = vld [vmem:[%s30584_s26 + $0x38] sm:$0xff]   ;;  %v22961_v38 = vld [vmem:[%s30584_s26 + $0x1c0] sm:$0xff]  }
  0x19   :  { %21018 = vmatpush3.bf16.msra.mxu0 %v22937_v10  ;;  %v22954_v27 = vld [vmem:[%s30584_s26 + $0xb0] sm:$0xff]   ;;  %v22958_v32 = vld [vmem:[%s30584_s26 + $0xb8] sm:$0xff]   ;;  %v24688_v43 = vrot.slane %v594_v39, %v24684_v41  ;;  %v609_v44 = vcombine.high %v601_v42, %v601_v42  ;;  %v617_v45 = vrot.slane %v601_v42, %v24684_v41  ;;  %v22962_v47 = vld [vmem:[%s30584_s26 + $0x100] sm:$0xff]  }
  0x1a   :  { %21040 = vmatpush3.bf16.msra.mxu1 %v22938_v11  ;;  %21019 = vmatprep.subr.bf16.mxu0 %v22939_v12  ;;  %v22963_v49 = vld [vmem:[%s30584_s26 + $0x180] sm:$0xff]   ;;  %v22964_v52 = vld [vmem:[%s30584_s26 + $0x148] sm:$0xff]   ;;  %v22968_v58 = vld [vmem:[%s30584_s26 + $0x150] sm:$0xff]  }
  0x1b   :  { %21041 = vmatprep.subr.bf16.mxu1 %v22940_v13  ;;  %v610_v46 = vcombine.high %v24688_v43, %v24688_v43  ;;  %v631_v48 = vrot.slane %v609_v44, %v24684_v41  ;;  %v639_v51 = vcombine.high %v617_v45, %v617_v45  ;;  %v22965_v54 = vld [vmem:[%s30584_s26 + $0x1c8] sm:$0xff]   ;;  %v22969_v59 = vld [vmem:[%s30584_s26 + $0x1d0] sm:$0xff]   ;;  %v22972_v62 = vld [vmem:[%s30584_s26 + $0x158] sm:$0xff]  }
  0x1c   :  { %v22966_v55 = vld [vmem:[%s30584_s26 + $0x108] sm:$0xff]   ;;  %v22970_v60 = vld [vmem:[%s30584_s26 + $0x110] sm:$0xff]   ;;  %v22973_v63 = vld [vmem:[%s30584_s26 + $0x1d8] sm:$0xff]  }
  0x1d   :  { %21020 = vmatpush3.bf16.msra.mxu0 %v22941_v14  ;;  %v638_v50 = vrot.slane %v610_v46, %v24684_v41  ;;  %2390 = vmatprep.mubr.bf16.mxu0 %v631_v48  ;;  %v641_v53 = vcombine.high %v631_v48, %v631_v48  ;;  %v22967_v57 = vld [vmem:[%s30584_s26 + $0x188] sm:$0xff]   ;;  %v22971_v61 = vld [vmem:[%s30584_s26 + $0x190] sm:$0xff]   ;;  %v22974_v0 = vld [vmem:[%s30584_s26 + $0x118] sm:$0xff]  }
  0x1e   :  { %21042 = vmatpush3.bf16.msra.mxu1 %v22942_v15  ;;  %21021 = vmatprep.subr.bf16.mxu0 %v22943_v16  ;;  %v22975_v1 = vld [vmem:[%s30584_s26 + $0x198] sm:$0xff]   ;;  %v22976_v2 = vld [vmem:[%s30584_s26 + $0x160] sm:$0xff]   ;;  %v22980_v6 = vld [vmem:[%s30584_s26 + $0x168] sm:$0xff]  }
  0x1f   :  { %21043 = vmatprep.subr.bf16.mxu1 %v22944_v17  ;;  %v642_v56 = vcombine.high %v638_v50, %v638_v50  ;;  %2430 = vmatprep.mubr.bf16.mxu1 %v641_v53  ;;  %v22977_v3 = vld [vmem:[%s30584_s26 + $0x1e0] sm:$0xff]   ;;  %v22981_v7 = vld [vmem:[%s30584_s26 + $0x1e8] sm:$0xff]   ;;  %v22984_v10 = vld [vmem:[%s30584_s26 + $0x170] sm:$0xff]  }
  0x20   :  { %v22978_v4 = vld [vmem:[%s30584_s26 + $0x120] sm:$0xff]   ;;  %v22982_v8 = vld [vmem:[%s30584_s26 + $0x128] sm:$0xff]   ;;  %v22985_v11 = vld [vmem:[%s30584_s26 + $0x1f0] sm:$0xff]  }
  0x21   :  { %21022 = vmatpush3.bf16.msra.mxu0 %v22945_v18  ;;  %v22979_v5 = vld [vmem:[%s30584_s26 + $0x1a0] sm:$0xff]   ;;  %v22983_v9 = vld [vmem:[%s30584_s26 + $0x1a8] sm:$0xff]   ;;  %v22986_v12 = vld [vmem:[%s30584_s26 + $0x130] sm:$0xff]   ;;  %v624_v18 = vrot.slane %v24688_v43, %v24684_v41 }
  0x22   :  { %21044 = vmatpush3.bf16.msra.mxu1 %v22946_v19  ;;  %21023 = vmatprep.subr.bf16.mxu0 %v22947_v20  ;;  %v22987_v13 = vld [vmem:[%s30584_s26 + $0x1b0] sm:$0xff]   ;;  %v22988_v14 = vld [vmem:[%s30584_s26 + $0x178] sm:$0xff]   ;;  %v22992_v19 = vld [vmem:[%s30584_s26 + $0x240] sm:$0xff]  }
  0x23   :  { %21045 = vmatprep.subr.bf16.mxu1 %v22948_v21  ;;  %v22989_v15 = vld [vmem:[%s30584_s26 + $0x1f8] sm:$0xff]   ;;  %v22993_v20 = vld [vmem:[%s30584_s26 + $0x2c0] sm:$0xff]   ;;  %v23000_v28 = vld [vmem:[%s30584_s26 + $0x250] sm:$0xff]  }
  0x24   :  { %v22990_v16 = vld [vmem:[%s30584_s26 + $0x138] sm:$0xff]   ;;  %v22994_v21 = vld [vmem:[%s30584_s26 + $0x200] sm:$0xff]   ;;  %v23012_v42 = vld [vmem:[%s30584_s26 + $0x268] sm:$0xff]  }
  0x25   :  { %21024 = vmatpush3.bf16.msra.mxu0 %v22949_v22  ;;  %v22991_v17 = vld [vmem:[%s30584_s26 + $0x1b8] sm:$0xff]   ;;  %v22995_v22 = vld [vmem:[%s30584_s26 + $0x280] sm:$0xff]   ;;  %v23013_v43 = vld [vmem:[%s30584_s26 + $0x2e8] sm:$0xff]  }
  0x26   :  { %21046 = vmatpush3.bf16.msra.mxu1 %v22950_v23  ;;  %21025 = vmatprep.subr.bf16.mxu0 %v22951_v24  ;;  %v640_v23 = vcombine.high %v624_v18, %v624_v18  ;;  %v22996_v24 = vld [vmem:[%s30584_s26 + $0x248] sm:$0xff]   ;;  %v23005_v34 = vld [vmem:[%s30584_s26 + $0x2d8] sm:$0xff]   ;;  %v23008_v37 = vld [vmem:[%s30584_s26 + $0x260] sm:$0xff]  }
  0x27   :  { %21047 = vmatprep.subr.bf16.mxu1 %v22952_v25  ;;  %v22997_v25 = vld [vmem:[%s30584_s26 + $0x2c8] sm:$0xff]   ;;  %v23007_v36 = vld [vmem:[%s30584_s26 + $0x298] sm:$0xff]   ;;  %v23010_v39 = vld [vmem:[%s30584_s26 + $0x220] sm:$0xff]  }
  0x28   :  { %v23011_v40 = vld [vmem:[%s30584_s26 + $0x2a0] sm:$0xff]   ;;  %v23014_v44 = vld [vmem:[%s30584_s26 + $0x228] sm:$0xff]   ;;  %v23016_v46 = vld [vmem:[%s30584_s26 + $0x270] sm:$0xff]  }
  0x29   :  { %21026 = vmatpush3.bf16.msra.mxu0 %v22953_v26  ;;  %v22998_v26 = vld [vmem:[%s30584_s26 + $0x208] sm:$0xff]   ;;  %v23017_v48 = vld [vmem:[%s30584_s26 + $0x2f0] sm:$0xff]  }
  0x2a   :  { %21048 = vmatpush3.bf16.msra.mxu1 %v22954_v27  ;;  %21027 = vmatprep.subr.bf16.mxu0 %v22955_v29  ;;  %v22999_v27 = vld [vmem:[%s30584_s26 + $0x288] sm:$0xff]   ;;  %v23001_v29 = vld [vmem:[%s30584_s26 + $0x2d0] sm:$0xff]  }
  0x2b   :  { %21049 = vmatprep.subr.bf16.mxu1 %v22956_v30  ;;  %v23002_v30 = vld [vmem:[%s30584_s26 + $0x210] sm:$0xff]  }
  0x2d   :  { %21028 = vmatpush3.bf16.msra.mxu0 %v22957_v31  ;;  %v23003_v31 = vld [vmem:[%s30584_s26 + $0x290] sm:$0xff]  }
  0x2e   :  { %21050 = vmatpush3.bf16.msra.mxu1 %v22958_v32  ;;  %21057 = vmatprep.subr.bf16.mxu0 %v22960_v35  ;;  %v23004_v32 = vld [vmem:[%s30584_s26 + $0x258] sm:$0xff]  }
  0x2f   :  { %21079 = vmatprep.subr.bf16.mxu1 %v22961_v38  ;;  %v23006_v35 = vld [vmem:[%s30584_s26 + $0x218] sm:$0xff]   ;;  %v23009_v38 = vld [vmem:[%s30584_s26 + $0x2e0] sm:$0xff]  }
  0x30   :  { %2391 = vmatmul.mubr.bf16.vlgmr.msra.gmra.mrb[0].mxu0 %v617_v45  ;;  %v23015_v45 = vld [vmem:[%s30584_s26 + $0x2a8] sm:$0xff]  }
  0x31   :  { %21058 = vmatpush3.bf16.msra.mxu0 %v22962_v47  ;;  %2431 = vmatmul.mubr.bf16.vlgmr.msra.gmra.mrb[0].mxu1 %v639_v51  ;;  %v68_v47 = vld [vmem:[%s30585_s22 + $0x8] sm:$0xff]  ;;  %v23018_v51 = vld [vmem:[%s30584_s26 + $0x230] sm:$0xff]  }
  0x32   :  { %21059 = vmatprep.subr.bf16.mxu0 %v22964_v52  ;;  %21080 = vmatpush3.bf16.msra.mxu1 %v22963_v49  ;;  %v650_v49 = vrot.slane %v68_v47, %v24684_v41  ;;  %v23019_v52 = vld [vmem:[%s30584_s26 + $0x2b0] sm:$0xff]  }
  0x33   :  { %2470 = vmatprep.mubr.bf16.mxu0 %v638_v50  ;;  %21081 = vmatprep.subr.bf16.mxu1 %v22965_v54  ;;  %v643_v50 = vcombine.high %v68_v47, %v68_v47  ;;  %v23066_v47 = vld [vmem:[%s30584_s26 + $0x4d0] sm:$0xff]  }
  0x34   :  { %2510 = vmatprep.mubr.bf16.mxu1 %v642_v56  ;;  %v658_v53 = vcombine.high %v650_v49, %v650_v49  ;;  %v23021_v56 = vld [vmem:[%s30584_s26 + $0x2f8] sm:$0xff]  }
  0x35   :  { %21060 = vmatpush3.bf16.msra.mxu0 %v22966_v55  ;;  %v24876_v54 = vrot.slane %v643_v50, %v24684_v41  ;;  %v23020_v55 = vld [vmem:[%s30584_s26 + $0x278] sm:$0xff]  }
  0x36   :  { %21061 = vmatprep.subr.bf16.mxu0 %v22968_v58  ;;  %21082 = vmatpush3.bf16.msra.mxu1 %v22967_v57  ;;  %v680_v57 = vrot.slane %v658_v53, %v24684_v41  ;;  %v23069_v50 = vld [vmem:[%s30584_s26 + $0x458] sm:$0xff]  }
  0x37   :  { %21083 = vmatprep.subr.bf16.mxu1 %v22969_v59  ;;  %v659_v58 = vcombine.high %v24876_v54, %v24876_v54  ;;  %v23022_v59 = vld [vmem:[%s30584_s26 + $0x238] sm:$0xff]  }
  0x38   :  { %v23072_v53 = vld [vmem:[%s30584_s26 + $0x498] sm:$0xff]  }
  0x39   :  { %21062 = vmatpush3.bf16.msra.mxu0 %v22970_v60  ;;  %v23023_v60 = vld [vmem:[%s30584_s26 + $0x2b8] sm:$0xff]  }
  0x3a   :  { %21063 = vmatprep.subr.bf16.mxu0 %v22972_v62  ;;  %21084 = vmatpush3.bf16.msra.mxu1 %v22971_v61  ;;  %v690_v61 = vcombine.high %v680_v57, %v680_v57  ;;  %v666_v62 = vrot.slane %v650_v49, %v24684_v41  ;;  %v23068_v49 = vld [vmem:[%s30584_s26 + $0x490] sm:$0xff]  }
  0x3b   :  { %21085 = vmatprep.subr.bf16.mxu1 %v22973_v63  ;;  %v23024_v63 = vld [vmem:[%s30584_s26 + $0x340] sm:$0xff]  }
  0x3d   :  { %21064 = vmatpush3.bf16.msra.mxu0 %v22974_v0  ;;  %v23025_v0 = vld [vmem:[%s30584_s26 + $0x3c0] sm:$0xff]  }
  0x3e   :  { %21065 = vmatprep.subr.bf16.mxu0 %v22976_v2  ;;  %21086 = vmatpush3.bf16.msra.mxu1 %v22975_v1  ;;  %v687_v1 = vrot.slane %v659_v58, %v24684_v41  ;;  %v23026_v2 = vld [vmem:[%s30584_s26 + $0x300] sm:$0xff]   ;;  %v23077_v58 = vld [vmem:[%s30584_s26 + $0x468] sm:$0xff]  }
  0x3f   :  { %21087 = vmatprep.subr.bf16.mxu1 %v22977_v3  ;;  %v23027_v3 = vld [vmem:[%s30584_s26 + $0x380] sm:$0xff]  }
  0x41   :  { %21066 = vmatpush3.bf16.msra.mxu0 %v22978_v4  ;;  %v688_v4 = vcombine.high %v666_v62, %v666_v62 }
  0x42   :  { %21067 = vmatprep.subr.bf16.mxu0 %v22980_v6  ;;  %21088 = vmatpush3.bf16.msra.mxu1 %v22979_v5  ;;  %v23028_v5 = vld [vmem:[%s30584_s26 + $0x348] sm:$0xff]  }
  0x43   :  { %21089 = vmatprep.subr.bf16.mxu1 %v22981_v7  ;;  %v23029_v6 = vld [vmem:[%s30584_s26 + $0x3c8] sm:$0xff]   ;;  %v691_v7 = vcombine.high %v687_v1, %v687_v1 }
  0x45   :  { %21068 = vmatpush3.bf16.msra.mxu0 %v22982_v8  ;;  %v23030_v8 = vld [vmem:[%s30584_s26 + $0x308] sm:$0xff]  }
  0x46   :  { %21069 = vmatprep.subr.bf16.mxu0 %v22984_v10  ;;  %21090 = vmatpush3.bf16.msra.mxu1 %v22983_v9  ;;  %v23031_v9 = vld [vmem:[%s30584_s26 + $0x388] sm:$0xff]   ;;  %v23032_v10 = vld [vmem:[%s30584_s26 + $0x350] sm:$0xff]  }
  0x47   :  { %21091 = vmatprep.subr.bf16.mxu1 %v22985_v11  ;;  %v23033_v11 = vld [vmem:[%s30584_s26 + $0x3d0] sm:$0xff]  }
  0x49   :  { %21070 = vmatpush3.bf16.msra.mxu0 %v22986_v12  ;;  %v23034_v12 = vld [vmem:[%s30584_s26 + $0x310] sm:$0xff]  }
  0x4a   :  { %21071 = vmatprep.subr.bf16.mxu0 %v22988_v14  ;;  %21092 = vmatpush3.bf16.msra.mxu1 %v22987_v13  ;;  %v23035_v13 = vld [vmem:[%s30584_s26 + $0x390] sm:$0xff]   ;;  %v23036_v14 = vld [vmem:[%s30584_s26 + $0x358] sm:$0xff]  }
  0x4b   :  { %21093 = vmatprep.subr.bf16.mxu1 %v22989_v15  ;;  %v23037_v15 = vld [vmem:[%s30584_s26 + $0x3d8] sm:$0xff]  }
  0x4d   :  { %21072 = vmatpush3.bf16.msra.mxu0 %v22990_v16  ;;  %v23038_v16 = vld [vmem:[%s30584_s26 + $0x318] sm:$0xff]  }
  0x4e   :  { %21101 = vmatprep.subr.bf16.mxu0 %v22992_v19  ;;  %21094 = vmatpush3.bf16.msra.mxu1 %v22991_v17  ;;  %v23039_v17 = vld [vmem:[%s30584_s26 + $0x398] sm:$0xff]   ;;  %v23041_v19 = vld [vmem:[%s30584_s26 + $0x3e0] sm:$0xff]  }
  0x4f   :  { %21123 = vmatprep.subr.bf16.mxu1 %v22993_v20  ;;  %v23042_v20 = vld [vmem:[%s30584_s26 + $0x320] sm:$0xff]  }
  0x50   :  { %2471 = vmatmul.mubr.bf16.vlgmr.msra.gmra.mrb[4].mxu0 %v624_v18  ;;  %v23040_v18 = vld [vmem:[%s30584_s26 + $0x360] sm:$0xff]  }
  0x51   :  { %21102 = vmatpush3.bf16.msra.mxu0 %v22994_v21  ;;  %2511 = vmatmul.mubr.bf16.vlgmr.msra.gmra.mrb[4].mxu1 %v640_v23  ;;  %v23043_v21 = vld [vmem:[%s30584_s26 + $0x3a0] sm:$0xff]   ;;  %v23045_v23 = vld [vmem:[%s30584_s26 + $0x3e8] sm:$0xff]  }
  0x52   :  { %21103 = vmatprep.subr.bf16.mxu0 %v22996_v24  ;;  %21124 = vmatpush3.bf16.msra.mxu1 %v22995_v22  ;;  %v23044_v22 = vld [vmem:[%s30584_s26 + $0x368] sm:$0xff]  }
  0x53   :  { %21125 = vmatprep.subr.bf16.mxu1 %v22997_v25  ;;  %2550 = vmatprep.mubr.bf16.mxu0 %v680_v57  ;;  %v23046_v24 = vld [vmem:[%s30584_s26 + $0x328] sm:$0xff]   ;;  %v23076_v57 = vld [vmem:[%s30584_s26 + $0x4a0] sm:$0xff]  }
  0x54   :  { %2590 = vmatprep.mubr.bf16.mxu1 %v690_v61  ;;  %v23047_v25 = vld [vmem:[%s30584_s26 + $0x3a8] sm:$0xff]  }
  0x55   :  { %21104 = vmatpush3.bf16.msra.mxu0 %v22998_v26  ;;  %v23048_v26 = vld [vmem:[%s30584_s26 + $0x370] sm:$0xff]   ;;  %v23080_v61 = vld [vmem:[%s30584_s26 + $0x4a8] sm:$0xff]  }
  0x56   :  { %21105 = vmatprep.subr.bf16.mxu0 %v23000_v28  ;;  %21126 = vmatpush3.bf16.msra.mxu1 %v22999_v27  ;;  %v23049_v27 = vld [vmem:[%s30584_s26 + $0x3f0] sm:$0xff]  }
  0x57   :  { %21127 = vmatprep.subr.bf16.mxu1 %v23001_v29  ;;  %v23050_v28 = vld [vmem:[%s30584_s26 + $0x330] sm:$0xff]  }
  0x58   :  { %v23051_v29 = vld [vmem:[%s30584_s26 + $0x3b0] sm:$0xff]  }
  0x59   :  { %21106 = vmatpush3.bf16.msra.mxu0 %v23002_v30  ;;  %v23052_v30 = vld [vmem:[%s30584_s26 + $0x378] sm:$0xff]  }
  0x5a   :  { %21107 = vmatprep.subr.bf16.mxu0 %v23004_v32  ;;  %21128 = vmatpush3.bf16.msra.mxu1 %v23003_v31  ;;  %v23053_v31 = vld [vmem:[%s30584_s26 + $0x3f8] sm:$0xff]  }
  0x5b   :  { %21129 = vmatprep.subr.bf16.mxu1 %v23005_v34  ;;  %v23054_v32 = vld [vmem:[%s30584_s26 + $0x338] sm:$0xff]  }
  0x5c   :  { %v23055_v34 = vld [vmem:[%s30584_s26 + $0x3b8] sm:$0xff]  }
  0x5d   :  { %21108 = vmatpush3.bf16.msra.mxu0 %v23006_v35  ;;  %v673_v35 = vrot.slane %v24876_v54, %v24684_v41  ;;  %v23073_v54 = vld [vmem:[%s30584_s26 + $0x460] sm:$0xff]  }
  0x5e   :  { %21109 = vmatprep.subr.bf16.mxu0 %v23008_v37  ;;  %21130 = vmatpush3.bf16.msra.mxu1 %v23007_v36  ;;  %v23057_v36 = vld [vmem:[%s30584_s26 + $0x440] sm:$0xff]  }
  0x5f   :  { %21131 = vmatprep.subr.bf16.mxu1 %v23009_v38  ;;  %v23058_v37 = vld [vmem:[%s30584_s26 + $0x4c0] sm:$0xff]  }
  0x60   :  { %v23059_v38 = vld [vmem:[%s30584_s26 + $0x400] sm:$0xff]  }
  0x61   :  { %21110 = vmatpush3.bf16.msra.mxu0 %v23010_v39  ;;  %v23060_v39 = vld [vmem:[%s30584_s26 + $0x480] sm:$0xff]  }
  0x62   :  { %21111 = vmatprep.subr.bf16.mxu0 %v23012_v42  ;;  %21132 = vmatpush3.bf16.msra.mxu1 %v23011_v40  ;;  %v689_v40 = vcombine.high %v673_v35, %v673_v35  ;;  %v23061_v42 = vld [vmem:[%s30584_s26 + $0x448] sm:$0xff]  }
  0x63   :  { %21133 = vmatprep.subr.bf16.mxu1 %v23013_v43  ;;  %v23062_v43 = vld [vmem:[%s30584_s26 + $0x4c8] sm:$0xff]  }
  0x65   :  { %21112 = vmatpush3.bf16.msra.mxu0 %v23014_v44  ;;  %v23063_v44 = vld [vmem:[%s30584_s26 + $0x408] sm:$0xff]  }
  0x66   :  { %21113 = vmatprep.subr.bf16.mxu0 %v23016_v46  ;;  %21134 = vmatpush3.bf16.msra.mxu1 %v23015_v45  ;;  %v23064_v45 = vld [vmem:[%s30584_s26 + $0x488] sm:$0xff]   ;;  %v23065_v46 = vld [vmem:[%s30584_s26 + $0x450] sm:$0xff]  }
  0x67   :  { %21135 = vmatprep.subr.bf16.mxu1 %v23017_v48  ;;  %v23067_v48 = vld [vmem:[%s30584_s26 + $0x410] sm:$0xff]  }
  0x69   :  { %21114 = vmatpush3.bf16.msra.mxu0 %v23018_v51  ;;  %v23070_v51 = vld [vmem:[%s30584_s26 + $0x4d8] sm:$0xff]  }
  0x6a   :  { %21115 = vmatprep.subr.bf16.mxu0 %v23020_v55  ;;  %21136 = vmatpush3.bf16.msra.mxu1 %v23019_v52  ;;  %v23071_v52 = vld [vmem:[%s30584_s26 + $0x418] sm:$0xff]   ;;  %v23074_v55 = vld [vmem:[%s30584_s26 + $0x4e0] sm:$0xff]  }
  0x6b   :  { %21137 = vmatprep.subr.bf16.mxu1 %v23021_v56  ;;  %v23075_v56 = vld [vmem:[%s30584_s26 + $0x420] sm:$0xff]  }
  0x6d   :  { %21116 = vmatpush3.bf16.msra.mxu0 %v23022_v59  ;;  %v23078_v59 = vld [vmem:[%s30584_s26 + $0x4e8] sm:$0xff]  }
  0x6e   :  { %21145 = vmatprep.subr.bf16.mxu0 %v23024_v63  ;;  %21138 = vmatpush3.bf16.msra.mxu1 %v23023_v60  ;;  %v23079_v60 = vld [vmem:[%s30584_s26 + $0x428] sm:$0xff]   ;;  %v69_v63 = vld [vmem:[%s30585_s22 + $0x10] sm:$0xff] }
  0x6f   :  { %21167 = vmatprep.subr.bf16.mxu1 %v23025_v0  ;;  %v23082_v0 = vld [vmem:[%s30584_s26 + $0x4f0] sm:$0xff]  }
  0x70   :  { %2551 = vmatmul.mubr.bf16.vlgmr.msra.gmra.mrb[8].mxu0 %v666_v62  ;;  %v23081_v62 = vld [vmem:[%s30584_s26 + $0x470] sm:$0xff]  }
  0x71   :  { %21146 = vmatpush3.bf16.msra.mxu0 %v23026_v2  ;;  %2630 = vmatprep.mubr.bf16.mxu0 %v687_v1  ;;  %v699_v1 = vrot.slane %v69_v63, %v24684_v41  ;;  %v692_v2 = vcombine.high %v69_v63, %v69_v63  ;;  %v23131_v63 = vld [vmem:[%s30584_s26 + $0x6d0] sm:$0xff]  }
  0x72   :  { %2591 = vmatmul.mubr.bf16.vlgmr.msra.gmra.mrb[8].mxu1 %v688_v4  ;;  %21147 = vmatprep.subr.bf16.mxu0 %v23028_v5  ;;  %v23084_v4 = vld [vmem:[%s30584_s26 + $0x4b0] sm:$0xff]  }
  0x73   :  { %21168 = vmatpush3.bf16.msra.mxu1 %v23027_v3  ;;  %2670 = vmatprep.mubr.bf16.mxu1 %v691_v7  ;;  %v23083_v3 = vld [vmem:[%s30584_s26 + $0x430] sm:$0xff]   ;;  %v707_v5 = vcombine.high %v699_v1, %v699_v1  ;;  %v23085_v7 = vld [vmem:[%s30584_s26 + $0x478] sm:$0xff]  }
  0x74   :  { %21169 = vmatprep.subr.bf16.mxu1 %v23029_v6  ;;  %v25082_v6 = vrot.slane %v692_v2, %v24684_v41  ;;  %v23134_v2 = vld [vmem:[%s30584_s26 + $0x658] sm:$0xff]  }
  0x75   :  { %21148 = vmatpush3.bf16.msra.mxu0 %v23030_v8  ;;  %v23086_v8 = vld [vmem:[%s30584_s26 + $0x4f8] sm:$0xff]  }
  0x76   :  { %21149 = vmatprep.subr.bf16.mxu0 %v23032_v10  ;;  %v708_v10 = vcombine.high %v25082_v6, %v25082_v6 }
  0x77   :  { %21170 = vmatpush3.bf16.msra.mxu1 %v23031_v9  ;;  %v729_v9 = vrot.slane %v707_v5, %v24684_v41  ;;  %v23137_v5 = vld [vmem:[%s30584_s26 + $0x698] sm:$0xff]  }
  0x78   :  { %21171 = vmatprep.subr.bf16.mxu1 %v23033_v11  ;;  %v23087_v11 = vld [vmem:[%s30584_s26 + $0x438] sm:$0xff]  }
  0x79   :  { %21150 = vmatpush3.bf16.msra.mxu0 %v23034_v12  ;;  %v23088_v12 = vld [vmem:[%s30584_s26 + $0x4b8] sm:$0xff]  }
  0x7a   :  { %21151 = vmatprep.subr.bf16.mxu0 %v23036_v14  ;;  %v715_v14 = vrot.slane %v699_v1, %v24684_v41  ;;  %v23133_v1 = vld [vmem:[%s30584_s26 + $0x690] sm:$0xff]  }
  0x7b   :  { %21172 = vmatpush3.bf16.msra.mxu1 %v23035_v13  ;;  %v739_v13 = vcombine.high %v729_v9, %v729_v9 }
  0x7c   :  { %21173 = vmatprep.subr.bf16.mxu1 %v23037_v15  ;;  %v23089_v15 = vld [vmem:[%s30584_s26 + $0x540] sm:$0xff]  }
  0x7d   :  { %21152 = vmatpush3.bf16.msra.mxu0 %v23038_v16  ;;  %v23090_v16 = vld [vmem:[%s30584_s26 + $0x5c0] sm:$0xff]  }
  0x7e   :  { %21153 = vmatprep.subr.bf16.mxu0 %v23040_v18  ;;  %v23091_v18 = vld [vmem:[%s30584_s26 + $0x500] sm:$0xff]  }
  0x7f   :  { %21174 = vmatpush3.bf16.msra.mxu1 %v23039_v17  ;;  %v736_v17 = vrot.slane %v708_v10, %v24684_v41  ;;  %v23142_v10 = vld [vmem:[%s30584_s26 + $0x668] sm:$0xff]  }
  0x80   :  { %21175 = vmatprep.subr.bf16.mxu1 %v23041_v19  ;;  %v23092_v19 = vld [vmem:[%s30584_s26 + $0x580] sm:$0xff]  }
  0x81   :  { %21154 = vmatpush3.bf16.msra.mxu0 %v23042_v20  ;;  %v737_v20 = vcombine.high %v715_v14, %v715_v14 }
  0x82   :  { %21155 = vmatprep.subr.bf16.mxu0 %v23044_v22  ;;  %v23094_v22 = vld [vmem:[%s30584_s26 + $0x5c8] sm:$0xff]  }
  0x83   :  { %21176 = vmatpush3.bf16.msra.mxu1 %v23043_v21  ;;  %v23093_v21 = vld [vmem:[%s30584_s26 + $0x548] sm:$0xff]  }
  0x84   :  { %21177 = vmatprep.subr.bf16.mxu1 %v23045_v23  ;;  %v740_v23 = vcombine.high %v736_v17, %v736_v17 }
  0x85   :  { %21156 = vmatpush3.bf16.msra.mxu0 %v23046_v24  ;;  %v23095_v24 = vld [vmem:[%s30584_s26 + $0x508] sm:$0xff]  }
  0x86   :  { %21157 = vmatprep.subr.bf16.mxu0 %v23048_v26  ;;  %v23097_v26 = vld [vmem:[%s30584_s26 + $0x550] sm:$0xff]  }
  0x87   :  { %21178 = vmatpush3.bf16.msra.mxu1 %v23047_v25  ;;  %v23096_v25 = vld [vmem:[%s30584_s26 + $0x588] sm:$0xff]  }
  0x88   :  { %21179 = vmatprep.subr.bf16.mxu1 %v23049_v27  ;;  %v23098_v27 = vld [vmem:[%s30584_s26 + $0x5d0] sm:$0xff]  }
  0x89   :  { %21158 = vmatpush3.bf16.msra.mxu0 %v23050_v28  ;;  %v23099_v28 = vld [vmem:[%s30584_s26 + $0x510] sm:$0xff]  }
  0x8a   :  { %21159 = vmatprep.subr.bf16.mxu0 %v23052_v30  ;;  %v23101_v30 = vld [vmem:[%s30584_s26 + $0x558] sm:$0xff]  }
  0x8b   :  { %21180 = vmatpush3.bf16.msra.mxu1 %v23051_v29  ;;  %v23100_v29 = vld [vmem:[%s30584_s26 + $0x590] sm:$0xff]  }
  0x8c   :  { %21181 = vmatprep.subr.bf16.mxu1 %v23053_v31  ;;  %v23102_v31 = vld [vmem:[%s30584_s26 + $0x5d8] sm:$0xff]  }
  0x8d   :  { %21160 = vmatpush3.bf16.msra.mxu0 %v23054_v32  ;;  %v23103_v32 = vld [vmem:[%s30584_s26 + $0x518] sm:$0xff]  }
  0x8e   :  { %21189 = vmatprep.subr.bf16.mxu0 %v23057_v36  ;;  %v23106_v36 = vld [vmem:[%s30584_s26 + $0x5e0] sm:$0xff]  }
  0x8f   :  { %21182 = vmatpush3.bf16.msra.mxu1 %v23055_v34  ;;  %v23104_v34 = vld [vmem:[%s30584_s26 + $0x598] sm:$0xff]  }
  0x90   :  { %2631 = vmatmul.mubr.bf16.vlgmr.msra.gmra.mrb[12].mxu0 %v673_v35  ;;  %21211 = vmatprep.subr.bf16.mxu1 %v23058_v37  ;;  %v23105_v35 = vld [vmem:[%s30584_s26 + $0x560] sm:$0xff]  }
  0x91   :  { %21190 = vmatpush3.bf16.msra.mxu0 %v23059_v38  ;;  %2710 = vmatprep.mubr.bf16.mxu0 %v729_v9  ;;  %v23107_v37 = vld [vmem:[%s30584_s26 + $0x520] sm:$0xff]  }
  0x92   :  { %2671 = vmatmul.mubr.bf16.vlgmr.msra.gmra.mrb[12].mxu1 %v689_v40  ;;  %21191 = vmatprep.subr.bf16.mxu0 %v23061_v42  ;;  %v23108_v38 = vld [vmem:[%s30584_s26 + $0x5a0] sm:$0xff]   ;;  %v23110_v40 = vld [vmem:[%s30584_s26 + $0x5e8] sm:$0xff]  }
  0x93   :  { %21212 = vmatpush3.bf16.msra.mxu1 %v23060_v39  ;;  %2750 = vmatprep.mubr.bf16.mxu1 %v739_v13  ;;  %v23109_v39 = vld [vmem:[%s30584_s26 + $0x568] sm:$0xff]   ;;  %v23141_v9 = vld [vmem:[%s30584_s26 + $0x6a0] sm:$0xff]  }
  0x94   :  { %21213 = vmatprep.subr.bf16.mxu1 %v23062_v43  ;;  %v23111_v42 = vld [vmem:[%s30584_s26 + $0x528] sm:$0xff]  }
  0x95   :  { %21192 = vmatpush3.bf16.msra.mxu0 %v23063_v44  ;;  %v23112_v43 = vld [vmem:[%s30584_s26 + $0x5a8] sm:$0xff]   ;;  %v23113_v44 = vld [vmem:[%s30584_s26 + $0x570] sm:$0xff]  }
  0x96   :  { %21193 = vmatprep.subr.bf16.mxu0 %v23065_v46  ;;  %v23115_v46 = vld [vmem:[%s30584_s26 + $0x530] sm:$0xff]   ;;  %v23145_v13 = vld [vmem:[%s30584_s26 + $0x6a8] sm:$0xff]  }
  0x97   :  { %21214 = vmatpush3.bf16.msra.mxu1 %v23064_v45  ;;  %v23114_v45 = vld [vmem:[%s30584_s26 + $0x5f0] sm:$0xff]  }
  0x98   :  { %21215 = vmatprep.subr.bf16.mxu1 %v23066_v47  ;;  %v23116_v47 = vld [vmem:[%s30584_s26 + $0x5b0] sm:$0xff]  }
  0x99   :  { %21194 = vmatpush3.bf16.msra.mxu0 %v23067_v48  ;;  %v23117_v48 = vld [vmem:[%s30584_s26 + $0x578] sm:$0xff]  }
  0x9a   :  { %21195 = vmatprep.subr.bf16.mxu0 %v23069_v50  ;;  %v23119_v50 = vld [vmem:[%s30584_s26 + $0x538] sm:$0xff]  }
  0x9b   :  { %21216 = vmatpush3.bf16.msra.mxu1 %v23068_v49  ;;  %v23118_v49 = vld [vmem:[%s30584_s26 + $0x5f8] sm:$0xff]  }
  0x9c   :  { %21217 = vmatprep.subr.bf16.mxu1 %v23070_v51  ;;  %v23120_v51 = vld [vmem:[%s30584_s26 + $0x5b8] sm:$0xff]  }
  0x9d   :  { %21196 = vmatpush3.bf16.msra.mxu0 %v23071_v52  ;;  %v722_v52 = vrot.slane %v25082_v6, %v24684_v41  ;;  %v23138_v6 = vld [vmem:[%s30584_s26 + $0x660] sm:$0xff]  }
  0x9e   :  { %21197 = vmatprep.subr.bf16.mxu0 %v23073_v54  ;;  %v23123_v54 = vld [vmem:[%s30584_s26 + $0x6c0] sm:$0xff]  }
  0x9f   :  { %21218 = vmatpush3.bf16.msra.mxu1 %v23072_v53  ;;  %v23122_v53 = vld [vmem:[%s30584_s26 + $0x640] sm:$0xff]  }
  0xa0   :  { %21219 = vmatprep.subr.bf16.mxu1 %v23074_v55  ;;  %v23124_v55 = vld [vmem:[%s30584_s26 + $0x600] sm:$0xff]  }
  0xa1   :  { %21198 = vmatpush3.bf16.msra.mxu0 %v23075_v56  ;;  %v23125_v56 = vld [vmem:[%s30584_s26 + $0x680] sm:$0xff]  }
  0xa2   :  { %21199 = vmatprep.subr.bf16.mxu0 %v23077_v58  ;;  %v23126_v58 = vld [vmem:[%s30584_s26 + $0x648] sm:$0xff]  }
  0xa3   :  { %21220 = vmatpush3.bf16.msra.mxu1 %v23076_v57  ;;  %v738_v57 = vcombine.high %v722_v52, %v722_v52 }
  0xa4   :  { %21221 = vmatprep.subr.bf16.mxu1 %v23078_v59  ;;  %v23127_v59 = vld [vmem:[%s30584_s26 + $0x6c8] sm:$0xff]  }
  0xa5   :  { %21200 = vmatpush3.bf16.msra.mxu0 %v23079_v60  ;;  %v23128_v60 = vld [vmem:[%s30584_s26 + $0x608] sm:$0xff]  }
  0xa6   :  { %21201 = vmatprep.subr.bf16.mxu0 %v23081_v62  ;;  %v23130_v62 = vld [vmem:[%s30584_s26 + $0x650] sm:$0xff]  }
  0xa7   :  { %21222 = vmatpush3.bf16.msra.mxu1 %v23080_v61  ;;  %v23129_v61 = vld [vmem:[%s30584_s26 + $0x688] sm:$0xff]  }
  0xa8   :  { %21223 = vmatprep.subr.bf16.mxu1 %v23082_v0  ;;  %v23132_v0 = vld [vmem:[%s30584_s26 + $0x610] sm:$0xff]  }
  0xa9   :  { %21202 = vmatpush3.bf16.msra.mxu0 %v23083_v3  ;;  %v23135_v3 = vld [vmem:[%s30584_s26 + $0x6d8] sm:$0xff]  }
  0xaa   :  { %21203 = vmatprep.subr.bf16.mxu0 %v23085_v7  ;;  %v23139_v7 = vld [vmem:[%s30584_s26 + $0x6e0] sm:$0xff]  }
  0xab   :  { %21224 = vmatpush3.bf16.msra.mxu1 %v23084_v4  ;;  %v23136_v4 = vld [vmem:[%s30584_s26 + $0x618] sm:$0xff]  }
  0xac   :  { %21225 = vmatprep.subr.bf16.mxu1 %v23086_v8  ;;  %v23140_v8 = vld [vmem:[%s30584_s26 + $0x620] sm:$0xff]  }
  0xad   :  { %21204 = vmatpush3.bf16.msra.mxu0 %v23087_v11  ;;  %v23143_v11 = vld [vmem:[%s30584_s26 + $0x6e8] sm:$0xff]  }
  0xae   :  { %21233 = vmatprep.subr.bf16.mxu0 %v23089_v15  ;;  %v70_v15 = vld [vmem:[%s30585_s22 + $0x18] sm:$0xff] }
  0xaf   :  { %21226 = vmatpush3.bf16.msra.mxu1 %v23088_v12  ;;  %v23144_v12 = vld [vmem:[%s30584_s26 + $0x628] sm:$0xff]  }
  0xb0   :  { %2711 = vmatmul.mubr.bf16.vlgmr.msra.gmra.mrb[16].mxu0 %v715_v14  ;;  %21255 = vmatprep.subr.bf16.mxu1 %v23090_v16  ;;  %v23146_v14 = vld [vmem:[%s30584_s26 + $0x670] sm:$0xff]  }
  0xb1   :  { %21234 = vmatpush3.bf16.msra.mxu0 %v23091_v18  ;;  %2790 = vmatprep.mubr.bf16.mxu0 %v736_v17  ;;  %v23147_v16 = vld [vmem:[%s30584_s26 + $0x6f0] sm:$0xff]   ;;  %v748_v17 = vrot.slane %v70_v15, %v24684_v41  ;;  %v741_v18 = vcombine.high %v70_v15, %v70_v15 }
  0xb2   :  { %2751 = vmatmul.mubr.bf16.vlgmr.msra.gmra.mrb[16].mxu1 %v737_v20  ;;  %21235 = vmatprep.subr.bf16.mxu0 %v23093_v21  ;;  %v23150_v20 = vld [vmem:[%s30584_s26 + $0x678] sm:$0xff]  }
  0xb3   :  { %21256 = vmatpush3.bf16.msra.mxu1 %v23092_v19  ;;  %2830 = vmatprep.mubr.bf16.mxu1 %v740_v23  ;;  %v23148_v19 = vld [vmem:[%s30584_s26 + $0x630] sm:$0xff]   ;;  %v756_v21 = vcombine.high %v748_v17, %v748_v17 }
  0xb4   :  { %21257 = vmatprep.subr.bf16.mxu1 %v23094_v22  ;;  %v25288_v22 = vrot.slane %v741_v18, %v24684_v41  ;;  %v23149_v23 = vld [vmem:[%s30584_s26 + $0x6b0] sm:$0xff]  }
  0xb5   :  { %21236 = vmatpush3.bf16.msra.mxu0 %v23095_v24  ;;  %v23151_v24 = vld [vmem:[%s30584_s26 + $0x6f8] sm:$0xff]  }
  0xb6   :  { %21237 = vmatprep.subr.bf16.mxu0 %v23097_v26  ;;  %v757_v26 = vcombine.high %v25288_v22, %v25288_v22 }
  0xb7   :  { %21258 = vmatpush3.bf16.msra.mxu1 %v23096_v25  ;;  %v778_v25 = vrot.slane %v756_v21, %v24684_v41 }
  0xb8   :  { %21259 = vmatprep.subr.bf16.mxu1 %v23098_v27  ;;  %v23152_v27 = vld [vmem:[%s30584_s26 + $0x638] sm:$0xff]  }
  0xb9   :  { %21238 = vmatpush3.bf16.msra.mxu0 %v23099_v28  ;;  %v788_v28 = vcombine.high %v778_v25, %v778_v25 }
  0xba   :  { %21239 = vmatprep.subr.bf16.mxu0 %v23101_v30  ;;  %v23154_v30 = vld [vmem:[%s30584_s26 + $0x740] sm:$0xff]  }
  0xbb   :  { %21260 = vmatpush3.bf16.msra.mxu1 %v23100_v29  ;;  %v764_v29 = vrot.slane %v748_v17, %v24684_v41  ;;  %v771_v17 = vrot.slane %v25288_v22, %v24684_v41 }
  0xbc   :  { %21261 = vmatprep.subr.bf16.mxu1 %v23102_v31  ;;  %v23153_v31 = vld [vmem:[%s30584_s26 + $0x6b8] sm:$0xff]  }
  0xbd   :  { %21240 = vmatpush3.bf16.msra.mxu0 %v23103_v32  ;;  %v785_v32 = vrot.slane %v757_v26, %v24684_v41  ;;  %v787_v18 = vcombine.high %v771_v17, %v771_v17 }
  0xbe   :  { %21241 = vmatprep.subr.bf16.mxu0 %v23105_v35  ;;  %v23156_v35 = vld [vmem:[%s30584_s26 + $0x700] sm:$0xff]  }
  0xbf   :  { %21262 = vmatpush3.bf16.msra.mxu1 %v23104_v34  ;;  %v23155_v34 = vld [vmem:[%s30584_s26 + $0x7c0] sm:$0xff]  }
  0xc0   :  { %21263 = vmatprep.subr.bf16.mxu1 %v23106_v36  ;;  %v786_v36 = vcombine.high %v764_v29, %v764_v29 }
  0xc1   :  { %21242 = vmatpush3.bf16.msra.mxu0 %v23107_v37  ;;  %v23158_v37 = vld [vmem:[%s30584_s26 + $0x748] sm:$0xff]  }
  0xc2   :  { %21243 = vmatprep.subr.bf16.mxu0 %v23109_v39  ;;  %v789_v39 = vcombine.high %v785_v32, %v785_v32 }
  0xc3   :  { %21264 = vmatpush3.bf16.msra.mxu1 %v23108_v38  ;;  %v23157_v38 = vld [vmem:[%s30584_s26 + $0x780] sm:$0xff]  }
  0xc4   :  { %21265 = vmatprep.subr.bf16.mxu1 %v23110_v40  ;;  %v23159_v40 = vld [vmem:[%s30584_s26 + $0x7c8] sm:$0xff]  }
  0xc5   :  { %21244 = vmatpush3.bf16.msra.mxu0 %v23111_v42  ;;  %v23160_v42 = vld [vmem:[%s30584_s26 + $0x708] sm:$0xff]  }
  0xc6   :  { %21245 = vmatprep.subr.bf16.mxu0 %v23113_v44  ;;  %v23161_v44 = vld [vmem:[%s30584_s26 + $0x788] sm:$0xff]  }
  0xc7   :  { %21266 = vmatpush3.bf16.msra.mxu1 %v23112_v43  ;;  %v23162_v43 = vld [vmem:[%s30584_s26 + $0x750] sm:$0xff]  }
  0xc8   :  { %21267 = vmatprep.subr.bf16.mxu1 %v23114_v45  ;;  %v23163_v45 = vld [vmem:[%s30584_s26 + $0x7d0] sm:$0xff]  }
  0xc9   :  { %21246 = vmatpush3.bf16.msra.mxu0 %v23115_v46  ;;  %v23164_v46 = vld [vmem:[%s30584_s26 + $0x710] sm:$0xff]  }
  0xca   :  { %21247 = vmatprep.subr.bf16.mxu0 %v23117_v48  ;;  %v23165_v48 = vld [vmem:[%s30584_s26 + $0x790] sm:$0xff]  }
  0xcb   :  { %21268 = vmatpush3.bf16.msra.mxu1 %v23116_v47  ;;  %v23166_v47 = vld [vmem:[%s30584_s26 + $0x758] sm:$0xff]  }
  0xcc   :  { %21269 = vmatprep.subr.bf16.mxu1 %v23118_v49  ;;  %v23167_v49 = vld [vmem:[%s30584_s26 + $0x7d8] sm:$0xff]  }
  0xcd   :  { %21248 = vmatpush3.bf16.msra.mxu0 %v23119_v50  ;;  %v23168_v50 = vld [vmem:[%s30584_s26 + $0x718] sm:$0xff]  }
  0xce   :  { %21277 = vmatprep.subr.bf16.mxu0 %v23122_v53  ;;  %v23171_v53 = vld [vmem:[%s30584_s26 + $0x7e0] sm:$0xff]  }
  0xcf   :  { %21270 = vmatpush3.bf16.msra.mxu1 %v23120_v51  ;;  %v23169_v51 = vld [vmem:[%s30584_s26 + $0x798] sm:$0xff]  }
  0xd0   :  { %2791 = vmatmul.mubr.bf16.vlgmr.msra.gmra.mrb[20].mxu0 %v722_v52  ;;  %21299 = vmatprep.subr.bf16.mxu1 %v23123_v54  ;;  %v23170_v52 = vld [vmem:[%s30584_s26 + $0x760] sm:$0xff]  }
  0xd1   :  { %21278 = vmatpush3.bf16.msra.mxu0 %v23124_v55  ;;  %2870 = vmatprep.mubr.bf16.mxu0 %v778_v25  ;;  %v23172_v54 = vld [vmem:[%s30584_s26 + $0x720] sm:$0xff]  }
  0xd2   :  { %2831 = vmatmul.mubr.bf16.vlgmr.msra.gmra.mrb[20].mxu1 %v738_v57  ;;  %21279 = vmatprep.subr.bf16.mxu0 %v23126_v58  ;;  %v23173_v55 = vld [vmem:[%s30584_s26 + $0x7a0] sm:$0xff]   ;;  %v23175_v57 = vld [vmem:[%s30584_s26 + $0x7e8] sm:$0xff]  }
  0xd3   :  { %21300 = vmatpush3.bf16.msra.mxu1 %v23125_v56  ;;  %2910 = vmatprep.mubr.bf16.mxu1 %v788_v28  ;;  %v23174_v56 = vld [vmem:[%s30584_s26 + $0x768] sm:$0xff]  }
  0xd4   :  { %21301 = vmatprep.subr.bf16.mxu1 %v23127_v59  ;;  %v23176_v58 = vld [vmem:[%s30584_s26 + $0x728] sm:$0xff]  }
  0xd5   :  { %21280 = vmatpush3.bf16.msra.mxu0 %v23128_v60  ;;  %v23177_v59 = vld [vmem:[%s30584_s26 + $0x7a8] sm:$0xff]   ;;  %v23178_v60 = vld [vmem:[%s30584_s26 + $0x770] sm:$0xff]  }
  0xd6   :  { %21281 = vmatprep.subr.bf16.mxu0 %v23130_v62  ;;  %v23179_v62 = vld [vmem:[%s30584_s26 + $0x7f0] sm:$0xff]  }
  0xd7   :  { %21302 = vmatpush3.bf16.msra.mxu1 %v23129_v61  ;;  %v19279_v61 = vld [vmem:[%s30586_s29] ss:$0 sm:$0xff] }
  0xd8   :  { %21303 = vmatprep.subr.bf16.mxu1 %v23131_v63 }
  0xd9   :  { %21282 = vmatpush3.bf16.msra.mxu0 %v23132_v0  ;;  %v23180_v0 = vld [vmem:[%s30584_s26 + $0x730] sm:$0xff]  }
  0xda   :  { %21283 = vmatprep.subr.bf16.mxu0 %v23134_v2  ;;  %v23182_v2 = vld [vmem:[%s30584_s26 + $0x778] sm:$0xff]  }
  0xdb   :  { %21304 = vmatpush3.bf16.msra.mxu1 %v23133_v1 }
  0xdc   :  { %21305 = vmatprep.subr.bf16.mxu1 %v23135_v3 }
  0xdd   :  { %21284 = vmatpush3.bf16.msra.mxu0 %v23136_v4 }
  0xde   :  { %21285 = vmatprep.subr.bf16.mxu0 %v23138_v6  ;;  %v23181_v6 = vld [vmem:[%s30584_s26 + $0x7b0] sm:$0xff]  }
  0xdf   :  { %21306 = vmatpush3.bf16.msra.mxu1 %v23137_v5 }
  0xe0   :  { %21307 = vmatprep.subr.bf16.mxu1 %v23139_v7 }
  0xe1   :  { %21286 = vmatpush3.bf16.msra.mxu0 %v23140_v8 }
  0xe2   :  { %21287 = vmatprep.subr.bf16.mxu0 %v23142_v10 }
  0xe3   :  { %21308 = vmatpush3.bf16.msra.mxu1 %v23141_v9 }
  0xe4   :  { %21309 = vmatprep.subr.bf16.mxu1 %v23143_v11 }
  0xe5   :  { %21288 = vmatpush3.bf16.msra.mxu0 %v23144_v12  ;;  %v23183_v12 = vld [vmem:[%s30584_s26 + $0x7f8] sm:$0xff]  }
  0xe6   :  { %21289 = vmatprep.subr.bf16.mxu0 %v23146_v14  ;;  %v23184_v14 = vld [vmem:[%s30584_s26 + $0x738] sm:$0xff]  }
  0xe7   :  { %21310 = vmatpush3.bf16.msra.mxu1 %v23145_v13 }
  0xe8   :  { %21311 = vmatprep.subr.bf16.mxu1 %v23147_v16  ;;  %v23185_v16 = vld [vmem:[%s30584_s26 + $0x7b8] sm:$0xff]  }
  0xe9   :  { %21290 = vmatpush3.bf16.msra.mxu0 %v23148_v19 }
  0xea   :  { %21291 = vmatprep.subr.bf16.mxu0 %v23150_v20 }
  0xeb   :  { %21312 = vmatpush3.bf16.msra.mxu1 %v23149_v23 }
  0xec   :  { %21313 = vmatprep.subr.bf16.mxu1 %v23151_v24 }
  0xed   :  { %21292 = vmatpush3.bf16.msra.mxu0 %v23152_v27 }
  0xee   :  { %21321 = vmatprep.subr.bf16.mxu0 %v23154_v30 }
  0xef   :  { %21314 = vmatpush3.bf16.msra.mxu1 %v23153_v31 }
  0xf0   :  { %2871 = vmatmul.mubr.bf16.vlgmr.msra.gmra.mrb[24].mxu0 %v764_v29  ;;  %21343 = vmatprep.subr.bf16.mxu1 %v23155_v34 }
  0xf1   :  { %21322 = vmatpush3.bf16.msra.mxu0 %v23156_v35  ;;  %2950 = vmatprep.mubr.bf16.mxu0 %v785_v32 }
  0xf2   :  { %2911 = vmatmul.mubr.bf16.vlgmr.msra.gmra.mrb[24].mxu1 %v786_v36  ;;  %21323 = vmatprep.subr.bf16.mxu0 %v23158_v37 }
  0xf3   :  { %21344 = vmatpush3.bf16.msra.mxu1 %v23157_v38  ;;  %2990 = vmatprep.mubr.bf16.mxu1 %v789_v39 }
  0xf4   :  { %21345 = vmatprep.subr.bf16.mxu1 %v23159_v40 }
  0xf5   :  { %21324 = vmatpush3.bf16.msra.mxu0 %v23160_v42 }
  0xf6   :  { %21325 = vmatprep.subr.bf16.mxu0 %v23162_v43 }
  0xf7   :  { %21346 = vmatpush3.bf16.msra.mxu1 %v23161_v44 }
  0xf8   :  { %21347 = vmatprep.subr.bf16.mxu1 %v23163_v45  ;;  %v23187_v45 = vld [vmem:[%s30587_s4] sm:$0xff]  }
  0xf9   :  { %21326 = vmatpush3.bf16.msra.mxu0 %v23164_v46  ;;  %v24458_v46 = vmov 0.0  }
  0xfa   :  { %21327 = vmatprep.subr.bf16.mxu0 %v23166_v47  ;;  %v23188_v47 = vld [vmem:[%s30587_s4 + $0x8] sm:$0xff]  }
  0xfb   :  { %21348 = vmatpush3.bf16.msra.mxu1 %v23165_v48  ;;  %v23189_v48 = vld [vmem:[%s30587_s4 + $0x10] sm:$0xff]  }
  0xfc   :  { %21349 = vmatprep.subr.bf16.mxu1 %v23167_v49  ;;  %v23190_v49 = vld [vmem:[%s30587_s4 + $0x18] sm:$0xff]  }
  0xfd   :  { %21328 = vmatpush3.bf16.msra.mxu0 %v23168_v50  ;;  %v23191_v50 = vld [vmem:[%s30587_s4 + $0x20] sm:$0xff]  }
  0xfe   :  { %21329 = vmatprep.subr.bf16.mxu0 %v23170_v52 }
  0xff   :  { %21350 = vmatpush3.bf16.msra.mxu1 %v23169_v51 }
 0x100   :  { %21351 = vmatprep.subr.bf16.mxu1 %v23171_v53  ;;  %v23192_v53 = vld [vmem:[%s30587_s4 + $0x28] sm:$0xff]  }
 0x101   :  { %21330 = vmatpush3.bf16.msra.mxu0 %v23172_v54 }
 0x102   :  { %21331 = vmatprep.subr.bf16.mxu0 %v23174_v56 }
 0x103   :  { %21352 = vmatpush3.bf16.msra.mxu1 %v23173_v55  ;;  %v21029_v63 = vpop.f32.mrb[0].mxu0 }
 0x104   :  { %v21030_v1 = vpop.f32.mrb[1].mxu0  ;;  %21353 = vmatprep.subr.bf16.mxu1 %v23175_v57  ;;  %v21051_v3 = vpop.f32.mrb[0].mxu1 }
 0x105   :  { %v21031_v4 = vadd.f32 %v21030_v1, %v21029_v63  ;;  %v21032_v5 = vpop.f32.mrb[2].mxu0  ;;  %21332 = vmatpush3.bf16.msra.mxu0 %v23176_v58  ;;  %v21052_v7 = vpop.f32.mrb[1].mxu1  ;;  %v23193_v63 = vld [vmem:[%s30587_s4 + $0x30] sm:$0xff]   ;;  %v23194_v1 = vld [vmem:[%s30587_s4 + $0x38] sm:$0xff]   ;;  %s30589_s4 = sld [smem:[#allocation13_spill]] }
 0x106   :  { %v21033_v8 = vpop.f32.mrb[3].mxu0  ;;  %21333 = vmatprep.subr.bf16.mxu0 %v23178_v60  ;;  %v21053_v10 = vadd.f32 %v21052_v7, %v21051_v3  ;;  %v21054_v11 = vpop.f32.mrb[2].mxu1  ;;  %v3126_v3 = vld [vmem:[%s30558_s6 + $0x60] sm:$0xff]  ;;  %v25456_v7 = vld [vmem:[%s30558_s6 + $0x68] sm:$0xff] }
 0x107   :  { %v2393_v9 = vadd.f32 %v21031_v4, %v19279_v61  ;;  %21354 = vmatpush3.bf16.msra.mxu1 %v23177_v59  ;;  %v21055_v13 = vpop.f32.mrb[3].mxu1  ;;  %v25451_v4 = vld [vmem:[%s30558_s6 + $0x8] sm:$0xff]  ;;  %v3138_v8 = vld [vmem:[%s30558_s6 + $0xc0] sm:$0xff] }
 0x108   :  { %21355 = vmatprep.subr.bf16.mxu1 %v23179_v62  ;;  %v19548_v11 = vcombine.high %v25451_v4, %v25456_v7 }
 0x109   :  { %v2433_v15 = vadd.f32 %v21053_v10, %v2393_v9  ;;  %21334 = vmatpush3.bf16.msra.mxu0 %v23180_v0  ;;  %v3150_v9 = vld [vmem:[%s30558_s6 + $0x120] sm:$0xff]  ;;  %v19547_v10 = vcombine.low %v25451_v4, %v25456_v7  ;;  %v3223_v4 = vld [vmem:[%s30558_s6 + $0x368] sm:$0xff] }
 0x10a   :  { %21335 = vmatprep.subr.bf16.mxu0 %v23182_v2  ;;  %v3114_v2 = vld [vmem:[%s30558_s6] sm:$0xff]  ;;  %v19569_v13 = vcombine.low %v3138_v8, %v3150_v9 }
 0x10b   :  { %21356 = vmatpush3.bf16.msra.mxu1 %v23181_v6  ;;  %v19545_v5 = vcombine.low %v3114_v2, %v3126_v3  ;;  %v19546_v6 = vcombine.high %v3114_v2, %v3126_v3 }
 0x10c   :  { %21357 = vmatprep.subr.bf16.mxu1 %v23183_v12  ;;  %v19570_v12 = vcombine.high %v3138_v8, %v3150_v9 }
 0x10d   :  { %21336 = vmatpush3.bf16.msra.mxu0 %v23184_v14  ;;  %v3162_v14 = vld [vmem:[%s30558_s6 + $0x180] sm:$0xff] }
 0x10e   :  { %22818 = vmatprep.subr.bf16.mxu0 %v24458_v46 }
 0x10f   :  { %21358 = vmatpush3.bf16.msra.mxu1 %v23185_v16 }
 0x110   :  { %2951 = vmatmul.mubr.bf16.vlgmr.msra.gmra.mrb[28].mxu0 %v771_v17  ;;  %4392 = vmatprep.subr.bf16.mxu1 %v19546_v6 }
 0x111   :  { %22819 = vmatpush3.bf16.msra.mxu0 %v23187_v45  ;;  %22834 = vmatprep.mubr.msk.bf16.mxu0 %vm24459_vm0, %v24458_v46 }
 0x112   :  { %2991 = vmatmul.mubr.bf16.vlgmr.msra.gmra.mrb[28].mxu1 %v787_v18  ;;  %22820 = vmatprep.subr.bf16.mxu0 %v24458_v46  ;;  %v3186_v18 = vld [vmem:[%s30558_s6 + $0x240] sm:$0xff] }
 0x113   :  { %4393 = vmatpush1.bf16.msra.mxu1 %v19545_v5 }
 0x114   :  { %4394 = vmatprep.subr.bf16.mxu1 %v19570_v12 }
 0x115   :  { %22821 = vmatpush3.bf16.msra.mxu0 %v23188_v47 }
 0x116   :  { %22822 = vmatprep.subr.bf16.mxu0 %v24458_v46 }
 0x117   :  { %4395 = vmatpush1.bf16.msra.mxu1 %v19569_v13 }
 0x119   :  { %22823 = vmatpush3.bf16.msra.mxu0 %v23189_v48 }
 0x11a   :  { %22824 = vmatprep.subr.bf16.mxu0 %v24458_v46 }
 0x11d   :  { %22825 = vmatpush3.bf16.msra.mxu0 %v23190_v49 }
 0x11e   :  { %22826 = vmatprep.subr.bf16.mxu0 %v24458_v46 }
 0x121   :  { %22827 = vmatpush3.bf16.msra.mxu0 %v23191_v50 }
 0x122   :  { %22828 = vmatprep.subr.bf16.mxu0 %v24458_v46 }
 0x123   :  { %v21073_v19 = vpop.f32.mrb[4].mxu0 }
 0x124   :  { %v21074_v20 = vpop.f32.mrb[5].mxu0  ;;  %v21095_v21 = vpop.f32.mrb[4].mxu1 }
 0x125   :  { %v21075_v23 = vadd.f32 %v21074_v20, %v21073_v19  ;;  %v21076_v24 = vpop.f32.mrb[6].mxu0  ;;  %v21096_v25 = vpop.f32.mrb[5].mxu1  ;;  %22829 = vmatpush3.bf16.msra.mxu0 %v23192_v53  ;;  %v3198_v19 = vld [vmem:[%s30558_s6 + $0x2a0] sm:$0xff] }
 0x126   :  { %v21077_v26 = vpop.f32.mrb[7].mxu0  ;;  %v21097_v28 = vadd.f32 %v21096_v25, %v21095_v21  ;;  %v21098_v29 = vpop.f32.mrb[6].mxu1  ;;  %22830 = vmatprep.subr.bf16.mxu0 %v24458_v46  ;;  %v19618_v20 = vcombine.high %v3186_v18, %v3198_v19  ;;  %v19617_v21 = vcombine.low %v3186_v18, %v3198_v19  ;;  %v3222_v24 = vld [vmem:[%s30558_s6 + $0x360] sm:$0xff] }
 0x127   :  { %v2473_v27 = vadd.f32 %v21075_v23, %v2433_v15  ;;  %v21099_v30 = vpop.f32.mrb[7].mxu1  ;;  %v3174_v15 = vld [vmem:[%s30558_s6 + $0x1e0] sm:$0xff] }
 0x128   :  { %v19594_v16 = vcombine.high %v3162_v14, %v3174_v15  ;;  %v19593_v17 = vcombine.low %v3162_v14, %v3174_v15  ;;  %v3210_v23 = vld [vmem:[%s30558_s6 + $0x300] sm:$0xff] }
 0x129   :  { %v2513_v31 = vadd.f32 %v21097_v28, %v2473_v27  ;;  %22831 = vmatpush3.bf16.msra.mxu0 %v23193_v63  ;;  %v19642_v25 = vcombine.high %v3210_v23, %v3222_v24  ;;  %v19641_v26 = vcombine.low %v3210_v23, %v3222_v24  ;;  %v3234_v27 = vld [vmem:[%s30558_s6 + $0x3c0] sm:$0xff]  ;;  %v3139_v24 = vld [vmem:[%s30558_s6 + $0xc8] sm:$0xff] }
 0x12a   :  { %22832 = vmatprep.subr.bf16.mxu0 %v24458_v46  ;;  %4396 = vmatprep.subr.bf16.mxu1 %v19594_v16  ;;  %v3246_v28 = vld [vmem:[%s30558_s6 + $0x420] sm:$0xff] }
 0x12b   :  { %4397 = vmatpush1.bf16.msra.mxu1 %v19593_v17  ;;  %v19666_v29 = vcombine.high %v3234_v27, %v3246_v28 }
 0x12c   :  { %4398 = vmatprep.subr.bf16.mxu1 %v19618_v20 }
 0x12d   :  { %22833 = vmatpush3.bf16.msra.mxu0 %v23194_v1 }
 0x12e   :  { %4433 = vmatprep.subr.bf16.mxu0 %v19548_v11 }
 0x12f   :  { %4399 = vmatpush1.bf16.msra.mxu1 %v19617_v21 }
 0x130   :  { %4400 = vmatprep.subr.bf16.mxu1 %v19642_v25  ;;  %v3151_v25 = vld [vmem:[%s30558_s6 + $0x128] sm:$0xff] }
 0x133   :  { %4401 = vmatpush1.bf16.msra.mxu1 %v19641_v26 }
 0x134   :  { %4402 = vmatprep.subr.bf16.mxu1 %v19666_v29  ;;  %v3175_v29 = vld [vmem:[%s30558_s6 + $0x1e8] sm:$0xff] }
 0x143   :  { %v21117_v22 = vpop.f32.mrb[8].mxu0 }
 0x144   :  { %v21118_v32 = vpop.f32.mrb[9].mxu0 }
 0x145   :  { %v21139_v34 = vpop.f32.mrb[8].mxu1  ;;  %v21119_v35 = vadd.f32 %v21118_v32, %v21117_v22  ;;  %v21120_v36 = vpop.f32.mrb[10].mxu0  ;;  %v3258_v32 = vld [vmem:[%s30558_s6 + $0x480] sm:$0xff] }
 0x146   :  { %v21140_v37 = vpop.f32.mrb[9].mxu1  ;;  %v21121_v38 = vpop.f32.mrb[11].mxu0 }
 0x147   :  { %v2553_v39 = vadd.f32 %v21119_v35, %v2513_v31  ;;  %v21141_v40 = vadd.f32 %v21140_v37, %v21139_v34  ;;  %v21142_v42 = vpop.f32.mrb[10].mxu1  ;;  %v19665_v31 = vcombine.low %v3234_v27, %v3246_v28  ;;  %v3270_v34 = vld [vmem:[%s30558_s6 + $0x4e0] sm:$0xff]  ;;  %v3163_v28 = vld [vmem:[%s30558_s6 + $0x188] sm:$0xff] }
 0x148   :  { %v21143_v43 = vpop.f32.mrb[11].mxu1  ;;  %v19690_v38 = vcombine.high %v3258_v32, %v3270_v34  ;;  %v19689_v45 = vcombine.low %v3258_v32, %v3270_v34  ;;  %v3187_v32 = vld [vmem:[%s30558_s6 + $0x248] sm:$0xff] }
 0x149   :  { %v2593_v44 = vadd.f32 %v21141_v40, %v2553_v39  ;;  %4403 = vmatpush1.bf16.msra.mxu1 %v19665_v31  ;;  %v19572_v31 = vcombine.high %v3139_v24, %v3151_v25  ;;  %v3199_v34 = vld [vmem:[%s30558_s6 + $0x2a8] sm:$0xff] }
 0x14a   :  { %4404 = vmatprep.subr.bf16.mxu1 %v19690_v38  ;;  %v19620_v7 = vcombine.high %v3187_v32, %v3199_v34  ;;  %v3235_v38 = vld [vmem:[%s30558_s6 + $0x3c8] sm:$0xff] }
 0x14d   :  { %4405 = vmatpush1.bf16.msra.mxu1 %v19689_v45 }
 0x163   :  { %v21161_v51 = vpop.f32.mrb[12].mxu0 }
 0x164   :  { %v21162_v52 = vpop.f32.mrb[13].mxu0 }
 0x165   :  { %v21183_v54 = vpop.f32.mrb[12].mxu1  ;;  %v21163_v55 = vadd.f32 %v21162_v52, %v21161_v51  ;;  %v21164_v56 = vpop.f32.mrb[14].mxu0 }
 0x166   :  { %v21184_v57 = vpop.f32.mrb[13].mxu1  ;;  %v21165_v58 = vpop.f32.mrb[15].mxu0 }
 0x167   :  { %v2633_v59 = vadd.f32 %v21163_v55, %v2593_v44  ;;  %v21185_v60 = vadd.f32 %v21184_v57, %v21183_v54  ;;  %v21186_v61 = vpop.f32.mrb[14].mxu1 }
 0x168   :  { %v21187_v62 = vpop.f32.mrb[15].mxu1 }
 0x169   :  { %v2673_v0 = vadd.f32 %v21185_v60, %v2633_v59 }
 0x183   :  { %v21205_v30 = vpop.f32.mrb[16].mxu0 }
 0x184   :  { %v21206_v22 = vpop.f32.mrb[17].mxu0 }
 0x185   :  { %v21227_v35 = vpop.f32.mrb[16].mxu1  ;;  %v21207_v36 = vadd.f32 %v21206_v22, %v21205_v30  ;;  %v21208_v37 = vpop.f32.mrb[18].mxu0  ;;  %v19571_v22 = vcombine.low %v3139_v24, %v3151_v25  ;;  %v3177_v24 = vld [vmem:[%s30558_s6 + $0x1f8] sm:$0xff] }
 0x186   :  { %v21228_v39 = vpop.f32.mrb[17].mxu1  ;;  %v21209_v40 = vpop.f32.mrb[19].mxu0  ;;  %v3211_v37 = vld [vmem:[%s30558_s6 + $0x308] sm:$0xff] }
 0x187   :  { %v2713_v42 = vadd.f32 %v21207_v36, %v2673_v0  ;;  %v21229_v43 = vadd.f32 %v21228_v39, %v21227_v35  ;;  %v21230_v44 = vpop.f32.mrb[18].mxu1  ;;  %v19596_v35 = vcombine.high %v3163_v28, %v3175_v29  ;;  %v19595_v36 = vcombine.low %v3163_v28, %v3175_v29  ;;  %v3247_v39 = vld [vmem:[%s30558_s6 + $0x428] sm:$0xff]  ;;  %v3200_v28 = vld [vmem:[%s30558_s6 + $0x2b0] sm:$0xff] }
 0x188   :  { %v21231_v47 = vpop.f32.mrb[19].mxu1  ;;  %v19644_v40 = vcombine.high %v3211_v37, %v3223_v4  ;;  %v3271_v44 = vld [vmem:[%s30558_s6 + $0x4e8] sm:$0xff]  ;;  %v19668_v45 = vcombine.high %v3235_v38, %v3247_v39 }
 0x189   :  { %v2753_v48 = vadd.f32 %v21229_v43, %v2713_v42  ;;  %v19643_v42 = vcombine.low %v3211_v37, %v3223_v4  ;;  %v3259_v43 = vld [vmem:[%s30558_s6 + $0x488] sm:$0xff]  ;;  %v19667_v47 = vcombine.low %v3235_v38, %v3247_v39 }
 0x1a3   :  { %v21249_v49 = vpop.f32.mrb[20].mxu0 }
 0x1a4   :  { %v21250_v50 = vpop.f32.mrb[21].mxu0 }
 0x1a5   :  { %v21271_v51 = vpop.f32.mrb[20].mxu1  ;;  %v21251_v52 = vadd.f32 %v21250_v50, %v21249_v49  ;;  %v21252_v53 = vpop.f32.mrb[22].mxu0  ;;  %v19691_v49 = vcombine.low %v3259_v43, %v3271_v44  ;;  %v3282_v50 = vld [vmem:[%s30558_s6 + $0x540] sm:$0xff] }
 0x1a6   :  { %v21272_v54 = vpop.f32.mrb[21].mxu1  ;;  %v21253_v55 = vpop.f32.mrb[23].mxu0 }
 0x1a7   :  { %v2793_v56 = vadd.f32 %v21251_v52, %v2753_v48  ;;  %v21273_v57 = vadd.f32 %v21272_v54, %v21271_v51  ;;  %v21274_v58 = vpop.f32.mrb[22].mxu1  ;;  %v19692_v48 = vcombine.high %v3259_v43, %v3271_v44  ;;  %v3294_v51 = vld [vmem:[%s30558_s6 + $0x5a0] sm:$0xff]  ;;  %v3283_v52 = vld [vmem:[%s30558_s6 + $0x548] sm:$0xff] }
 0x1a8   :  { %v21275_v59 = vpop.f32.mrb[23].mxu1  ;;  %v19714_v53 = vcombine.high %v3282_v50, %v3294_v51  ;;  %v3295_v54 = vld [vmem:[%s30558_s6 + $0x5a8] sm:$0xff]  ;;  %v19713_v55 = vcombine.low %v3282_v50, %v3294_v51  ;;  %v3116_v58 = vld [vmem:[%s30558_s6 + $0x10] sm:$0xff] }
 0x1a9   :  { %v2833_v60 = vadd.f32 %v21273_v57, %v2793_v56  ;;  %v19715_v56 = vcombine.low %v3283_v52, %v3295_v54  ;;  %v19716_v57 = vcombine.high %v3283_v52, %v3295_v54  ;;  %v3128_v59 = vld [vmem:[%s30558_s6 + $0x70] sm:$0xff]  ;;  %v3261_v54 = vld [vmem:[%s30558_s6 + $0x498] sm:$0xff] }
 0x1aa   :  { %4406 = vmatprep.subr.bf16.mxu1 %v19714_v53  ;;  %v3260_v50 = vld [vmem:[%s30558_s6 + $0x490] sm:$0xff] }
 0x1ab   :  { %4407 = vmatpush1.bf16.msra.mxu1 %v19713_v55  ;;  %v3272_v51 = vld [vmem:[%s30558_s6 + $0x4f0] sm:$0xff]  ;;  %v3273_v55 = vld [vmem:[%s30558_s6 + $0x4f8] sm:$0xff] }
 0x1c3   :  { %v21293_v61 = vpop.f32.mrb[24].mxu0 }
 0x1c4   :  { %v21294_v62 = vpop.f32.mrb[25].mxu0 }
 0x1c5   :  { %v21315_v63 = vpop.f32.mrb[24].mxu1  ;;  %v21295_v0 = vadd.f32 %v21294_v62, %v21293_v61  ;;  %v21296_v1 = vpop.f32.mrb[26].mxu0  ;;  %v24460_v61 = vmov 0   ;;  %v19549_v62 = vcombine.low %v3116_v58, %v3128_v59 }
 0x1c6   :  { %v21316_v2 = vpop.f32.mrb[25].mxu1  ;;  %v21297_v3 = vpop.f32.mrb[27].mxu0  ;;  %4424 = vmatprep.mubr.bf16.mxu1 %v24460_v61 }
 0x1c7   :  { %v2873_v5 = vadd.f32 %v21295_v0, %v2833_v60  ;;  %v21317_v6 = vadd.f32 %v21316_v2, %v21315_v63  ;;  %v21318_v8 = vpop.f32.mrb[26].mxu1  ;;  %v3117_v60 = vld [vmem:[%s30558_s6 + $0x18] sm:$0xff]  ;;  %v19550_v63 = vcombine.high %v3116_v58, %v3128_v59  ;;  %v19536_v3 = vld [vmem:[%s30588_s0] ss:$0 sm:$0xff]  ;;  %v3284_v58 = vld [vmem:[%s30558_s6 + $0x550] sm:$0xff] }
 0x1c8   :  { %v21319_v9 = vpop.f32.mrb[27].mxu1  ;;  %v3129_v0 = vld [vmem:[%s30558_s6 + $0x78] sm:$0xff]  ;;  %v3296_v59 = vld [vmem:[%s30558_s6 + $0x5b0] sm:$0xff] }
 0x1c9   :  { %v2913_v11 = vadd.f32 %v21317_v6, %v2873_v5  ;;  %v19551_v1 = vcombine.low %v3117_v60, %v3129_v0  ;;  %v19552_v2 = vcombine.high %v3117_v60, %v3129_v0  ;;  %4474 = vmatprep.subr.bf16.mxu1 %v19550_v63  ;;  %v3140_v6 = vld [vmem:[%s30558_s6 + $0xd0] sm:$0xff]  ;;  %v19694_v60 = vcombine.high %v3260_v50, %v3272_v51  ;;  %v3285_v63 = vld [vmem:[%s30558_s6 + $0x558] sm:$0xff] }
 0x1ca   :  { %v3297_v0 = vld [vmem:[%s30558_s6 + $0x5b8] sm:$0xff] }
 0x1e3   :  { %v21337_v12 = vpop.f32.mrb[28].mxu0 }
 0x1e4   :  { %v21338_v13 = vpop.f32.mrb[29].mxu0 }
 0x1e5   :  { %v21359_v14 = vpop.f32.mrb[28].mxu1  ;;  %v21339_v15 = vadd.f32 %v21338_v13, %v21337_v12  ;;  %v21340_v16 = vpop.f32.mrb[30].mxu0  ;;  %v3141_v12 = vld [vmem:[%s30558_s6 + $0xd8] sm:$0xff] }
 0x1e6   :  { %v21360_v17 = vpop.f32.mrb[29].mxu1  ;;  %v21341_v18 = vpop.f32.mrb[31].mxu0 }
 0x1e7   :  { %v2953_v19 = vadd.f32 %v21339_v15, %v2913_v11  ;;  %v21361_v20 = vadd.f32 %v21360_v17, %v21359_v14  ;;  %v21362_v21 = vpop.f32.mrb[30].mxu1  ;;  %v3152_v11 = vld [vmem:[%s30558_s6 + $0x130] sm:$0xff]  ;;  %v3153_v14 = vld [vmem:[%s30558_s6 + $0x138] sm:$0xff] }
 0x1e8   :  { %v21363_v23 = vpop.f32.mrb[31].mxu1  ;;  %v19574_v18 = vcombine.high %v3140_v6, %v3152_v11  ;;  %v3176_v21 = vld [vmem:[%s30558_s6 + $0x1f0] sm:$0xff]  ;;  %v19573_v25 = vcombine.low %v3140_v6, %v3152_v11  ;;  %v19718_v6 = vcombine.high %v3284_v58, %v3296_v59  ;;  %v3131_v11 = vld [vmem:[%s30558_s6 + $0x88] sm:$0xff] }
 0x1e9   :  { %v2993_v26 = vadd.f32 %v21361_v20, %v2953_v19  ;;  %v19576_v19 = vcombine.high %v3141_v12, %v3153_v14  ;;  %v3164_v20 = vld [vmem:[%s30558_s6 + $0x190] sm:$0xff]  ;;  %v3165_v23 = vld [vmem:[%s30558_s6 + $0x198] sm:$0xff] }
 0x1ea   :  { %v19598_v29 = vcombine.high %v3164_v20, %v3176_v21 }
 0x1eb   :  { %v2998_v27 = vmax.f32 %v2993_v26, 0.0  ;;  %v19575_v26 = vcombine.low %v3141_v12, %v3153_v14  ;;  %v19717_v12 = vcombine.low %v3284_v58, %v3296_v59  ;;  %v3142_v14 = vld [vmem:[%s30558_s6 + $0xe0] sm:$0xff]  ;;  %v3263_v59 = vld [vmem:[%s30558_s6 + $0x4a8] sm:$0xff] }
 0x1ed   :  { %v3000_v30 = vpack.c.bf16 %v2998_v27, %v2998_v27  ;;  %2999 = vst [vmem:[#allocation6] sm:$0x3] %v2998_v27  ;;  %v3188_v27 = vld [vmem:[%s30558_s6 + $0x250] sm:$0xff] }
 0x1ee   :  { %v19622_v37 = vcombine.high %v3188_v27, %v3200_v28  ;;  %v19621_v38 = vcombine.low %v3188_v27, %v3200_v28  ;;  %v3167_v28 = vld [vmem:[%s30558_s6 + $0x1a8] sm:$0xff] }
 0x1ef   :  { %22835 = vmatmul.mubr.bf16.vlgmr.msra.gmra.mrb[32].mxu0 %v3000_v30  ;;  %v19600_v30 = vcombine.high %v3165_v23, %v3177_v24 }
 0x1f0   :  { %4434 = vmatpush1.bf16.msra.mxu0 %v19547_v10  ;;  %v19619_v10 = vcombine.low %v3187_v32, %v3199_v34  ;;  %4465 = vmatprep.mubr.bf16.mxu0 %v24460_v61  ;;  %v19597_v32 = vcombine.low %v3164_v20, %v3176_v21  ;;  %v19599_v34 = vcombine.low %v3165_v23, %v3177_v24  ;;  %v3155_v20 = vld [vmem:[%s30558_s6 + $0x148] sm:$0xff]  ;;  %v3166_v24 = vld [vmem:[%s30558_s6 + $0x1a0] sm:$0xff] }
 0x1f1   :  { %4435 = vmatprep.subr.bf16.mxu0 %v19572_v31  ;;  %v3189_v31 = vld [vmem:[%s30558_s6 + $0x258] sm:$0xff] }
 0x1f4   :  { %4436 = vmatpush1.bf16.msra.mxu0 %v19571_v22  ;;  %v3201_v22 = vld [vmem:[%s30558_s6 + $0x2b8] sm:$0xff] }
 0x1f5   :  { %4437 = vmatprep.subr.bf16.mxu0 %v19596_v35  ;;  %v3212_v35 = vld [vmem:[%s30558_s6 + $0x310] sm:$0xff]  ;;  %v19624_v4 = vcombine.high %v3189_v31, %v3201_v22  ;;  %v19623_v39 = vcombine.low %v3189_v31, %v3201_v22  ;;  %v3190_v22 = vld [vmem:[%s30558_s6 + $0x260] sm:$0xff] }
 0x1f8   :  { %4438 = vmatpush1.bf16.msra.mxu0 %v19595_v36  ;;  %v3224_v36 = vld [vmem:[%s30558_s6 + $0x370] sm:$0xff] }
 0x1f9   :  { %4439 = vmatprep.subr.bf16.mxu0 %v19620_v7  ;;  %v3213_v7 = vld [vmem:[%s30558_s6 + $0x318] sm:$0xff]  ;;  %v19646_v43 = vcombine.high %v3212_v35, %v3224_v36 }
 0x1fc   :  { %4440 = vmatpush1.bf16.msra.mxu0 %v19619_v10  ;;  %v3225_v10 = vld [vmem:[%s30558_s6 + $0x378] sm:$0xff] }
 0x1fd   :  { %4441 = vmatprep.subr.bf16.mxu0 %v19644_v40  ;;  %v3236_v40 = vld [vmem:[%s30558_s6 + $0x3d0] sm:$0xff]  ;;  %v19648_v44 = vcombine.high %v3213_v7, %v3225_v10 }
 0x200   :  { %4442 = vmatpush1.bf16.msra.mxu0 %v19643_v42  ;;  %v3248_v42 = vld [vmem:[%s30558_s6 + $0x430] sm:$0xff] }
 0x201   :  { %4443 = vmatprep.subr.bf16.mxu0 %v19668_v45  ;;  %v3237_v45 = vld [vmem:[%s30558_s6 + $0x3d8] sm:$0xff]  ;;  %v19670_v52 = vcombine.high %v3236_v40, %v3248_v42 }
 0x204   :  { %4444 = vmatpush1.bf16.msra.mxu0 %v19667_v47  ;;  %v3249_v47 = vld [vmem:[%s30558_s6 + $0x438] sm:$0xff] }
 0x205   :  { %4445 = vmatprep.subr.bf16.mxu0 %v19692_v48  ;;  %v19645_v48 = vcombine.low %v3212_v35, %v3224_v36  ;;  %v19672_v53 = vcombine.high %v3237_v45, %v3249_v47  ;;  %v3191_v36 = vld [vmem:[%s30558_s6 + $0x268] sm:$0xff] }
 0x208   :  { %4446 = vmatpush1.bf16.msra.mxu0 %v19691_v49  ;;  %v19647_v49 = vcombine.low %v3213_v7, %v3225_v10  ;;  %v3214_v10 = vld [vmem:[%s30558_s6 + $0x320] sm:$0xff] }
 0x209   :  { %4447 = vmatprep.subr.bf16.mxu0 %v19716_v57  ;;  %v19671_v57 = vcombine.low %v3237_v45, %v3249_v47  ;;  %v3238_v47 = vld [vmem:[%s30558_s6 + $0x3e0] sm:$0xff] }
 0x20c   :  { %4448 = vmatpush1.bf16.msra.mxu0 %v19715_v56  ;;  %v19669_v56 = vcombine.low %v3236_v40, %v3248_v42  ;;  %v3215_v42 = vld [vmem:[%s30558_s6 + $0x328] sm:$0xff] }
 0x20d   :  { %4515 = vmatprep.subr.bf16.mxu0 %v19552_v2  ;;  %v19695_v2 = vcombine.low %v3261_v54, %v3273_v55 }
 0x2c2   :  { %v3106_v5 = vpop.f32.mrb[32].mxu0 }
 0x2c3   :  { %v3107_v8 = vadd.f32 %v19536_v3, %v3106_v5  ;;  %v22836_v9 = vpop.f32.mrb[33].mxu0  ;;  %v3118_v3 = vld [vmem:[%s30558_s6 + $0x20] sm:$0xff] }
 0x2c4   :  { %v3109_v13 = vpop.f32.mrb[34].mxu0  ;;  %v3130_v5 = vld [vmem:[%s30558_s6 + $0x80] sm:$0xff]  ;;  %v3119_v9 = vld [vmem:[%s30558_s6 + $0x28] sm:$0xff] }
 0x2c5   :  { %v3112_v15 = vmax.f32 %v3107_v8, 0.0  ;;  %v22837_v16 = vpop.f32.mrb[35].mxu0  ;;  %v19720_v8 = vcombine.high %v3285_v63, %v3297_v0  ;;  %v19719_v13 = vcombine.low %v3285_v63, %v3297_v0  ;;  %v19553_v21 = vcombine.low %v3118_v3, %v3130_v5  ;;  %v3286_v0 = vld [vmem:[%s30558_s6 + $0x560] sm:$0xff] }
 0x2c6   :  { %v19554_v16 = vcombine.high %v3118_v3, %v3130_v5  ;;  %v19555_v23 = vcombine.low %v3119_v9, %v3131_v11  ;;  %v3287_v5 = vld [vmem:[%s30558_s6 + $0x568] sm:$0xff] }
 0x2c7   :  { %v25578_v17 = vpack.c.bf16 %v3112_v15, %v3112_v15  ;;  %v3154_v15 = vld [vmem:[%s30558_s6 + $0x140] sm:$0xff] }
 0x2c9   :  { %4425 = vmatmul.mubr.bf16.vlgmr.msra.gmra.mrb[32].mxu1 %v25578_v17  ;;  %4466 = vmatmul.mubr.bf16.vlgmr.msra.gmra.mrb[36].mxu0 %v25578_v17 }
 0x2ca   :  { %4475 = vmatpush1.bf16.msra.mxu1 %v19549_v62  ;;  %4516 = vmatpush1.bf16.msra.mxu0 %v19551_v1  ;;  %v19696_v62 = vcombine.high %v3261_v54, %v3273_v55  ;;  %v19693_v1 = vcombine.low %v3260_v50, %v3272_v51  ;;  %v3239_v51 = vld [vmem:[%s30558_s6 + $0x3e8] sm:$0xff]  ;;  %v3262_v55 = vld [vmem:[%s30558_s6 + $0x4a0] sm:$0xff] }
 0x2cb   :  { %4476 = vmatprep.subr.bf16.mxu1 %v19574_v18  ;;  %4517 = vmatprep.subr.bf16.mxu0 %v19576_v19  ;;  %v19556_v18 = vcombine.high %v3119_v9, %v3131_v11  ;;  %v3143_v19 = vld [vmem:[%s30558_s6 + $0xe8] sm:$0xff]  ;;  %v3120_v11 = vld [vmem:[%s30558_s6 + $0x30] sm:$0xff] }
 0x2cc   :  { %4506 = vmatprep.mubr.bf16.mxu1 %v24460_v61  ;;  %4547 = vmatprep.mubr.bf16.mxu0 %v24460_v61  ;;  %v19580_v27 = vcombine.high %v3143_v19, %v3155_v20  ;;  %v19579_v31 = vcombine.low %v3143_v19, %v3155_v20  ;;  %v3144_v20 = vld [vmem:[%s30558_s6 + $0xf0] sm:$0xff] }
 0x2ce   :  { %4477 = vmatpush1.bf16.msra.mxu1 %v19573_v25  ;;  %4518 = vmatpush1.bf16.msra.mxu0 %v19575_v26  ;;  %v3178_v25 = vld [vmem:[%s30558_s6 + $0x200] sm:$0xff]  ;;  %v19578_v26 = vcombine.high %v3142_v14, %v3154_v15 }
 0x2cf   :  { %4478 = vmatprep.subr.bf16.mxu1 %v19598_v29  ;;  %4519 = vmatprep.subr.bf16.mxu0 %v19600_v30  ;;  %v3179_v29 = vld [vmem:[%s30558_s6 + $0x208] sm:$0xff]  ;;  %v19577_v30 = vcombine.low %v3142_v14, %v3154_v15  ;;  %v3132_v14 = vld [vmem:[%s30558_s6 + $0x90] sm:$0xff]  ;;  %v3121_v15 = vld [vmem:[%s30558_s6 + $0x38] sm:$0xff] }
 0x2d0   :  { %v19604_v35 = vcombine.high %v3167_v28, %v3179_v29  ;;  %v19603_v7 = vcombine.low %v3167_v28, %v3179_v29  ;;  %v3168_v29 = vld [vmem:[%s30558_s6 + $0x1b0] sm:$0xff] }
 0x2d2   :  { %4479 = vmatpush1.bf16.msra.mxu1 %v19597_v32  ;;  %4520 = vmatpush1.bf16.msra.mxu0 %v19599_v34  ;;  %v3202_v32 = vld [vmem:[%s30558_s6 + $0x2c0] sm:$0xff]  ;;  %v19602_v34 = vcombine.high %v3166_v24, %v3178_v25 }
 0x2d3   :  { %4480 = vmatprep.subr.bf16.mxu1 %v19622_v37  ;;  %4521 = vmatprep.subr.bf16.mxu0 %v19624_v4  ;;  %v3203_v37 = vld [vmem:[%s30558_s6 + $0x2c8] sm:$0xff]  ;;  %v19601_v4 = vcombine.low %v3166_v24, %v3178_v25  ;;  %v3145_v25 = vld [vmem:[%s30558_s6 + $0xf8] sm:$0xff] }
 0x2d4   :  { %v19628_v40 = vcombine.high %v3191_v36, %v3203_v37  ;;  %v19627_v45 = vcombine.low %v3191_v36, %v3203_v37  ;;  %v3192_v37 = vld [vmem:[%s30558_s6 + $0x270] sm:$0xff] }
 0x2d6   :  { %4481 = vmatpush1.bf16.msra.mxu1 %v19621_v38  ;;  %4522 = vmatpush1.bf16.msra.mxu0 %v19623_v39  ;;  %v3226_v38 = vld [vmem:[%s30558_s6 + $0x380] sm:$0xff]  ;;  %v19626_v39 = vcombine.high %v3190_v22, %v3202_v32 }
 0x2d7   :  { %4482 = vmatprep.subr.bf16.mxu1 %v19646_v43  ;;  %4523 = vmatprep.subr.bf16.mxu0 %v19648_v44  ;;  %v3227_v43 = vld [vmem:[%s30558_s6 + $0x388] sm:$0xff]  ;;  %v19625_v44 = vcombine.low %v3190_v22, %v3202_v32  ;;  %v3169_v32 = vld [vmem:[%s30558_s6 + $0x1b8] sm:$0xff] }
 0x2d8   :  { %v19652_v50 = vcombine.high %v3215_v42, %v3227_v43  ;;  %v19651_v54 = vcombine.low %v3215_v42, %v3227_v43  ;;  %v3216_v43 = vld [vmem:[%s30558_s6 + $0x330] sm:$0xff] }
 0x2da   :  { %4483 = vmatpush1.bf16.msra.mxu1 %v19645_v48  ;;  %4524 = vmatpush1.bf16.msra.mxu0 %v19647_v49  ;;  %v3250_v48 = vld [vmem:[%s30558_s6 + $0x440] sm:$0xff]  ;;  %v19650_v49 = vcombine.high %v3214_v10, %v3226_v38 }
 0x2db   :  { %4484 = vmatprep.subr.bf16.mxu1 %v19670_v52  ;;  %4525 = vmatprep.subr.bf16.mxu0 %v19672_v53  ;;  %v3251_v52 = vld [vmem:[%s30558_s6 + $0x448] sm:$0xff]  ;;  %v19649_v53 = vcombine.low %v3214_v10, %v3226_v38  ;;  %v3193_v38 = vld [vmem:[%s30558_s6 + $0x278] sm:$0xff] }
 0x2dc   :  { %v19676_v58 = vcombine.high %v3239_v51, %v3251_v52  ;;  %v19675_v63 = vcombine.low %v3239_v51, %v3251_v52  ;;  %v3240_v52 = vld [vmem:[%s30558_s6 + $0x3f0] sm:$0xff] }
 0x2de   :  { %4485 = vmatpush1.bf16.msra.mxu1 %v19669_v56  ;;  %4526 = vmatpush1.bf16.msra.mxu0 %v19671_v57  ;;  %v3274_v56 = vld [vmem:[%s30558_s6 + $0x500] sm:$0xff]  ;;  %v19674_v57 = vcombine.high %v3238_v47, %v3250_v48 }
 0x2df   :  { %4486 = vmatprep.subr.bf16.mxu1 %v19694_v60  ;;  %4527 = vmatprep.subr.bf16.mxu0 %v19696_v62  ;;  %v3275_v60 = vld [vmem:[%s30558_s6 + $0x508] sm:$0xff]  ;;  %v19673_v62 = vcombine.low %v3238_v47, %v3250_v48  ;;  %v3217_v48 = vld [vmem:[%s30558_s6 + $0x338] sm:$0xff] }
 0x2e0   :  { %v19700_v3 = vcombine.high %v3263_v59, %v3275_v60  ;;  %v19699_v9 = vcombine.low %v3263_v59, %v3275_v60  ;;  %v3264_v60 = vld [vmem:[%s30558_s6 + $0x4b0] sm:$0xff] }
 0x2e2   :  { %4487 = vmatpush1.bf16.msra.mxu1 %v19693_v1  ;;  %4528 = vmatpush1.bf16.msra.mxu0 %v19695_v2  ;;  %v3298_v1 = vld [vmem:[%s30558_s6 + $0x5c0] sm:$0xff]  ;;  %v19698_v2 = vcombine.high %v3262_v55, %v3274_v56 }
 0x2e3   :  { %4488 = vmatprep.subr.bf16.mxu1 %v19718_v6  ;;  %4529 = vmatprep.subr.bf16.mxu0 %v19720_v8  ;;  %v3299_v6 = vld [vmem:[%s30558_s6 + $0x5c8] sm:$0xff]  ;;  %v19697_v8 = vcombine.low %v3262_v55, %v3274_v56  ;;  %v3241_v56 = vld [vmem:[%s30558_s6 + $0x3f8] sm:$0xff] }
 0x2e4   :  { %v19723_v19 = vcombine.low %v3287_v5, %v3299_v6 }
 0x2e6   :  { %4489 = vmatpush1.bf16.msra.mxu1 %v19717_v12  ;;  %4530 = vmatpush1.bf16.msra.mxu0 %v19719_v13  ;;  %v19722_v12 = vcombine.high %v3286_v0, %v3298_v1  ;;  %v19724_v13 = vcombine.high %v3287_v5, %v3299_v6  ;;  %v3288_v6 = vld [vmem:[%s30558_s6 + $0x570] sm:$0xff] }
 0x2e7   :  { %4556 = vmatprep.subr.bf16.mxu1 %v19554_v16  ;;  %4597 = vmatprep.subr.bf16.mxu0 %v19556_v18  ;;  %v3133_v16 = vld [vmem:[%s30558_s6 + $0x98] sm:$0xff]  ;;  %v19721_v18 = vcombine.low %v3286_v0, %v3298_v1 }
 0x2e8   :  { %v19560_v24 = vcombine.high %v3121_v15, %v3133_v16  ;;  %v19559_v28 = vcombine.low %v3121_v15, %v3133_v16  ;;  %v3265_v1 = vld [vmem:[%s30558_s6 + $0x4b8] sm:$0xff]  ;;  %v3122_v16 = vld [vmem:[%s30558_s6 + $0x40] sm:$0xff] }
 0x2e9   :  { %4507 = vmatmul.mubr.bf16.vlgmr.msra.gmra.mrb[36].mxu1 %v25578_v17  ;;  %4548 = vmatmul.mubr.bf16.vlgmr.msra.gmra.mrb[40].mxu0 %v25578_v17 }
 0x2ea   :  { %4557 = vmatpush1.bf16.msra.mxu1 %v19553_v21  ;;  %4598 = vmatpush1.bf16.msra.mxu0 %v19555_v23  ;;  %v3156_v21 = vld [vmem:[%s30558_s6 + $0x150] sm:$0xff]  ;;  %v19558_v23 = vcombine.high %v3120_v11, %v3132_v14 }
 0x2eb   :  { %4558 = vmatprep.subr.bf16.mxu1 %v19578_v26  ;;  %4599 = vmatprep.subr.bf16.mxu0 %v19580_v27  ;;  %v3157_v26 = vld [vmem:[%s30558_s6 + $0x158] sm:$0xff]  ;;  %v19557_v27 = vcombine.low %v3120_v11, %v3132_v14  ;;  %v3300_v11 = vld [vmem:[%s30558_s6 + $0x5d0] sm:$0xff] }
 0x2ec   :  { %4588 = vmatprep.mubr.bf16.mxu1 %v24460_v61  ;;  %4629 = vmatprep.mubr.bf16.mxu0 %v24460_v61  ;;  %v19584_v22 = vcombine.high %v3145_v25, %v3157_v26  ;;  %v19583_v36 = vcombine.low %v3145_v25, %v3157_v26  ;;  %v3146_v26 = vld [vmem:[%s30558_s6 + $0x100] sm:$0xff] }
 0x2ee   :  { %4559 = vmatpush1.bf16.msra.mxu1 %v19577_v30  ;;  %4600 = vmatpush1.bf16.msra.mxu0 %v19579_v31  ;;  %v3180_v30 = vld [vmem:[%s30558_s6 + $0x210] sm:$0xff]  ;;  %v19582_v31 = vcombine.high %v3144_v20, %v3156_v21 }
 0x2ef   :  { %4560 = vmatprep.subr.bf16.mxu1 %v19602_v34  ;;  %4601 = vmatprep.subr.bf16.mxu0 %v19604_v35  ;;  %v3181_v34 = vld [vmem:[%s30558_s6 + $0x218] sm:$0xff]  ;;  %v19581_v35 = vcombine.low %v3144_v20, %v3156_v21  ;;  %v3123_v21 = vld [vmem:[%s30558_s6 + $0x48] sm:$0xff] }
 0x2f0   :  { %v19608_v10 = vcombine.high %v3169_v32, %v3181_v34  ;;  %v19607_v42 = vcombine.low %v3169_v32, %v3181_v34  ;;  %v3170_v34 = vld [vmem:[%s30558_s6 + $0x1c0] sm:$0xff] }
 0x2f2   :  { %4561 = vmatpush1.bf16.msra.mxu1 %v19601_v4  ;;  %4602 = vmatpush1.bf16.msra.mxu0 %v19603_v7  ;;  %v3204_v4 = vld [vmem:[%s30558_s6 + $0x2d0] sm:$0xff]  ;;  %v19606_v7 = vcombine.high %v3168_v29, %v3180_v30 }
 0x2f3   :  { %4562 = vmatprep.subr.bf16.mxu1 %v19626_v39  ;;  %4603 = vmatprep.subr.bf16.mxu0 %v19628_v40  ;;  %v3205_v39 = vld [vmem:[%s30558_s6 + $0x2d8] sm:$0xff]  ;;  %v19605_v40 = vcombine.low %v3168_v29, %v3180_v30  ;;  %v3147_v30 = vld [vmem:[%s30558_s6 + $0x108] sm:$0xff] }
 0x2f4   :  { %v19632_v47 = vcombine.high %v3193_v38, %v3205_v39  ;;  %v19631_v51 = vcombine.low %v3193_v38, %v3205_v39  ;;  %v3194_v39 = vld [vmem:[%s30558_s6 + $0x280] sm:$0xff] }
 0x2f6   :  { %4563 = vmatpush1.bf16.msra.mxu1 %v19625_v44  ;;  %4604 = vmatpush1.bf16.msra.mxu0 %v19627_v45  ;;  %v3228_v44 = vld [vmem:[%s30558_s6 + $0x390] sm:$0xff]  ;;  %v19630_v45 = vcombine.high %v3192_v37, %v3204_v4 }
 0x2f7   :  { %4564 = vmatprep.subr.bf16.mxu1 %v19650_v49  ;;  %4605 = vmatprep.subr.bf16.mxu0 %v19652_v50  ;;  %v3229_v49 = vld [vmem:[%s30558_s6 + $0x398] sm:$0xff]  ;;  %v19629_v50 = vcombine.low %v3192_v37, %v3204_v4  ;;  %v3171_v4 = vld [vmem:[%s30558_s6 + $0x1c8] sm:$0xff] }
 0x2f8   :  { %v19656_v55 = vcombine.high %v3217_v48, %v3229_v49  ;;  %v19655_v59 = vcombine.low %v3217_v48, %v3229_v49  ;;  %v3218_v49 = vld [vmem:[%s30558_s6 + $0x340] sm:$0xff] }
 0x2fa   :  { %4565 = vmatpush1.bf16.msra.mxu1 %v19649_v53  ;;  %4606 = vmatpush1.bf16.msra.mxu0 %v19651_v54  ;;  %v3252_v53 = vld [vmem:[%s30558_s6 + $0x450] sm:$0xff]  ;;  %v19654_v54 = vcombine.high %v3216_v43, %v3228_v44 }
 0x2fb   :  { %4566 = vmatprep.subr.bf16.mxu1 %v19674_v57  ;;  %4607 = vmatprep.subr.bf16.mxu0 %v19676_v58  ;;  %v3253_v57 = vld [vmem:[%s30558_s6 + $0x458] sm:$0xff]  ;;  %v19653_v58 = vcombine.low %v3216_v43, %v3228_v44  ;;  %v3195_v44 = vld [vmem:[%s30558_s6 + $0x288] sm:$0xff] }
 0x2fc   :  { %v19680_v0 = vcombine.high %v3241_v56, %v3253_v57  ;;  %v19679_v5 = vcombine.low %v3241_v56, %v3253_v57  ;;  %v3242_v57 = vld [vmem:[%s30558_s6 + $0x400] sm:$0xff] }
 0x2fe   :  { %4567 = vmatpush1.bf16.msra.mxu1 %v19673_v62  ;;  %4608 = vmatpush1.bf16.msra.mxu0 %v19675_v63  ;;  %v3276_v62 = vld [vmem:[%s30558_s6 + $0x510] sm:$0xff]  ;;  %v19678_v63 = vcombine.high %v3240_v52, %v3252_v53 }
 0x2ff   :  { %4568 = vmatprep.subr.bf16.mxu1 %v19698_v2  ;;  %4609 = vmatprep.subr.bf16.mxu0 %v19700_v3  ;;  %v3277_v2 = vld [vmem:[%s30558_s6 + $0x518] sm:$0xff]  ;;  %v19677_v3 = vcombine.low %v3240_v52, %v3252_v53  ;;  %v19701_v14 = vcombine.low %v3264_v60, %v3276_v62  ;;  %v3219_v53 = vld [vmem:[%s30558_s6 + $0x348] sm:$0xff] }
 0x300   :  { %v19703_v15 = vcombine.low %v3265_v1, %v3277_v2 }
 0x302   :  { %4569 = vmatpush1.bf16.msra.mxu1 %v19697_v8  ;;  %4610 = vmatpush1.bf16.msra.mxu0 %v19699_v9  ;;  %v19702_v8 = vcombine.high %v3264_v60, %v3276_v62  ;;  %v19704_v9 = vcombine.high %v3265_v1, %v3277_v2  ;;  %v3243_v62 = vld [vmem:[%s30558_s6 + $0x408] sm:$0xff]  ;;  %v3266_v2 = vld [vmem:[%s30558_s6 + $0x4c0] sm:$0xff] }
 0x303   :  { %4570 = vmatprep.subr.bf16.mxu1 %v19722_v12  ;;  %4611 = vmatprep.subr.bf16.mxu0 %v19724_v13  ;;  %v3289_v12 = vld [vmem:[%s30558_s6 + $0x578] sm:$0xff] }
 0x304   :  { %v3301_v13 = vld [vmem:[%s30558_s6 + $0x5d8] sm:$0xff] }
 0x305   :  { %v19728_v20 = vcombine.high %v3289_v12, %v3301_v13  ;;  %v19727_v25 = vcombine.low %v3289_v12, %v3301_v13  ;;  %v3290_v13 = vld [vmem:[%s30558_s6 + $0x580] sm:$0xff] }
 0x306   :  { %4571 = vmatpush1.bf16.msra.mxu1 %v19721_v18  ;;  %4612 = vmatpush1.bf16.msra.mxu0 %v19723_v19  ;;  %v3134_v18 = vld [vmem:[%s30558_s6 + $0xa0] sm:$0xff]  ;;  %v19726_v19 = vcombine.high %v3288_v6, %v3300_v11 }
 0x307   :  { %4638 = vmatprep.subr.bf16.mxu1 %v19558_v23  ;;  %4679 = vmatprep.subr.bf16.mxu0 %v19560_v24  ;;  %v3135_v23 = vld [vmem:[%s30558_s6 + $0xa8] sm:$0xff]  ;;  %v19725_v24 = vcombine.low %v3288_v6, %v3300_v11 }
 0x308   :  { %v19564_v29 = vcombine.high %v3123_v21, %v3135_v23  ;;  %v19563_v32 = vcombine.low %v3123_v21, %v3135_v23  ;;  %v3124_v23 = vld [vmem:[%s30558_s6 + $0x50] sm:$0xff] }
 0x309   :  { %4589 = vmatmul.mubr.bf16.vlgmr.msra.gmra.mrb[40].mxu1 %v25578_v17  ;;  %4630 = vmatmul.mubr.bf16.vlgmr.msra.gmra.mrb[44].mxu0 %v25578_v17 }
 0x30a   :  { %4639 = vmatpush1.bf16.msra.mxu1 %v19557_v27  ;;  %4680 = vmatpush1.bf16.msra.mxu0 %v19559_v28  ;;  %v3158_v27 = vld [vmem:[%s30558_s6 + $0x160] sm:$0xff]  ;;  %v19562_v28 = vcombine.high %v3122_v16, %v3134_v18 }
 0x30b   :  { %4640 = vmatprep.subr.bf16.mxu1 %v19582_v31  ;;  %4681 = vmatprep.subr.bf16.mxu0 %v19584_v22  ;;  %v3159_v31 = vld [vmem:[%s30558_s6 + $0x168] sm:$0xff]  ;;  %v19561_v22 = vcombine.low %v3122_v16, %v3134_v18  ;;  %v3302_v16 = vld [vmem:[%s30558_s6 + $0x5e0] sm:$0xff] }
 0x30c   :  { %4670 = vmatprep.mubr.bf16.mxu1 %v24460_v61  ;;  %4711 = vmatprep.mubr.bf16.mxu0 %v24460_v61  ;;  %v19588_v37 = vcombine.high %v3147_v30, %v3159_v31  ;;  %v19587_v38 = vcombine.low %v3147_v30, %v3159_v31  ;;  %v3291_v18 = vld [vmem:[%s30558_s6 + $0x588] sm:$0xff]  ;;  %v3148_v31 = vld [vmem:[%s30558_s6 + $0x110] sm:$0xff] }
 0x30e   :  { %4641 = vmatpush1.bf16.msra.mxu1 %v19581_v35  ;;  %4682 = vmatpush1.bf16.msra.mxu0 %v19583_v36  ;;  %v3182_v35 = vld [vmem:[%s30558_s6 + $0x220] sm:$0xff]  ;;  %v19586_v36 = vcombine.high %v3146_v26, %v3158_v27 }
 0x30f   :  { %4642 = vmatprep.subr.bf16.mxu1 %v19606_v7  ;;  %4683 = vmatprep.subr.bf16.mxu0 %v19608_v10  ;;  %v3183_v7 = vld [vmem:[%s30558_s6 + $0x228] sm:$0xff]  ;;  %v19585_v10 = vcombine.low %v3146_v26, %v3158_v27  ;;  %v3136_v26 = vld [vmem:[%s30558_s6 + $0xb0] sm:$0xff]  ;;  %v3125_v27 = vld [vmem:[%s30558_s6 + $0x58] sm:$0xff] }
 0x310   :  { %v19612_v43 = vcombine.high %v3171_v4, %v3183_v7  ;;  %v19611_v48 = vcombine.low %v3171_v4, %v3183_v7  ;;  %v3172_v7 = vld [vmem:[%s30558_s6 + $0x1d0] sm:$0xff] }
 0x312   :  { %4643 = vmatpush1.bf16.msra.mxu1 %v19605_v40  ;;  %4684 = vmatpush1.bf16.msra.mxu0 %v19607_v42  ;;  %v3206_v40 = vld [vmem:[%s30558_s6 + $0x2e0] sm:$0xff]  ;;  %v19610_v42 = vcombine.high %v3170_v34, %v3182_v35 }
 0x313   :  { %4644 = vmatprep.subr.bf16.mxu1 %v19630_v45  ;;  %4685 = vmatprep.subr.bf16.mxu0 %v19632_v47  ;;  %v3207_v45 = vld [vmem:[%s30558_s6 + $0x2e8] sm:$0xff]  ;;  %v19609_v47 = vcombine.low %v3170_v34, %v3182_v35  ;;  %v3149_v35 = vld [vmem:[%s30558_s6 + $0x118] sm:$0xff] }
 0x314   :  { %v19636_v52 = vcombine.high %v3195_v44, %v3207_v45  ;;  %v19635_v56 = vcombine.low %v3195_v44, %v3207_v45  ;;  %v3196_v45 = vld [vmem:[%s30558_s6 + $0x290] sm:$0xff] }
 0x316   :  { %4645 = vmatpush1.bf16.msra.mxu1 %v19629_v50  ;;  %4686 = vmatpush1.bf16.msra.mxu0 %v19631_v51  ;;  %v3230_v50 = vld [vmem:[%s30558_s6 + $0x3a0] sm:$0xff]  ;;  %v19634_v51 = vcombine.high %v3194_v39, %v3206_v40 }
 0x317   :  { %4646 = vmatprep.subr.bf16.mxu1 %v19654_v54  ;;  %4687 = vmatprep.subr.bf16.mxu0 %v19656_v55  ;;  %v3231_v54 = vld [vmem:[%s30558_s6 + $0x3a8] sm:$0xff]  ;;  %v19633_v55 = vcombine.low %v3194_v39, %v3206_v40  ;;  %v3173_v40 = vld [vmem:[%s30558_s6 + $0x1d8] sm:$0xff] }
 0x318   :  { %v19660_v60 = vcombine.high %v3219_v53, %v3231_v54  ;;  %v19659_v1 = vcombine.low %v3219_v53, %v3231_v54  ;;  %v3220_v54 = vld [vmem:[%s30558_s6 + $0x350] sm:$0xff] }
 0x31a   :  { %4647 = vmatpush1.bf16.msra.mxu1 %v19653_v58  ;;  %4688 = vmatpush1.bf16.msra.mxu0 %v19655_v59  ;;  %v3254_v58 = vld [vmem:[%s30558_s6 + $0x460] sm:$0xff]  ;;  %v19658_v59 = vcombine.high %v3218_v49, %v3230_v50 }
 0x31b   :  { %4648 = vmatprep.subr.bf16.mxu1 %v19678_v63  ;;  %4689 = vmatprep.subr.bf16.mxu0 %v19680_v0  ;;  %v3255_v63 = vld [vmem:[%s30558_s6 + $0x468] sm:$0xff]  ;;  %v19657_v0 = vcombine.low %v3218_v49, %v3230_v50  ;;  %v19681_v11 = vcombine.low %v3242_v57, %v3254_v58  ;;  %v3197_v50 = vld [vmem:[%s30558_s6 + $0x298] sm:$0xff] }
 0x31c   :  { %v19684_v6 = vcombine.high %v3243_v62, %v3255_v63  ;;  %v19683_v12 = vcombine.low %v3243_v62, %v3255_v63  ;;  %v3244_v63 = vld [vmem:[%s30558_s6 + $0x410] sm:$0xff] }
 0x31e   :  { %4649 = vmatpush1.bf16.msra.mxu1 %v19677_v3  ;;  %4690 = vmatpush1.bf16.msra.mxu0 %v19679_v5  ;;  %v3278_v3 = vld [vmem:[%s30558_s6 + $0x520] sm:$0xff]  ;;  %v19682_v5 = vcombine.high %v3242_v57, %v3254_v58  ;;  %v3221_v58 = vld [vmem:[%s30558_s6 + $0x358] sm:$0xff] }
 0x31f   :  { %4650 = vmatprep.subr.bf16.mxu1 %v19702_v8  ;;  %4691 = vmatprep.subr.bf16.mxu0 %v19704_v9  ;;  %v3267_v8 = vld [vmem:[%s30558_s6 + $0x4c8] sm:$0xff] }
 0x320   :  { %v3279_v9 = vld [vmem:[%s30558_s6 + $0x528] sm:$0xff] }
 0x321   :  { %v19707_v21 = vcombine.low %v3267_v8, %v3279_v9 }
 0x322   :  { %4651 = vmatpush1.bf16.msra.mxu1 %v19701_v14  ;;  %4692 = vmatpush1.bf16.msra.mxu0 %v19703_v15  ;;  %v19706_v14 = vcombine.high %v3266_v2, %v3278_v3  ;;  %v19708_v15 = vcombine.high %v3267_v8, %v3279_v9  ;;  %v3268_v9 = vld [vmem:[%s30558_s6 + $0x4d0] sm:$0xff] }
 0x323   :  { %4652 = vmatprep.subr.bf16.mxu1 %v19726_v19  ;;  %4693 = vmatprep.subr.bf16.mxu0 %v19728_v20  ;;  %v3303_v19 = vld [vmem:[%s30558_s6 + $0x5e8] sm:$0xff]  ;;  %v19705_v20 = vcombine.low %v3266_v2, %v3278_v3  ;;  %v3245_v3 = vld [vmem:[%s30558_s6 + $0x418] sm:$0xff] }
 0x324   :  { %v19731_v30 = vcombine.low %v3291_v18, %v3303_v19 }
 0x326   :  { %4653 = vmatpush1.bf16.msra.mxu1 %v19725_v24  ;;  %4694 = vmatpush1.bf16.msra.mxu0 %v19727_v25  ;;  %v19730_v24 = vcombine.high %v3290_v13, %v3302_v16  ;;  %v19732_v25 = vcombine.high %v3291_v18, %v3303_v19 }
 0x327   :  { %4720 = vmatprep.subr.bf16.mxu1 %v19562_v28  ;;  %4761 = vmatprep.subr.bf16.mxu0 %v19564_v29  ;;  %v3137_v28 = vld [vmem:[%s30558_s6 + $0xb8] sm:$0xff]  ;;  %v19729_v29 = vcombine.low %v3290_v13, %v3302_v16  ;;  %v26047_v16 = vld [vmem:[%s30589_s4] sm:$0xff] }
 0x328   :  { %v19568_v34 = vcombine.high %v3125_v27, %v3137_v28  ;;  %v19567_v4 = vcombine.low %v3125_v27, %v3137_v28  ;;  %v26063_v27 = vrot.slane %v26047_v16, %v24684_v41 }
 0x329   :  { %4671 = vmatmul.mubr.bf16.vlgmr.msra.gmra.mrb[44].mxu1 %v25578_v17  ;;  %4712 = vmatmul.mubr.bf16.vlgmr.msra.gmra.mrb[48].mxu0 %v25578_v17 }
 0x32a   :  { %4721 = vmatpush1.bf16.msra.mxu1 %v19561_v22  ;;  %4762 = vmatpush1.bf16.msra.mxu0 %v19563_v32  ;;  %v3160_v22 = vld [vmem:[%s30558_s6 + $0x170] sm:$0xff]  ;;  %v19566_v32 = vcombine.high %v3124_v23, %v3136_v26 }
 0x32b   :  { %4722 = vmatprep.subr.bf16.mxu1 %v19586_v36  ;;  %4763 = vmatprep.subr.bf16.mxu0 %v19588_v37  ;;  %v3161_v36 = vld [vmem:[%s30558_s6 + $0x178] sm:$0xff]  ;;  %v19565_v37 = vcombine.low %v3124_v23, %v3136_v26 }
 0x32c   :  { %4752 = vmatprep.mubr.bf16.mxu1 %v24460_v61  ;;  %4793 = vmatprep.mubr.bf16.mxu0 %v24460_v61  ;;  %v19592_v39 = vcombine.high %v3149_v35, %v3161_v36  ;;  %v19591_v44 = vcombine.low %v3149_v35, %v3161_v36  ;;  %v3305_v26 = vld [vmem:[%s30558_s6 + $0x5f8] sm:$0xff] }
 0x32e   :  { %4723 = vmatpush1.bf16.msra.mxu1 %v19585_v10  ;;  %4764 = vmatpush1.bf16.msra.mxu0 %v19587_v38  ;;  %v3184_v10 = vld [vmem:[%s30558_s6 + $0x230] sm:$0xff]  ;;  %v19590_v38 = vcombine.high %v3148_v31, %v3160_v22 }
 0x32f   :  { %4724 = vmatprep.subr.bf16.mxu1 %v19610_v42  ;;  %4765 = vmatprep.subr.bf16.mxu0 %v19612_v43  ;;  %v3185_v42 = vld [vmem:[%s30558_s6 + $0x238] sm:$0xff]  ;;  %v19589_v43 = vcombine.low %v3148_v31, %v3160_v22  ;;  %v7124_v22 = vcombine.high %v26063_v27, %v26063_v27 }
 0x330   :  { %v19616_v49 = vcombine.high %v3173_v40, %v3185_v42  ;;  %v19615_v53 = vcombine.low %v3173_v40, %v3185_v42  ;;  %v23201_v40 = vld [vmem:[%s30560_s8 + $0x8] sm:$0xff]  }
 0x331   :  { %v23202_v42 = vld [vmem:[%s30560_s8 + $0x88] sm:$0xff]  }
 0x332   :  { %4725 = vmatpush1.bf16.msra.mxu1 %v19609_v47  ;;  %4766 = vmatpush1.bf16.msra.mxu0 %v19611_v48  ;;  %v3208_v47 = vld [vmem:[%s30558_s6 + $0x2f0] sm:$0xff]  ;;  %v19614_v48 = vcombine.high %v3172_v7, %v3184_v10 }
 0x333   :  { %4726 = vmatprep.subr.bf16.mxu1 %v19634_v51  ;;  %4767 = vmatprep.subr.bf16.mxu0 %v19636_v52  ;;  %v3209_v51 = vld [vmem:[%s30558_s6 + $0x2f8] sm:$0xff]  ;;  %v19613_v52 = vcombine.low %v3172_v7, %v3184_v10  ;;  %v7146_v7 = vrot.slane %v7124_v22, %v24684_v41  ;;  %v23199_v10 = vld [vmem:[%s30560_s8 + $0x48] sm:$0xff]  }
 0x334   :  { %v19640_v57 = vcombine.high %v3197_v50, %v3209_v51  ;;  %v19639_v62 = vcombine.low %v3197_v50, %v3209_v51  ;;  %v23209_v50 = vld [vmem:[%s30560_s8 + $0x18] sm:$0xff]  }
 0x335   :  { %v23210_v51 = vld [vmem:[%s30560_s8 + $0x98] sm:$0xff]  }
 0x336   :  { %4727 = vmatpush1.bf16.msra.mxu1 %v19633_v55  ;;  %4768 = vmatpush1.bf16.msra.mxu0 %v19635_v56  ;;  %v3232_v55 = vld [vmem:[%s30558_s6 + $0x3b0] sm:$0xff]  ;;  %v19638_v56 = vcombine.high %v3196_v45, %v3208_v47  ;;  %v23242_v22 = vld [vmem:[%s30560_s8 + $0x198] sm:$0xff]  }
 0x337   :  { %4728 = vmatprep.subr.bf16.mxu1 %v19658_v59  ;;  %4769 = vmatprep.subr.bf16.mxu0 %v19660_v60  ;;  %v3233_v59 = vld [vmem:[%s30558_s6 + $0x3b8] sm:$0xff]  ;;  %v19637_v60 = vcombine.low %v3196_v45, %v3208_v47  ;;  %v23205_v45 = vld [vmem:[%s30560_s8 + $0x10] sm:$0xff]  }
 0x338   :  { %v19664_v2 = vcombine.high %v3221_v58, %v3233_v59  ;;  %v19663_v8 = vcombine.low %v3221_v58, %v3233_v59  ;;  %v23206_v47 = vld [vmem:[%s30560_s8 + $0x90] sm:$0xff]   ;;  %v23217_v58 = vld [vmem:[%s30560_s8 + $0x28] sm:$0xff]  }
 0x339   :  { %v23218_v59 = vld [vmem:[%s30560_s8 + $0xa8] sm:$0xff]  }
 0x33a   :  { %4729 = vmatpush1.bf16.msra.mxu1 %v19657_v0  ;;  %4770 = vmatpush1.bf16.msra.mxu0 %v19659_v1  ;;  %v3256_v0 = vld [vmem:[%s30558_s6 + $0x470] sm:$0xff]  ;;  %v19662_v1 = vcombine.high %v3220_v54, %v3232_v55 }
 0x33b   :  { %4730 = vmatprep.subr.bf16.mxu1 %v19682_v5  ;;  %4771 = vmatprep.subr.bf16.mxu0 %v19684_v6  ;;  %v3257_v5 = vld [vmem:[%s30558_s6 + $0x478] sm:$0xff]  ;;  %v19661_v6 = vcombine.low %v3220_v54, %v3232_v55  ;;  %v19685_v18 = vcombine.low %v3244_v63, %v3256_v0  ;;  %v23213_v54 = vld [vmem:[%s30560_s8 + $0x20] sm:$0xff]  }
 0x33c   :  { %v19688_v13 = vcombine.high %v3245_v3, %v3257_v5  ;;  %v19687_v19 = vcombine.low %v3245_v3, %v3257_v5  ;;  %v23214_v55 = vld [vmem:[%s30560_s8 + $0xa0] sm:$0xff]   ;;  %v23223_v3 = vld [vmem:[%s30560_s8 + $0x78] sm:$0xff]  }
 0x33d   :  { %v23224_v5 = vld [vmem:[%s30560_s8 + $0xf8] sm:$0xff]  }
 0x33e   :  { %4731 = vmatpush1.bf16.msra.mxu1 %v19681_v11  ;;  %4772 = vmatpush1.bf16.msra.mxu0 %v19683_v12  ;;  %v3280_v11 = vld [vmem:[%s30558_s6 + $0x530] sm:$0xff]  ;;  %v19686_v12 = vcombine.high %v3244_v63, %v3256_v0 }
 0x33f   :  { %4732 = vmatprep.subr.bf16.mxu1 %v19706_v14  ;;  %4773 = vmatprep.subr.bf16.mxu0 %v19708_v15  ;;  %v3269_v14 = vld [vmem:[%s30558_s6 + $0x4d8] sm:$0xff]  ;;  %v19710_v23 = vcombine.high %v3268_v9, %v3280_v11  ;;  %v19709_v28 = vcombine.low %v3268_v9, %v3280_v11  ;;  %v23220_v63 = vld [vmem:[%s30560_s8 + $0xf0] sm:$0xff]   ;;  %v7132_v11 = vrot.slane %v26063_v27, %v24684_v41 }
 0x340   :  { %v3281_v15 = vld [vmem:[%s30558_s6 + $0x538] sm:$0xff]  ;;  %v23221_v0 = vld [vmem:[%s30560_s8 + $0x30] sm:$0xff]  }
 0x341   :  { %v23237_v27 = vld [vmem:[%s30560_s8 + $0x110] sm:$0xff]  }
 0x342   :  { %4733 = vmatpush1.bf16.msra.mxu1 %v19705_v20  ;;  %4774 = vmatpush1.bf16.msra.mxu0 %v19707_v21  ;;  %v3292_v20 = vld [vmem:[%s30558_s6 + $0x590] sm:$0xff] }
 0x343   :  { %4734 = vmatprep.subr.bf16.mxu1 %v19730_v24  ;;  %4775 = vmatprep.subr.bf16.mxu0 %v19732_v25  ;;  %v3304_v21 = vld [vmem:[%s30558_s6 + $0x5f0] sm:$0xff]  ;;  %v19712_v24 = vcombine.high %v3269_v14, %v3281_v15  ;;  %v3293_v25 = vld [vmem:[%s30558_s6 + $0x598] sm:$0xff] }
 0x344   :  { %v19736_v31 = vcombine.high %v3293_v25, %v3305_v26  ;;  %v19733_v35 = vcombine.low %v3292_v20, %v3304_v21  ;;  %v19735_v36 = vcombine.low %v3293_v25, %v3305_v26  ;;  %v23235_v25 = vld [vmem:[%s30560_s8 + $0x150] sm:$0xff]  }
 0x345   :  { %v23236_v26 = vld [vmem:[%s30560_s8 + $0x1d0] sm:$0xff]  }
 0x346   :  { %4735 = vmatpush1.bf16.msra.mxu1 %v19729_v29  ;;  %4776 = vmatpush1.bf16.msra.mxu0 %v19731_v30  ;;  %v19711_v29 = vcombine.low %v3269_v14, %v3281_v15  ;;  %v19734_v30 = vcombine.high %v3292_v20, %v3304_v21  ;;  %v23229_v14 = vld [vmem:[%s30560_s8 + $0x100] sm:$0xff]   ;;  %v23232_v20 = vld [vmem:[%s30560_s8 + $0x1c8] sm:$0xff]  }
 0x347   :  { %4802 = vmatprep.subr.bf16.mxu1 %v19566_v32  ;;  %4843 = vmatprep.subr.bf16.mxu0 %v19568_v34  ;;  %v23195_v32 = vld [vmem:[%s30560_s8 + $0x40] sm:$0xff]  }
 0x348   :  { %v23196_v34 = vld [vmem:[%s30560_s8 + $0xc0] sm:$0xff]  }
 0x349   :  { %4753 = vmatmul.mubr.bf16.vlgmr.msra.gmra.mrb[48].mxu1 %v25578_v17  ;;  %4794 = vmatmul.mubr.bf16.vlgmr.msra.gmra.mrb[52].mxu0 %v25578_v17  ;;  %v23230_v15 = vld [vmem:[%s30560_s8 + $0x180] sm:$0xff]  }
 0x34a   :  { %4803 = vmatpush1.bf16.msra.mxu1 %v19565_v37  ;;  %4844 = vmatpush1.bf16.msra.mxu0 %v19567_v4  ;;  %v23197_v37 = vld [vmem:[%s30560_s8] sm:$0xff]  }
 0x34b   :  { %4804 = vmatprep.subr.bf16.mxu1 %v19590_v38  ;;  %4845 = vmatprep.subr.bf16.mxu0 %v19592_v39  ;;  %v23198_v4 = vld [vmem:[%s30560_s8 + $0x80] sm:$0xff]   ;;  %v23200_v38 = vld [vmem:[%s30560_s8 + $0xc8] sm:$0xff]   ;;  %v7156_v39 = vcombine.high %v7146_v7, %v7146_v7 }
 0x34c   :  { %4834 = vmatprep.mubr.bf16.mxu1 %v24460_v61  ;;  %4875 = vmatprep.mubr.bf16.mxu0 %v24460_v61 }
 0x34e   :  { %4805 = vmatpush1.bf16.msra.mxu1 %v19589_v43  ;;  %4846 = vmatpush1.bf16.msra.mxu0 %v19591_v44  ;;  %v23203_v43 = vld [vmem:[%s30560_s8 + $0x50] sm:$0xff]  }
 0x34f   :  { %4806 = vmatprep.subr.bf16.mxu1 %v19614_v48  ;;  %4847 = vmatprep.subr.bf16.mxu0 %v19616_v49  ;;  %v23204_v44 = vld [vmem:[%s30560_s8 + $0xd0] sm:$0xff]   ;;  %v23207_v48 = vld [vmem:[%s30560_s8 + $0x58] sm:$0xff]  }
 0x350   :  { %v23208_v49 = vld [vmem:[%s30560_s8 + $0xd8] sm:$0xff]  }
 0x352   :  { %4807 = vmatpush1.bf16.msra.mxu1 %v19613_v52  ;;  %4848 = vmatpush1.bf16.msra.mxu0 %v19615_v53  ;;  %v23211_v52 = vld [vmem:[%s30560_s8 + $0x60] sm:$0xff]  }
 0x353   :  { %4808 = vmatprep.subr.bf16.mxu1 %v19638_v56  ;;  %4849 = vmatprep.subr.bf16.mxu0 %v19640_v57  ;;  %v23212_v53 = vld [vmem:[%s30560_s8 + $0xe0] sm:$0xff]   ;;  %v23215_v56 = vld [vmem:[%s30560_s8 + $0x68] sm:$0xff]  }
 0x354   :  { %v23216_v57 = vld [vmem:[%s30560_s8 + $0xe8] sm:$0xff]  }
 0x356   :  { %4809 = vmatpush1.bf16.msra.mxu1 %v19637_v60  ;;  %4850 = vmatpush1.bf16.msra.mxu0 %v19639_v62  ;;  %v7109_v60 = vcombine.high %v26047_v16, %v26047_v16  ;;  %v23219_v62 = vld [vmem:[%s30560_s8 + $0x70] sm:$0xff]  }
 0x357   :  { %4810 = vmatprep.subr.bf16.mxu1 %v19662_v1  ;;  %4851 = vmatprep.subr.bf16.mxu0 %v19664_v2  ;;  %v23222_v1 = vld [vmem:[%s30560_s8 + $0xb0] sm:$0xff]  }
 0x358   :  { %v26157_v2 = vrot.slane %v7109_v60, %v24684_v41 }
 0x35a   :  { %4811 = vmatpush1.bf16.msra.mxu1 %v19661_v6  ;;  %4852 = vmatpush1.bf16.msra.mxu0 %v19663_v8  ;;  %v23225_v6 = vld [vmem:[%s30560_s8 + $0x38] sm:$0xff]   ;;  %v7125_v9 = vcombine.high %v26157_v2, %v26157_v2 }
 0x35b   :  { %4812 = vmatprep.subr.bf16.mxu1 %v19686_v12  ;;  %4853 = vmatprep.subr.bf16.mxu0 %v19688_v13  ;;  %v23226_v8 = vld [vmem:[%s30560_s8 + $0xb8] sm:$0xff]   ;;  %v23227_v12 = vld [vmem:[%s30560_s8 + $0x140] sm:$0xff]  }
 0x35c   :  { %v23228_v13 = vld [vmem:[%s30560_s8 + $0x1c0] sm:$0xff]   ;;  %v7153_v16 = vrot.slane %v7125_v9, %v24684_v41 }
 0x35e   :  { %4813 = vmatpush1.bf16.msra.mxu1 %v19685_v18  ;;  %4854 = vmatpush1.bf16.msra.mxu0 %v19687_v19  ;;  %v7154_v18 = vcombine.high %v7132_v11, %v7132_v11  ;;  %v23231_v19 = vld [vmem:[%s30560_s8 + $0x148] sm:$0xff]   ;;  %v7157_v21 = vcombine.high %v7153_v16, %v7153_v16 }
 0x35f   :  { %4814 = vmatprep.subr.bf16.mxu1 %v19710_v23  ;;  %4855 = vmatprep.subr.bf16.mxu0 %v19712_v24  ;;  %v23233_v23 = vld [vmem:[%s30560_s8 + $0x108] sm:$0xff]  }
 0x360   :  { %v23234_v24 = vld [vmem:[%s30560_s8 + $0x188] sm:$0xff]  }
 0x362   :  { %4815 = vmatpush1.bf16.msra.mxu1 %v19709_v28  ;;  %4856 = vmatpush1.bf16.msra.mxu0 %v19711_v29  ;;  %v23238_v28 = vld [vmem:[%s30560_s8 + $0x190] sm:$0xff]   ;;  %v23239_v29 = vld [vmem:[%s30560_s8 + $0x158] sm:$0xff]  }
 0x363   :  { %4816 = vmatprep.subr.bf16.mxu1 %v19734_v30  ;;  %4857 = vmatprep.subr.bf16.mxu0 %v19736_v31  ;;  %v23240_v30 = vld [vmem:[%s30560_s8 + $0x1d8] sm:$0xff]  }
 0x364   :  { %v23241_v31 = vld [vmem:[%s30560_s8 + $0x118] sm:$0xff]  }
 0x366   :  { %4817 = vmatpush1.bf16.msra.mxu1 %v19733_v35  ;;  %4858 = vmatpush1.bf16.msra.mxu0 %v19735_v36  ;;  %v23245_v35 = vld [vmem:[%s30560_s8 + $0x120] sm:$0xff]  }
 0x367   :  { %21374 = vmatprep.subr.bf16.mxu1 %v23195_v32  ;;  %21396 = vmatprep.subr.bf16.mxu0 %v23196_v34  ;;  %v23243_v32 = vld [vmem:[%s30560_s8 + $0x160] sm:$0xff]  }
 0x368   :  { %v23244_v34 = vld [vmem:[%s30560_s8 + $0x1e0] sm:$0xff]  }
 0x369   :  { %4835 = vmatmul.mubr.bf16.vlgmr.msra.gmra.mrb[52].mxu1 %v25578_v17  ;;  %4876 = vmatmul.mubr.bf16.vlgmr.msra.gmra.mrb[56].mxu0 %v25578_v17  ;;  %v23246_v36 = vld [vmem:[%s30560_s8 + $0x1a0] sm:$0xff]  }
 0x36a   :  { %21375 = vmatpush3.bf16.msra.mxu1 %v23197_v37  ;;  %21397 = vmatpush3.bf16.msra.mxu0 %v23198_v4  ;;  %v26239_v37 = vld [vmem:[%s30559_s7] sm:$0xff]  ;;  %v26242_v4 = vsub.s32 0, %v24672_v33 }
 0x36b   :  { %21376 = vmatprep.subr.bf16.mxu1 %v23199_v10  ;;  %21398 = vmatprep.subr.bf16.mxu0 %v23200_v38  ;;  %v26248_v10 = vsub.s32 1, %v24672_v33  ;;  %v24461_v38 = vmov 1983009808  }
 0x36c   :  { %14197 = vmatprep.mubr.bf16.mxu1 %v7146_v7  ;;  %14237 = vmatprep.mubr.bf16.mxu0 %v7156_v39  ;;  %v26245_v7 = vsub.s32 2, %v24672_v33  ;;  %v4911_v39 = vunpack.c.l.s4 %v24461_v38  ;;  %v23270_v38 = vld [vmem:[%s30560_s8 + $0x210] sm:$0xff]  }
 0x36e   :  { %21377 = vmatpush3.bf16.msra.mxu1 %v23201_v40  ;;  %21399 = vmatpush3.bf16.msra.mxu0 %v23202_v42  ;;  %v26251_v40 = vsub.s32 3, %v24672_v33  ;;  %v23247_v42 = vld [vmem:[%s30560_s8 + $0x168] sm:$0xff]  }
 0x36f   :  { %21378 = vmatprep.subr.bf16.mxu1 %v23203_v43  ;;  %21400 = vmatprep.subr.bf16.mxu0 %v23204_v44  ;;  %v23248_v43 = vld [vmem:[%s30560_s8 + $0x1e8] sm:$0xff]  }
 0x370   :  { %v23249_v44 = vld [vmem:[%s30560_s8 + $0x128] sm:$0xff]  }
 0x372   :  { %21379 = vmatpush3.bf16.msra.mxu1 %v23205_v45  ;;  %21401 = vmatpush3.bf16.msra.mxu0 %v23206_v47  ;;  %v23250_v45 = vld [vmem:[%s30560_s8 + $0x1a8] sm:$0xff]   ;;  %v3315_v47 = vrot.slane %v26239_v37, %v26242_v4 }
 0x373   :  { %21380 = vmatprep.subr.bf16.mxu1 %v23207_v48  ;;  %21402 = vmatprep.subr.bf16.mxu0 %v23208_v49  ;;  %v3323_v48 = vrot.slane %v26239_v37, %v26245_v7  ;;  %v23251_v49 = vld [vmem:[%s30560_s8 + $0x170] sm:$0xff]  }
 0x376   :  { %21381 = vmatpush3.bf16.msra.mxu1 %v23209_v50  ;;  %21403 = vmatpush3.bf16.msra.mxu0 %v23210_v51  ;;  %v26275_v50 = vld [vmem:[%s30589_s4 + $0x8] sm:$0xff]  ;;  %v3319_v51 = vrot.slane %v26239_v37, %v26248_v10 }
 0x377   :  { %21382 = vmatprep.subr.bf16.mxu1 %v23211_v52  ;;  %21404 = vmatprep.subr.bf16.mxu0 %v23212_v53  ;;  %v4912_v52 = vunpack.c.0.s8 %v4911_v39  ;;  %v3327_v53 = vrot.slane %v26239_v37, %v26251_v40  ;;  %v23271_v39 = vld [vmem:[%s30560_s8 + $0x290] sm:$0xff]  }
 0x37a   :  { %21383 = vmatpush3.bf16.msra.mxu1 %v23213_v54  ;;  %21405 = vmatpush3.bf16.msra.mxu0 %v23214_v55  ;;  %v23252_v54 = vld [vmem:[%s30560_s8 + $0x1f0] sm:$0xff]  }
 0x37b   :  { %21384 = vmatprep.subr.bf16.mxu1 %v23215_v56  ;;  %21406 = vmatprep.subr.bf16.mxu0 %v23216_v57  ;;  %v23253_v57 = vld [vmem:[%s30560_s8 + $0x130] sm:$0xff]  }
 0x37e   :  { %21385 = vmatpush3.bf16.msra.mxu1 %v23217_v58  ;;  %21407 = vmatpush3.bf16.msra.mxu0 %v23218_v59  ;;  %v23254_v58 = vld [vmem:[%s30560_s8 + $0x1b0] sm:$0xff]   ;;  %v26292_v59 = vrot.slane %v26275_v50, %v24684_v41 }
 0x37f   :  { %21386 = vmatprep.subr.bf16.mxu1 %v23219_v62  ;;  %21408 = vmatprep.subr.bf16.mxu0 %v23220_v63 }
 0x382   :  { %21387 = vmatpush3.bf16.msra.mxu1 %v23221_v0  ;;  %21409 = vmatpush3.bf16.msra.mxu0 %v23222_v1  ;;  %v23255_v1 = vld [vmem:[%s30560_s8 + $0x178] sm:$0xff]  }
 0x383   :  { %21388 = vmatprep.subr.bf16.mxu1 %v23223_v3  ;;  %21410 = vmatprep.subr.bf16.mxu0 %v23224_v5  ;;  %v23256_v3 = vld [vmem:[%s30560_s8 + $0x1f8] sm:$0xff]  }
 0x386   :  { %21389 = vmatpush3.bf16.msra.mxu1 %v23225_v6  ;;  %21411 = vmatpush3.bf16.msra.mxu0 %v23226_v8  ;;  %v26301_v6 = vsub.s32 %v4912_v52, %v24672_v33  ;;  %v26377_v52 = vsub.s32 4, %v24672_v33 }
 0x387   :  { %21418 = vmatprep.subr.bf16.mxu1 %v23227_v12  ;;  %21440 = vmatprep.subr.bf16.mxu0 %v23228_v13 }
 0x389   :  { %14198 = vmatmul.mubr.bf16.vlgmr.msra.gmra.mrb[56].mxu1 %v7132_v11  ;;  %14238 = vmatmul.mubr.bf16.vlgmr.msra.gmra.mrb[60].mxu0 %v7154_v18  ;;  %v23258_v18 = vld [vmem:[%s30560_s8 + $0x1b8] sm:$0xff]  }
 0x38a   :  { %21419 = vmatpush3.bf16.msra.mxu1 %v23229_v14  ;;  %21441 = vmatpush3.bf16.msra.mxu0 %v23230_v15 }
 0x38b   :  { %21420 = vmatprep.subr.bf16.mxu1 %v23231_v19  ;;  %21442 = vmatprep.subr.bf16.mxu0 %v23232_v20  ;;  %v7173_v19 = vcombine.high %v26292_v59, %v26292_v59  ;;  %v7139_v20 = vrot.slane %v26157_v2, %v24684_v41  ;;  %v23262_v2 = vld [vmem:[%s30560_s8 + $0x200] sm:$0xff]  }
 0x38c   :  { %14277 = vmatprep.mubr.bf16.mxu1 %v7153_v16  ;;  %14317 = vmatprep.mubr.bf16.mxu0 %v7157_v21  ;;  %v23257_v16 = vld [vmem:[%s30560_s8 + $0x138] sm:$0xff]   ;;  %v23260_v21 = vld [vmem:[%s30560_s8 + $0x240] sm:$0xff]  }
 0x38e   :  { %21421 = vmatpush3.bf16.msra.mxu1 %v23233_v23  ;;  %21443 = vmatpush3.bf16.msra.mxu0 %v23234_v24  ;;  %v23261_v23 = vld [vmem:[%s30560_s8 + $0x2c0] sm:$0xff]  }
 0x38f   :  { %21422 = vmatprep.subr.bf16.mxu1 %v23235_v25  ;;  %21444 = vmatprep.subr.bf16.mxu0 %v23236_v26 }
 0x392   :  { %21423 = vmatpush3.bf16.msra.mxu1 %v23237_v27  ;;  %21445 = vmatpush3.bf16.msra.mxu0 %v23238_v28  ;;  %v23263_v27 = vld [vmem:[%s30560_s8 + $0x280] sm:$0xff]   ;;  %v7195_v28 = vrot.slane %v7173_v19, %v24684_v41 }
 0x393   :  { %21424 = vmatprep.subr.bf16.mxu1 %v23239_v29  ;;  %21446 = vmatprep.subr.bf16.mxu0 %v23240_v30  ;;  %v7155_v29 = vcombine.high %v7139_v20, %v7139_v20  ;;  %v23264_v30 = vld [vmem:[%s30560_s8 + $0x248] sm:$0xff]  }
 0x396   :  { %21425 = vmatpush3.bf16.msra.mxu1 %v23241_v31  ;;  %21447 = vmatpush3.bf16.msra.mxu0 %v23242_v22  ;;  %v23265_v31 = vld [vmem:[%s30560_s8 + $0x2c8] sm:$0xff]   ;;  %v7205_v22 = vcombine.high %v7195_v28, %v7195_v28 }
 0x397   :  { %21426 = vmatprep.subr.bf16.mxu1 %v23243_v32  ;;  %21448 = vmatprep.subr.bf16.mxu0 %v23244_v34  ;;  %v23266_v32 = vld [vmem:[%s30560_s8 + $0x208] sm:$0xff]  }
 0x398   :  { %v23267_v34 = vld [vmem:[%s30560_s8 + $0x288] sm:$0xff]  }
 0x39a   :  { %21427 = vmatpush3.bf16.msra.mxu1 %v23245_v35  ;;  %21449 = vmatpush3.bf16.msra.mxu0 %v23246_v36  ;;  %v23268_v35 = vld [vmem:[%s30560_s8 + $0x250] sm:$0xff]  }
 0x39b   :  { %21428 = vmatprep.subr.bf16.mxu1 %v23247_v42  ;;  %21450 = vmatprep.subr.bf16.mxu0 %v23248_v43  ;;  %v23269_v36 = vld [vmem:[%s30560_s8 + $0x2d0] sm:$0xff]   ;;  %v23272_v42 = vld [vmem:[%s30560_s8 + $0x258] sm:$0xff]  }
 0x39c   :  { %v4426_v55 = vpop.f32.mrb[32].mxu1  ;;  %v4467_v56 = vpop.f32.mrb[36].mxu0  ;;  %v23273_v43 = vld [vmem:[%s30560_s8 + $0x2d8] sm:$0xff]  }
 0x39d   :  { %v4427_v60 = vadd.f32 %v4426_v55, %v3315_v47  ;;  %v4468_v62 = vadd.f32 %v4467_v56, %v3323_v48  ;;  %v4428_v63 = vpop.f32.mrb[33].mxu1  ;;  %v4469_v0 = vpop.f32.mrb[37].mxu0  ;;  %v23276_v47 = vld [vmem:[%s30560_s8 + $0x260] sm:$0xff]   ;;  %v26386_v55 = vsub.s32 7, %v24672_v33  ;;  %v23280_v56 = vld [vmem:[%s30560_s8 + $0x268] sm:$0xff]  }
 0x39e   :  { %v4429_v5 = vadd.f32 %v4428_v63, %v3319_v51  ;;  %v4470_v8 = vadd.f32 %v4469_v0, %v3327_v53  ;;  %21429 = vmatpush3.bf16.msra.mxu1 %v23249_v44  ;;  %21451 = vmatpush3.bf16.msra.mxu0 %v23250_v45  ;;  %v4430_v9 = vpop.f32.mrb[34].mxu1  ;;  %v4471_v11 = vpop.f32.mrb[38].mxu0  ;;  %v23274_v44 = vld [vmem:[%s30560_s8 + $0x218] sm:$0xff]   ;;  %v23277_v48 = vld [vmem:[%s30560_s8 + $0x2e0] sm:$0xff]   ;;  %v26380_v53 = vsub.s32 6, %v24672_v33  ;;  %v23284_v0 = vld [vmem:[%s30560_s8 + $0x270] sm:$0xff]  }
 0x39f   :  { %v4431_v12 = vpop.f32.mrb[35].mxu1  ;;  %v4472_v13 = vpop.f32.mrb[39].mxu0  ;;  %21430 = vmatprep.subr.bf16.mxu1 %v23251_v49  ;;  %21452 = vmatprep.subr.bf16.mxu0 %v23252_v54  ;;  %v23275_v45 = vld [vmem:[%s30560_s8 + $0x298] sm:$0xff]   ;;  %v23278_v49 = vld [vmem:[%s30560_s8 + $0x220] sm:$0xff]   ;;  %v26383_v54 = vsub.s32 5, %v24672_v33  ;;  %v7158_v33 = vcombine.high %v26275_v50, %v26275_v50  ;;  %v3343_v50 = vrot.slane %v26239_v37, %v26386_v55  ;;  %v23286_v9 = vld [vmem:[%s30560_s8 + $0x230] sm:$0xff]  }
 0x3a0   :  { %v4908_v14 = vcombine.low %v4427_v60, %v4429_v5  ;;  %v4909_v15 = vcombine.low %v4468_v62, %v4470_v8  ;;  %v23279_v51 = vld [vmem:[%s30560_s8 + $0x2a0] sm:$0xff]   ;;  %v23283_v60 = vld [vmem:[%s30560_s8 + $0x2a8] sm:$0xff]   ;;  %v3331_v62 = vrot.slane %v26239_v37, %v26377_v52  ;;  %v3339_v63 = vrot.slane %v26239_v37, %v26380_v53  ;;  %v23287_v11 = vld [vmem:[%s30560_s8 + $0x2b0] sm:$0xff]  }
 0x3a1   :  { %v26423_v12 = vrot.slane %v7158_v33, %v24684_v41  ;;  %v23307_v33 = vld [vmem:[%s30560_s8 + $0x398] sm:$0xff]  }
 0x3a2   :  { %v4916_v24 = vrot.slane %v4908_v14, %v26301_v6  ;;  %v4923_v25 = vrot.slane %v4909_v15, %v26301_v6  ;;  %21431 = vmatpush3.bf16.msra.mxu1 %v23253_v57  ;;  %21453 = vmatpush3.bf16.msra.mxu0 %v23254_v58  ;;  %v23281_v57 = vld [vmem:[%s30560_s8 + $0x2e8] sm:$0xff]  }
 0x3a3   :  { %21432 = vmatprep.subr.bf16.mxu1 %v23255_v1  ;;  %21454 = vmatprep.subr.bf16.mxu0 %v23256_v3  ;;  %v23282_v58 = vld [vmem:[%s30560_s8 + $0x228] sm:$0xff]   ;;  %v23285_v1 = vld [vmem:[%s30560_s8 + $0x2f0] sm:$0xff]   ;;  %v3335_v3 = vrot.slane %v26239_v37, %v26383_v54  ;;  %v23288_v37 = vld [vmem:[%s30560_s8 + $0x278] sm:$0xff]  }
 0x3a4   :  { %v4924_v26 = vcombine.low %v4916_v24, %v4923_v25 }
 0x3a6   :  { %5016 = vst [vmem:[#allocation2] sm:$0xff] %v4924_v26  ;;  %21433 = vmatpush3.bf16.msra.mxu1 %v23257_v16  ;;  %21455 = vmatpush3.bf16.msra.mxu0 %v23258_v18  ;;  %v23289_v18 = vld [vmem:[%s30560_s8 + $0x2f8] sm:$0xff]  }
 0x3a7   :  { %21462 = vmatprep.subr.bf16.mxu1 %v23260_v21  ;;  %21484 = vmatprep.subr.bf16.mxu0 %v23261_v23 }
 0x3a9   :  { %14278 = vmatmul.mubr.bf16.vlgmr.msra.gmra.mrb[60].mxu1 %v7139_v20  ;;  %14318 = vmatmul.mubr.bf16.vlgmr.msra.gmra.mrb[64].mxu0 %v7155_v29  ;;  %v7174_v29 = vcombine.high %v26423_v12, %v26423_v12 }
 0x3aa   :  { %21463 = vmatpush3.bf16.msra.mxu1 %v23262_v2  ;;  %21485 = vmatpush3.bf16.msra.mxu0 %v23263_v27  ;;  %v23290_v27 = vld [vmem:[%s30560_s8 + $0x238] sm:$0xff]  }
 0x3ab   :  { %21464 = vmatprep.subr.bf16.mxu1 %v23264_v30  ;;  %21486 = vmatprep.subr.bf16.mxu0 %v23265_v31  ;;  %v7181_v30 = vrot.slane %v26292_v59, %v24684_v41  ;;  %v23292_v31 = vld [vmem:[%s30560_s8 + $0x340] sm:$0xff]  }
 0x3ac   :  { %14357 = vmatprep.mubr.bf16.mxu1 %v7195_v28  ;;  %14397 = vmatprep.mubr.bf16.mxu0 %v7205_v22  ;;  %v23291_v28 = vld [vmem:[%s30560_s8 + $0x2b8] sm:$0xff]   ;;  %v23293_v22 = vld [vmem:[%s30560_s8 + $0x3c0] sm:$0xff]  }
 0x3ad   :  { %v23294_v59 = vld [vmem:[%s30560_s8 + $0x300] sm:$0xff]  }
 0x3ae   :  { %21465 = vmatpush3.bf16.msra.mxu1 %v23266_v32  ;;  %21487 = vmatpush3.bf16.msra.mxu0 %v23267_v34 }
 0x3af   :  { %21466 = vmatprep.subr.bf16.mxu1 %v23268_v35  ;;  %21488 = vmatprep.subr.bf16.mxu0 %v23269_v36  ;;  %v23295_v36 = vld [vmem:[%s30560_s8 + $0x380] sm:$0xff]  }
 0x3b2   :  { %21467 = vmatpush3.bf16.msra.mxu1 %v23270_v38  ;;  %21489 = vmatpush3.bf16.msra.mxu0 %v23271_v39  ;;  %v7202_v38 = vrot.slane %v7174_v29, %v24684_v41  ;;  %v7203_v39 = vcombine.high %v7181_v30, %v7181_v30  ;;  %v23321_v29 = vld [vmem:[%s30560_s8 + $0x3f8] sm:$0xff]  }
 0x3b3   :  { %21468 = vmatprep.subr.bf16.mxu1 %v23272_v42  ;;  %21490 = vmatprep.subr.bf16.mxu0 %v23273_v43  ;;  %v23296_v42 = vld [vmem:[%s30560_s8 + $0x348] sm:$0xff]  }
 0x3b4   :  { %v23297_v43 = vld [vmem:[%s30560_s8 + $0x3c8] sm:$0xff]  }
 0x3b6   :  { %21469 = vmatpush3.bf16.msra.mxu1 %v23274_v44  ;;  %21491 = vmatpush3.bf16.msra.mxu0 %v23275_v45  ;;  %v7206_v44 = vcombine.high %v7202_v38, %v7202_v38  ;;  %v23298_v45 = vld [vmem:[%s30560_s8 + $0x308] sm:$0xff]  }
 0x3b7   :  { %21470 = vmatprep.subr.bf16.mxu1 %v23276_v47  ;;  %21492 = vmatprep.subr.bf16.mxu0 %v23277_v48  ;;  %v23299_v47 = vld [vmem:[%s30560_s8 + $0x388] sm:$0xff]   ;;  %v23300_v48 = vld [vmem:[%s30560_s8 + $0x350] sm:$0xff]  }
 0x3ba   :  { %21471 = vmatpush3.bf16.msra.mxu1 %v23278_v49  ;;  %21493 = vmatpush3.bf16.msra.mxu0 %v23279_v51  ;;  %v23301_v49 = vld [vmem:[%s30560_s8 + $0x3d0] sm:$0xff]  }
 0x3bb   :  { %21472 = vmatprep.subr.bf16.mxu1 %v23280_v56  ;;  %21494 = vmatprep.subr.bf16.mxu0 %v23281_v57  ;;  %v23302_v51 = vld [vmem:[%s30560_s8 + $0x310] sm:$0xff]   ;;  %v23304_v57 = vld [vmem:[%s30560_s8 + $0x358] sm:$0xff]  }
 0x3bc   :  { %v4508_v5 = vpop.f32.mrb[36].mxu1  ;;  %v4549_v8 = vpop.f32.mrb[40].mxu0  ;;  %v23303_v56 = vld [vmem:[%s30560_s8 + $0x390] sm:$0xff]  }
 0x3bd   :  { %v4509_v13 = vadd.f32 %v4508_v5, %v3331_v62  ;;  %v4550_v14 = vadd.f32 %v4549_v8, %v3339_v63  ;;  %v4510_v15 = vpop.f32.mrb[37].mxu1  ;;  %v4551_v16 = vpop.f32.mrb[41].mxu0  ;;  %v23308_v62 = vld [vmem:[%s30560_s8 + $0x360] sm:$0xff]   ;;  %v23313_v5 = vld [vmem:[%s30560_s8 + $0x3e8] sm:$0xff]  }
 0x3be   :  { %v4511_v19 = vadd.f32 %v4510_v15, %v3335_v3  ;;  %v4552_v20 = vadd.f32 %v4551_v16, %v3343_v50  ;;  %v4512_v21 = vpop.f32.mrb[38].mxu1  ;;  %v4553_v23 = vpop.f32.mrb[42].mxu0  ;;  %21473 = vmatpush3.bf16.msra.mxu1 %v23282_v58  ;;  %21495 = vmatpush3.bf16.msra.mxu0 %v23283_v60  ;;  %v23305_v58 = vld [vmem:[%s30560_s8 + $0x3d8] sm:$0xff]   ;;  %v23309_v63 = vld [vmem:[%s30560_s8 + $0x3e0] sm:$0xff]   ;;  %v26507_v3 = vld [vmem:[%s30559_s7 + $0x8] sm:$0xff] }
 0x3bf   :  { %v4513_v24 = vpop.f32.mrb[39].mxu1  ;;  %v4554_v25 = vpop.f32.mrb[43].mxu0  ;;  %21474 = vmatprep.subr.bf16.mxu1 %v23284_v0  ;;  %21496 = vmatprep.subr.bf16.mxu0 %v23285_v1  ;;  %v23306_v60 = vld [vmem:[%s30560_s8 + $0x318] sm:$0xff]   ;;  %v23310_v0 = vld [vmem:[%s30560_s8 + $0x320] sm:$0xff]   ;;  %v23312_v50 = vld [vmem:[%s30560_s8 + $0x368] sm:$0xff]  }
 0x3c0   :  { %v4925_v26 = vcombine.low %v4509_v13, %v4511_v19  ;;  %v4926_v2 = vcombine.low %v4550_v14, %v4552_v20  ;;  %v23311_v1 = vld [vmem:[%s30560_s8 + $0x3a0] sm:$0xff]   ;;  %v23314_v8 = vld [vmem:[%s30560_s8 + $0x328] sm:$0xff]   ;;  %v3355_v13 = vrot.slane %v26507_v3, %v26245_v7  ;;  %v23316_v14 = vld [vmem:[%s30560_s8 + $0x370] sm:$0xff]  }
 0x3c1   :  { %v23317_v15 = vld [vmem:[%s30560_s8 + $0x3f0] sm:$0xff]  }
 0x3c2   :  { %v4933_v32 = vrot.slane %v4925_v26, %v26301_v6  ;;  %v4940_v34 = vrot.slane %v4926_v2, %v26301_v6  ;;  %21475 = vmatpush3.bf16.msra.mxu1 %v23286_v9  ;;  %21497 = vmatpush3.bf16.msra.mxu0 %v23287_v11  ;;  %v23315_v9 = vld [vmem:[%s30560_s8 + $0x3a8] sm:$0xff]   ;;  %v3347_v11 = vrot.slane %v26507_v3, %v26242_v4  ;;  %v26534_v16 = vld [vmem:[%s30589_s4 + $0x10] sm:$0xff] }
 0x3c3   :  { %21476 = vmatprep.subr.bf16.mxu1 %v23288_v37  ;;  %21498 = vmatprep.subr.bf16.mxu0 %v23289_v18  ;;  %v3351_v37 = vrot.slane %v26507_v3, %v26248_v10  ;;  %v3359_v18 = vrot.slane %v26507_v3, %v26251_v40  ;;  %v23318_v21 = vld [vmem:[%s30560_s8 + $0x330] sm:$0xff]   ;;  %v26548_v24 = vrot.slane %v26534_v16, %v24684_v41 }
 0x3c4   :  { %v4941_v35 = vcombine.low %v4933_v32, %v4940_v34  ;;  %v23319_v23 = vld [vmem:[%s30560_s8 + $0x3b0] sm:$0xff]  }
 0x3c6   :  { %5017 = vst [vmem:[#allocation2 + $0x8] sm:$0xff] %v4941_v35  ;;  %21477 = vmatpush3.bf16.msra.mxu1 %v23290_v27  ;;  %21499 = vmatpush3.bf16.msra.mxu0 %v23291_v28  ;;  %v23320_v28 = vld [vmem:[%s30560_s8 + $0x378] sm:$0xff]  }
 0x3c7   :  { %21506 = vmatprep.subr.bf16.mxu1 %v23292_v31  ;;  %21528 = vmatprep.subr.bf16.mxu0 %v23293_v22 }
 0x3c9   :  { %14358 = vmatmul.mubr.bf16.vlgmr.msra.gmra.mrb[64].mxu1 %v7181_v30  ;;  %14398 = vmatmul.mubr.bf16.vlgmr.msra.gmra.mrb[68].mxu0 %v7203_v39  ;;  %v23322_v39 = vld [vmem:[%s30560_s8 + $0x338] sm:$0xff]  }
 0x3ca   :  { %21507 = vmatpush3.bf16.msra.mxu1 %v23294_v59  ;;  %21529 = vmatpush3.bf16.msra.mxu0 %v23295_v36 }
 0x3cb   :  { %21508 = vmatprep.subr.bf16.mxu1 %v23296_v42  ;;  %21530 = vmatprep.subr.bf16.mxu0 %v23297_v43  ;;  %v7188_v42 = vrot.slane %v26423_v12, %v24684_v41  ;;  %v23326_v12 = vld [vmem:[%s30560_s8 + $0x4c0] sm:$0xff]  }
 0x3cc   :  { %14437 = vmatprep.mubr.bf16.mxu1 %v7202_v38  ;;  %14477 = vmatprep.mubr.bf16.mxu0 %v7206_v44  ;;  %v7222_v38 = vcombine.high %v26548_v24, %v26548_v24 }
 0x3ce   :  { %21509 = vmatpush3.bf16.msra.mxu1 %v23298_v45  ;;  %21531 = vmatpush3.bf16.msra.mxu0 %v23299_v47  ;;  %v23323_v45 = vld [vmem:[%s30560_s8 + $0x3b8] sm:$0xff]   ;;  %v23325_v47 = vld [vmem:[%s30560_s8 + $0x440] sm:$0xff]  }
 0x3cf   :  { %21510 = vmatprep.subr.bf16.mxu1 %v23300_v48  ;;  %21532 = vmatprep.subr.bf16.mxu0 %v23301_v49  ;;  %v23327_v49 = vld [vmem:[%s30560_s8 + $0x400] sm:$0xff]  }
 0x3d2   :  { %21511 = vmatpush3.bf16.msra.mxu1 %v23302_v51  ;;  %21533 = vmatpush3.bf16.msra.mxu0 %v23303_v56  ;;  %v23328_v51 = vld [vmem:[%s30560_s8 + $0x480] sm:$0xff]   ;;  %v7244_v56 = vrot.slane %v7222_v38, %v24684_v41 }
 0x3d3   :  { %21512 = vmatprep.subr.bf16.mxu1 %v23304_v57  ;;  %21534 = vmatprep.subr.bf16.mxu0 %v23305_v58  ;;  %v7204_v57 = vcombine.high %v7188_v42, %v7188_v42  ;;  %v23329_v58 = vld [vmem:[%s30560_s8 + $0x448] sm:$0xff]  }
 0x3d6   :  { %21513 = vmatpush3.bf16.msra.mxu1 %v23306_v60  ;;  %21535 = vmatpush3.bf16.msra.mxu0 %v23307_v33  ;;  %v23330_v60 = vld [vmem:[%s30560_s8 + $0x4c8] sm:$0xff]   ;;  %v7254_v33 = vcombine.high %v7244_v56, %v7244_v56 }
 0x3d7   :  { %21514 = vmatprep.subr.bf16.mxu1 %v23308_v62  ;;  %21536 = vmatprep.subr.bf16.mxu0 %v23309_v63  ;;  %v23331_v62 = vld [vmem:[%s30560_s8 + $0x408] sm:$0xff]  }
 0x3d8   :  { %v23332_v63 = vld [vmem:[%s30560_s8 + $0x488] sm:$0xff]  }
 0x3da   :  { %21515 = vmatpush3.bf16.msra.mxu1 %v23310_v0  ;;  %21537 = vmatpush3.bf16.msra.mxu0 %v23311_v1  ;;  %v23333_v0 = vld [vmem:[%s30560_s8 + $0x450] sm:$0xff]  }
 0x3db   :  { %21516 = vmatprep.subr.bf16.mxu1 %v23312_v50  ;;  %21538 = vmatprep.subr.bf16.mxu0 %v23313_v5  ;;  %v23334_v1 = vld [vmem:[%s30560_s8 + $0x4d0] sm:$0xff]  }
 0x3dc   :  { %v4590_v19 = vpop.f32.mrb[40].mxu1  ;;  %v4631_v20 = vpop.f32.mrb[44].mxu0  ;;  %v23335_v50 = vld [vmem:[%s30560_s8 + $0x410] sm:$0xff]  }
 0x3dd   :  { %v4591_v25 = vadd.f32 %v4590_v19, %v3347_v11  ;;  %v4632_v26 = vadd.f32 %v4631_v20, %v3355_v13  ;;  %v4592_v2 = vpop.f32.mrb[41].mxu1  ;;  %v4633_v27 = vpop.f32.mrb[45].mxu0  ;;  %v23336_v5 = vld [vmem:[%s30560_s8 + $0x490] sm:$0xff]   ;;  %v23339_v11 = vld [vmem:[%s30560_s8 + $0x418] sm:$0xff]   ;;  %v23345_v19 = vld [vmem:[%s30560_s8 + $0x468] sm:$0xff]  }
 0x3de   :  { %v4593_v30 = vadd.f32 %v4592_v2, %v3351_v37  ;;  %v4634_v31 = vadd.f32 %v4633_v27, %v3359_v18  ;;  %v4594_v22 = vpop.f32.mrb[42].mxu1  ;;  %v4635_v32 = vpop.f32.mrb[46].mxu0  ;;  %21517 = vmatpush3.bf16.msra.mxu1 %v23314_v8  ;;  %21539 = vmatpush3.bf16.msra.mxu0 %v23315_v9  ;;  %v23337_v8 = vld [vmem:[%s30560_s8 + $0x458] sm:$0xff]   ;;  %v23343_v37 = vld [vmem:[%s30560_s8 + $0x420] sm:$0xff]   ;;  %v23346_v20 = vld [vmem:[%s30560_s8 + $0x4e8] sm:$0xff]   ;;  %v3371_v2 = vrot.slane %v26507_v3, %v26380_v53 }
 0x3df   :  { %v4595_v34 = vpop.f32.mrb[43].mxu1  ;;  %v4636_v35 = vpop.f32.mrb[47].mxu0  ;;  %21518 = vmatprep.subr.bf16.mxu1 %v23316_v14  ;;  %21540 = vmatprep.subr.bf16.mxu0 %v23317_v15  ;;  %v23338_v9 = vld [vmem:[%s30560_s8 + $0x4d8] sm:$0xff]   ;;  %v23341_v14 = vld [vmem:[%s30560_s8 + $0x460] sm:$0xff]   ;;  %v23349_v27 = vld [vmem:[%s30560_s8 + $0x470] sm:$0xff]  }
 0x3e0   :  { %v4942_v59 = vcombine.low %v4591_v25, %v4593_v30  ;;  %v4943_v36 = vcombine.low %v4632_v26, %v4634_v31  ;;  %v23340_v13 = vld [vmem:[%s30560_s8 + $0x498] sm:$0xff]   ;;  %v23342_v15 = vld [vmem:[%s30560_s8 + $0x4e0] sm:$0xff]   ;;  %v7207_v25 = vcombine.high %v26534_v16, %v26534_v16  ;;  %v3363_v26 = vrot.slane %v26507_v3, %v26377_v52  ;;  %v23351_v22 = vld [vmem:[%s30560_s8 + $0x430] sm:$0xff]  }
 0x3e1   :  { %v23344_v18 = vld [vmem:[%s30560_s8 + $0x4a0] sm:$0xff]   ;;  %v3375_v16 = vrot.slane %v26507_v3, %v26386_v55  ;;  %v23352_v32 = vld [vmem:[%s30560_s8 + $0x4b0] sm:$0xff]  }
 0x3e2   :  { %v4950_v43 = vrot.slane %v4942_v59, %v26301_v6  ;;  %v4957_v44 = vrot.slane %v4943_v36, %v26301_v6  ;;  %21519 = vmatpush3.bf16.msra.mxu1 %v23318_v21  ;;  %21541 = vmatpush3.bf16.msra.mxu0 %v23319_v23  ;;  %v23347_v21 = vld [vmem:[%s30560_s8 + $0x428] sm:$0xff]   ;;  %v26664_v34 = vrot.slane %v7207_v25, %v24684_v41  ;;  %v23372_v25 = vld [vmem:[%s30560_s8 + $0x598] sm:$0xff]  }
 0x3e3   :  { %21520 = vmatprep.subr.bf16.mxu1 %v23320_v28  ;;  %21542 = vmatprep.subr.bf16.mxu0 %v23321_v29  ;;  %v23348_v23 = vld [vmem:[%s30560_s8 + $0x4a8] sm:$0xff]   ;;  %v23350_v28 = vld [vmem:[%s30560_s8 + $0x4f0] sm:$0xff]   ;;  %v3367_v29 = vrot.slane %v26507_v3, %v26383_v54  ;;  %v23353_v3 = vld [vmem:[%s30560_s8 + $0x478] sm:$0xff]  }
 0x3e4   :  { %v4958_v48 = vcombine.low %v4950_v43, %v4957_v44 }
 0x3e6   :  { %5018 = vst [vmem:[#allocation2 + $0x10] sm:$0xff] %v4958_v48  ;;  %21521 = vmatpush3.bf16.msra.mxu1 %v23322_v39  ;;  %21543 = vmatpush3.bf16.msra.mxu0 %v23323_v45  ;;  %v23354_v39 = vld [vmem:[%s30560_s8 + $0x4f8] sm:$0xff]  }
 0x3e7   :  { %21550 = vmatprep.subr.bf16.mxu1 %v23325_v47  ;;  %21572 = vmatprep.subr.bf16.mxu0 %v23326_v12 }
 0x3e9   :  { %14438 = vmatmul.mubr.bf16.vlgmr.msra.gmra.mrb[68].mxu1 %v7188_v42  ;;  %14478 = vmatmul.mubr.bf16.vlgmr.msra.gmra.mrb[72].mxu0 %v7204_v57  ;;  %v7230_v57 = vrot.slane %v26548_v24, %v24684_v41  ;;  %v23358_v24 = vld [vmem:[%s30560_s8 + $0x5c0] sm:$0xff]  }
 0x3ea   :  { %21551 = vmatpush3.bf16.msra.mxu1 %v23327_v49  ;;  %21573 = vmatpush3.bf16.msra.mxu0 %v23328_v51  ;;  %v7223_v51 = vcombine.high %v26664_v34, %v26664_v34 }
 0x3eb   :  { %21552 = vmatprep.subr.bf16.mxu1 %v23329_v58  ;;  %21574 = vmatprep.subr.bf16.mxu0 %v23330_v60 }
 0x3ec   :  { %14517 = vmatprep.mubr.bf16.mxu1 %v7244_v56  ;;  %14557 = vmatprep.mubr.bf16.mxu0 %v7254_v33  ;;  %v23355_v56 = vld [vmem:[%s30560_s8 + $0x438] sm:$0xff]  }
 0x3ed   :  { %v23356_v33 = vld [vmem:[%s30560_s8 + $0x4b8] sm:$0xff]  }
 0x3ee   :  { %21553 = vmatpush3.bf16.msra.mxu1 %v23331_v62  ;;  %21575 = vmatpush3.bf16.msra.mxu0 %v23332_v63  ;;  %v23357_v62 = vld [vmem:[%s30560_s8 + $0x540] sm:$0xff]  }
 0x3ef   :  { %21554 = vmatprep.subr.bf16.mxu1 %v23333_v0  ;;  %21576 = vmatprep.subr.bf16.mxu0 %v23334_v1  ;;  %v23359_v0 = vld [vmem:[%s30560_s8 + $0x500] sm:$0xff]  }
 0x3f0   :  { %v23360_v1 = vld [vmem:[%s30560_s8 + $0x580] sm:$0xff]  }
 0x3f2   :  { %21555 = vmatpush3.bf16.msra.mxu1 %v23335_v50  ;;  %21577 = vmatpush3.bf16.msra.mxu0 %v23336_v5  ;;  %v7251_v50 = vrot.slane %v7223_v51, %v24684_v41  ;;  %v7252_v5 = vcombine.high %v7230_v57, %v7230_v57 }
 0x3f3   :  { %21556 = vmatprep.subr.bf16.mxu1 %v23337_v8  ;;  %21578 = vmatprep.subr.bf16.mxu0 %v23338_v9  ;;  %v23361_v8 = vld [vmem:[%s30560_s8 + $0x548] sm:$0xff]  }
 0x3f4   :  { %v23362_v9 = vld [vmem:[%s30560_s8 + $0x5c8] sm:$0xff]  }
 0x3f6   :  { %21557 = vmatpush3.bf16.msra.mxu1 %v23339_v11  ;;  %21579 = vmatpush3.bf16.msra.mxu0 %v23340_v13  ;;  %v7255_v11 = vcombine.high %v7251_v50, %v7251_v50  ;;  %v23363_v13 = vld [vmem:[%s30560_s8 + $0x508] sm:$0xff]  }
 0x3f7   :  { %21558 = vmatprep.subr.bf16.mxu1 %v23341_v14  ;;  %21580 = vmatprep.subr.bf16.mxu0 %v23342_v15  ;;  %v23364_v14 = vld [vmem:[%s30560_s8 + $0x588] sm:$0xff]   ;;  %v23365_v15 = vld [vmem:[%s30560_s8 + $0x550] sm:$0xff]  }
 0x3fa   :  { %21559 = vmatpush3.bf16.msra.mxu1 %v23343_v37  ;;  %21581 = vmatpush3.bf16.msra.mxu0 %v23344_v18  ;;  %v23366_v37 = vld [vmem:[%s30560_s8 + $0x5d0] sm:$0xff]  }
 0x3fb   :  { %21560 = vmatprep.subr.bf16.mxu1 %v23345_v19  ;;  %21582 = vmatprep.subr.bf16.mxu0 %v23346_v20  ;;  %v23367_v18 = vld [vmem:[%s30560_s8 + $0x510] sm:$0xff]   ;;  %v23369_v20 = vld [vmem:[%s30560_s8 + $0x558] sm:$0xff]  }
 0x3fc   :  { %v4672_v30 = vpop.f32.mrb[44].mxu1  ;;  %v4713_v31 = vpop.f32.mrb[48].mxu0  ;;  %v23368_v19 = vld [vmem:[%s30560_s8 + $0x590] sm:$0xff]  }
 0x3fd   :  { %v4673_v35 = vadd.f32 %v4672_v30, %v3363_v26  ;;  %v4714_v59 = vadd.f32 %v4713_v31, %v3371_v2  ;;  %v4674_v36 = vpop.f32.mrb[45].mxu1  ;;  %v4715_v38 = vpop.f32.mrb[49].mxu0  ;;  %v23373_v26 = vld [vmem:[%s30560_s8 + $0x560] sm:$0xff]   ;;  %v23378_v30 = vld [vmem:[%s30560_s8 + $0x5e8] sm:$0xff]  }
 0x3fe   :  { %v4675_v42 = vadd.f32 %v4674_v36, %v3367_v29  ;;  %v4716_v43 = vadd.f32 %v4715_v38, %v3375_v16  ;;  %v4676_v44 = vpop.f32.mrb[46].mxu1  ;;  %v4717_v45 = vpop.f32.mrb[50].mxu0  ;;  %21561 = vmatpush3.bf16.msra.mxu1 %v23347_v21  ;;  %21583 = vmatpush3.bf16.msra.mxu0 %v23348_v23  ;;  %v23370_v21 = vld [vmem:[%s30560_s8 + $0x5d8] sm:$0xff]   ;;  %v23374_v2 = vld [vmem:[%s30560_s8 + $0x5e0] sm:$0xff]   ;;  %v26748_v29 = vld [vmem:[%s30559_s7 + $0x10] sm:$0xff] }
 0x3ff   :  { %v4677_v47 = vpop.f32.mrb[47].mxu1  ;;  %v4718_v12 = vpop.f32.mrb[51].mxu0  ;;  %21562 = vmatprep.subr.bf16.mxu1 %v23349_v27  ;;  %21584 = vmatprep.subr.bf16.mxu0 %v23350_v28  ;;  %v23371_v23 = vld [vmem:[%s30560_s8 + $0x518] sm:$0xff]   ;;  %v23375_v27 = vld [vmem:[%s30560_s8 + $0x520] sm:$0xff]   ;;  %v23377_v16 = vld [vmem:[%s30560_s8 + $0x568] sm:$0xff]  }
 0x400   :  { %v4959_v48 = vcombine.low %v4673_v35, %v4675_v42  ;;  %v4960_v49 = vcombine.low %v4714_v59, %v4716_v43  ;;  %v23376_v28 = vld [vmem:[%s30560_s8 + $0x5a0] sm:$0xff]   ;;  %v23379_v31 = vld [vmem:[%s30560_s8 + $0x528] sm:$0xff]   ;;  %v3387_v35 = vrot.slane %v26748_v29, %v26245_v7  ;;  %v23381_v59 = vld [vmem:[%s30560_s8 + $0x570] sm:$0xff]  }
 0x401   :  { %v23382_v36 = vld [vmem:[%s30560_s8 + $0x5f0] sm:$0xff]   ;;  %v26775_v38 = vld [vmem:[%s30589_s4 + $0x18] sm:$0xff] }
 0x402   :  { %v4967_v58 = vrot.slane %v4959_v48, %v26301_v6  ;;  %v4974_v60 = vrot.slane %v4960_v49, %v26301_v6  ;;  %21563 = vmatpush3.bf16.msra.mxu1 %v23351_v22  ;;  %21585 = vmatpush3.bf16.msra.mxu0 %v23352_v32  ;;  %v23380_v22 = vld [vmem:[%s30560_s8 + $0x5a8] sm:$0xff]   ;;  %v3379_v32 = vrot.slane %v26748_v29, %v26242_v4  ;;  %v23383_v44 = vld [vmem:[%s30560_s8 + $0x530] sm:$0xff]  }
 0x403   :  { %21564 = vmatprep.subr.bf16.mxu1 %v23353_v3  ;;  %21586 = vmatprep.subr.bf16.mxu0 %v23354_v39  ;;  %v3383_v3 = vrot.slane %v26748_v29, %v26248_v10  ;;  %v3391_v39 = vrot.slane %v26748_v29, %v26251_v40  ;;  %v23384_v45 = vld [vmem:[%s30560_s8 + $0x5b0] sm:$0xff]   ;;  %v26789_v47 = vrot.slane %v26775_v38, %v24684_v41 }
 0x404   :  { %v4975_v63 = vcombine.low %v4967_v58, %v4974_v60 }
 0x406   :  { %5019 = vst [vmem:[#allocation2 + $0x18] sm:$0xff] %v4975_v63  ;;  %21565 = vmatpush3.bf16.msra.mxu1 %v23355_v56  ;;  %21587 = vmatpush3.bf16.msra.mxu0 %v23356_v33  ;;  %v23385_v56 = vld [vmem:[%s30560_s8 + $0x578] sm:$0xff]  }
 0x407   :  { %21594 = vmatprep.subr.bf16.mxu1 %v23357_v62  ;;  %21616 = vmatprep.subr.bf16.mxu0 %v23358_v24 }
 0x409   :  { %14518 = vmatmul.mubr.bf16.vlgmr.msra.gmra.mrb[72].mxu1 %v7230_v57  ;;  %14558 = vmatmul.mubr.bf16.vlgmr.msra.gmra.mrb[76].mxu0 %v7252_v5  ;;  %v23386_v57 = vld [vmem:[%s30560_s8 + $0x5f8] sm:$0xff]  }
 0x40a   :  { %21595 = vmatpush3.bf16.msra.mxu1 %v23359_v0  ;;  %21617 = vmatpush3.bf16.msra.mxu0 %v23360_v1  ;;  %v23387_v5 = vld [vmem:[%s30560_s8 + $0x538] sm:$0xff]  }
 0x40b   :  { %21596 = vmatprep.subr.bf16.mxu1 %v23361_v8  ;;  %21618 = vmatprep.subr.bf16.mxu0 %v23362_v9  ;;  %v7237_v8 = vrot.slane %v26664_v34, %v24684_v41  ;;  %v23391_v34 = vld [vmem:[%s30560_s8 + $0x6c0] sm:$0xff]  }
 0x40c   :  { %14597 = vmatprep.mubr.bf16.mxu1 %v7251_v50  ;;  %14637 = vmatprep.mubr.bf16.mxu0 %v7255_v11  ;;  %v7271_v50 = vcombine.high %v26789_v47, %v26789_v47 }
 0x40e   :  { %21597 = vmatpush3.bf16.msra.mxu1 %v23363_v13  ;;  %21619 = vmatpush3.bf16.msra.mxu0 %v23364_v14  ;;  %v23388_v13 = vld [vmem:[%s30560_s8 + $0x5b8] sm:$0xff]   ;;  %v23390_v14 = vld [vmem:[%s30560_s8 + $0x640] sm:$0xff]  }
 0x40f   :  { %21598 = vmatprep.subr.bf16.mxu1 %v23365_v15  ;;  %21620 = vmatprep.subr.bf16.mxu0 %v23366_v37  ;;  %v23392_v37 = vld [vmem:[%s30560_s8 + $0x600] sm:$0xff]  }
 0x412   :  { %21599 = vmatpush3.bf16.msra.mxu1 %v23367_v18  ;;  %21621 = vmatpush3.bf16.msra.mxu0 %v23368_v19  ;;  %v23393_v18 = vld [vmem:[%s30560_s8 + $0x680] sm:$0xff]   ;;  %v7293_v19 = vrot.slane %v7271_v50, %v24684_v41 }
 0x413   :  { %21600 = vmatprep.subr.bf16.mxu1 %v23369_v20  ;;  %21622 = vmatprep.subr.bf16.mxu0 %v23370_v21  ;;  %v7253_v20 = vcombine.high %v7237_v8, %v7237_v8  ;;  %v23394_v21 = vld [vmem:[%s30560_s8 + $0x648] sm:$0xff]  }
 0x416   :  { %21601 = vmatpush3.bf16.msra.mxu1 %v23371_v23  ;;  %21623 = vmatpush3.bf16.msra.mxu0 %v23372_v25  ;;  %v23395_v23 = vld [vmem:[%s30560_s8 + $0x6c8] sm:$0xff]   ;;  %v7303_v25 = vcombine.high %v7293_v19, %v7293_v19 }
 0x417   :  { %21602 = vmatprep.subr.bf16.mxu1 %v23373_v26  ;;  %21624 = vmatprep.subr.bf16.mxu0 %v23374_v2  ;;  %v23396_v26 = vld [vmem:[%s30560_s8 + $0x608] sm:$0xff]  }
 0x418   :  { %v23397_v2 = vld [vmem:[%s30560_s8 + $0x688] sm:$0xff]  }
 0x41a   :  { %21603 = vmatpush3.bf16.msra.mxu1 %v23375_v27  ;;  %21625 = vmatpush3.bf16.msra.mxu0 %v23376_v28  ;;  %v23398_v27 = vld [vmem:[%s30560_s8 + $0x650] sm:$0xff]  }
 0x41b   :  { %21604 = vmatprep.subr.bf16.mxu1 %v23377_v16  ;;  %21626 = vmatprep.subr.bf16.mxu0 %v23378_v30  ;;  %v23399_v28 = vld [vmem:[%s30560_s8 + $0x6d0] sm:$0xff]  }
 0x41c   :  { %v4754_v42 = vpop.f32.mrb[48].mxu1  ;;  %v4795_v43 = vpop.f32.mrb[52].mxu0  ;;  %v23400_v16 = vld [vmem:[%s30560_s8 + $0x610] sm:$0xff]  }
 0x41d   :  { %v4755_v12 = vadd.f32 %v4754_v42, %v3379_v32  ;;  %v4796_v48 = vadd.f32 %v4795_v43, %v3387_v35  ;;  %v4756_v49 = vpop.f32.mrb[49].mxu1  ;;  %v4797_v51 = vpop.f32.mrb[53].mxu0  ;;  %v23401_v30 = vld [vmem:[%s30560_s8 + $0x690] sm:$0xff]   ;;  %v23404_v32 = vld [vmem:[%s30560_s8 + $0x618] sm:$0xff]   ;;  %v23410_v42 = vld [vmem:[%s30560_s8 + $0x668] sm:$0xff]  }
 0x41e   :  { %v4757_v58 = vadd.f32 %v4756_v49, %v3383_v3  ;;  %v4798_v60 = vadd.f32 %v4797_v51, %v3391_v39  ;;  %v4758_v33 = vpop.f32.mrb[50].mxu1  ;;  %v4799_v62 = vpop.f32.mrb[54].mxu0  ;;  %21605 = vmatpush3.bf16.msra.mxu1 %v23379_v31  ;;  %21627 = vmatpush3.bf16.msra.mxu0 %v23380_v22  ;;  %v23402_v31 = vld [vmem:[%s30560_s8 + $0x658] sm:$0xff]   ;;  %v23408_v3 = vld [vmem:[%s30560_s8 + $0x620] sm:$0xff]   ;;  %v23411_v43 = vld [vmem:[%s30560_s8 + $0x6e8] sm:$0xff]   ;;  %v3403_v49 = vrot.slane %v26748_v29, %v26380_v53 }
 0x41f   :  { %v4759_v24 = vpop.f32.mrb[51].mxu1  ;;  %v4800_v63 = vpop.f32.mrb[55].mxu0  ;;  %21606 = vmatprep.subr.bf16.mxu1 %v23381_v59  ;;  %21628 = vmatprep.subr.bf16.mxu0 %v23382_v36  ;;  %v23403_v22 = vld [vmem:[%s30560_s8 + $0x6d8] sm:$0xff]   ;;  %v23406_v59 = vld [vmem:[%s30560_s8 + $0x660] sm:$0xff]   ;;  %v23414_v51 = vld [vmem:[%s30560_s8 + $0x670] sm:$0xff]  }
 0x420   :  { %v4976_v0 = vcombine.low %v4755_v12, %v4757_v58  ;;  %v4977_v1 = vcombine.low %v4796_v48, %v4798_v60  ;;  %v23405_v35 = vld [vmem:[%s30560_s8 + $0x698] sm:$0xff]   ;;  %v23407_v36 = vld [vmem:[%s30560_s8 + $0x6e0] sm:$0xff]   ;;  %v7256_v12 = vcombine.high %v26775_v38, %v26775_v38  ;;  %v3395_v48 = vrot.slane %v26748_v29, %v26377_v52  ;;  %v23416_v33 = vld [vmem:[%s30560_s8 + $0x630] sm:$0xff]  }
 0x421   :  { %v23409_v39 = vld [vmem:[%s30560_s8 + $0x6a0] sm:$0xff]   ;;  %v3407_v38 = vrot.slane %v26748_v29, %v26386_v55  ;;  %v23417_v62 = vld [vmem:[%s30560_s8 + $0x6b0] sm:$0xff]  }
 0x422   :  { %v4984_v9 = vrot.slane %v4976_v0, %v26301_v6  ;;  %v4991_v11 = vrot.slane %v4977_v1, %v26301_v6  ;;  %21607 = vmatpush3.bf16.msra.mxu1 %v23383_v44  ;;  %21629 = vmatpush3.bf16.msra.mxu0 %v23384_v45  ;;  %v23412_v44 = vld [vmem:[%s30560_s8 + $0x628] sm:$0xff]   ;;  %v26905_v24 = vrot.slane %v7256_v12, %v24684_v41  ;;  %v23437_v12 = vld [vmem:[%s30560_s8 + $0x798] sm:$0xff]  }
 0x423   :  { %21608 = vmatprep.subr.bf16.mxu1 %v23385_v56  ;;  %21630 = vmatprep.subr.bf16.mxu0 %v23386_v57  ;;  %v23413_v45 = vld [vmem:[%s30560_s8 + $0x6a8] sm:$0xff]   ;;  %v23415_v56 = vld [vmem:[%s30560_s8 + $0x6f0] sm:$0xff]   ;;  %v3399_v57 = vrot.slane %v26748_v29, %v26383_v54  ;;  %v23418_v29 = vld [vmem:[%s30560_s8 + $0x678] sm:$0xff]  }
 0x424   :  { %v4992_v15 = vcombine.low %v4984_v9, %v4991_v11 }
 0x426   :  { %5020 = vst [vmem:[#allocation2 + $0x20] sm:$0xff] %v4992_v15  ;;  %21609 = vmatpush3.bf16.msra.mxu1 %v23387_v5  ;;  %21631 = vmatpush3.bf16.msra.mxu0 %v23388_v13  ;;  %v23419_v5 = vld [vmem:[%s30560_s8 + $0x6f8] sm:$0xff]  }
 0x427   :  { %21638 = vmatprep.subr.bf16.mxu1 %v23390_v14  ;;  %21660 = vmatprep.subr.bf16.mxu0 %v23391_v34 }
 0x429   :  { %14598 = vmatmul.mubr.bf16.vlgmr.msra.gmra.mrb[76].mxu1 %v7237_v8  ;;  %14638 = vmatmul.mubr.bf16.vlgmr.msra.gmra.mrb[80].mxu0 %v7253_v20  ;;  %v7279_v20 = vrot.slane %v26789_v47, %v24684_v41  ;;  %v23423_v47 = vld [vmem:[%s30560_s8 + $0x7c0] sm:$0xff]  }
 0x42a   :  { %21639 = vmatpush3.bf16.msra.mxu1 %v23392_v37  ;;  %21661 = vmatpush3.bf16.msra.mxu0 %v23393_v18  ;;  %v7272_v18 = vcombine.high %v26905_v24, %v26905_v24 }
 0x42b   :  { %21640 = vmatprep.subr.bf16.mxu1 %v23394_v21  ;;  %21662 = vmatprep.subr.bf16.mxu0 %v23395_v23 }
 0x42c   :  { %14677 = vmatprep.mubr.bf16.mxu1 %v7293_v19  ;;  %14717 = vmatprep.mubr.bf16.mxu0 %v7303_v25  ;;  %v23420_v19 = vld [vmem:[%s30560_s8 + $0x638] sm:$0xff]  }
 0x42d   :  { %v23421_v25 = vld [vmem:[%s30560_s8 + $0x6b8] sm:$0xff]  }
 0x42e   :  { %21641 = vmatpush3.bf16.msra.mxu1 %v23396_v26  ;;  %21663 = vmatpush3.bf16.msra.mxu0 %v23397_v2  ;;  %v23422_v26 = vld [vmem:[%s30560_s8 + $0x740] sm:$0xff]  }
 0x42f   :  { %21642 = vmatprep.subr.bf16.mxu1 %v23398_v27  ;;  %21664 = vmatprep.subr.bf16.mxu0 %v23399_v28  ;;  %v23424_v27 = vld [vmem:[%s30560_s8 + $0x700] sm:$0xff]  }
 0x430   :  { %v23425_v28 = vld [vmem:[%s30560_s8 + $0x780] sm:$0xff]  }
 0x432   :  { %21643 = vmatpush3.bf16.msra.mxu1 %v23400_v16  ;;  %21665 = vmatpush3.bf16.msra.mxu0 %v23401_v30  ;;  %v7300_v16 = vrot.slane %v7272_v18, %v24684_v41  ;;  %v7301_v30 = vcombine.high %v7279_v20, %v7279_v20 }
 0x433   :  { %21644 = vmatprep.subr.bf16.mxu1 %v23402_v31  ;;  %21666 = vmatprep.subr.bf16.mxu0 %v23403_v22  ;;  %v23426_v31 = vld [vmem:[%s30560_s8 + $0x748] sm:$0xff]  }
 0x434   :  { %v23427_v22 = vld [vmem:[%s30560_s8 + $0x7c8] sm:$0xff]  }
 0x436   :  { %21645 = vmatpush3.bf16.msra.mxu1 %v23404_v32  ;;  %21667 = vmatpush3.bf16.msra.mxu0 %v23405_v35  ;;  %v7304_v32 = vcombine.high %v7300_v16, %v7300_v16  ;;  %v23428_v35 = vld [vmem:[%s30560_s8 + $0x708] sm:$0xff]  }
 0x437   :  { %21646 = vmatprep.subr.bf16.mxu1 %v23406_v59  ;;  %21668 = vmatprep.subr.bf16.mxu0 %v23407_v36  ;;  %v23429_v59 = vld [vmem:[%s30560_s8 + $0x788] sm:$0xff]   ;;  %v23430_v36 = vld [vmem:[%s30560_s8 + $0x750] sm:$0xff]  }
 0x43a   :  { %21647 = vmatpush3.bf16.msra.mxu1 %v23408_v3  ;;  %21669 = vmatpush3.bf16.msra.mxu0 %v23409_v39  ;;  %v23431_v3 = vld [vmem:[%s30560_s8 + $0x7d0] sm:$0xff]  }
 0x43b   :  { %21648 = vmatprep.subr.bf16.mxu1 %v23410_v42  ;;  %21670 = vmatprep.subr.bf16.mxu0 %v23411_v43  ;;  %v23432_v39 = vld [vmem:[%s30560_s8 + $0x710] sm:$0xff]   ;;  %v23434_v43 = vld [vmem:[%s30560_s8 + $0x758] sm:$0xff]  }
 0x43c   :  { %v4836_v58 = vpop.f32.mrb[52].mxu1  ;;  %v4877_v60 = vpop.f32.mrb[56].mxu0  ;;  %v23433_v42 = vld [vmem:[%s30560_s8 + $0x790] sm:$0xff]  }
 0x43d   :  { %v4837_v63 = vadd.f32 %v4836_v58, %v3395_v48  ;;  %v4878_v0 = vadd.f32 %v4877_v60, %v3403_v49  ;;  %v4838_v1 = vpop.f32.mrb[53].mxu1  ;;  %v4879_v50 = vpop.f32.mrb[57].mxu0  ;;  %v23438_v48 = vld [vmem:[%s30560_s8 + $0x760] sm:$0xff]   ;;  %v23444_v58 = vld [vmem:[%s30560_s8 + $0x728] sm:$0xff]  }
 0x43e   :  { %v4839_v8 = vadd.f32 %v4838_v1, %v3399_v57  ;;  %v4880_v9 = vadd.f32 %v4879_v50, %v3407_v38  ;;  %v4840_v11 = vpop.f32.mrb[54].mxu1  ;;  %v4881_v13 = vpop.f32.mrb[58].mxu0  ;;  %21649 = vmatpush3.bf16.msra.mxu1 %v23412_v44  ;;  %21671 = vmatpush3.bf16.msra.mxu0 %v23413_v45  ;;  %v23435_v44 = vld [vmem:[%s30560_s8 + $0x7d8] sm:$0xff]   ;;  %v23439_v49 = vld [vmem:[%s30560_s8 + $0x7e0] sm:$0xff]   ;;  %v23442_v57 = vld [vmem:[%s30560_s8 + $0x768] sm:$0xff]  }
 0x43f   :  { %v4841_v14 = vpop.f32.mrb[55].mxu1  ;;  %v4882_v34 = vpop.f32.mrb[59].mxu0  ;;  %21650 = vmatprep.subr.bf16.mxu1 %v23414_v51  ;;  %21672 = vmatprep.subr.bf16.mxu0 %v23415_v56  ;;  %v23436_v45 = vld [vmem:[%s30560_s8 + $0x718] sm:$0xff]   ;;  %v23440_v51 = vld [vmem:[%s30560_s8 + $0x720] sm:$0xff]   ;;  %v23443_v38 = vld [vmem:[%s30560_s8 + $0x7e8] sm:$0xff]  }
 0x440   :  { %v4993_v15 = vcombine.low %v4837_v63, %v4839_v8  ;;  %v4994_v37 = vcombine.low %v4878_v0, %v4880_v9  ;;  %v23441_v56 = vld [vmem:[%s30560_s8 + $0x7a0] sm:$0xff]   ;;  %v23445_v60 = vld [vmem:[%s30560_s8 + $0x7a8] sm:$0xff]   ;;  %v23450_v13 = vld [vmem:[%s30560_s8 + $0x778] sm:$0xff]  }
 0x441   :  { %v27007_v63 = vld [vmem:[%s30589_s4 + $0x20] sm:$0xff]  ;;  %v23451_v14 = vld [vmem:[%s30560_s8 + $0x7f8] sm:$0xff]  }
 0x442   :  { %v5001_v21 = vrot.slane %v4993_v15, %v26301_v6  ;;  %v5008_v23 = vrot.slane %v4994_v37, %v26301_v6  ;;  %21651 = vmatpush3.bf16.msra.mxu1 %v23416_v33  ;;  %21673 = vmatpush3.bf16.msra.mxu0 %v23417_v62  ;;  %v23446_v33 = vld [vmem:[%s30560_s8 + $0x770] sm:$0xff]   ;;  %v19737_v0 = vld [vmem:[%s30561_s9] ss:$0 sm:$0xff]  ;;  %v27020_v8 = vrot.slane %v27007_v63, %v24684_v41 }
 0x443   :  { %21652 = vmatprep.subr.bf16.mxu1 %v23418_v29  ;;  %21674 = vmatprep.subr.bf16.mxu0 %v23419_v5  ;;  %v23447_v62 = vld [vmem:[%s30560_s8 + $0x7f0] sm:$0xff]  }
 0x444   :  { %v5009_v2 = vcombine.low %v5001_v21, %v5008_v23  ;;  %v23448_v29 = vld [vmem:[%s30560_s8 + $0x730] sm:$0xff]   ;;  %v7320_v23 = vcombine.high %v27020_v8, %v27020_v8 }
 0x445   :  { %v23449_v5 = vld [vmem:[%s30560_s8 + $0x7b0] sm:$0xff]  }
 0x446   :  { %5021 = vst [vmem:[#allocation2 + $0x28] sm:$0xff] %v5009_v2  ;;  %21653 = vmatpush3.bf16.msra.mxu1 %v23420_v19  ;;  %21675 = vmatpush3.bf16.msra.mxu0 %v23421_v25  ;;  %v23452_v25 = vld [vmem:[%s30560_s8 + $0x738] sm:$0xff]  }
 0x447   :  { %21682 = vmatprep.subr.bf16.mxu1 %v23422_v26  ;;  %21704 = vmatprep.subr.bf16.mxu0 %v23423_v47  ;;  %v7286_v26 = vrot.slane %v26905_v24, %v24684_v41  ;;  %v23453_v2 = vld [vmem:[%s30560_s8 + $0x7b8] sm:$0xff]   ;;  %v23457_v24 = vld [vmem:[%s30560_s8 + $0x800] sm:$0xff]  }
 0x449   :  { %14678 = vmatmul.mubr.bf16.vlgmr.msra.gmra.mrb[80].mxu1 %v7279_v20  ;;  %14718 = vmatmul.mubr.bf16.vlgmr.msra.gmra.mrb[84].mxu0 %v7301_v30  ;;  %v7342_v30 = vrot.slane %v7320_v23, %v24684_v41 }
 0x44a   :  { %21683 = vmatpush3.bf16.msra.mxu1 %v23424_v27  ;;  %21705 = vmatpush3.bf16.msra.mxu0 %v23425_v28  ;;  %v23455_v27 = vld [vmem:[%s30560_s8 + $0x840] sm:$0xff]  }
 0x44b   :  { %21684 = vmatprep.subr.bf16.mxu1 %v23426_v31  ;;  %21706 = vmatprep.subr.bf16.mxu0 %v23427_v22  ;;  %v23456_v28 = vld [vmem:[%s30560_s8 + $0x8c0] sm:$0xff]   ;;  %v7302_v31 = vcombine.high %v7286_v26, %v7286_v26  ;;  %v23459_v22 = vld [vmem:[%s30560_s8 + $0x848] sm:$0xff]  }
 0x44c   :  { %14757 = vmatprep.mubr.bf16.mxu1 %v7300_v16  ;;  %14797 = vmatprep.mubr.bf16.mxu0 %v7304_v32  ;;  %v23458_v16 = vld [vmem:[%s30560_s8 + $0x880] sm:$0xff]   ;;  %v23460_v32 = vld [vmem:[%s30560_s8 + $0x8c8] sm:$0xff]  }
 0x44e   :  { %21685 = vmatpush3.bf16.msra.mxu1 %v23428_v35  ;;  %21707 = vmatpush3.bf16.msra.mxu0 %v23429_v59  ;;  %v7352_v35 = vcombine.high %v7342_v30, %v7342_v30  ;;  %v23461_v59 = vld [vmem:[%s30560_s8 + $0x808] sm:$0xff]  }
 0x44f   :  { %21686 = vmatprep.subr.bf16.mxu1 %v23430_v36  ;;  %21708 = vmatprep.subr.bf16.mxu0 %v23431_v3  ;;  %v23462_v36 = vld [vmem:[%s30560_s8 + $0x888] sm:$0xff]   ;;  %v23463_v3 = vld [vmem:[%s30560_s8 + $0x850] sm:$0xff]  }
 0x452   :  { %21687 = vmatpush3.bf16.msra.mxu1 %v23432_v39  ;;  %21709 = vmatpush3.bf16.msra.mxu0 %v23433_v42  ;;  %v23464_v39 = vld [vmem:[%s30560_s8 + $0x8d0] sm:$0xff]  }
 0x453   :  { %21688 = vmatprep.subr.bf16.mxu1 %v23434_v43  ;;  %21710 = vmatprep.subr.bf16.mxu0 %v23435_v44  ;;  %v23465_v42 = vld [vmem:[%s30560_s8 + $0x810] sm:$0xff]   ;;  %v23467_v44 = vld [vmem:[%s30560_s8 + $0x858] sm:$0xff]  }
 0x454   :  { %v23466_v43 = vld [vmem:[%s30560_s8 + $0x890] sm:$0xff]  }
 0x456   :  { %21689 = vmatpush3.bf16.msra.mxu1 %v23436_v45  ;;  %21711 = vmatpush3.bf16.msra.mxu0 %v23437_v12  ;;  %v23468_v45 = vld [vmem:[%s30560_s8 + $0x8d8] sm:$0xff]  }
 0x457   :  { %21690 = vmatprep.subr.bf16.mxu1 %v23438_v48  ;;  %21712 = vmatprep.subr.bf16.mxu0 %v23439_v49  ;;  %v23469_v12 = vld [vmem:[%s30560_s8 + $0x818] sm:$0xff]   ;;  %v23471_v49 = vld [vmem:[%s30560_s8 + $0x860] sm:$0xff]  }
 0x458   :  { %v23470_v48 = vld [vmem:[%s30560_s8 + $0x898] sm:$0xff]  }
 0x45a   :  { %21691 = vmatpush3.bf16.msra.mxu1 %v23440_v51  ;;  %21713 = vmatpush3.bf16.msra.mxu0 %v23441_v56  ;;  %v23472_v51 = vld [vmem:[%s30560_s8 + $0x8e0] sm:$0xff]  }
 0x45b   :  { %21692 = vmatprep.subr.bf16.mxu1 %v23442_v57  ;;  %21714 = vmatprep.subr.bf16.mxu0 %v23443_v38  ;;  %v23473_v56 = vld [vmem:[%s30560_s8 + $0x820] sm:$0xff]   ;;  %v23475_v38 = vld [vmem:[%s30560_s8 + $0x868] sm:$0xff]  }
 0x45c   :  { %v21390_v1 = vpop.f32.mrb[56].mxu1  ;;  %v21412_v50 = vpop.f32.mrb[60].mxu0  ;;  %v23474_v57 = vld [vmem:[%s30560_s8 + $0x8a0] sm:$0xff]  }
 0x45d   :  { %v21391_v9 = vpop.f32.mrb[57].mxu1  ;;  %v21413_v11 = vpop.f32.mrb[61].mxu0 }
 0x45e   :  { %v21392_v34 = vadd.f32 %v21391_v9, %v21390_v1  ;;  %v21414_v15 = vadd.f32 %v21413_v11, %v21412_v50  ;;  %v21393_v37 = vpop.f32.mrb[58].mxu1  ;;  %v21415_v18 = vpop.f32.mrb[62].mxu0  ;;  %21693 = vmatpush3.bf16.msra.mxu1 %v23444_v58  ;;  %21715 = vmatpush3.bf16.msra.mxu0 %v23445_v60  ;;  %v23476_v58 = vld [vmem:[%s30560_s8 + $0x8e8] sm:$0xff]   ;;  %v23480_v1 = vld [vmem:[%s30560_s8 + $0x8f0] sm:$0xff]  }
 0x45f   :  { %v21394_v19 = vpop.f32.mrb[59].mxu1  ;;  %v21416_v20 = vpop.f32.mrb[63].mxu0  ;;  %21694 = vmatprep.subr.bf16.mxu1 %v23446_v33  ;;  %21716 = vmatprep.subr.bf16.mxu0 %v23447_v62  ;;  %v23477_v60 = vld [vmem:[%s30560_s8 + $0x828] sm:$0xff]   ;;  %v7305_v62 = vcombine.high %v27007_v63, %v27007_v63  ;;  %v23482_v63 = vld [vmem:[%s30560_s8 + $0x8b0] sm:$0xff]  }
 0x460   :  { %v14200_v21 = vadd.f32 %v21392_v34, %v19737_v0  ;;  %v23478_v33 = vld [vmem:[%s30560_s8 + $0x8a8] sm:$0xff]   ;;  %v23479_v0 = vld [vmem:[%s30560_s8 + $0x870] sm:$0xff]   ;;  %v23484_v34 = vld [vmem:[%s30560_s8 + $0x8f8] sm:$0xff]  }
 0x461   :  { %v27128_v9 = vrot.slane %v7305_v62, %v24684_v41  ;;  %v23511_v62 = vld [vmem:[%s30560_s8 + $0x970] sm:$0xff]  }
 0x462   :  { %v27035_v47 = vadd.f32 %v21414_v15, %v14200_v21  ;;  %21695 = vmatpush3.bf16.msra.mxu1 %v23448_v29  ;;  %21717 = vmatpush3.bf16.msra.mxu0 %v23449_v5  ;;  %v23481_v5 = vld [vmem:[%s30560_s8 + $0x830] sm:$0xff]  }
 0x463   :  { %21696 = vmatprep.subr.bf16.mxu1 %v23450_v13  ;;  %21718 = vmatprep.subr.bf16.mxu0 %v23451_v14  ;;  %v23483_v14 = vld [vmem:[%s30560_s8 + $0x878] sm:$0xff]  }
 0x466   :  { %21697 = vmatpush3.bf16.msra.mxu1 %v23452_v25  ;;  %21719 = vmatpush3.bf16.msra.mxu0 %v23453_v2  ;;  %v7321_v25 = vcombine.high %v27128_v9, %v27128_v9  ;;  %v7328_v2 = vrot.slane %v27020_v8, %v24684_v41  ;;  %v23489_v8 = vld [vmem:[%s30560_s8 + $0x900] sm:$0xff]  }
 0x467   :  { %21726 = vmatprep.subr.bf16.mxu1 %v23455_v27  ;;  %21748 = vmatprep.subr.bf16.mxu0 %v23456_v28  ;;  %v23486_v28 = vld [vmem:[%s30560_s8 + $0x8b8] sm:$0xff]  }
 0x469   :  { %14758 = vmatmul.mubr.bf16.vlgmr.msra.gmra.mrb[84].mxu1 %v7286_v26  ;;  %14798 = vmatmul.mubr.bf16.vlgmr.msra.gmra.mrb[88].mxu0 %v7302_v31  ;;  %v23485_v26 = vld [vmem:[%s30560_s8 + $0x838] sm:$0xff]   ;;  %v7350_v31 = vcombine.high %v7328_v2, %v7328_v2 }
 0x46a   :  { %21727 = vmatpush3.bf16.msra.mxu1 %v23457_v24  ;;  %21749 = vmatpush3.bf16.msra.mxu0 %v23458_v16  ;;  %v23488_v24 = vld [vmem:[%s30560_s8 + $0x9c0] sm:$0xff]  }
 0x46b   :  { %21728 = vmatprep.subr.bf16.mxu1 %v23459_v22  ;;  %21750 = vmatprep.subr.bf16.mxu0 %v23460_v32  ;;  %v23490_v16 = vld [vmem:[%s30560_s8 + $0x980] sm:$0xff]   ;;  %v23491_v22 = vld [vmem:[%s30560_s8 + $0x948] sm:$0xff]  }
 0x46c   :  { %14837 = vmatprep.mubr.bf16.mxu1 %v7342_v30  ;;  %14877 = vmatprep.mubr.bf16.mxu0 %v7352_v35  ;;  %v7349_v30 = vrot.slane %v7321_v25, %v24684_v41  ;;  %v23492_v32 = vld [vmem:[%s30560_s8 + $0x9c8] sm:$0xff]  }
 0x46e   :  { %21729 = vmatpush3.bf16.msra.mxu1 %v23461_v59  ;;  %21751 = vmatpush3.bf16.msra.mxu0 %v23462_v36  ;;  %v7353_v35 = vcombine.high %v7349_v30, %v7349_v30  ;;  %v23493_v59 = vld [vmem:[%s30560_s8 + $0x908] sm:$0xff]  }
 0x46f   :  { %21730 = vmatprep.subr.bf16.mxu1 %v23463_v3  ;;  %21752 = vmatprep.subr.bf16.mxu0 %v23464_v39  ;;  %v23494_v36 = vld [vmem:[%s30560_s8 + $0x988] sm:$0xff]   ;;  %v23495_v3 = vld [vmem:[%s30560_s8 + $0x950] sm:$0xff]  }
 0x470   :  { %v23496_v39 = vld [vmem:[%s30560_s8 + $0x9d0] sm:$0xff]  }
 0x472   :  { %21731 = vmatpush3.bf16.msra.mxu1 %v23465_v42  ;;  %21753 = vmatpush3.bf16.msra.mxu0 %v23466_v43  ;;  %v23497_v42 = vld [vmem:[%s30560_s8 + $0x910] sm:$0xff]  }
 0x473   :  { %21732 = vmatprep.subr.bf16.mxu1 %v23467_v44  ;;  %21754 = vmatprep.subr.bf16.mxu0 %v23468_v45  ;;  %v23498_v43 = vld [vmem:[%s30560_s8 + $0x990] sm:$0xff]   ;;  %v23499_v44 = vld [vmem:[%s30560_s8 + $0x958] sm:$0xff]  }
 0x474   :  { %v23500_v45 = vld [vmem:[%s30560_s8 + $0x9d8] sm:$0xff]  }
 0x476   :  { %21733 = vmatpush3.bf16.msra.mxu1 %v23469_v12  ;;  %21755 = vmatpush3.bf16.msra.mxu0 %v23470_v48  ;;  %v23501_v12 = vld [vmem:[%s30560_s8 + $0x918] sm:$0xff]  }
 0x477   :  { %21734 = vmatprep.subr.bf16.mxu1 %v23471_v49  ;;  %21756 = vmatprep.subr.bf16.mxu0 %v23472_v51  ;;  %v23502_v48 = vld [vmem:[%s30560_s8 + $0x998] sm:$0xff]   ;;  %v23503_v49 = vld [vmem:[%s30560_s8 + $0x960] sm:$0xff]  }
 0x478   :  { %v23504_v51 = vld [vmem:[%s30560_s8 + $0x9e0] sm:$0xff]  }
 0x47a   :  { %21735 = vmatpush3.bf16.msra.mxu1 %v23473_v56  ;;  %21757 = vmatpush3.bf16.msra.mxu0 %v23474_v57  ;;  %v23505_v56 = vld [vmem:[%s30560_s8 + $0x920] sm:$0xff]  }
 0x47b   :  { %21736 = vmatprep.subr.bf16.mxu1 %v23475_v38  ;;  %21758 = vmatprep.subr.bf16.mxu0 %v23476_v58  ;;  %v23506_v57 = vld [vmem:[%s30560_s8 + $0x9a0] sm:$0xff]   ;;  %v23507_v38 = vld [vmem:[%s30560_s8 + $0x968] sm:$0xff]  }
 0x47c   :  { %v21434_v50 = vpop.f32.mrb[60].mxu1  ;;  %v21456_v29 = vpop.f32.mrb[64].mxu0  ;;  %v23508_v58 = vld [vmem:[%s30560_s8 + $0x9e8] sm:$0xff]  }
 0x47d   :  { %v21435_v11 = vpop.f32.mrb[61].mxu1  ;;  %v21457_v13 = vpop.f32.mrb[65].mxu0 }
 0x47e   :  { %v21436_v15 = vadd.f32 %v21435_v11, %v21434_v50  ;;  %v21458_v37 = vadd.f32 %v21457_v13, %v21456_v29  ;;  %v21437_v18 = vpop.f32.mrb[62].mxu1  ;;  %v21459_v19 = vpop.f32.mrb[66].mxu0  ;;  %21737 = vmatpush3.bf16.msra.mxu1 %v23477_v60  ;;  %21759 = vmatpush3.bf16.msra.mxu0 %v23478_v33  ;;  %v23509_v60 = vld [vmem:[%s30560_s8 + $0x928] sm:$0xff]  }
 0x47f   :  { %v21438_v20 = vpop.f32.mrb[63].mxu1  ;;  %v21460_v21 = vpop.f32.mrb[67].mxu0  ;;  %21738 = vmatprep.subr.bf16.mxu1 %v23479_v0  ;;  %21760 = vmatprep.subr.bf16.mxu0 %v23480_v1  ;;  %v23510_v33 = vld [vmem:[%s30560_s8 + $0x9a8] sm:$0xff]   ;;  %v23512_v0 = vld [vmem:[%s30560_s8 + $0x9f0] sm:$0xff]  }
 0x480   :  { %v14280_v23 = vadd.f32 %v21436_v15, %v27035_v47  ;;  %v23487_v47 = vld [vmem:[%s30560_s8 + $0x940] sm:$0xff]   ;;  %v27231_v1 = vld [vmem:[%s30589_s4 + $0x28] sm:$0xff]  ;;  %v23516_v15 = vld [vmem:[%s30560_s8 + $0x9f8] sm:$0xff]  }
 0x481   :  { %v27241_v11 = vrot.slane %v27231_v1, %v24684_v41 }
 0x482   :  { %v27144_v27 = vadd.f32 %v21458_v37, %v14280_v23  ;;  %21739 = vmatpush3.bf16.msra.mxu1 %v23481_v5  ;;  %21761 = vmatpush3.bf16.msra.mxu0 %v23482_v63  ;;  %v23513_v5 = vld [vmem:[%s30560_s8 + $0x930] sm:$0xff]  }
 0x483   :  { %21740 = vmatprep.subr.bf16.mxu1 %v23483_v14  ;;  %21762 = vmatprep.subr.bf16.mxu0 %v23484_v34  ;;  %v23514_v63 = vld [vmem:[%s30560_s8 + $0x9b0] sm:$0xff]   ;;  %v23515_v34 = vld [vmem:[%s30560_s8 + $0x978] sm:$0xff]  }
 0x486   :  { %21741 = vmatpush3.bf16.msra.mxu1 %v23485_v26  ;;  %21763 = vmatpush3.bf16.msra.mxu0 %v23486_v28  ;;  %v7369_v26 = vcombine.high %v27241_v11, %v27241_v11  ;;  %v7335_v28 = vrot.slane %v27128_v9, %v24684_v41  ;;  %v23522_v9 = vld [vmem:[%s30560_s8 + $0xa00] sm:$0xff]  }
 0x487   :  { %21770 = vmatprep.subr.bf16.mxu1 %v23487_v47  ;;  %21792 = vmatprep.subr.bf16.mxu0 %v23488_v24  ;;  %v23518_v24 = vld [vmem:[%s30560_s8 + $0x9b8] sm:$0xff]  }
 0x489   :  { %14838 = vmatmul.mubr.bf16.vlgmr.msra.gmra.mrb[88].mxu1 %v7328_v2  ;;  %14878 = vmatmul.mubr.bf16.vlgmr.msra.gmra.mrb[92].mxu0 %v7350_v31  ;;  %v23517_v2 = vld [vmem:[%s30560_s8 + $0x938] sm:$0xff]   ;;  %v7351_v31 = vcombine.high %v7335_v28, %v7335_v28 }
 0x48a   :  { %21771 = vmatpush3.bf16.msra.mxu1 %v23489_v8  ;;  %21793 = vmatpush3.bf16.msra.mxu0 %v23490_v16  ;;  %v23521_v8 = vld [vmem:[%s30560_s8 + $0xac0] sm:$0xff]  }
 0x48b   :  { %21772 = vmatprep.subr.bf16.mxu1 %v23491_v22  ;;  %21794 = vmatprep.subr.bf16.mxu0 %v23492_v32  ;;  %v23523_v16 = vld [vmem:[%s30560_s8 + $0xa80] sm:$0xff]   ;;  %v23524_v22 = vld [vmem:[%s30560_s8 + $0xa48] sm:$0xff]  }
 0x48c   :  { %14917 = vmatprep.mubr.bf16.mxu1 %v7349_v30  ;;  %14957 = vmatprep.mubr.bf16.mxu0 %v7353_v35  ;;  %v7391_v30 = vrot.slane %v7369_v26, %v24684_v41  ;;  %v23525_v32 = vld [vmem:[%s30560_s8 + $0xac8] sm:$0xff]  }
 0x48e   :  { %21773 = vmatpush3.bf16.msra.mxu1 %v23493_v59  ;;  %21795 = vmatpush3.bf16.msra.mxu0 %v23494_v36  ;;  %v7401_v35 = vcombine.high %v7391_v30, %v7391_v30  ;;  %v23526_v59 = vld [vmem:[%s30560_s8 + $0xa08] sm:$0xff]  }
 0x48f   :  { %21774 = vmatprep.subr.bf16.mxu1 %v23495_v3  ;;  %21796 = vmatprep.subr.bf16.mxu0 %v23496_v39  ;;  %v23527_v36 = vld [vmem:[%s30560_s8 + $0xa88] sm:$0xff]   ;;  %v23528_v3 = vld [vmem:[%s30560_s8 + $0xa50] sm:$0xff]  }
 0x490   :  { %v23529_v39 = vld [vmem:[%s30560_s8 + $0xad0] sm:$0xff]  }
 0x492   :  { %21775 = vmatpush3.bf16.msra.mxu1 %v23497_v42  ;;  %21797 = vmatpush3.bf16.msra.mxu0 %v23498_v43  ;;  %v23530_v42 = vld [vmem:[%s30560_s8 + $0xa10] sm:$0xff]  }
 0x493   :  { %21776 = vmatprep.subr.bf16.mxu1 %v23499_v44  ;;  %21798 = vmatprep.subr.bf16.mxu0 %v23500_v45  ;;  %v23531_v43 = vld [vmem:[%s30560_s8 + $0xa90] sm:$0xff]   ;;  %v23532_v44 = vld [vmem:[%s30560_s8 + $0xa58] sm:$0xff]  }
 0x494   :  { %v23533_v45 = vld [vmem:[%s30560_s8 + $0xad8] sm:$0xff]  }
 0x496   :  { %21777 = vmatpush3.bf16.msra.mxu1 %v23501_v12  ;;  %21799 = vmatpush3.bf16.msra.mxu0 %v23502_v48  ;;  %v23534_v12 = vld [vmem:[%s30560_s8 + $0xa18] sm:$0xff]  }
 0x497   :  { %21778 = vmatprep.subr.bf16.mxu1 %v23503_v49  ;;  %21800 = vmatprep.subr.bf16.mxu0 %v23504_v51  ;;  %v23535_v48 = vld [vmem:[%s30560_s8 + $0xa98] sm:$0xff]   ;;  %v23536_v49 = vld [vmem:[%s30560_s8 + $0xa60] sm:$0xff]  }
 0x498   :  { %v23537_v51 = vld [vmem:[%s30560_s8 + $0xae0] sm:$0xff]  }
 0x49a   :  { %21779 = vmatpush3.bf16.msra.mxu1 %v23505_v56  ;;  %21801 = vmatpush3.bf16.msra.mxu0 %v23506_v57  ;;  %v23538_v56 = vld [vmem:[%s30560_s8 + $0xa20] sm:$0xff]  }
 0x49b   :  { %21780 = vmatprep.subr.bf16.mxu1 %v23507_v38  ;;  %21802 = vmatprep.subr.bf16.mxu0 %v23508_v58  ;;  %v23539_v57 = vld [vmem:[%s30560_s8 + $0xaa0] sm:$0xff]   ;;  %v23540_v38 = vld [vmem:[%s30560_s8 + $0xa68] sm:$0xff]  }
 0x49c   :  { %v21478_v50 = vpop.f32.mrb[64].mxu1  ;;  %v21500_v29 = vpop.f32.mrb[68].mxu0  ;;  %v23541_v58 = vld [vmem:[%s30560_s8 + $0xae8] sm:$0xff]  }
 0x49d   :  { %v21479_v13 = vpop.f32.mrb[65].mxu1  ;;  %v21501_v14 = vpop.f32.mrb[69].mxu0 }
 0x49e   :  { %v21480_v37 = vadd.f32 %v21479_v13, %v21478_v50  ;;  %v21502_v18 = vadd.f32 %v21501_v14, %v21500_v29  ;;  %v21481_v19 = vpop.f32.mrb[66].mxu1  ;;  %v21503_v20 = vpop.f32.mrb[70].mxu0  ;;  %21781 = vmatpush3.bf16.msra.mxu1 %v23509_v60  ;;  %21803 = vmatpush3.bf16.msra.mxu0 %v23510_v33  ;;  %v23542_v60 = vld [vmem:[%s30560_s8 + $0xa28] sm:$0xff]   ;;  %v23545_v50 = vld [vmem:[%s30560_s8 + $0xaf0] sm:$0xff]  }
 0x49f   :  { %v21482_v21 = vpop.f32.mrb[67].mxu1  ;;  %v21504_v23 = vpop.f32.mrb[71].mxu0  ;;  %21782 = vmatprep.subr.bf16.mxu1 %v23511_v62  ;;  %21804 = vmatprep.subr.bf16.mxu0 %v23512_v0  ;;  %v23543_v33 = vld [vmem:[%s30560_s8 + $0xaa8] sm:$0xff]   ;;  %v7354_v62 = vcombine.high %v27231_v1, %v27231_v1  ;;  %v23544_v0 = vld [vmem:[%s30560_s8 + $0xa70] sm:$0xff]  }
 0x4a0   :  { %v14360_v25 = vadd.f32 %v21480_v37, %v27144_v27  ;;  %v23520_v27 = vld [vmem:[%s30560_s8 + $0xa40] sm:$0xff]   ;;  %v23547_v1 = vld [vmem:[%s30560_s8 + $0xab0] sm:$0xff]   ;;  %v23549_v37 = vld [vmem:[%s30560_s8 + $0xaf8] sm:$0xff]  }
 0x4a1   :  { %v27350_v13 = vrot.slane %v7354_v62, %v24684_v41 }
 0x4a2   :  { %v27257_v47 = vadd.f32 %v21502_v18, %v14360_v25  ;;  %21783 = vmatpush3.bf16.msra.mxu1 %v23513_v5  ;;  %21805 = vmatpush3.bf16.msra.mxu0 %v23514_v63  ;;  %v23546_v63 = vld [vmem:[%s30560_s8 + $0xa30] sm:$0xff]  }
 0x4a3   :  { %21784 = vmatprep.subr.bf16.mxu1 %v23515_v34  ;;  %21806 = vmatprep.subr.bf16.mxu0 %v23516_v15  ;;  %v23548_v15 = vld [vmem:[%s30560_s8 + $0xa78] sm:$0xff]  }
 0x4a6   :  { %21785 = vmatpush3.bf16.msra.mxu1 %v23517_v2  ;;  %21807 = vmatpush3.bf16.msra.mxu0 %v23518_v24  ;;  %v7370_v2 = vcombine.high %v27350_v13, %v27350_v13  ;;  %v7377_v24 = vrot.slane %v27241_v11, %v24684_v41  ;;  %v23554_v11 = vld [vmem:[%s30560_s8 + $0xb00] sm:$0xff]  }
 0x4a7   :  { %21814 = vmatprep.subr.bf16.mxu1 %v23520_v27  ;;  %21836 = vmatprep.subr.bf16.mxu0 %v23521_v8  ;;  %v23551_v8 = vld [vmem:[%s30560_s8 + $0xab8] sm:$0xff]  }
 0x4a9   :  { %14918 = vmatmul.mubr.bf16.vlgmr.msra.gmra.mrb[92].mxu1 %v7335_v28  ;;  %14958 = vmatmul.mubr.bf16.vlgmr.msra.gmra.mrb[96].mxu0 %v7351_v31  ;;  %v23550_v28 = vld [vmem:[%s30560_s8 + $0xa38] sm:$0xff]   ;;  %v7399_v31 = vcombine.high %v7377_v24, %v7377_v24 }
 0x4aa   :  { %21815 = vmatpush3.bf16.msra.mxu1 %v23522_v9  ;;  %21837 = vmatpush3.bf16.msra.mxu0 %v23523_v16  ;;  %v23553_v9 = vld [vmem:[%s30560_s8 + $0xbc0] sm:$0xff]  }
 0x4ab   :  { %21816 = vmatprep.subr.bf16.mxu1 %v23524_v22  ;;  %21838 = vmatprep.subr.bf16.mxu0 %v23525_v32  ;;  %v23555_v16 = vld [vmem:[%s30560_s8 + $0xb80] sm:$0xff]   ;;  %v23556_v22 = vld [vmem:[%s30560_s8 + $0xb48] sm:$0xff]  }
 0x4ac   :  { %14997 = vmatprep.mubr.bf16.mxu1 %v7391_v30  ;;  %15037 = vmatprep.mubr.bf16.mxu0 %v7401_v35  ;;  %v7398_v30 = vrot.slane %v7370_v2, %v24684_v41  ;;  %v23557_v32 = vld [vmem:[%s30560_s8 + $0xbc8] sm:$0xff]  }
 0x4ae   :  { %21817 = vmatpush3.bf16.msra.mxu1 %v23526_v59  ;;  %21839 = vmatpush3.bf16.msra.mxu0 %v23527_v36 }
 0x4af   :  { %21818 = vmatprep.subr.bf16.mxu1 %v23528_v3  ;;  %21840 = vmatprep.subr.bf16.mxu0 %v23529_v39 }
 0x4b2   :  { %21819 = vmatpush3.bf16.msra.mxu1 %v23530_v42  ;;  %21841 = vmatpush3.bf16.msra.mxu0 %v23531_v43 }
 0x4b3   :  { %21820 = vmatprep.subr.bf16.mxu1 %v23532_v44  ;;  %21842 = vmatprep.subr.bf16.mxu0 %v23533_v45 }
 0x4b6   :  { %21821 = vmatpush3.bf16.msra.mxu1 %v23534_v12  ;;  %21843 = vmatpush3.bf16.msra.mxu0 %v23535_v48 }
 0x4b7   :  { %21822 = vmatprep.subr.bf16.mxu1 %v23536_v49  ;;  %21844 = vmatprep.subr.bf16.mxu0 %v23537_v51 }
 0x4ba   :  { %21823 = vmatpush3.bf16.msra.mxu1 %v23538_v56  ;;  %21845 = vmatpush3.bf16.msra.mxu0 %v23539_v57 }
 0x4bb   :  { %21824 = vmatprep.subr.bf16.mxu1 %v23540_v38  ;;  %21846 = vmatprep.subr.bf16.mxu0 %v23541_v58 }
 0x4bc   :  { %v21522_v29 = vpop.f32.mrb[68].mxu1  ;;  %v21544_v5 = vpop.f32.mrb[72].mxu0 }
 0x4bd   :  { %v21523_v14 = vpop.f32.mrb[69].mxu1  ;;  %v21545_v34 = vpop.f32.mrb[73].mxu0 }
 0x4be   :  { %v21524_v18 = vadd.f32 %v21523_v14, %v21522_v29  ;;  %v21546_v19 = vadd.f32 %v21545_v34, %v21544_v5  ;;  %v21525_v20 = vpop.f32.mrb[70].mxu1  ;;  %v21547_v21 = vpop.f32.mrb[74].mxu0  ;;  %21825 = vmatpush3.bf16.msra.mxu1 %v23542_v60  ;;  %21847 = vmatpush3.bf16.msra.mxu0 %v23543_v33 }
 0x4bf   :  { %v21526_v23 = vpop.f32.mrb[71].mxu1  ;;  %v21548_v25 = vpop.f32.mrb[75].mxu0  ;;  %21826 = vmatprep.subr.bf16.mxu1 %v23544_v0  ;;  %21848 = vmatprep.subr.bf16.mxu0 %v23545_v50 }
 0x4c0   :  { %v14440_v26 = vadd.f32 %v21524_v18, %v27257_v47  ;;  %v23552_v47 = vld [vmem:[%s30560_s8 + $0xb40] sm:$0xff]  }
 0x4c2   :  { %v27366_v27 = vadd.f32 %v21546_v19, %v14440_v26  ;;  %21827 = vmatpush3.bf16.msra.mxu1 %v23546_v63  ;;  %21849 = vmatpush3.bf16.msra.mxu0 %v23547_v1 }
 0x4c3   :  { %21828 = vmatprep.subr.bf16.mxu1 %v23548_v15  ;;  %21850 = vmatprep.subr.bf16.mxu0 %v23549_v37 }
 0x4c6   :  { %21829 = vmatpush3.bf16.msra.mxu1 %v23550_v28  ;;  %21851 = vmatpush3.bf16.msra.mxu0 %v23551_v8 }
 0x4c7   :  { %21858 = vmatprep.subr.bf16.mxu1 %v23552_v47  ;;  %21880 = vmatprep.subr.bf16.mxu0 %v23553_v9 }
 0x4c8   :  { %29 = vsyncpa [#allocation8], 0  ;;  %v7402_v35 = vcombine.high %v7398_v30, %v7398_v30  ;;  %v23558_v59 = vld [vmem:[%s30560_s8 + $0xb08] sm:$0xff]   ;;  %v23560_v3 = vld [vmem:[%s30560_s8 + $0xb50] sm:$0xff]   ;;  %s24462_s27 = smov [#allocation2]  }
 0x4c9   :  { %14998 = vmatmul.mubr.bf16.vlgmr.msra.gmra.mrb[96].mxu1 %v7377_v24  ;;  %15038 = vmatmul.mubr.bf16.vlgmr.msra.gmra.mrb[100].mxu0 %v7399_v31  ;;  %v23559_v36 = vld [vmem:[%s30560_s8 + $0xb88] sm:$0xff]   ;;  %v23561_v39 = vld [vmem:[%s30560_s8 + $0xbd0] sm:$0xff]   ;;  %v23564_v44 = vld [vmem:[%s30560_s8 + $0xb58] sm:$0xff]   ;;  %v7384_v24 = vrot.slane %v27350_v13, %v24684_v41 }
 0x4ca   :  { %21859 = vmatpush3.bf16.msra.mxu1 %v23554_v11  ;;  %21881 = vmatpush3.bf16.msra.mxu0 %v23555_v16  ;;  %v23562_v42 = vld [vmem:[%s30560_s8 + $0xb10] sm:$0xff]   ;;  %v23565_v45 = vld [vmem:[%s30560_s8 + $0xbd8] sm:$0xff]   ;;  %v23568_v49 = vld [vmem:[%s30560_s8 + $0xb60] sm:$0xff]  }
 0x4cb   :  { %21860 = vmatprep.subr.bf16.mxu1 %v23556_v22  ;;  %21882 = vmatprep.subr.bf16.mxu0 %v23557_v32  ;;  %v23563_v43 = vld [vmem:[%s30560_s8 + $0xb90] sm:$0xff]   ;;  %v23566_v12 = vld [vmem:[%s30560_s8 + $0xb18] sm:$0xff]   ;;  %v23569_v51 = vld [vmem:[%s30560_s8 + $0xbe0] sm:$0xff]   ;;  %v7400_v16 = vcombine.high %v7384_v24, %v7384_v24 }
 0x4cc   :  { %15077 = vmatprep.mubr.bf16.mxu1 %v7398_v30  ;;  %15117 = vmatprep.mubr.bf16.mxu0 %v7402_v35  ;;  %v23567_v48 = vld [vmem:[%s30560_s8 + $0xb98] sm:$0xff]   ;;  %v23570_v56 = vld [vmem:[%s30560_s8 + $0xb20] sm:$0xff]   ;;  %v23572_v38 = vld [vmem:[%s30560_s8 + $0xb68] sm:$0xff]  }
 0x4cd   :  { %v23571_v57 = vld [vmem:[%s30560_s8 + $0xba0] sm:$0xff]   ;;  %v23573_v58 = vld [vmem:[%s30560_s8 + $0xbe8] sm:$0xff]   ;;  %v27441_v60 = vld [vmem:[%s30589_s4 + $0x30] sm:$0xff] }
 0x4ce   :  { %21861 = vmatpush3.bf16.msra.mxu1 %v23558_v59  ;;  %21883 = vmatpush3.bf16.msra.mxu0 %v23559_v36  ;;  %v23574_v33 = vld [vmem:[%s30560_s8 + $0xb28] sm:$0xff]   ;;  %v23576_v0 = vld [vmem:[%s30560_s8 + $0xb70] sm:$0xff]   ;;  %v27457_v63 = vrot.slane %v27441_v60, %v24684_v41  ;;  %v23580_v25 = vld [vmem:[%s30560_s8 + $0xb78] sm:$0xff]  }
 0x4cf   :  { %21862 = vmatprep.subr.bf16.mxu1 %v23560_v3  ;;  %21884 = vmatprep.subr.bf16.mxu0 %v23561_v39  ;;  %v23575_v62 = vld [vmem:[%s30560_s8 + $0xba8] sm:$0xff]   ;;  %v23577_v50 = vld [vmem:[%s30560_s8 + $0xbf0] sm:$0xff]   ;;  %v23581_v26 = vld [vmem:[%s30560_s8 + $0xbf8] sm:$0xff]  }
 0x4d0   :  { %v23578_v19 = vld [vmem:[%s30560_s8 + $0xb30] sm:$0xff]   ;;  %v7418_v28 = vcombine.high %v27457_v63, %v27457_v63  ;;  %v23582_v47 = vld [vmem:[%s30560_s8 + $0xb38] sm:$0xff]   ;;  %v23586_v13 = vld [vmem:[%s30560_s8 + $0xcc0] sm:$0xff]  }
 0x4d1   :  { %v23579_v20 = vld [vmem:[%s30560_s8 + $0xbb0] sm:$0xff]   ;;  %v23583_v9 = vld [vmem:[%s30560_s8 + $0xbb8] sm:$0xff]   ;;  %v23587_v30 = vld [vmem:[%s30560_s8 + $0xc00] sm:$0xff]  }
 0x4d2   :  { %21863 = vmatpush3.bf16.msra.mxu1 %v23562_v42  ;;  %21885 = vmatpush3.bf16.msra.mxu0 %v23563_v43  ;;  %v7440_v11 = vrot.slane %v7418_v28, %v24684_v41  ;;  %v23588_v31 = vld [vmem:[%s30560_s8 + $0xc80] sm:$0xff]   ;;  %v23589_v22 = vld [vmem:[%s30560_s8 + $0xc48] sm:$0xff]   ;;  %v23593_v3 = vld [vmem:[%s30560_s8 + $0xc50] sm:$0xff]  }
 0x4d3   :  { %21864 = vmatprep.subr.bf16.mxu1 %v23564_v44  ;;  %21886 = vmatprep.subr.bf16.mxu0 %v23565_v45  ;;  %v23590_v32 = vld [vmem:[%s30560_s8 + $0xcc8] sm:$0xff]   ;;  %v23594_v39 = vld [vmem:[%s30560_s8 + $0xcd0] sm:$0xff]   ;;  %v23597_v44 = vld [vmem:[%s30560_s8 + $0xc58] sm:$0xff]  }
 0x4d4   :  { %v7450_v35 = vcombine.high %v7440_v11, %v7440_v11  ;;  %v23591_v59 = vld [vmem:[%s30560_s8 + $0xc08] sm:$0xff]   ;;  %v23595_v42 = vld [vmem:[%s30560_s8 + $0xc10] sm:$0xff]   ;;  %v23598_v45 = vld [vmem:[%s30560_s8 + $0xcd8] sm:$0xff]  }
 0x4d5   :  { %v23592_v36 = vld [vmem:[%s30560_s8 + $0xc88] sm:$0xff]   ;;  %v23596_v43 = vld [vmem:[%s30560_s8 + $0xc90] sm:$0xff]  }
 0x4d6   :  { %21865 = vmatpush3.bf16.msra.mxu1 %v23566_v12  ;;  %21887 = vmatpush3.bf16.msra.mxu0 %v23567_v48  ;;  %v23599_v12 = vld [vmem:[%s30560_s8 + $0xc18] sm:$0xff]  }
 0x4d7   :  { %21866 = vmatprep.subr.bf16.mxu1 %v23568_v49  ;;  %21888 = vmatprep.subr.bf16.mxu0 %v23569_v51  ;;  %v23600_v48 = vld [vmem:[%s30560_s8 + $0xc98] sm:$0xff]   ;;  %v23601_v49 = vld [vmem:[%s30560_s8 + $0xc60] sm:$0xff]  }
 0x4d8   :  { %v23602_v51 = vld [vmem:[%s30560_s8 + $0xce0] sm:$0xff]  }
 0x4da   :  { %21867 = vmatpush3.bf16.msra.mxu1 %v23570_v56  ;;  %21889 = vmatpush3.bf16.msra.mxu0 %v23571_v57  ;;  %v23603_v56 = vld [vmem:[%s30560_s8 + $0xc20] sm:$0xff]  }
 0x4db   :  { %21868 = vmatprep.subr.bf16.mxu1 %v23572_v38  ;;  %21890 = vmatprep.subr.bf16.mxu0 %v23573_v58  ;;  %v23604_v57 = vld [vmem:[%s30560_s8 + $0xca0] sm:$0xff]   ;;  %v23605_v38 = vld [vmem:[%s30560_s8 + $0xc68] sm:$0xff]  }
 0x4dc   :  { %v21566_v29 = vpop.f32.mrb[72].mxu1  ;;  %v21588_v5 = vpop.f32.mrb[76].mxu0  ;;  %v23606_v58 = vld [vmem:[%s30560_s8 + $0xce8] sm:$0xff]  }
 0x4dd   :  { %v21567_v1 = vpop.f32.mrb[73].mxu1  ;;  %v21589_v14 = vpop.f32.mrb[77].mxu0 }
 0x4de   :  { %v21568_v34 = vadd.f32 %v21567_v1, %v21566_v29  ;;  %v21590_v15 = vadd.f32 %v21589_v14, %v21588_v5  ;;  %v21569_v37 = vpop.f32.mrb[74].mxu1  ;;  %v21591_v18 = vpop.f32.mrb[78].mxu0  ;;  %21869 = vmatpush3.bf16.msra.mxu1 %v23574_v33  ;;  %21891 = vmatpush3.bf16.msra.mxu0 %v23575_v62  ;;  %v7403_v33 = vcombine.high %v27441_v60, %v27441_v60  ;;  %v23607_v62 = vld [vmem:[%s30560_s8 + $0xc28] sm:$0xff]   ;;  %v23610_v60 = vld [vmem:[%s30560_s8 + $0xcf0] sm:$0xff]  }
 0x4df   :  { %v21570_v21 = vpop.f32.mrb[75].mxu1  ;;  %v21592_v23 = vpop.f32.mrb[79].mxu0  ;;  %21870 = vmatprep.subr.bf16.mxu1 %v23576_v0  ;;  %21892 = vmatprep.subr.bf16.mxu0 %v23577_v50  ;;  %v23608_v0 = vld [vmem:[%s30560_s8 + $0xca8] sm:$0xff]   ;;  %v23609_v50 = vld [vmem:[%s30560_s8 + $0xc70] sm:$0xff]  }
 0x4e0   :  { %v14520_v2 = vadd.f32 %v21568_v34, %v27366_v27  ;;  %v23585_v27 = vld [vmem:[%s30560_s8 + $0xc40] sm:$0xff]   ;;  %v27566_v1 = vrot.slane %v7403_v33, %v24684_v41  ;;  %v23612_v21 = vld [vmem:[%s30560_s8 + $0xcb0] sm:$0xff]   ;;  %v27663_v33 = vld [vmem:[%s30589_s4 + $0x38] sm:$0xff] }
 0x4e2   :  { %v27476_v8 = vadd.f32 %v21590_v15, %v14520_v2  ;;  %21871 = vmatpush3.bf16.msra.mxu1 %v23578_v19  ;;  %21893 = vmatpush3.bf16.msra.mxu0 %v23579_v20  ;;  %v23611_v20 = vld [vmem:[%s30560_s8 + $0xc30] sm:$0xff]   ;;  %v23614_v2 = vld [vmem:[%s30560_s8 + $0xcf8] sm:$0xff]  }
 0x4e3   :  { %21872 = vmatprep.subr.bf16.mxu1 %v23580_v25  ;;  %21894 = vmatprep.subr.bf16.mxu0 %v23581_v26  ;;  %v23613_v26 = vld [vmem:[%s30560_s8 + $0xc78] sm:$0xff]  }
 0x4e6   :  { %21873 = vmatpush3.bf16.msra.mxu1 %v23582_v47  ;;  %21895 = vmatpush3.bf16.msra.mxu0 %v23583_v9  ;;  %v7426_v47 = vrot.slane %v27457_v63, %v24684_v41  ;;  %v23618_v63 = vld [vmem:[%s30560_s8 + $0xdc0] sm:$0xff]  }
 0x4e7   :  { %21902 = vmatprep.subr.bf16.mxu1 %v23585_v27  ;;  %21924 = vmatprep.subr.bf16.mxu0 %v23586_v13  ;;  %v23615_v27 = vld [vmem:[%s30560_s8 + $0xc38] sm:$0xff]  }
 0x4e8   :  { %v23616_v13 = vld [vmem:[%s30560_s8 + $0xcb8] sm:$0xff]  }
 0x4e9   :  { %15078 = vmatmul.mubr.bf16.vlgmr.msra.gmra.mrb[100].mxu1 %v7384_v24  ;;  %15118 = vmatmul.mubr.bf16.vlgmr.msra.gmra.mrb[104].mxu0 %v7400_v16  ;;  %v7419_v24 = vcombine.high %v27566_v1, %v27566_v1  ;;  %v7448_v16 = vcombine.high %v7426_v47, %v7426_v47 }
 0x4ea   :  { %21903 = vmatpush3.bf16.msra.mxu1 %v23587_v30  ;;  %21925 = vmatpush3.bf16.msra.mxu0 %v23588_v31  ;;  %v23619_v30 = vld [vmem:[%s30560_s8 + $0xd00] sm:$0xff]  }
 0x4eb   :  { %21904 = vmatprep.subr.bf16.mxu1 %v23589_v22  ;;  %21926 = vmatprep.subr.bf16.mxu0 %v23590_v32  ;;  %v23620_v31 = vld [vmem:[%s30560_s8 + $0xd80] sm:$0xff]   ;;  %v23621_v22 = vld [vmem:[%s30560_s8 + $0xd48] sm:$0xff]  }
 0x4ec   :  { %15157 = vmatprep.mubr.bf16.mxu1 %v7440_v11  ;;  %15197 = vmatprep.mubr.bf16.mxu0 %v7450_v35  ;;  %v7447_v11 = vrot.slane %v7419_v24, %v24684_v41  ;;  %v23622_v32 = vld [vmem:[%s30560_s8 + $0xdc8] sm:$0xff]  }
 0x4ee   :  { %21905 = vmatpush3.bf16.msra.mxu1 %v23591_v59  ;;  %21927 = vmatpush3.bf16.msra.mxu0 %v23592_v36  ;;  %v7451_v35 = vcombine.high %v7447_v11, %v7447_v11  ;;  %v23623_v59 = vld [vmem:[%s30560_s8 + $0xd08] sm:$0xff]  }
 0x4ef   :  { %21906 = vmatprep.subr.bf16.mxu1 %v23593_v3  ;;  %21928 = vmatprep.subr.bf16.mxu0 %v23594_v39  ;;  %v23624_v36 = vld [vmem:[%s30560_s8 + $0xd88] sm:$0xff]   ;;  %v23625_v3 = vld [vmem:[%s30560_s8 + $0xd50] sm:$0xff]  }
 0x4f0   :  { %v23626_v39 = vld [vmem:[%s30560_s8 + $0xdd0] sm:$0xff]  }
 0x4f2   :  { %21907 = vmatpush3.bf16.msra.mxu1 %v23595_v42  ;;  %21929 = vmatpush3.bf16.msra.mxu0 %v23596_v43  ;;  %v23627_v42 = vld [vmem:[%s30560_s8 + $0xd10] sm:$0xff]  }
 0x4f3   :  { %21908 = vmatprep.subr.bf16.mxu1 %v23597_v44  ;;  %21930 = vmatprep.subr.bf16.mxu0 %v23598_v45  ;;  %v23628_v43 = vld [vmem:[%s30560_s8 + $0xd90] sm:$0xff]   ;;  %v23629_v44 = vld [vmem:[%s30560_s8 + $0xd58] sm:$0xff]  }
 0x4f4   :  { %v23630_v45 = vld [vmem:[%s30560_s8 + $0xdd8] sm:$0xff]  }
 0x4f6   :  { %21909 = vmatpush3.bf16.msra.mxu1 %v23599_v12  ;;  %21931 = vmatpush3.bf16.msra.mxu0 %v23600_v48  ;;  %v23631_v12 = vld [vmem:[%s30560_s8 + $0xd18] sm:$0xff]  }
 0x4f7   :  { %21910 = vmatprep.subr.bf16.mxu1 %v23601_v49  ;;  %21932 = vmatprep.subr.bf16.mxu0 %v23602_v51  ;;  %v23632_v48 = vld [vmem:[%s30560_s8 + $0xd98] sm:$0xff]   ;;  %v23633_v49 = vld [vmem:[%s30560_s8 + $0xd60] sm:$0xff]  }
 0x4f8   :  { %v23634_v51 = vld [vmem:[%s30560_s8 + $0xde0] sm:$0xff]  }
 0x4fa   :  { %21911 = vmatpush3.bf16.msra.mxu1 %v23603_v56  ;;  %21933 = vmatpush3.bf16.msra.mxu0 %v23604_v57  ;;  %v23635_v56 = vld [vmem:[%s30560_s8 + $0xd20] sm:$0xff]  }
 0x4fb   :  { %21912 = vmatprep.subr.bf16.mxu1 %v23605_v38  ;;  %21934 = vmatprep.subr.bf16.mxu0 %v23606_v58  ;;  %v23636_v57 = vld [vmem:[%s30560_s8 + $0xda0] sm:$0xff]   ;;  %v23637_v38 = vld [vmem:[%s30560_s8 + $0xd68] sm:$0xff]  }
 0x4fc   :  { %v21610_v29 = vpop.f32.mrb[76].mxu1  ;;  %v21632_v5 = vpop.f32.mrb[80].mxu0  ;;  %v23638_v58 = vld [vmem:[%s30560_s8 + $0xde8] sm:$0xff]  }
 0x4fd   :  { %v21611_v14 = vpop.f32.mrb[77].mxu1  ;;  %v21633_v34 = vpop.f32.mrb[81].mxu0 }
 0x4fe   :  { %v21612_v15 = vadd.f32 %v21611_v14, %v21610_v29  ;;  %v21634_v37 = vadd.f32 %v21633_v34, %v21632_v5  ;;  %v21613_v18 = vpop.f32.mrb[78].mxu1  ;;  %v21635_v19 = vpop.f32.mrb[82].mxu0  ;;  %21913 = vmatpush3.bf16.msra.mxu1 %v23607_v62  ;;  %21935 = vmatpush3.bf16.msra.mxu0 %v23608_v0  ;;  %v23639_v62 = vld [vmem:[%s30560_s8 + $0xd28] sm:$0xff]   ;;  %v27679_v14 = vrot.slane %v27663_v33, %v24684_v41 }
 0x4ff   :  { %v21614_v23 = vpop.f32.mrb[79].mxu1  ;;  %v21636_v25 = vpop.f32.mrb[83].mxu0  ;;  %21914 = vmatprep.subr.bf16.mxu1 %v23609_v50  ;;  %21936 = vmatprep.subr.bf16.mxu0 %v23610_v60  ;;  %v23640_v0 = vld [vmem:[%s30560_s8 + $0xda8] sm:$0xff]   ;;  %v23641_v50 = vld [vmem:[%s30560_s8 + $0xd70] sm:$0xff]  }
 0x500   :  { %v14600_v28 = vadd.f32 %v21612_v15, %v27476_v8  ;;  %v23617_v8 = vld [vmem:[%s30560_s8 + $0xd40] sm:$0xff]   ;;  %v23642_v60 = vld [vmem:[%s30560_s8 + $0xdf0] sm:$0xff]  }
 0x501   :  { %v23644_v23 = vld [vmem:[%s30560_s8 + $0xdb0] sm:$0xff]  }
 0x502   :  { %v27585_v9 = vadd.f32 %v21634_v37, %v14600_v28  ;;  %21915 = vmatpush3.bf16.msra.mxu1 %v23611_v20  ;;  %21937 = vmatpush3.bf16.msra.mxu0 %v23612_v21  ;;  %v23643_v21 = vld [vmem:[%s30560_s8 + $0xd30] sm:$0xff]   ;;  %v23646_v28 = vld [vmem:[%s30560_s8 + $0xdf8] sm:$0xff]  }
 0x503   :  { %21916 = vmatprep.subr.bf16.mxu1 %v23613_v26  ;;  %21938 = vmatprep.subr.bf16.mxu0 %v23614_v2  ;;  %v23645_v2 = vld [vmem:[%s30560_s8 + $0xd78] sm:$0xff]  }
 0x506   :  { %21917 = vmatpush3.bf16.msra.mxu1 %v23615_v27  ;;  %21939 = vmatpush3.bf16.msra.mxu0 %v23616_v13  ;;  %v7433_v27 = vrot.slane %v27566_v1, %v24684_v41  ;;  %v23651_v1 = vld [vmem:[%s30560_s8 + $0xec0] sm:$0xff]  }
 0x507   :  { %21946 = vmatprep.subr.bf16.mxu1 %v23617_v8  ;;  %21968 = vmatprep.subr.bf16.mxu0 %v23618_v63  ;;  %v23647_v8 = vld [vmem:[%s30560_s8 + $0xd38] sm:$0xff]  }
 0x508   :  { %v23648_v63 = vld [vmem:[%s30560_s8 + $0xdb8] sm:$0xff]  }
 0x509   :  { %15158 = vmatmul.mubr.bf16.vlgmr.msra.gmra.mrb[104].mxu1 %v7426_v47  ;;  %15198 = vmatmul.mubr.bf16.vlgmr.msra.gmra.mrb[108].mxu0 %v7448_v16  ;;  %v7467_v47 = vcombine.high %v27679_v14, %v27679_v14  ;;  %v7449_v16 = vcombine.high %v7433_v27, %v7433_v27 }
 0x50a   :  { %21947 = vmatpush3.bf16.msra.mxu1 %v23619_v30  ;;  %21969 = vmatpush3.bf16.msra.mxu0 %v23620_v31  ;;  %v23652_v30 = vld [vmem:[%s30560_s8 + $0xe00] sm:$0xff]  }
 0x50b   :  { %21948 = vmatprep.subr.bf16.mxu1 %v23621_v22  ;;  %21970 = vmatprep.subr.bf16.mxu0 %v23622_v32  ;;  %v23653_v31 = vld [vmem:[%s30560_s8 + $0xe80] sm:$0xff]   ;;  %v23654_v22 = vld [vmem:[%s30560_s8 + $0xe48] sm:$0xff]  }
 0x50c   :  { %15237 = vmatprep.mubr.bf16.mxu1 %v7447_v11  ;;  %15277 = vmatprep.mubr.bf16.mxu0 %v7451_v35  ;;  %v7489_v11 = vrot.slane %v7467_v47, %v24684_v41  ;;  %v23655_v32 = vld [vmem:[%s30560_s8 + $0xec8] sm:$0xff]  }
 0x50e   :  { %21949 = vmatpush3.bf16.msra.mxu1 %v23623_v59  ;;  %21971 = vmatpush3.bf16.msra.mxu0 %v23624_v36  ;;  %v7499_v35 = vcombine.high %v7489_v11, %v7489_v11  ;;  %v23656_v59 = vld [vmem:[%s30560_s8 + $0xe08] sm:$0xff]  }
 0x50f   :  { %21950 = vmatprep.subr.bf16.mxu1 %v23625_v3  ;;  %21972 = vmatprep.subr.bf16.mxu0 %v23626_v39  ;;  %v23657_v36 = vld [vmem:[%s30560_s8 + $0xe88] sm:$0xff]   ;;  %v23658_v3 = vld [vmem:[%s30560_s8 + $0xe50] sm:$0xff]  }
 0x510   :  { %v23659_v39 = vld [vmem:[%s30560_s8 + $0xed0] sm:$0xff]  }
 0x512   :  { %21951 = vmatpush3.bf16.msra.mxu1 %v23627_v42  ;;  %21973 = vmatpush3.bf16.msra.mxu0 %v23628_v43  ;;  %v23660_v42 = vld [vmem:[%s30560_s8 + $0xe10] sm:$0xff]  }
 0x513   :  { %21952 = vmatprep.subr.bf16.mxu1 %v23629_v44  ;;  %21974 = vmatprep.subr.bf16.mxu0 %v23630_v45  ;;  %v23661_v43 = vld [vmem:[%s30560_s8 + $0xe90] sm:$0xff]   ;;  %v23662_v44 = vld [vmem:[%s30560_s8 + $0xe58] sm:$0xff]  }
 0x514   :  { %v23663_v45 = vld [vmem:[%s30560_s8 + $0xed8] sm:$0xff]  }
 0x516   :  { %21953 = vmatpush3.bf16.msra.mxu1 %v23631_v12  ;;  %21975 = vmatpush3.bf16.msra.mxu0 %v23632_v48  ;;  %v23664_v12 = vld [vmem:[%s30560_s8 + $0xe18] sm:$0xff]  }
 0x517   :  { %21954 = vmatprep.subr.bf16.mxu1 %v23633_v49  ;;  %21976 = vmatprep.subr.bf16.mxu0 %v23634_v51  ;;  %v23665_v48 = vld [vmem:[%s30560_s8 + $0xe98] sm:$0xff]   ;;  %v23666_v49 = vld [vmem:[%s30560_s8 + $0xe60] sm:$0xff]  }
 0x518   :  { %v23667_v51 = vld [vmem:[%s30560_s8 + $0xee0] sm:$0xff]  }
 0x51a   :  { %21955 = vmatpush3.bf16.msra.mxu1 %v23635_v56  ;;  %21977 = vmatpush3.bf16.msra.mxu0 %v23636_v57  ;;  %v23668_v56 = vld [vmem:[%s30560_s8 + $0xe20] sm:$0xff]  }
 0x51b   :  { %21956 = vmatprep.subr.bf16.mxu1 %v23637_v38  ;;  %21978 = vmatprep.subr.bf16.mxu0 %v23638_v58  ;;  %v23669_v57 = vld [vmem:[%s30560_s8 + $0xea0] sm:$0xff]   ;;  %v23670_v38 = vld [vmem:[%s30560_s8 + $0xe68] sm:$0xff]  }
 0x51c   :  { %v21654_v29 = vpop.f32.mrb[80].mxu1  ;;  %v21676_v5 = vpop.f32.mrb[84].mxu0  ;;  %v23671_v58 = vld [vmem:[%s30560_s8 + $0xee8] sm:$0xff]  }
 0x51d   :  { %v21655_v34 = vpop.f32.mrb[81].mxu1  ;;  %v21677_v15 = vpop.f32.mrb[85].mxu0 }
 0x51e   :  { %v21656_v37 = vadd.f32 %v21655_v34, %v21654_v29  ;;  %v21678_v18 = vadd.f32 %v21677_v15, %v21676_v5  ;;  %v21657_v19 = vpop.f32.mrb[82].mxu1  ;;  %v21679_v20 = vpop.f32.mrb[86].mxu0  ;;  %21957 = vmatpush3.bf16.msra.mxu1 %v23639_v62  ;;  %21979 = vmatpush3.bf16.msra.mxu0 %v23640_v0  ;;  %v7452_v62 = vcombine.high %v27663_v33, %v27663_v33  ;;  %v23672_v0 = vld [vmem:[%s30560_s8 + $0xe28] sm:$0xff]   ;;  %v23675_v33 = vld [vmem:[%s30560_s8 + $0xef0] sm:$0xff]  }
 0x51f   :  { %v21658_v25 = vpop.f32.mrb[83].mxu1  ;;  %v21680_v26 = vpop.f32.mrb[87].mxu0  ;;  %21958 = vmatprep.subr.bf16.mxu1 %v23641_v50  ;;  %21980 = vmatprep.subr.bf16.mxu0 %v23642_v60  ;;  %v23673_v50 = vld [vmem:[%s30560_s8 + $0xea8] sm:$0xff]   ;;  %v23674_v60 = vld [vmem:[%s30560_s8 + $0xe70] sm:$0xff]  }
 0x520   :  { %v14680_v24 = vadd.f32 %v21656_v37, %v27585_v9  ;;  %v23650_v9 = vld [vmem:[%s30560_s8 + $0xe40] sm:$0xff]   ;;  %v27788_v34 = vrot.slane %v7452_v62, %v24684_v41  ;;  %v23677_v25 = vld [vmem:[%s30560_s8 + $0xeb0] sm:$0xff]  }
 0x521   :  { %v27885_v62 = vld [vmem:[%s30589_s4 + $0x40] sm:$0xff] }
 0x522   :  { %v27698_v13 = vadd.f32 %v21678_v18, %v14680_v24  ;;  %21959 = vmatpush3.bf16.msra.mxu1 %v23643_v21  ;;  %21981 = vmatpush3.bf16.msra.mxu0 %v23644_v23  ;;  %v23676_v23 = vld [vmem:[%s30560_s8 + $0xe30] sm:$0xff]   ;;  %v23679_v24 = vld [vmem:[%s30560_s8 + $0xef8] sm:$0xff]  }
 0x523   :  { %21960 = vmatprep.subr.bf16.mxu1 %v23645_v2  ;;  %21982 = vmatprep.subr.bf16.mxu0 %v23646_v28  ;;  %v23678_v28 = vld [vmem:[%s30560_s8 + $0xe78] sm:$0xff]  }
 0x526   :  { %21961 = vmatpush3.bf16.msra.mxu1 %v23647_v8  ;;  %21983 = vmatpush3.bf16.msra.mxu0 %v23648_v63  ;;  %v7475_v8 = vrot.slane %v27679_v14, %v24684_v41  ;;  %v23683_v14 = vld [vmem:[%s30560_s8 + $0xfc0] sm:$0xff]  }
 0x527   :  { %21990 = vmatprep.subr.bf16.mxu1 %v23650_v9  ;;  %22012 = vmatprep.subr.bf16.mxu0 %v23651_v1  ;;  %v23680_v9 = vld [vmem:[%s30560_s8 + $0xe38] sm:$0xff]  }
 0x528   :  { %v23681_v1 = vld [vmem:[%s30560_s8 + $0xeb8] sm:$0xff]  }
 0x529   :  { %15238 = vmatmul.mubr.bf16.vlgmr.msra.gmra.mrb[108].mxu1 %v7433_v27  ;;  %15278 = vmatmul.mubr.bf16.vlgmr.msra.gmra.mrb[112].mxu0 %v7449_v16  ;;  %v7468_v27 = vcombine.high %v27788_v34, %v27788_v34  ;;  %v7497_v16 = vcombine.high %v7475_v8, %v7475_v8 }
 0x52a   :  { %21991 = vmatpush3.bf16.msra.mxu1 %v23652_v30  ;;  %22013 = vmatpush3.bf16.msra.mxu0 %v23653_v31  ;;  %v23684_v30 = vld [vmem:[%s30560_s8 + $0xf00] sm:$0xff]  }
 0x52b   :  { %21992 = vmatprep.subr.bf16.mxu1 %v23654_v22  ;;  %22014 = vmatprep.subr.bf16.mxu0 %v23655_v32  ;;  %v23685_v31 = vld [vmem:[%s30560_s8 + $0xf80] sm:$0xff]   ;;  %v23686_v22 = vld [vmem:[%s30560_s8 + $0xf48] sm:$0xff]  }
 0x52c   :  { %15317 = vmatprep.mubr.bf16.mxu1 %v7489_v11  ;;  %15357 = vmatprep.mubr.bf16.mxu0 %v7499_v35  ;;  %v7496_v11 = vrot.slane %v7468_v27, %v24684_v41  ;;  %v23687_v32 = vld [vmem:[%s30560_s8 + $0xfc8] sm:$0xff]  }
 0x52e   :  { %21993 = vmatpush3.bf16.msra.mxu1 %v23656_v59  ;;  %22015 = vmatpush3.bf16.msra.mxu0 %v23657_v36  ;;  %v7500_v35 = vcombine.high %v7496_v11, %v7496_v11  ;;  %v23688_v59 = vld [vmem:[%s30560_s8 + $0xf08] sm:$0xff]  }
 0x52f   :  { %21994 = vmatprep.subr.bf16.mxu1 %v23658_v3  ;;  %22016 = vmatprep.subr.bf16.mxu0 %v23659_v39  ;;  %v23689_v36 = vld [vmem:[%s30560_s8 + $0xf88] sm:$0xff]   ;;  %v23690_v3 = vld [vmem:[%s30560_s8 + $0xf50] sm:$0xff]  }
 0x530   :  { %v23691_v39 = vld [vmem:[%s30560_s8 + $0xfd0] sm:$0xff]  }
 0x532   :  { %21995 = vmatpush3.bf16.msra.mxu1 %v23660_v42  ;;  %22017 = vmatpush3.bf16.msra.mxu0 %v23661_v43  ;;  %v23692_v42 = vld [vmem:[%s30560_s8 + $0xf10] sm:$0xff]  }
 0x533   :  { %21996 = vmatprep.subr.bf16.mxu1 %v23662_v44  ;;  %22018 = vmatprep.subr.bf16.mxu0 %v23663_v45  ;;  %v23693_v43 = vld [vmem:[%s30560_s8 + $0xf90] sm:$0xff]   ;;  %v23694_v44 = vld [vmem:[%s30560_s8 + $0xf58] sm:$0xff]  }
 0x534   :  { %v23695_v45 = vld [vmem:[%s30560_s8 + $0xfd8] sm:$0xff]  }
 0x536   :  { %21997 = vmatpush3.bf16.msra.mxu1 %v23664_v12  ;;  %22019 = vmatpush3.bf16.msra.mxu0 %v23665_v48  ;;  %v23696_v12 = vld [vmem:[%s30560_s8 + $0xf18] sm:$0xff]  }
 0x537   :  { %21998 = vmatprep.subr.bf16.mxu1 %v23666_v49  ;;  %22020 = vmatprep.subr.bf16.mxu0 %v23667_v51  ;;  %v23697_v48 = vld [vmem:[%s30560_s8 + $0xf98] sm:$0xff]   ;;  %v23698_v49 = vld [vmem:[%s30560_s8 + $0xf60] sm:$0xff]  }
 0x538   :  { %v23699_v51 = vld [vmem:[%s30560_s8 + $0xfe0] sm:$0xff]  }
 0x53a   :  { %21999 = vmatpush3.bf16.msra.mxu1 %v23668_v56  ;;  %22021 = vmatpush3.bf16.msra.mxu0 %v23669_v57  ;;  %v23700_v56 = vld [vmem:[%s30560_s8 + $0xf20] sm:$0xff]  }
 0x53b   :  { %22000 = vmatprep.subr.bf16.mxu1 %v23670_v38  ;;  %22022 = vmatprep.subr.bf16.mxu0 %v23671_v58  ;;  %v23701_v57 = vld [vmem:[%s30560_s8 + $0xfa0] sm:$0xff]   ;;  %v23702_v38 = vld [vmem:[%s30560_s8 + $0xf68] sm:$0xff]  }
 0x53c   :  { %v21698_v29 = vpop.f32.mrb[84].mxu1  ;;  %v21720_v5 = vpop.f32.mrb[88].mxu0  ;;  %v23703_v58 = vld [vmem:[%s30560_s8 + $0xfe8] sm:$0xff]  }
 0x53d   :  { %v21699_v15 = vpop.f32.mrb[85].mxu1  ;;  %v21721_v37 = vpop.f32.mrb[89].mxu0 }
 0x53e   :  { %v21700_v18 = vadd.f32 %v21699_v15, %v21698_v29  ;;  %v21722_v19 = vadd.f32 %v21721_v37, %v21720_v5  ;;  %v21701_v20 = vpop.f32.mrb[86].mxu1  ;;  %v21723_v21 = vpop.f32.mrb[90].mxu0  ;;  %22001 = vmatpush3.bf16.msra.mxu1 %v23672_v0  ;;  %22023 = vmatpush3.bf16.msra.mxu0 %v23673_v50  ;;  %v23704_v0 = vld [vmem:[%s30560_s8 + $0xf28] sm:$0xff]   ;;  %v27901_v15 = vrot.slane %v27885_v62, %v24684_v41 }
 0x53f   :  { %v21702_v26 = vpop.f32.mrb[87].mxu1  ;;  %v21724_v2 = vpop.f32.mrb[91].mxu0  ;;  %22002 = vmatprep.subr.bf16.mxu1 %v23674_v60  ;;  %22024 = vmatprep.subr.bf16.mxu0 %v23675_v33  ;;  %v23705_v50 = vld [vmem:[%s30560_s8 + $0xfa8] sm:$0xff]   ;;  %v23706_v60 = vld [vmem:[%s30560_s8 + $0xf70] sm:$0xff]  }
 0x540   :  { %v14760_v47 = vadd.f32 %v21700_v18, %v27698_v13  ;;  %v23682_v13 = vld [vmem:[%s30560_s8 + $0xf40] sm:$0xff]   ;;  %v23707_v33 = vld [vmem:[%s30560_s8 + $0xff0] sm:$0xff]  }
 0x541   :  { %v23709_v26 = vld [vmem:[%s30560_s8 + $0xfb0] sm:$0xff]  }
 0x542   :  { %v27807_v63 = vadd.f32 %v21722_v19, %v14760_v47  ;;  %22003 = vmatpush3.bf16.msra.mxu1 %v23676_v23  ;;  %22025 = vmatpush3.bf16.msra.mxu0 %v23677_v25  ;;  %v23708_v25 = vld [vmem:[%s30560_s8 + $0xf30] sm:$0xff]   ;;  %v23711_v47 = vld [vmem:[%s30560_s8 + $0xff8] sm:$0xff]  }
 0x543   :  { %22004 = vmatprep.subr.bf16.mxu1 %v23678_v28  ;;  %22026 = vmatprep.subr.bf16.mxu0 %v23679_v24  ;;  %v23710_v24 = vld [vmem:[%s30560_s8 + $0xf78] sm:$0xff]  }
 0x546   :  { %22005 = vmatpush3.bf16.msra.mxu1 %v23680_v9  ;;  %22027 = vmatpush3.bf16.msra.mxu0 %v23681_v1  ;;  %v7482_v9 = vrot.slane %v27788_v34, %v24684_v41  ;;  %v23716_v34 = vld [vmem:[%s30560_s8 + $0x10c0] sm:$0xff]  }
 0x547   :  { %22034 = vmatprep.subr.bf16.mxu1 %v23682_v13  ;;  %22056 = vmatprep.subr.bf16.mxu0 %v23683_v14  ;;  %v23712_v13 = vld [vmem:[%s30560_s8 + $0xf38] sm:$0xff]  }
 0x548   :  { %v23713_v14 = vld [vmem:[%s30560_s8 + $0xfb8] sm:$0xff]  }
 0x549   :  { %15318 = vmatmul.mubr.bf16.vlgmr.msra.gmra.mrb[112].mxu1 %v7475_v8  ;;  %15358 = vmatmul.mubr.bf16.vlgmr.msra.gmra.mrb[116].mxu0 %v7497_v16  ;;  %v7516_v8 = vcombine.high %v27901_v15, %v27901_v15  ;;  %v7498_v16 = vcombine.high %v7482_v9, %v7482_v9 }
 0x54a   :  { %22035 = vmatpush3.bf16.msra.mxu1 %v23684_v30  ;;  %22057 = vmatpush3.bf16.msra.mxu0 %v23685_v31  ;;  %v23717_v30 = vld [vmem:[%s30560_s8 + $0x1000] sm:$0xff]  }
 0x54b   :  { %22036 = vmatprep.subr.bf16.mxu1 %v23686_v22  ;;  %22058 = vmatprep.subr.bf16.mxu0 %v23687_v32  ;;  %v23718_v31 = vld [vmem:[%s30560_s8 + $0x1080] sm:$0xff]   ;;  %v23719_v22 = vld [vmem:[%s30560_s8 + $0x1048] sm:$0xff]  }
 0x54c   :  { %15397 = vmatprep.mubr.bf16.mxu1 %v7496_v11  ;;  %15437 = vmatprep.mubr.bf16.mxu0 %v7500_v35  ;;  %v7538_v11 = vrot.slane %v7516_v8, %v24684_v41  ;;  %v23720_v32 = vld [vmem:[%s30560_s8 + $0x10c8] sm:$0xff]  }
 0x54e   :  { %22037 = vmatpush3.bf16.msra.mxu1 %v23688_v59  ;;  %22059 = vmatpush3.bf16.msra.mxu0 %v23689_v36  ;;  %v7548_v35 = vcombine.high %v7538_v11, %v7538_v11  ;;  %v23721_v59 = vld [vmem:[%s30560_s8 + $0x1008] sm:$0xff]  }
 0x54f   :  { %22038 = vmatprep.subr.bf16.mxu1 %v23690_v3  ;;  %22060 = vmatprep.subr.bf16.mxu0 %v23691_v39  ;;  %v23722_v36 = vld [vmem:[%s30560_s8 + $0x1088] sm:$0xff]   ;;  %v23723_v3 = vld [vmem:[%s30560_s8 + $0x1050] sm:$0xff]  }
 0x550   :  { %v23724_v39 = vld [vmem:[%s30560_s8 + $0x10d0] sm:$0xff]  }
 0x552   :  { %22039 = vmatpush3.bf16.msra.mxu1 %v23692_v42  ;;  %22061 = vmatpush3.bf16.msra.mxu0 %v23693_v43  ;;  %v23725_v42 = vld [vmem:[%s30560_s8 + $0x1010] sm:$0xff]  }
 0x553   :  { %22040 = vmatprep.subr.bf16.mxu1 %v23694_v44  ;;  %22062 = vmatprep.subr.bf16.mxu0 %v23695_v45  ;;  %v23726_v43 = vld [vmem:[%s30560_s8 + $0x1090] sm:$0xff]   ;;  %v23727_v44 = vld [vmem:[%s30560_s8 + $0x1058] sm:$0xff]  }
 0x554   :  { %v23728_v45 = vld [vmem:[%s30560_s8 + $0x10d8] sm:$0xff]  }
 0x556   :  { %22041 = vmatpush3.bf16.msra.mxu1 %v23696_v12  ;;  %22063 = vmatpush3.bf16.msra.mxu0 %v23697_v48  ;;  %v23729_v12 = vld [vmem:[%s30560_s8 + $0x1018] sm:$0xff]  }
 0x557   :  { %22042 = vmatprep.subr.bf16.mxu1 %v23698_v49  ;;  %22064 = vmatprep.subr.bf16.mxu0 %v23699_v51  ;;  %v23730_v48 = vld [vmem:[%s30560_s8 + $0x1098] sm:$0xff]   ;;  %v23731_v49 = vld [vmem:[%s30560_s8 + $0x1060] sm:$0xff]  }
 0x558   :  { %v23732_v51 = vld [vmem:[%s30560_s8 + $0x10e0] sm:$0xff]  }
 0x55a   :  { %22043 = vmatpush3.bf16.msra.mxu1 %v23700_v56  ;;  %22065 = vmatpush3.bf16.msra.mxu0 %v23701_v57  ;;  %v23733_v56 = vld [vmem:[%s30560_s8 + $0x1020] sm:$0xff]  }
 0x55b   :  { %22044 = vmatprep.subr.bf16.mxu1 %v23702_v38  ;;  %22066 = vmatprep.subr.bf16.mxu0 %v23703_v58  ;;  %v23734_v57 = vld [vmem:[%s30560_s8 + $0x10a0] sm:$0xff]   ;;  %v23735_v38 = vld [vmem:[%s30560_s8 + $0x1068] sm:$0xff]  }
 0x55c   :  { %v21742_v29 = vpop.f32.mrb[88].mxu1  ;;  %v21764_v5 = vpop.f32.mrb[92].mxu0  ;;  %v23736_v58 = vld [vmem:[%s30560_s8 + $0x10e8] sm:$0xff]  }
 0x55d   :  { %v21743_v37 = vpop.f32.mrb[89].mxu1  ;;  %v21765_v18 = vpop.f32.mrb[93].mxu0 }
 0x55e   :  { %v21744_v19 = vadd.f32 %v21743_v37, %v21742_v29  ;;  %v21766_v20 = vadd.f32 %v21765_v18, %v21764_v5  ;;  %v21745_v21 = vpop.f32.mrb[90].mxu1  ;;  %v21767_v23 = vpop.f32.mrb[94].mxu0  ;;  %22045 = vmatpush3.bf16.msra.mxu1 %v23704_v0  ;;  %22067 = vmatpush3.bf16.msra.mxu0 %v23705_v50  ;;  %v7501_v0 = vcombine.high %v27885_v62, %v27885_v62  ;;  %v23737_v50 = vld [vmem:[%s30560_s8 + $0x1028] sm:$0xff]   ;;  %v23740_v62 = vld [vmem:[%s30560_s8 + $0x10f0] sm:$0xff]  }
 0x55f   :  { %v21746_v2 = vpop.f32.mrb[91].mxu1  ;;  %v21768_v28 = vpop.f32.mrb[95].mxu0  ;;  %22046 = vmatprep.subr.bf16.mxu1 %v23706_v60  ;;  %22068 = vmatprep.subr.bf16.mxu0 %v23707_v33  ;;  %v23738_v60 = vld [vmem:[%s30560_s8 + $0x10a8] sm:$0xff]   ;;  %v23739_v33 = vld [vmem:[%s30560_s8 + $0x1070] sm:$0xff]  }
 0x560   :  { %v14840_v27 = vadd.f32 %v21744_v19, %v27807_v63  ;;  %v23715_v63 = vld [vmem:[%s30560_s8 + $0x1040] sm:$0xff]   ;;  %v28010_v37 = vrot.slane %v7501_v0, %v24684_v41  ;;  %v23742_v2 = vld [vmem:[%s30560_s8 + $0x10b0] sm:$0xff]   ;;  %v28107_v0 = vld [vmem:[%s30589_s4 + $0x48] sm:$0xff] }
 0x562   :  { %v27920_v1 = vadd.f32 %v21766_v20, %v14840_v27  ;;  %22047 = vmatpush3.bf16.msra.mxu1 %v23708_v25  ;;  %22069 = vmatpush3.bf16.msra.mxu0 %v23709_v26  ;;  %v23741_v26 = vld [vmem:[%s30560_s8 + $0x1030] sm:$0xff]   ;;  %v23744_v27 = vld [vmem:[%s30560_s8 + $0x10f8] sm:$0xff]  }
 0x563   :  { %22048 = vmatprep.subr.bf16.mxu1 %v23710_v24  ;;  %22070 = vmatprep.subr.bf16.mxu0 %v23711_v47  ;;  %v23743_v47 = vld [vmem:[%s30560_s8 + $0x1078] sm:$0xff]  }
 0x566   :  { %22049 = vmatpush3.bf16.msra.mxu1 %v23712_v13  ;;  %22071 = vmatpush3.bf16.msra.mxu0 %v23713_v14  ;;  %v7524_v13 = vrot.slane %v27901_v15, %v24684_v41  ;;  %v23748_v15 = vld [vmem:[%s30560_s8 + $0x11c0] sm:$0xff]  }
 0x567   :  { %22078 = vmatprep.subr.bf16.mxu1 %v23715_v63  ;;  %22100 = vmatprep.subr.bf16.mxu0 %v23716_v34  ;;  %v23745_v63 = vld [vmem:[%s30560_s8 + $0x1038] sm:$0xff]  }
 0x568   :  { %v23746_v34 = vld [vmem:[%s30560_s8 + $0x10b8] sm:$0xff]  }
 0x569   :  { %15398 = vmatmul.mubr.bf16.vlgmr.msra.gmra.mrb[116].mxu1 %v7482_v9  ;;  %15438 = vmatmul.mubr.bf16.vlgmr.msra.gmra.mrb[120].mxu0 %v7498_v16  ;;  %v7517_v9 = vcombine.high %v28010_v37, %v28010_v37  ;;  %v7546_v16 = vcombine.high %v7524_v13, %v7524_v13 }
 0x56a   :  { %22079 = vmatpush3.bf16.msra.mxu1 %v23717_v30  ;;  %22101 = vmatpush3.bf16.msra.mxu0 %v23718_v31  ;;  %v23749_v30 = vld [vmem:[%s30560_s8 + $0x1100] sm:$0xff]  }
 0x56b   :  { %22080 = vmatprep.subr.bf16.mxu1 %v23719_v22  ;;  %22102 = vmatprep.subr.bf16.mxu0 %v23720_v32  ;;  %v23750_v31 = vld [vmem:[%s30560_s8 + $0x1180] sm:$0xff]   ;;  %v23751_v22 = vld [vmem:[%s30560_s8 + $0x1148] sm:$0xff]  }
 0x56c   :  { %15477 = vmatprep.mubr.bf16.mxu1 %v7538_v11  ;;  %15517 = vmatprep.mubr.bf16.mxu0 %v7548_v35  ;;  %v7545_v11 = vrot.slane %v7517_v9, %v24684_v41  ;;  %v23752_v32 = vld [vmem:[%s30560_s8 + $0x11c8] sm:$0xff]  }
 0x56e   :  { %22081 = vmatpush3.bf16.msra.mxu1 %v23721_v59  ;;  %22103 = vmatpush3.bf16.msra.mxu0 %v23722_v36  ;;  %v7549_v35 = vcombine.high %v7545_v11, %v7545_v11  ;;  %v23753_v59 = vld [vmem:[%s30560_s8 + $0x1108] sm:$0xff]  }
 0x56f   :  { %22082 = vmatprep.subr.bf16.mxu1 %v23723_v3  ;;  %22104 = vmatprep.subr.bf16.mxu0 %v23724_v39  ;;  %v23754_v36 = vld [vmem:[%s30560_s8 + $0x1188] sm:$0xff]   ;;  %v23755_v3 = vld [vmem:[%s30560_s8 + $0x1150] sm:$0xff]  }
 0x570   :  { %v23756_v39 = vld [vmem:[%s30560_s8 + $0x11d0] sm:$0xff]  }
 0x572   :  { %22083 = vmatpush3.bf16.msra.mxu1 %v23725_v42  ;;  %22105 = vmatpush3.bf16.msra.mxu0 %v23726_v43  ;;  %v23757_v42 = vld [vmem:[%s30560_s8 + $0x1110] sm:$0xff]  }
 0x573   :  { %22084 = vmatprep.subr.bf16.mxu1 %v23727_v44  ;;  %22106 = vmatprep.subr.bf16.mxu0 %v23728_v45  ;;  %v23758_v43 = vld [vmem:[%s30560_s8 + $0x1190] sm:$0xff]   ;;  %v23759_v44 = vld [vmem:[%s30560_s8 + $0x1158] sm:$0xff]  }
 0x574   :  { %v23760_v45 = vld [vmem:[%s30560_s8 + $0x11d8] sm:$0xff]  }
 0x576   :  { %22085 = vmatpush3.bf16.msra.mxu1 %v23729_v12  ;;  %22107 = vmatpush3.bf16.msra.mxu0 %v23730_v48  ;;  %v23761_v12 = vld [vmem:[%s30560_s8 + $0x1118] sm:$0xff]  }
 0x577   :  { %22086 = vmatprep.subr.bf16.mxu1 %v23731_v49  ;;  %22108 = vmatprep.subr.bf16.mxu0 %v23732_v51  ;;  %v23762_v48 = vld [vmem:[%s30560_s8 + $0x1198] sm:$0xff]   ;;  %v23763_v49 = vld [vmem:[%s30560_s8 + $0x1160] sm:$0xff]  }
 0x578   :  { %v23764_v51 = vld [vmem:[%s30560_s8 + $0x11e0] sm:$0xff]  }
 0x57a   :  { %22087 = vmatpush3.bf16.msra.mxu1 %v23733_v56  ;;  %22109 = vmatpush3.bf16.msra.mxu0 %v23734_v57  ;;  %v23765_v56 = vld [vmem:[%s30560_s8 + $0x1120] sm:$0xff]  }
 0x57b   :  { %22088 = vmatprep.subr.bf16.mxu1 %v23735_v38  ;;  %22110 = vmatprep.subr.bf16.mxu0 %v23736_v58  ;;  %v23766_v57 = vld [vmem:[%s30560_s8 + $0x11a0] sm:$0xff]   ;;  %v23767_v38 = vld [vmem:[%s30560_s8 + $0x1168] sm:$0xff]  }
 0x57c   :  { %v21786_v29 = vpop.f32.mrb[92].mxu1  ;;  %v21808_v5 = vpop.f32.mrb[96].mxu0  ;;  %v23768_v58 = vld [vmem:[%s30560_s8 + $0x11e8] sm:$0xff]  }
 0x57d   :  { %v21787_v18 = vpop.f32.mrb[93].mxu1  ;;  %v21809_v19 = vpop.f32.mrb[97].mxu0 }
 0x57e   :  { %v21788_v20 = vadd.f32 %v21787_v18, %v21786_v29  ;;  %v21810_v21 = vadd.f32 %v21809_v19, %v21808_v5  ;;  %v21789_v23 = vpop.f32.mrb[94].mxu1  ;;  %v21811_v25 = vpop.f32.mrb[98].mxu0  ;;  %22089 = vmatpush3.bf16.msra.mxu1 %v23737_v50  ;;  %22111 = vmatpush3.bf16.msra.mxu0 %v23738_v60  ;;  %v23769_v50 = vld [vmem:[%s30560_s8 + $0x1128] sm:$0xff]   ;;  %v28123_v18 = vrot.slane %v28107_v0, %v24684_v41 }
 0x57f   :  { %v21790_v28 = vpop.f32.mrb[95].mxu1  ;;  %v21812_v24 = vpop.f32.mrb[99].mxu0  ;;  %22090 = vmatprep.subr.bf16.mxu1 %v23739_v33  ;;  %22112 = vmatprep.subr.bf16.mxu0 %v23740_v62  ;;  %v23770_v60 = vld [vmem:[%s30560_s8 + $0x11a8] sm:$0xff]   ;;  %v23771_v33 = vld [vmem:[%s30560_s8 + $0x1170] sm:$0xff]  }
 0x580   :  { %v14920_v8 = vadd.f32 %v21788_v20, %v27920_v1  ;;  %v23747_v1 = vld [vmem:[%s30560_s8 + $0x1140] sm:$0xff]   ;;  %v23772_v62 = vld [vmem:[%s30560_s8 + $0x11f0] sm:$0xff]  }
 0x581   :  { %v23774_v28 = vld [vmem:[%s30560_s8 + $0x11b0] sm:$0xff]  }
 0x582   :  { %v28029_v14 = vadd.f32 %v21810_v21, %v14920_v8  ;;  %22091 = vmatpush3.bf16.msra.mxu1 %v23741_v26  ;;  %22113 = vmatpush3.bf16.msra.mxu0 %v23742_v2  ;;  %v23773_v2 = vld [vmem:[%s30560_s8 + $0x1130] sm:$0xff]   ;;  %v23776_v8 = vld [vmem:[%s30560_s8 + $0x11f8] sm:$0xff]  }
 0x583   :  { %22092 = vmatprep.subr.bf16.mxu1 %v23743_v47  ;;  %22114 = vmatprep.subr.bf16.mxu0 %v23744_v27  ;;  %v23775_v27 = vld [vmem:[%s30560_s8 + $0x1178] sm:$0xff]  }
 0x586   :  { %22093 = vmatpush3.bf16.msra.mxu1 %v23745_v63  ;;  %22115 = vmatpush3.bf16.msra.mxu0 %v23746_v34  ;;  %v7531_v63 = vrot.slane %v28010_v37, %v24684_v41  ;;  %v23781_v37 = vld [vmem:[%s30560_s8 + $0x12c0] sm:$0xff]  }
 0x587   :  { %22122 = vmatprep.subr.bf16.mxu1 %v23747_v1  ;;  %22144 = vmatprep.subr.bf16.mxu0 %v23748_v15  ;;  %v23777_v1 = vld [vmem:[%s30560_s8 + $0x1138] sm:$0xff]  }
 0x588   :  { %v23778_v15 = vld [vmem:[%s30560_s8 + $0x11b8] sm:$0xff]  }
 0x589   :  { %15478 = vmatmul.mubr.bf16.vlgmr.msra.gmra.mrb[120].mxu1 %v7524_v13  ;;  %15518 = vmatmul.mubr.bf16.vlgmr.msra.gmra.mrb[124].mxu0 %v7546_v16  ;;  %v7565_v13 = vcombine.high %v28123_v18, %v28123_v18  ;;  %v7547_v16 = vcombine.high %v7531_v63, %v7531_v63 }
 0x58a   :  { %22123 = vmatpush3.bf16.msra.mxu1 %v23749_v30  ;;  %22145 = vmatpush3.bf16.msra.mxu0 %v23750_v31  ;;  %v23782_v30 = vld [vmem:[%s30560_s8 + $0x1200] sm:$0xff]  }
 0x58b   :  { %22124 = vmatprep.subr.bf16.mxu1 %v23751_v22  ;;  %22146 = vmatprep.subr.bf16.mxu0 %v23752_v32  ;;  %v23783_v31 = vld [vmem:[%s30560_s8 + $0x1280] sm:$0xff]   ;;  %v23784_v22 = vld [vmem:[%s30560_s8 + $0x1248] sm:$0xff]  }
 0x58c   :  { %15557 = vmatprep.mubr.bf16.mxu1 %v7545_v11  ;;  %15597 = vmatprep.mubr.bf16.mxu0 %v7549_v35  ;;  %v7587_v11 = vrot.slane %v7565_v13, %v24684_v41  ;;  %v23785_v32 = vld [vmem:[%s30560_s8 + $0x12c8] sm:$0xff]  }
 0x58e   :  { %22125 = vmatpush3.bf16.msra.mxu1 %v23753_v59  ;;  %22147 = vmatpush3.bf16.msra.mxu0 %v23754_v36  ;;  %v7597_v35 = vcombine.high %v7587_v11, %v7587_v11  ;;  %v23786_v59 = vld [vmem:[%s30560_s8 + $0x1208] sm:$0xff]  }
 0x58f   :  { %22126 = vmatprep.subr.bf16.mxu1 %v23755_v3  ;;  %22148 = vmatprep.subr.bf16.mxu0 %v23756_v39  ;;  %v23787_v36 = vld [vmem:[%s30560_s8 + $0x1288] sm:$0xff]   ;;  %v23788_v3 = vld [vmem:[%s30560_s8 + $0x1250] sm:$0xff]  }
 0x590   :  { %v23789_v39 = vld [vmem:[%s30560_s8 + $0x12d0] sm:$0xff]  }
 0x592   :  { %22127 = vmatpush3.bf16.msra.mxu1 %v23757_v42  ;;  %22149 = vmatpush3.bf16.msra.mxu0 %v23758_v43  ;;  %v23790_v42 = vld [vmem:[%s30560_s8 + $0x1210] sm:$0xff]  }
 0x593   :  { %22128 = vmatprep.subr.bf16.mxu1 %v23759_v44  ;;  %22150 = vmatprep.subr.bf16.mxu0 %v23760_v45  ;;  %v23791_v43 = vld [vmem:[%s30560_s8 + $0x1290] sm:$0xff]   ;;  %v23792_v44 = vld [vmem:[%s30560_s8 + $0x1258] sm:$0xff]  }
 0x594   :  { %v23793_v45 = vld [vmem:[%s30560_s8 + $0x12d8] sm:$0xff]  }
 0x596   :  { %22129 = vmatpush3.bf16.msra.mxu1 %v23761_v12  ;;  %22151 = vmatpush3.bf16.msra.mxu0 %v23762_v48  ;;  %v23794_v12 = vld [vmem:[%s30560_s8 + $0x1218] sm:$0xff]  }
 0x597   :  { %22130 = vmatprep.subr.bf16.mxu1 %v23763_v49  ;;  %22152 = vmatprep.subr.bf16.mxu0 %v23764_v51  ;;  %v23795_v48 = vld [vmem:[%s30560_s8 + $0x1298] sm:$0xff]   ;;  %v23796_v49 = vld [vmem:[%s30560_s8 + $0x1260] sm:$0xff]  }
 0x598   :  { %v23797_v51 = vld [vmem:[%s30560_s8 + $0x12e0] sm:$0xff]  }
 0x59a   :  { %22131 = vmatpush3.bf16.msra.mxu1 %v23765_v56  ;;  %22153 = vmatpush3.bf16.msra.mxu0 %v23766_v57  ;;  %v23798_v56 = vld [vmem:[%s30560_s8 + $0x1220] sm:$0xff]  }
 0x59b   :  { %22132 = vmatprep.subr.bf16.mxu1 %v23767_v38  ;;  %22154 = vmatprep.subr.bf16.mxu0 %v23768_v58  ;;  %v23799_v57 = vld [vmem:[%s30560_s8 + $0x12a0] sm:$0xff]   ;;  %v23800_v38 = vld [vmem:[%s30560_s8 + $0x1268] sm:$0xff]  }
 0x59c   :  { %v21830_v29 = vpop.f32.mrb[96].mxu1  ;;  %v21852_v5 = vpop.f32.mrb[100].mxu0  ;;  %v23801_v58 = vld [vmem:[%s30560_s8 + $0x12e8] sm:$0xff]  }
 0x59d   :  { %v21831_v19 = vpop.f32.mrb[97].mxu1  ;;  %v21853_v20 = vpop.f32.mrb[101].mxu0 }
 0x59e   :  { %v21832_v21 = vadd.f32 %v21831_v19, %v21830_v29  ;;  %v21854_v23 = vadd.f32 %v21853_v20, %v21852_v5  ;;  %v21833_v25 = vpop.f32.mrb[98].mxu1  ;;  %v21855_v26 = vpop.f32.mrb[102].mxu0  ;;  %22133 = vmatpush3.bf16.msra.mxu1 %v23769_v50  ;;  %22155 = vmatpush3.bf16.msra.mxu0 %v23770_v60  ;;  %v7550_v50 = vcombine.high %v28107_v0, %v28107_v0  ;;  %v23802_v60 = vld [vmem:[%s30560_s8 + $0x1228] sm:$0xff]   ;;  %v23805_v0 = vld [vmem:[%s30560_s8 + $0x12f0] sm:$0xff]  }
 0x59f   :  { %v21834_v24 = vpop.f32.mrb[99].mxu1  ;;  %v21856_v47 = vpop.f32.mrb[103].mxu0  ;;  %22134 = vmatprep.subr.bf16.mxu1 %v23771_v33  ;;  %22156 = vmatprep.subr.bf16.mxu0 %v23772_v62  ;;  %v23803_v33 = vld [vmem:[%s30560_s8 + $0x12a8] sm:$0xff]   ;;  %v23804_v62 = vld [vmem:[%s30560_s8 + $0x1270] sm:$0xff]  }
 0x5a0   :  { %v15000_v9 = vadd.f32 %v21832_v21, %v28029_v14  ;;  %v23780_v14 = vld [vmem:[%s30560_s8 + $0x1240] sm:$0xff]   ;;  %v28232_v19 = vrot.slane %v7550_v50, %v24684_v41  ;;  %v23807_v24 = vld [vmem:[%s30560_s8 + $0x12b0] sm:$0xff]  }
 0x5a1   :  { %v28329_v50 = vld [vmem:[%s30589_s4 + $0x50] sm:$0xff] }
 0x5a2   :  { %v28142_v34 = vadd.f32 %v21854_v23, %v15000_v9  ;;  %22135 = vmatpush3.bf16.msra.mxu1 %v23773_v2  ;;  %22157 = vmatpush3.bf16.msra.mxu0 %v23774_v28  ;;  %v23806_v28 = vld [vmem:[%s30560_s8 + $0x1230] sm:$0xff]   ;;  %v23809_v9 = vld [vmem:[%s30560_s8 + $0x12f8] sm:$0xff]  }
 0x5a3   :  { %22136 = vmatprep.subr.bf16.mxu1 %v23775_v27  ;;  %22158 = vmatprep.subr.bf16.mxu0 %v23776_v8  ;;  %v23808_v8 = vld [vmem:[%s30560_s8 + $0x1278] sm:$0xff]  }
 0x5a6   :  { %22137 = vmatpush3.bf16.msra.mxu1 %v23777_v1  ;;  %22159 = vmatpush3.bf16.msra.mxu0 %v23778_v15  ;;  %v7573_v1 = vrot.slane %v28123_v18, %v24684_v41  ;;  %v23813_v18 = vld [vmem:[%s30560_s8 + $0x13c0] sm:$0xff]  }
 0x5a7   :  { %22166 = vmatprep.subr.bf16.mxu1 %v23780_v14  ;;  %22188 = vmatprep.subr.bf16.mxu0 %v23781_v37  ;;  %v23810_v14 = vld [vmem:[%s30560_s8 + $0x1238] sm:$0xff]  }
 0x5a8   :  { %v23811_v37 = vld [vmem:[%s30560_s8 + $0x12b8] sm:$0xff]  }
 0x5a9   :  { %15558 = vmatmul.mubr.bf16.vlgmr.msra.gmra.mrb[124].mxu1 %v7531_v63  ;;  %15598 = vmatmul.mubr.bf16.vlgmr.msra.gmra.mrb[128].mxu0 %v7547_v16  ;;  %v7566_v63 = vcombine.high %v28232_v19, %v28232_v19  ;;  %v7595_v16 = vcombine.high %v7573_v1, %v7573_v1 }
 0x5aa   :  { %22167 = vmatpush3.bf16.msra.mxu1 %v23782_v30  ;;  %22189 = vmatpush3.bf16.msra.mxu0 %v23783_v31  ;;  %v23814_v30 = vld [vmem:[%s30560_s8 + $0x1300] sm:$0xff]  }
 0x5ab   :  { %22168 = vmatprep.subr.bf16.mxu1 %v23784_v22  ;;  %22190 = vmatprep.subr.bf16.mxu0 %v23785_v32  ;;  %v23815_v31 = vld [vmem:[%s30560_s8 + $0x1380] sm:$0xff]   ;;  %v23816_v22 = vld [vmem:[%s30560_s8 + $0x1348] sm:$0xff]  }
 0x5ac   :  { %15637 = vmatprep.mubr.bf16.mxu1 %v7587_v11  ;;  %15677 = vmatprep.mubr.bf16.mxu0 %v7597_v35  ;;  %v7594_v11 = vrot.slane %v7566_v63, %v24684_v41  ;;  %v23817_v32 = vld [vmem:[%s30560_s8 + $0x13c8] sm:$0xff]  }
 0x5ae   :  { %22169 = vmatpush3.bf16.msra.mxu1 %v23786_v59  ;;  %22191 = vmatpush3.bf16.msra.mxu0 %v23787_v36  ;;  %v7598_v35 = vcombine.high %v7594_v11, %v7594_v11  ;;  %v23818_v59 = vld [vmem:[%s30560_s8 + $0x1308] sm:$0xff]  }
 0x5af   :  { %22170 = vmatprep.subr.bf16.mxu1 %v23788_v3  ;;  %22192 = vmatprep.subr.bf16.mxu0 %v23789_v39  ;;  %v23819_v36 = vld [vmem:[%s30560_s8 + $0x1388] sm:$0xff]   ;;  %v23820_v3 = vld [vmem:[%s30560_s8 + $0x1350] sm:$0xff]  }
 0x5b0   :  { %v23821_v39 = vld [vmem:[%s30560_s8 + $0x13d0] sm:$0xff]  }
 0x5b2   :  { %22171 = vmatpush3.bf16.msra.mxu1 %v23790_v42  ;;  %22193 = vmatpush3.bf16.msra.mxu0 %v23791_v43  ;;  %v23822_v42 = vld [vmem:[%s30560_s8 + $0x1310] sm:$0xff]  }
 0x5b3   :  { %22172 = vmatprep.subr.bf16.mxu1 %v23792_v44  ;;  %22194 = vmatprep.subr.bf16.mxu0 %v23793_v45  ;;  %v23823_v43 = vld [vmem:[%s30560_s8 + $0x1390] sm:$0xff]   ;;  %v23824_v44 = vld [vmem:[%s30560_s8 + $0x1358] sm:$0xff]  }
 0x5b4   :  { %v23825_v45 = vld [vmem:[%s30560_s8 + $0x13d8] sm:$0xff]  }
 0x5b6   :  { %22173 = vmatpush3.bf16.msra.mxu1 %v23794_v12  ;;  %22195 = vmatpush3.bf16.msra.mxu0 %v23795_v48  ;;  %v23826_v12 = vld [vmem:[%s30560_s8 + $0x1318] sm:$0xff]  }
 0x5b7   :  { %22174 = vmatprep.subr.bf16.mxu1 %v23796_v49  ;;  %22196 = vmatprep.subr.bf16.mxu0 %v23797_v51  ;;  %v23827_v48 = vld [vmem:[%s30560_s8 + $0x1398] sm:$0xff]   ;;  %v23828_v49 = vld [vmem:[%s30560_s8 + $0x1360] sm:$0xff]  }
 0x5b8   :  { %v23829_v51 = vld [vmem:[%s30560_s8 + $0x13e0] sm:$0xff]  }
 0x5ba   :  { %22175 = vmatpush3.bf16.msra.mxu1 %v23798_v56  ;;  %22197 = vmatpush3.bf16.msra.mxu0 %v23799_v57  ;;  %v23830_v56 = vld [vmem:[%s30560_s8 + $0x1320] sm:$0xff]  }
 0x5bb   :  { %22176 = vmatprep.subr.bf16.mxu1 %v23800_v38  ;;  %22198 = vmatprep.subr.bf16.mxu0 %v23801_v58  ;;  %v23831_v57 = vld [vmem:[%s30560_s8 + $0x13a0] sm:$0xff]   ;;  %v23832_v38 = vld [vmem:[%s30560_s8 + $0x1368] sm:$0xff]  }
 0x5bc   :  { %v21874_v29 = vpop.f32.mrb[100].mxu1  ;;  %v21896_v5 = vpop.f32.mrb[104].mxu0  ;;  %v23833_v58 = vld [vmem:[%s30560_s8 + $0x13e8] sm:$0xff]  }
 0x5bd   :  { %v21875_v20 = vpop.f32.mrb[101].mxu1  ;;  %v21897_v21 = vpop.f32.mrb[105].mxu0 }
 0x5be   :  { %v21876_v23 = vadd.f32 %v21875_v20, %v21874_v29  ;;  %v21898_v25 = vadd.f32 %v21897_v21, %v21896_v5  ;;  %v21877_v26 = vpop.f32.mrb[102].mxu1  ;;  %v21899_v2 = vpop.f32.mrb[106].mxu0  ;;  %22177 = vmatpush3.bf16.msra.mxu1 %v23802_v60  ;;  %22199 = vmatpush3.bf16.msra.mxu0 %v23803_v33  ;;  %v23834_v60 = vld [vmem:[%s30560_s8 + $0x1328] sm:$0xff]   ;;  %v28345_v20 = vrot.slane %v28329_v50, %v24684_v41 }
 0x5bf   :  { %v21878_v47 = vpop.f32.mrb[103].mxu1  ;;  %v21900_v27 = vpop.f32.mrb[107].mxu0  ;;  %22178 = vmatprep.subr.bf16.mxu1 %v23804_v62  ;;  %22200 = vmatprep.subr.bf16.mxu0 %v23805_v0  ;;  %v23835_v33 = vld [vmem:[%s30560_s8 + $0x13a8] sm:$0xff]   ;;  %v23836_v62 = vld [vmem:[%s30560_s8 + $0x1370] sm:$0xff]  }
 0x5c0   :  { %v15080_v13 = vadd.f32 %v21876_v23, %v28142_v34  ;;  %v23812_v34 = vld [vmem:[%s30560_s8 + $0x1340] sm:$0xff]   ;;  %v23837_v0 = vld [vmem:[%s30560_s8 + $0x13f0] sm:$0xff]  }
 0x5c1   :  { %v23839_v47 = vld [vmem:[%s30560_s8 + $0x13b0] sm:$0xff]  }
 0x5c2   :  { %v28251_v15 = vadd.f32 %v21898_v25, %v15080_v13  ;;  %22179 = vmatpush3.bf16.msra.mxu1 %v23806_v28  ;;  %22201 = vmatpush3.bf16.msra.mxu0 %v23807_v24  ;;  %v23838_v24 = vld [vmem:[%s30560_s8 + $0x1330] sm:$0xff]   ;;  %v23841_v13 = vld [vmem:[%s30560_s8 + $0x13f8] sm:$0xff]  }
 0x5c3   :  { %22180 = vmatprep.subr.bf16.mxu1 %v23808_v8  ;;  %22202 = vmatprep.subr.bf16.mxu0 %v23809_v9  ;;  %v23840_v9 = vld [vmem:[%s30560_s8 + $0x1378] sm:$0xff]  }
 0x5c6   :  { %22181 = vmatpush3.bf16.msra.mxu1 %v23810_v14  ;;  %22203 = vmatpush3.bf16.msra.mxu0 %v23811_v37  ;;  %v7580_v14 = vrot.slane %v28232_v19, %v24684_v41  ;;  %v23846_v19 = vld [vmem:[%s30560_s8 + $0x14c0] sm:$0xff]  }
 0x5c7   :  { %22210 = vmatprep.subr.bf16.mxu1 %v23812_v34  ;;  %22232 = vmatprep.subr.bf16.mxu0 %v23813_v18  ;;  %v23842_v34 = vld [vmem:[%s30560_s8 + $0x1338] sm:$0xff]  }
 0x5c8   :  { %v23843_v18 = vld [vmem:[%s30560_s8 + $0x13b8] sm:$0xff]  }
 0x5c9   :  { %15638 = vmatmul.mubr.bf16.vlgmr.msra.gmra.mrb[128].mxu1 %v7573_v1  ;;  %15678 = vmatmul.mubr.bf16.vlgmr.msra.gmra.mrb[132].mxu0 %v7595_v16  ;;  %v7614_v1 = vcombine.high %v28345_v20, %v28345_v20  ;;  %v7596_v16 = vcombine.high %v7580_v14, %v7580_v14 }
 0x5ca   :  { %22211 = vmatpush3.bf16.msra.mxu1 %v23814_v30  ;;  %22233 = vmatpush3.bf16.msra.mxu0 %v23815_v31  ;;  %v23847_v30 = vld [vmem:[%s30560_s8 + $0x1400] sm:$0xff]  }
 0x5cb   :  { %22212 = vmatprep.subr.bf16.mxu1 %v23816_v22  ;;  %22234 = vmatprep.subr.bf16.mxu0 %v23817_v32  ;;  %v23848_v31 = vld [vmem:[%s30560_s8 + $0x1480] sm:$0xff]   ;;  %v23849_v22 = vld [vmem:[%s30560_s8 + $0x1448] sm:$0xff]  }
 0x5cc   :  { %15717 = vmatprep.mubr.bf16.mxu1 %v7594_v11  ;;  %15757 = vmatprep.mubr.bf16.mxu0 %v7598_v35  ;;  %v7636_v11 = vrot.slane %v7614_v1, %v24684_v41  ;;  %v23850_v32 = vld [vmem:[%s30560_s8 + $0x14c8] sm:$0xff]  }
 0x5ce   :  { %22213 = vmatpush3.bf16.msra.mxu1 %v23818_v59  ;;  %22235 = vmatpush3.bf16.msra.mxu0 %v23819_v36  ;;  %v7646_v35 = vcombine.high %v7636_v11, %v7636_v11  ;;  %v23851_v59 = vld [vmem:[%s30560_s8 + $0x1408] sm:$0xff]  }
 0x5cf   :  { %22214 = vmatprep.subr.bf16.mxu1 %v23820_v3  ;;  %22236 = vmatprep.subr.bf16.mxu0 %v23821_v39  ;;  %v23852_v36 = vld [vmem:[%s30560_s8 + $0x1488] sm:$0xff]   ;;  %v23853_v3 = vld [vmem:[%s30560_s8 + $0x1450] sm:$0xff]  }
 0x5d0   :  { %v23854_v39 = vld [vmem:[%s30560_s8 + $0x14d0] sm:$0xff]  }
 0x5d2   :  { %22215 = vmatpush3.bf16.msra.mxu1 %v23822_v42  ;;  %22237 = vmatpush3.bf16.msra.mxu0 %v23823_v43  ;;  %v23855_v42 = vld [vmem:[%s30560_s8 + $0x1410] sm:$0xff]  }
 0x5d3   :  { %22216 = vmatprep.subr.bf16.mxu1 %v23824_v44  ;;  %22238 = vmatprep.subr.bf16.mxu0 %v23825_v45  ;;  %v23856_v43 = vld [vmem:[%s30560_s8 + $0x1490] sm:$0xff]   ;;  %v23857_v44 = vld [vmem:[%s30560_s8 + $0x1458] sm:$0xff]  }
 0x5d4   :  { %v23858_v45 = vld [vmem:[%s30560_s8 + $0x14d8] sm:$0xff]  }
 0x5d6   :  { %22217 = vmatpush3.bf16.msra.mxu1 %v23826_v12  ;;  %22239 = vmatpush3.bf16.msra.mxu0 %v23827_v48  ;;  %v23859_v12 = vld [vmem:[%s30560_s8 + $0x1418] sm:$0xff]  }
 0x5d7   :  { %22218 = vmatprep.subr.bf16.mxu1 %v23828_v49  ;;  %22240 = vmatprep.subr.bf16.mxu0 %v23829_v51  ;;  %v23860_v48 = vld [vmem:[%s30560_s8 + $0x1498] sm:$0xff]   ;;  %v23861_v49 = vld [vmem:[%s30560_s8 + $0x1460] sm:$0xff]  }
 0x5d8   :  { %v23862_v51 = vld [vmem:[%s30560_s8 + $0x14e0] sm:$0xff]  }
 0x5da   :  { %22219 = vmatpush3.bf16.msra.mxu1 %v23830_v56  ;;  %22241 = vmatpush3.bf16.msra.mxu0 %v23831_v57  ;;  %v23863_v56 = vld [vmem:[%s30560_s8 + $0x1420] sm:$0xff]  }
 0x5db   :  { %22220 = vmatprep.subr.bf16.mxu1 %v23832_v38  ;;  %22242 = vmatprep.subr.bf16.mxu0 %v23833_v58  ;;  %v23864_v57 = vld [vmem:[%s30560_s8 + $0x14a0] sm:$0xff]   ;;  %v23865_v38 = vld [vmem:[%s30560_s8 + $0x1468] sm:$0xff]  }
 0x5dc   :  { %v21918_v29 = vpop.f32.mrb[104].mxu1  ;;  %v21940_v5 = vpop.f32.mrb[108].mxu0  ;;  %v23866_v58 = vld [vmem:[%s30560_s8 + $0x14e8] sm:$0xff]  }
 0x5dd   :  { %v21919_v21 = vpop.f32.mrb[105].mxu1  ;;  %v21941_v23 = vpop.f32.mrb[109].mxu0 }
 0x5de   :  { %v21920_v25 = vadd.f32 %v21919_v21, %v21918_v29  ;;  %v21942_v26 = vadd.f32 %v21941_v23, %v21940_v5  ;;  %v21921_v2 = vpop.f32.mrb[106].mxu1  ;;  %v21943_v28 = vpop.f32.mrb[110].mxu0  ;;  %22221 = vmatpush3.bf16.msra.mxu1 %v23834_v60  ;;  %22243 = vmatpush3.bf16.msra.mxu0 %v23835_v33  ;;  %v7599_v60 = vcombine.high %v28329_v50, %v28329_v50  ;;  %v23867_v33 = vld [vmem:[%s30560_s8 + $0x1428] sm:$0xff]   ;;  %v23870_v50 = vld [vmem:[%s30560_s8 + $0x14f0] sm:$0xff]  }
 0x5df   :  { %v21922_v27 = vpop.f32.mrb[107].mxu1  ;;  %v21944_v8 = vpop.f32.mrb[111].mxu0  ;;  %22222 = vmatprep.subr.bf16.mxu1 %v23836_v62  ;;  %22244 = vmatprep.subr.bf16.mxu0 %v23837_v0  ;;  %v23868_v62 = vld [vmem:[%s30560_s8 + $0x14a8] sm:$0xff]   ;;  %v23869_v0 = vld [vmem:[%s30560_s8 + $0x1470] sm:$0xff]  }
 0x5e0   :  { %v15160_v63 = vadd.f32 %v21920_v25, %v28251_v15  ;;  %v23845_v15 = vld [vmem:[%s30560_s8 + $0x1440] sm:$0xff]   ;;  %v28454_v21 = vrot.slane %v7599_v60, %v24684_v41  ;;  %v23872_v27 = vld [vmem:[%s30560_s8 + $0x14b0] sm:$0xff]   ;;  %v28551_v60 = vld [vmem:[%s30589_s4 + $0x58] sm:$0xff] }
 0x5e2   :  { %v28364_v37 = vadd.f32 %v21942_v26, %v15160_v63  ;;  %22223 = vmatpush3.bf16.msra.mxu1 %v23838_v24  ;;  %22245 = vmatpush3.bf16.msra.mxu0 %v23839_v47  ;;  %v23871_v47 = vld [vmem:[%s30560_s8 + $0x1430] sm:$0xff]   ;;  %v23874_v63 = vld [vmem:[%s30560_s8 + $0x14f8] sm:$0xff]  }
 0x5e3   :  { %22224 = vmatprep.subr.bf16.mxu1 %v23840_v9  ;;  %22246 = vmatprep.subr.bf16.mxu0 %v23841_v13  ;;  %v23873_v13 = vld [vmem:[%s30560_s8 + $0x1478] sm:$0xff]  }
 0x5e6   :  { %22225 = vmatpush3.bf16.msra.mxu1 %v23842_v34  ;;  %22247 = vmatpush3.bf16.msra.mxu0 %v23843_v18  ;;  %v7622_v34 = vrot.slane %v28345_v20, %v24684_v41  ;;  %v23878_v20 = vld [vmem:[%s30560_s8 + $0x15c0] sm:$0xff]  }
 0x5e7   :  { %22254 = vmatprep.subr.bf16.mxu1 %v23845_v15  ;;  %22276 = vmatprep.subr.bf16.mxu0 %v23846_v19  ;;  %v23875_v15 = vld [vmem:[%s30560_s8 + $0x1438] sm:$0xff]  }
 0x5e8   :  { %v23876_v19 = vld [vmem:[%s30560_s8 + $0x14b8] sm:$0xff]  }
 0x5e9   :  { %15718 = vmatmul.mubr.bf16.vlgmr.msra.gmra.mrb[132].mxu1 %v7580_v14  ;;  %15758 = vmatmul.mubr.bf16.vlgmr.msra.gmra.mrb[136].mxu0 %v7596_v16  ;;  %v7615_v14 = vcombine.high %v28454_v21, %v28454_v21  ;;  %v7644_v16 = vcombine.high %v7622_v34, %v7622_v34 }
 0x5ea   :  { %22255 = vmatpush3.bf16.msra.mxu1 %v23847_v30  ;;  %22277 = vmatpush3.bf16.msra.mxu0 %v23848_v31  ;;  %v23879_v30 = vld [vmem:[%s30560_s8 + $0x1500] sm:$0xff]  }
 0x5eb   :  { %22256 = vmatprep.subr.bf16.mxu1 %v23849_v22  ;;  %22278 = vmatprep.subr.bf16.mxu0 %v23850_v32  ;;  %v23880_v31 = vld [vmem:[%s30560_s8 + $0x1580] sm:$0xff]   ;;  %v23881_v22 = vld [vmem:[%s30560_s8 + $0x1548] sm:$0xff]  }
 0x5ec   :  { %15797 = vmatprep.mubr.bf16.mxu1 %v7636_v11  ;;  %15837 = vmatprep.mubr.bf16.mxu0 %v7646_v35  ;;  %v7643_v11 = vrot.slane %v7615_v14, %v24684_v41  ;;  %v23882_v32 = vld [vmem:[%s30560_s8 + $0x15c8] sm:$0xff]  }
 0x5ee   :  { %22257 = vmatpush3.bf16.msra.mxu1 %v23851_v59  ;;  %22279 = vmatpush3.bf16.msra.mxu0 %v23852_v36  ;;  %v7647_v35 = vcombine.high %v7643_v11, %v7643_v11  ;;  %v23883_v59 = vld [vmem:[%s30560_s8 + $0x1508] sm:$0xff]  }
 0x5ef   :  { %22258 = vmatprep.subr.bf16.mxu1 %v23853_v3  ;;  %22280 = vmatprep.subr.bf16.mxu0 %v23854_v39  ;;  %v23884_v36 = vld [vmem:[%s30560_s8 + $0x1588] sm:$0xff]   ;;  %v23885_v3 = vld [vmem:[%s30560_s8 + $0x1550] sm:$0xff]  }
 0x5f0   :  { %v23886_v39 = vld [vmem:[%s30560_s8 + $0x15d0] sm:$0xff]  }
 0x5f2   :  { %22259 = vmatpush3.bf16.msra.mxu1 %v23855_v42  ;;  %22281 = vmatpush3.bf16.msra.mxu0 %v23856_v43  ;;  %v23887_v42 = vld [vmem:[%s30560_s8 + $0x1510] sm:$0xff]  }
 0x5f3   :  { %22260 = vmatprep.subr.bf16.mxu1 %v23857_v44  ;;  %22282 = vmatprep.subr.bf16.mxu0 %v23858_v45  ;;  %v23888_v43 = vld [vmem:[%s30560_s8 + $0x1590] sm:$0xff]   ;;  %v23889_v44 = vld [vmem:[%s30560_s8 + $0x1558] sm:$0xff]  }
 0x5f4   :  { %v23890_v45 = vld [vmem:[%s30560_s8 + $0x15d8] sm:$0xff]  }
 0x5f6   :  { %22261 = vmatpush3.bf16.msra.mxu1 %v23859_v12  ;;  %22283 = vmatpush3.bf16.msra.mxu0 %v23860_v48  ;;  %v23891_v12 = vld [vmem:[%s30560_s8 + $0x1518] sm:$0xff]  }
 0x5f7   :  { %22262 = vmatprep.subr.bf16.mxu1 %v23861_v49  ;;  %22284 = vmatprep.subr.bf16.mxu0 %v23862_v51  ;;  %v23892_v48 = vld [vmem:[%s30560_s8 + $0x1598] sm:$0xff]   ;;  %v23893_v49 = vld [vmem:[%s30560_s8 + $0x1560] sm:$0xff]  }
 0x5f8   :  { %v23894_v51 = vld [vmem:[%s30560_s8 + $0x15e0] sm:$0xff]  }
 0x5fa   :  { %22263 = vmatpush3.bf16.msra.mxu1 %v23863_v56  ;;  %22285 = vmatpush3.bf16.msra.mxu0 %v23864_v57  ;;  %v23895_v56 = vld [vmem:[%s30560_s8 + $0x1520] sm:$0xff]  }
 0x5fb   :  { %22264 = vmatprep.subr.bf16.mxu1 %v23865_v38  ;;  %22286 = vmatprep.subr.bf16.mxu0 %v23866_v58  ;;  %v23896_v57 = vld [vmem:[%s30560_s8 + $0x15a0] sm:$0xff]   ;;  %v23897_v38 = vld [vmem:[%s30560_s8 + $0x1568] sm:$0xff]  }
 0x5fc   :  { %v21962_v29 = vpop.f32.mrb[108].mxu1  ;;  %v21984_v5 = vpop.f32.mrb[112].mxu0  ;;  %v23898_v58 = vld [vmem:[%s30560_s8 + $0x15e8] sm:$0xff]  }
 0x5fd   :  { %v21963_v23 = vpop.f32.mrb[109].mxu1  ;;  %v21985_v25 = vpop.f32.mrb[113].mxu0 }
 0x5fe   :  { %v21964_v26 = vadd.f32 %v21963_v23, %v21962_v29  ;;  %v21986_v2 = vadd.f32 %v21985_v25, %v21984_v5  ;;  %v21965_v28 = vpop.f32.mrb[110].mxu1  ;;  %v21987_v24 = vpop.f32.mrb[114].mxu0  ;;  %22265 = vmatpush3.bf16.msra.mxu1 %v23867_v33  ;;  %22287 = vmatpush3.bf16.msra.mxu0 %v23868_v62  ;;  %v23899_v33 = vld [vmem:[%s30560_s8 + $0x1528] sm:$0xff]   ;;  %v28567_v23 = vrot.slane %v28551_v60, %v24684_v41 }
 0x5ff   :  { %v21966_v8 = vpop.f32.mrb[111].mxu1  ;;  %v21988_v9 = vpop.f32.mrb[115].mxu0  ;;  %22266 = vmatprep.subr.bf16.mxu1 %v23869_v0  ;;  %22288 = vmatprep.subr.bf16.mxu0 %v23870_v50  ;;  %v23900_v62 = vld [vmem:[%s30560_s8 + $0x15a8] sm:$0xff]   ;;  %v23901_v0 = vld [vmem:[%s30560_s8 + $0x1570] sm:$0xff]  }
 0x600   :  { %v15240_v1 = vadd.f32 %v21964_v26, %v28364_v37  ;;  %v23877_v37 = vld [vmem:[%s30560_s8 + $0x1540] sm:$0xff]   ;;  %v23902_v50 = vld [vmem:[%s30560_s8 + $0x15f0] sm:$0xff]  }
 0x601   :  { %v23904_v8 = vld [vmem:[%s30560_s8 + $0x15b0] sm:$0xff]  }
 0x602   :  { %v28473_v18 = vadd.f32 %v21986_v2, %v15240_v1  ;;  %22267 = vmatpush3.bf16.msra.mxu1 %v23871_v47  ;;  %22289 = vmatpush3.bf16.msra.mxu0 %v23872_v27  ;;  %v23903_v27 = vld [vmem:[%s30560_s8 + $0x1530] sm:$0xff]   ;;  %v23906_v1 = vld [vmem:[%s30560_s8 + $0x15f8] sm:$0xff]  }
 0x603   :  { %22268 = vmatprep.subr.bf16.mxu1 %v23873_v13  ;;  %22290 = vmatprep.subr.bf16.mxu0 %v23874_v63  ;;  %v23905_v63 = vld [vmem:[%s30560_s8 + $0x1578] sm:$0xff]  }
 0x606   :  { %22269 = vmatpush3.bf16.msra.mxu1 %v23875_v15  ;;  %22291 = vmatpush3.bf16.msra.mxu0 %v23876_v19  ;;  %v7629_v15 = vrot.slane %v28454_v21, %v24684_v41  ;;  %v23911_v21 = vld [vmem:[%s30560_s8 + $0x16c0] sm:$0xff]  }
 0x607   :  { %22298 = vmatprep.subr.bf16.mxu1 %v23877_v37  ;;  %22320 = vmatprep.subr.bf16.mxu0 %v23878_v20  ;;  %v23907_v37 = vld [vmem:[%s30560_s8 + $0x1538] sm:$0xff]  }
 0x608   :  { %v23908_v20 = vld [vmem:[%s30560_s8 + $0x15b8] sm:$0xff]  }
 0x609   :  { %15798 = vmatmul.mubr.bf16.vlgmr.msra.gmra.mrb[136].mxu1 %v7622_v34  ;;  %15838 = vmatmul.mubr.bf16.vlgmr.msra.gmra.mrb[140].mxu0 %v7644_v16  ;;  %v7663_v34 = vcombine.high %v28567_v23, %v28567_v23  ;;  %v7645_v16 = vcombine.high %v7629_v15, %v7629_v15 }
 0x60a   :  { %22299 = vmatpush3.bf16.msra.mxu1 %v23879_v30  ;;  %22321 = vmatpush3.bf16.msra.mxu0 %v23880_v31  ;;  %v23912_v30 = vld [vmem:[%s30560_s8 + $0x1600] sm:$0xff]  }
 0x60b   :  { %22300 = vmatprep.subr.bf16.mxu1 %v23881_v22  ;;  %22322 = vmatprep.subr.bf16.mxu0 %v23882_v32  ;;  %v23913_v31 = vld [vmem:[%s30560_s8 + $0x1680] sm:$0xff]   ;;  %v23914_v22 = vld [vmem:[%s30560_s8 + $0x1648] sm:$0xff]  }
 0x60c   :  { %15877 = vmatprep.mubr.bf16.mxu1 %v7643_v11  ;;  %15917 = vmatprep.mubr.bf16.mxu0 %v7647_v35  ;;  %v7685_v11 = vrot.slane %v7663_v34, %v24684_v41  ;;  %v23915_v32 = vld [vmem:[%s30560_s8 + $0x16c8] sm:$0xff]  }
 0x60e   :  { %22301 = vmatpush3.bf16.msra.mxu1 %v23883_v59  ;;  %22323 = vmatpush3.bf16.msra.mxu0 %v23884_v36  ;;  %v7695_v35 = vcombine.high %v7685_v11, %v7685_v11  ;;  %v23916_v59 = vld [vmem:[%s30560_s8 + $0x1608] sm:$0xff]  }
 0x60f   :  { %22302 = vmatprep.subr.bf16.mxu1 %v23885_v3  ;;  %22324 = vmatprep.subr.bf16.mxu0 %v23886_v39  ;;  %v23917_v36 = vld [vmem:[%s30560_s8 + $0x1688] sm:$0xff]   ;;  %v23918_v3 = vld [vmem:[%s30560_s8 + $0x1650] sm:$0xff]  }
 0x610   :  { %v23919_v39 = vld [vmem:[%s30560_s8 + $0x16d0] sm:$0xff]  }
 0x612   :  { %22303 = vmatpush3.bf16.msra.mxu1 %v23887_v42  ;;  %22325 = vmatpush3.bf16.msra.mxu0 %v23888_v43  ;;  %v23920_v42 = vld [vmem:[%s30560_s8 + $0x1610] sm:$0xff]  }
 0x613   :  { %22304 = vmatprep.subr.bf16.mxu1 %v23889_v44  ;;  %22326 = vmatprep.subr.bf16.mxu0 %v23890_v45  ;;  %v23921_v43 = vld [vmem:[%s30560_s8 + $0x1690] sm:$0xff]   ;;  %v23922_v44 = vld [vmem:[%s30560_s8 + $0x1658] sm:$0xff]  }
 0x614   :  { %v23923_v45 = vld [vmem:[%s30560_s8 + $0x16d8] sm:$0xff]  }
 0x616   :  { %22305 = vmatpush3.bf16.msra.mxu1 %v23891_v12  ;;  %22327 = vmatpush3.bf16.msra.mxu0 %v23892_v48  ;;  %v23924_v12 = vld [vmem:[%s30560_s8 + $0x1618] sm:$0xff]  }
 0x617   :  { %22306 = vmatprep.subr.bf16.mxu1 %v23893_v49  ;;  %22328 = vmatprep.subr.bf16.mxu0 %v23894_v51  ;;  %v23925_v48 = vld [vmem:[%s30560_s8 + $0x1698] sm:$0xff]   ;;  %v23926_v49 = vld [vmem:[%s30560_s8 + $0x1660] sm:$0xff]  }
 0x618   :  { %v23927_v51 = vld [vmem:[%s30560_s8 + $0x16e0] sm:$0xff]  }
 0x61a   :  { %22307 = vmatpush3.bf16.msra.mxu1 %v23895_v56  ;;  %22329 = vmatpush3.bf16.msra.mxu0 %v23896_v57  ;;  %v23928_v56 = vld [vmem:[%s30560_s8 + $0x1620] sm:$0xff]  }
 0x61b   :  { %22308 = vmatprep.subr.bf16.mxu1 %v23897_v38  ;;  %22330 = vmatprep.subr.bf16.mxu0 %v23898_v58  ;;  %v23929_v57 = vld [vmem:[%s30560_s8 + $0x16a0] sm:$0xff]   ;;  %v23930_v38 = vld [vmem:[%s30560_s8 + $0x1668] sm:$0xff]  }
 0x61c   :  { %v22006_v29 = vpop.f32.mrb[112].mxu1  ;;  %v22028_v5 = vpop.f32.mrb[116].mxu0  ;;  %v23931_v58 = vld [vmem:[%s30560_s8 + $0x16e8] sm:$0xff]  }
 0x61d   :  { %v22007_v25 = vpop.f32.mrb[113].mxu1  ;;  %v22029_v26 = vpop.f32.mrb[117].mxu0 }
 0x61e   :  { %v22008_v2 = vadd.f32 %v22007_v25, %v22006_v29  ;;  %v22030_v28 = vadd.f32 %v22029_v26, %v22028_v5  ;;  %v22009_v24 = vpop.f32.mrb[114].mxu1  ;;  %v22031_v47 = vpop.f32.mrb[118].mxu0  ;;  %22309 = vmatpush3.bf16.msra.mxu1 %v23899_v33  ;;  %22331 = vmatpush3.bf16.msra.mxu0 %v23900_v62  ;;  %v7648_v33 = vcombine.high %v28551_v60, %v28551_v60  ;;  %v23932_v62 = vld [vmem:[%s30560_s8 + $0x1628] sm:$0xff]   ;;  %v23935_v60 = vld [vmem:[%s30560_s8 + $0x16f0] sm:$0xff]  }
 0x61f   :  { %v22010_v9 = vpop.f32.mrb[115].mxu1  ;;  %v22032_v13 = vpop.f32.mrb[119].mxu0  ;;  %22310 = vmatprep.subr.bf16.mxu1 %v23901_v0  ;;  %22332 = vmatprep.subr.bf16.mxu0 %v23902_v50  ;;  %v23933_v0 = vld [vmem:[%s30560_s8 + $0x16a8] sm:$0xff]   ;;  %v23934_v50 = vld [vmem:[%s30560_s8 + $0x1670] sm:$0xff]  }
 0x620   :  { %v15320_v14 = vadd.f32 %v22008_v2, %v28473_v18  ;;  %v23910_v18 = vld [vmem:[%s30560_s8 + $0x1640] sm:$0xff]   ;;  %v28676_v25 = vrot.slane %v7648_v33, %v24684_v41  ;;  %v23937_v9 = vld [vmem:[%s30560_s8 + $0x16b0] sm:$0xff]  }
 0x621   :  { %v28773_v33 = vld [vmem:[%s30589_s4 + $0x60] sm:$0xff] }
 0x622   :  { %v28586_v19 = vadd.f32 %v22030_v28, %v15320_v14  ;;  %22311 = vmatpush3.bf16.msra.mxu1 %v23903_v27  ;;  %22333 = vmatpush3.bf16.msra.mxu0 %v23904_v8  ;;  %v23936_v8 = vld [vmem:[%s30560_s8 + $0x1630] sm:$0xff]   ;;  %v23939_v14 = vld [vmem:[%s30560_s8 + $0x16f8] sm:$0xff]  }
 0x623   :  { %22312 = vmatprep.subr.bf16.mxu1 %v23905_v63  ;;  %22334 = vmatprep.subr.bf16.mxu0 %v23906_v1  ;;  %v23938_v1 = vld [vmem:[%s30560_s8 + $0x1678] sm:$0xff]  }
 0x626   :  { %22313 = vmatpush3.bf16.msra.mxu1 %v23907_v37  ;;  %22335 = vmatpush3.bf16.msra.mxu0 %v23908_v20  ;;  %v7671_v37 = vrot.slane %v28567_v23, %v24684_v41  ;;  %v23943_v23 = vld [vmem:[%s30560_s8 + $0x17c0] sm:$0xff]  }
 0x627   :  { %22342 = vmatprep.subr.bf16.mxu1 %v23910_v18  ;;  %22364 = vmatprep.subr.bf16.mxu0 %v23911_v21  ;;  %v23940_v18 = vld [vmem:[%s30560_s8 + $0x1638] sm:$0xff]  }
 0x628   :  { %v23941_v21 = vld [vmem:[%s30560_s8 + $0x16b8] sm:$0xff]  }
 0x629   :  { %15878 = vmatmul.mubr.bf16.vlgmr.msra.gmra.mrb[140].mxu1 %v7629_v15  ;;  %15918 = vmatmul.mubr.bf16.vlgmr.msra.gmra.mrb[144].mxu0 %v7645_v16  ;;  %v7664_v15 = vcombine.high %v28676_v25, %v28676_v25  ;;  %v7693_v16 = vcombine.high %v7671_v37, %v7671_v37 }
 0x62a   :  { %22343 = vmatpush3.bf16.msra.mxu1 %v23912_v30  ;;  %22365 = vmatpush3.bf16.msra.mxu0 %v23913_v31  ;;  %v23944_v30 = vld [vmem:[%s30560_s8 + $0x1700] sm:$0xff]  }
 0x62b   :  { %22344 = vmatprep.subr.bf16.mxu1 %v23914_v22  ;;  %22366 = vmatprep.subr.bf16.mxu0 %v23915_v32  ;;  %v23945_v31 = vld [vmem:[%s30560_s8 + $0x1780] sm:$0xff]   ;;  %v23946_v22 = vld [vmem:[%s30560_s8 + $0x1748] sm:$0xff]  }
 0x62c   :  { %15957 = vmatprep.mubr.bf16.mxu1 %v7685_v11  ;;  %15997 = vmatprep.mubr.bf16.mxu0 %v7695_v35  ;;  %v7692_v11 = vrot.slane %v7664_v15, %v24684_v41  ;;  %v23947_v32 = vld [vmem:[%s30560_s8 + $0x17c8] sm:$0xff]  }
 0x62e   :  { %22345 = vmatpush3.bf16.msra.mxu1 %v23916_v59  ;;  %22367 = vmatpush3.bf16.msra.mxu0 %v23917_v36  ;;  %v7696_v35 = vcombine.high %v7692_v11, %v7692_v11  ;;  %v23948_v59 = vld [vmem:[%s30560_s8 + $0x1708] sm:$0xff]  }
 0x62f   :  { %22346 = vmatprep.subr.bf16.mxu1 %v23918_v3  ;;  %22368 = vmatprep.subr.bf16.mxu0 %v23919_v39  ;;  %v23949_v36 = vld [vmem:[%s30560_s8 + $0x1788] sm:$0xff]   ;;  %v23950_v3 = vld [vmem:[%s30560_s8 + $0x1750] sm:$0xff]  }
 0x630   :  { %v23951_v39 = vld [vmem:[%s30560_s8 + $0x17d0] sm:$0xff]  }
 0x632   :  { %22347 = vmatpush3.bf16.msra.mxu1 %v23920_v42  ;;  %22369 = vmatpush3.bf16.msra.mxu0 %v23921_v43  ;;  %v23952_v42 = vld [vmem:[%s30560_s8 + $0x1710] sm:$0xff]  }
 0x633   :  { %22348 = vmatprep.subr.bf16.mxu1 %v23922_v44  ;;  %22370 = vmatprep.subr.bf16.mxu0 %v23923_v45  ;;  %v23953_v43 = vld [vmem:[%s30560_s8 + $0x1790] sm:$0xff]   ;;  %v23954_v44 = vld [vmem:[%s30560_s8 + $0x1758] sm:$0xff]  }
 0x634   :  { %v23955_v45 = vld [vmem:[%s30560_s8 + $0x17d8] sm:$0xff]  }
 0x636   :  { %22349 = vmatpush3.bf16.msra.mxu1 %v23924_v12  ;;  %22371 = vmatpush3.bf16.msra.mxu0 %v23925_v48  ;;  %v23956_v12 = vld [vmem:[%s30560_s8 + $0x1718] sm:$0xff]  }
 0x637   :  { %22350 = vmatprep.subr.bf16.mxu1 %v23926_v49  ;;  %22372 = vmatprep.subr.bf16.mxu0 %v23927_v51  ;;  %v23957_v48 = vld [vmem:[%s30560_s8 + $0x1798] sm:$0xff]   ;;  %v23958_v49 = vld [vmem:[%s30560_s8 + $0x1760] sm:$0xff]  }
 0x638   :  { %v23959_v51 = vld [vmem:[%s30560_s8 + $0x17e0] sm:$0xff]  }
 0x63a   :  { %22351 = vmatpush3.bf16.msra.mxu1 %v23928_v56  ;;  %22373 = vmatpush3.bf16.msra.mxu0 %v23929_v57  ;;  %v23960_v56 = vld [vmem:[%s30560_s8 + $0x1720] sm:$0xff]  }
 0x63b   :  { %22352 = vmatprep.subr.bf16.mxu1 %v23930_v38  ;;  %22374 = vmatprep.subr.bf16.mxu0 %v23931_v58  ;;  %v23961_v57 = vld [vmem:[%s30560_s8 + $0x17a0] sm:$0xff]   ;;  %v23962_v38 = vld [vmem:[%s30560_s8 + $0x1768] sm:$0xff]  }
 0x63c   :  { %v22050_v29 = vpop.f32.mrb[116].mxu1  ;;  %v22072_v5 = vpop.f32.mrb[120].mxu0  ;;  %v23963_v58 = vld [vmem:[%s30560_s8 + $0x17e8] sm:$0xff]  }
 0x63d   :  { %v22051_v26 = vpop.f32.mrb[117].mxu1  ;;  %v22073_v2 = vpop.f32.mrb[121].mxu0 }
 0x63e   :  { %v22052_v28 = vadd.f32 %v22051_v26, %v22050_v29  ;;  %v22074_v24 = vadd.f32 %v22073_v2, %v22072_v5  ;;  %v22053_v47 = vpop.f32.mrb[118].mxu1  ;;  %v22075_v27 = vpop.f32.mrb[122].mxu0  ;;  %22353 = vmatpush3.bf16.msra.mxu1 %v23932_v62  ;;  %22375 = vmatpush3.bf16.msra.mxu0 %v23933_v0  ;;  %v23964_v62 = vld [vmem:[%s30560_s8 + $0x1728] sm:$0xff]   ;;  %v28789_v26 = vrot.slane %v28773_v33, %v24684_v41 }
 0x63f   :  { %v22054_v13 = vpop.f32.mrb[119].mxu1  ;;  %v22076_v63 = vpop.f32.mrb[123].mxu0  ;;  %22354 = vmatprep.subr.bf16.mxu1 %v23934_v50  ;;  %22376 = vmatprep.subr.bf16.mxu0 %v23935_v60  ;;  %v23965_v0 = vld [vmem:[%s30560_s8 + $0x17a8] sm:$0xff]   ;;  %v23966_v50 = vld [vmem:[%s30560_s8 + $0x1770] sm:$0xff]  }
 0x640   :  { %v15400_v34 = vadd.f32 %v22052_v28, %v28586_v19  ;;  %v23942_v19 = vld [vmem:[%s30560_s8 + $0x1740] sm:$0xff]   ;;  %v23967_v60 = vld [vmem:[%s30560_s8 + $0x17f0] sm:$0xff]  }
 0x641   :  { %v23969_v13 = vld [vmem:[%s30560_s8 + $0x17b0] sm:$0xff]  }
 0x642   :  { %v28695_v20 = vadd.f32 %v22074_v24, %v15400_v34  ;;  %22355 = vmatpush3.bf16.msra.mxu1 %v23936_v8  ;;  %22377 = vmatpush3.bf16.msra.mxu0 %v23937_v9  ;;  %v23968_v9 = vld [vmem:[%s30560_s8 + $0x1730] sm:$0xff]   ;;  %v23971_v34 = vld [vmem:[%s30560_s8 + $0x17f8] sm:$0xff]  }
 0x643   :  { %22356 = vmatprep.subr.bf16.mxu1 %v23938_v1  ;;  %22378 = vmatprep.subr.bf16.mxu0 %v23939_v14  ;;  %v23970_v14 = vld [vmem:[%s30560_s8 + $0x1778] sm:$0xff]  }
 0x646   :  { %22357 = vmatpush3.bf16.msra.mxu1 %v23940_v18  ;;  %22379 = vmatpush3.bf16.msra.mxu0 %v23941_v21  ;;  %v7678_v18 = vrot.slane %v28676_v25, %v24684_v41  ;;  %v23976_v25 = vld [vmem:[%s30560_s8 + $0x18c0] sm:$0xff]  }
 0x647   :  { %22386 = vmatprep.subr.bf16.mxu1 %v23942_v19  ;;  %22408 = vmatprep.subr.bf16.mxu0 %v23943_v23  ;;  %v23972_v19 = vld [vmem:[%s30560_s8 + $0x1738] sm:$0xff]  }
 0x648   :  { %v23973_v23 = vld [vmem:[%s30560_s8 + $0x17b8] sm:$0xff]  }
 0x649   :  { %15958 = vmatmul.mubr.bf16.vlgmr.msra.gmra.mrb[144].mxu1 %v7671_v37  ;;  %15998 = vmatmul.mubr.bf16.vlgmr.msra.gmra.mrb[148].mxu0 %v7693_v16  ;;  %v7712_v37 = vcombine.high %v28789_v26, %v28789_v26  ;;  %v7694_v16 = vcombine.high %v7678_v18, %v7678_v18 }
 0x64a   :  { %22387 = vmatpush3.bf16.msra.mxu1 %v23944_v30  ;;  %22409 = vmatpush3.bf16.msra.mxu0 %v23945_v31  ;;  %v23977_v30 = vld [vmem:[%s30560_s8 + $0x1800] sm:$0xff]  }
 0x64b   :  { %22388 = vmatprep.subr.bf16.mxu1 %v23946_v22  ;;  %22410 = vmatprep.subr.bf16.mxu0 %v23947_v32  ;;  %v23978_v31 = vld [vmem:[%s30560_s8 + $0x1880] sm:$0xff]   ;;  %v23979_v22 = vld [vmem:[%s30560_s8 + $0x1848] sm:$0xff]  }
 0x64c   :  { %16037 = vmatprep.mubr.bf16.mxu1 %v7692_v11  ;;  %16077 = vmatprep.mubr.bf16.mxu0 %v7696_v35  ;;  %v7734_v11 = vrot.slane %v7712_v37, %v24684_v41  ;;  %v23980_v32 = vld [vmem:[%s30560_s8 + $0x18c8] sm:$0xff]  }
 0x64e   :  { %22389 = vmatpush3.bf16.msra.mxu1 %v23948_v59  ;;  %22411 = vmatpush3.bf16.msra.mxu0 %v23949_v36  ;;  %v7744_v35 = vcombine.high %v7734_v11, %v7734_v11  ;;  %v23981_v59 = vld [vmem:[%s30560_s8 + $0x1808] sm:$0xff]  }
 0x64f   :  { %22390 = vmatprep.subr.bf16.mxu1 %v23950_v3  ;;  %22412 = vmatprep.subr.bf16.mxu0 %v23951_v39  ;;  %v23982_v36 = vld [vmem:[%s30560_s8 + $0x1888] sm:$0xff]   ;;  %v23983_v3 = vld [vmem:[%s30560_s8 + $0x1850] sm:$0xff]  }
 0x650   :  { %v23984_v39 = vld [vmem:[%s30560_s8 + $0x18d0] sm:$0xff]  }
 0x652   :  { %22391 = vmatpush3.bf16.msra.mxu1 %v23952_v42  ;;  %22413 = vmatpush3.bf16.msra.mxu0 %v23953_v43  ;;  %v23985_v42 = vld [vmem:[%s30560_s8 + $0x1810] sm:$0xff]  }
 0x653   :  { %22392 = vmatprep.subr.bf16.mxu1 %v23954_v44  ;;  %22414 = vmatprep.subr.bf16.mxu0 %v23955_v45  ;;  %v23986_v43 = vld [vmem:[%s30560_s8 + $0x1890] sm:$0xff]   ;;  %v23987_v44 = vld [vmem:[%s30560_s8 + $0x1858] sm:$0xff]  }
 0x654   :  { %v23988_v45 = vld [vmem:[%s30560_s8 + $0x18d8] sm:$0xff]  }
 0x656   :  { %22393 = vmatpush3.bf16.msra.mxu1 %v23956_v12  ;;  %22415 = vmatpush3.bf16.msra.mxu0 %v23957_v48  ;;  %v23989_v12 = vld [vmem:[%s30560_s8 + $0x1818] sm:$0xff]  }
 0x657   :  { %22394 = vmatprep.subr.bf16.mxu1 %v23958_v49  ;;  %22416 = vmatprep.subr.bf16.mxu0 %v23959_v51  ;;  %v23990_v48 = vld [vmem:[%s30560_s8 + $0x1898] sm:$0xff]   ;;  %v23991_v49 = vld [vmem:[%s30560_s8 + $0x1860] sm:$0xff]  }
 0x658   :  { %v23992_v51 = vld [vmem:[%s30560_s8 + $0x18e0] sm:$0xff]  }
 0x65a   :  { %22395 = vmatpush3.bf16.msra.mxu1 %v23960_v56  ;;  %22417 = vmatpush3.bf16.msra.mxu0 %v23961_v57  ;;  %v23993_v56 = vld [vmem:[%s30560_s8 + $0x1820] sm:$0xff]  }
 0x65b   :  { %22396 = vmatprep.subr.bf16.mxu1 %v23962_v38  ;;  %22418 = vmatprep.subr.bf16.mxu0 %v23963_v58  ;;  %v23994_v57 = vld [vmem:[%s30560_s8 + $0x18a0] sm:$0xff]   ;;  %v23995_v38 = vld [vmem:[%s30560_s8 + $0x1868] sm:$0xff]  }
 0x65c   :  { %v22094_v29 = vpop.f32.mrb[120].mxu1  ;;  %v22116_v5 = vpop.f32.mrb[124].mxu0  ;;  %v23996_v58 = vld [vmem:[%s30560_s8 + $0x18e8] sm:$0xff]  }
 0x65d   :  { %v22095_v2 = vpop.f32.mrb[121].mxu1  ;;  %v22117_v28 = vpop.f32.mrb[125].mxu0 }
 0x65e   :  { %v22096_v24 = vadd.f32 %v22095_v2, %v22094_v29  ;;  %v22118_v47 = vadd.f32 %v22117_v28, %v22116_v5  ;;  %v22097_v27 = vpop.f32.mrb[122].mxu1  ;;  %v22119_v8 = vpop.f32.mrb[126].mxu0  ;;  %22397 = vmatpush3.bf16.msra.mxu1 %v23964_v62  ;;  %22419 = vmatpush3.bf16.msra.mxu0 %v23965_v0  ;;  %v7697_v62 = vcombine.high %v28773_v33, %v28773_v33  ;;  %v23997_v0 = vld [vmem:[%s30560_s8 + $0x1828] sm:$0xff]   ;;  %v24000_v33 = vld [vmem:[%s30560_s8 + $0x18f0] sm:$0xff]  }
 0x65f   :  { %v22098_v63 = vpop.f32.mrb[123].mxu1  ;;  %v22120_v1 = vpop.f32.mrb[127].mxu0  ;;  %22398 = vmatprep.subr.bf16.mxu1 %v23966_v50  ;;  %22420 = vmatprep.subr.bf16.mxu0 %v23967_v60  ;;  %v23998_v50 = vld [vmem:[%s30560_s8 + $0x18a8] sm:$0xff]   ;;  %v23999_v60 = vld [vmem:[%s30560_s8 + $0x1870] sm:$0xff]  }
 0x660   :  { %v15480_v15 = vadd.f32 %v22096_v24, %v28695_v20  ;;  %v23975_v20 = vld [vmem:[%s30560_s8 + $0x1840] sm:$0xff]   ;;  %v28898_v2 = vrot.slane %v7697_v62, %v24684_v41  ;;  %v24002_v63 = vld [vmem:[%s30560_s8 + $0x18b0] sm:$0xff]   ;;  %v28995_v62 = vld [vmem:[%s30589_s4 + $0x68] sm:$0xff] }
 0x662   :  { %v28808_v21 = vadd.f32 %v22118_v47, %v15480_v15  ;;  %22399 = vmatpush3.bf16.msra.mxu1 %v23968_v9  ;;  %22421 = vmatpush3.bf16.msra.mxu0 %v23969_v13  ;;  %v24001_v13 = vld [vmem:[%s30560_s8 + $0x1830] sm:$0xff]   ;;  %v24004_v15 = vld [vmem:[%s30560_s8 + $0x18f8] sm:$0xff]  }
 0x663   :  { %22400 = vmatprep.subr.bf16.mxu1 %v23970_v14  ;;  %22422 = vmatprep.subr.bf16.mxu0 %v23971_v34  ;;  %v24003_v34 = vld [vmem:[%s30560_s8 + $0x1878] sm:$0xff]  }
 0x666   :  { %22401 = vmatpush3.bf16.msra.mxu1 %v23972_v19  ;;  %22423 = vmatpush3.bf16.msra.mxu0 %v23973_v23  ;;  %v7720_v19 = vrot.slane %v28789_v26, %v24684_v41  ;;  %v24008_v26 = vld [vmem:[%s30560_s8 + $0x19c0] sm:$0xff]  }
 0x667   :  { %22430 = vmatprep.subr.bf16.mxu1 %v23975_v20  ;;  %22452 = vmatprep.subr.bf16.mxu0 %v23976_v25  ;;  %v24005_v20 = vld [vmem:[%s30560_s8 + $0x1838] sm:$0xff]  }
 0x668   :  { %v24006_v25 = vld [vmem:[%s30560_s8 + $0x18b8] sm:$0xff]  }
 0x669   :  { %16038 = vmatmul.mubr.bf16.vlgmr.msra.gmra.mrb[148].mxu1 %v7678_v18  ;;  %16078 = vmatmul.mubr.bf16.vlgmr.msra.gmra.mrb[152].mxu0 %v7694_v16  ;;  %v7713_v18 = vcombine.high %v28898_v2, %v28898_v2  ;;  %v7742_v16 = vcombine.high %v7720_v19, %v7720_v19 }
 0x66a   :  { %22431 = vmatpush3.bf16.msra.mxu1 %v23977_v30  ;;  %22453 = vmatpush3.bf16.msra.mxu0 %v23978_v31  ;;  %v24009_v30 = vld [vmem:[%s30560_s8 + $0x1900] sm:$0xff]  }
 0x66b   :  { %22432 = vmatprep.subr.bf16.mxu1 %v23979_v22  ;;  %22454 = vmatprep.subr.bf16.mxu0 %v23980_v32  ;;  %v24010_v31 = vld [vmem:[%s30560_s8 + $0x1980] sm:$0xff]   ;;  %v24011_v22 = vld [vmem:[%s30560_s8 + $0x1948] sm:$0xff]  }
 0x66c   :  { %16117 = vmatprep.mubr.bf16.mxu1 %v7734_v11  ;;  %16157 = vmatprep.mubr.bf16.mxu0 %v7744_v35  ;;  %v7741_v11 = vrot.slane %v7713_v18, %v24684_v41  ;;  %v24012_v32 = vld [vmem:[%s30560_s8 + $0x19c8] sm:$0xff]  }
 0x66e   :  { %22433 = vmatpush3.bf16.msra.mxu1 %v23981_v59  ;;  %22455 = vmatpush3.bf16.msra.mxu0 %v23982_v36  ;;  %v7745_v35 = vcombine.high %v7741_v11, %v7741_v11  ;;  %v24013_v59 = vld [vmem:[%s30560_s8 + $0x1908] sm:$0xff]  }
 0x66f   :  { %22434 = vmatprep.subr.bf16.mxu1 %v23983_v3  ;;  %22456 = vmatprep.subr.bf16.mxu0 %v23984_v39  ;;  %v24014_v36 = vld [vmem:[%s30560_s8 + $0x1988] sm:$0xff]   ;;  %v24015_v3 = vld [vmem:[%s30560_s8 + $0x1950] sm:$0xff]  }
 0x670   :  { %v24016_v39 = vld [vmem:[%s30560_s8 + $0x19d0] sm:$0xff]  }
 0x672   :  { %22435 = vmatpush3.bf16.msra.mxu1 %v23985_v42  ;;  %22457 = vmatpush3.bf16.msra.mxu0 %v23986_v43  ;;  %v24017_v42 = vld [vmem:[%s30560_s8 + $0x1910] sm:$0xff]  }
 0x673   :  { %22436 = vmatprep.subr.bf16.mxu1 %v23987_v44  ;;  %22458 = vmatprep.subr.bf16.mxu0 %v23988_v45  ;;  %v24018_v43 = vld [vmem:[%s30560_s8 + $0x1990] sm:$0xff]   ;;  %v24019_v44 = vld [vmem:[%s30560_s8 + $0x1958] sm:$0xff]  }
 0x674   :  { %v24020_v45 = vld [vmem:[%s30560_s8 + $0x19d8] sm:$0xff]  }
 0x676   :  { %22437 = vmatpush3.bf16.msra.mxu1 %v23989_v12  ;;  %22459 = vmatpush3.bf16.msra.mxu0 %v23990_v48  ;;  %v24021_v12 = vld [vmem:[%s30560_s8 + $0x1918] sm:$0xff]  }
 0x677   :  { %22438 = vmatprep.subr.bf16.mxu1 %v23991_v49  ;;  %22460 = vmatprep.subr.bf16.mxu0 %v23992_v51  ;;  %v24022_v48 = vld [vmem:[%s30560_s8 + $0x1998] sm:$0xff]   ;;  %v24023_v49 = vld [vmem:[%s30560_s8 + $0x1960] sm:$0xff]  }
 0x678   :  { %v24024_v51 = vld [vmem:[%s30560_s8 + $0x19e0] sm:$0xff]  }
 0x67a   :  { %22439 = vmatpush3.bf16.msra.mxu1 %v23993_v56  ;;  %22461 = vmatpush3.bf16.msra.mxu0 %v23994_v57  ;;  %v24025_v56 = vld [vmem:[%s30560_s8 + $0x1920] sm:$0xff]  }
 0x67b   :  { %22440 = vmatprep.subr.bf16.mxu1 %v23995_v38  ;;  %22462 = vmatprep.subr.bf16.mxu0 %v23996_v58  ;;  %v24026_v57 = vld [vmem:[%s30560_s8 + $0x19a0] sm:$0xff]   ;;  %v24027_v38 = vld [vmem:[%s30560_s8 + $0x1968] sm:$0xff]  }
 0x67c   :  { %v22138_v29 = vpop.f32.mrb[124].mxu1  ;;  %v22160_v5 = vpop.f32.mrb[128].mxu0  ;;  %v24028_v58 = vld [vmem:[%s30560_s8 + $0x19e8] sm:$0xff]  }
 0x67d   :  { %v22139_v28 = vpop.f32.mrb[125].mxu1  ;;  %v22161_v24 = vpop.f32.mrb[129].mxu0 }
 0x67e   :  { %v22140_v47 = vadd.f32 %v22139_v28, %v22138_v29  ;;  %v22162_v27 = vadd.f32 %v22161_v24, %v22160_v5  ;;  %v22141_v8 = vpop.f32.mrb[126].mxu1  ;;  %v22163_v9 = vpop.f32.mrb[130].mxu0  ;;  %22441 = vmatpush3.bf16.msra.mxu1 %v23997_v0  ;;  %22463 = vmatpush3.bf16.msra.mxu0 %v23998_v50  ;;  %v24029_v0 = vld [vmem:[%s30560_s8 + $0x1928] sm:$0xff]   ;;  %v29011_v28 = vrot.slane %v28995_v62, %v24684_v41 }
 0x67f   :  { %v22142_v1 = vpop.f32.mrb[127].mxu1  ;;  %v22164_v14 = vpop.f32.mrb[131].mxu0  ;;  %22442 = vmatprep.subr.bf16.mxu1 %v23999_v60  ;;  %22464 = vmatprep.subr.bf16.mxu0 %v24000_v33  ;;  %v24030_v50 = vld [vmem:[%s30560_s8 + $0x19a8] sm:$0xff]   ;;  %v24031_v60 = vld [vmem:[%s30560_s8 + $0x1970] sm:$0xff]  }
 0x680   :  { %v15560_v37 = vadd.f32 %v22140_v47, %v28808_v21  ;;  %v24007_v21 = vld [vmem:[%s30560_s8 + $0x1940] sm:$0xff]   ;;  %v24032_v33 = vld [vmem:[%s30560_s8 + $0x19f0] sm:$0xff]  }
 0x681   :  { %v24034_v1 = vld [vmem:[%s30560_s8 + $0x19b0] sm:$0xff]  }
 0x682   :  { %v28917_v23 = vadd.f32 %v22162_v27, %v15560_v37  ;;  %22443 = vmatpush3.bf16.msra.mxu1 %v24001_v13  ;;  %22465 = vmatpush3.bf16.msra.mxu0 %v24002_v63  ;;  %v24033_v63 = vld [vmem:[%s30560_s8 + $0x1930] sm:$0xff]   ;;  %v24036_v37 = vld [vmem:[%s30560_s8 + $0x19f8] sm:$0xff]  }
 0x683   :  { %22444 = vmatprep.subr.bf16.mxu1 %v24003_v34  ;;  %22466 = vmatprep.subr.bf16.mxu0 %v24004_v15  ;;  %v24035_v15 = vld [vmem:[%s30560_s8 + $0x1978] sm:$0xff]  }
 0x686   :  { %22445 = vmatpush3.bf16.msra.mxu1 %v24005_v20  ;;  %22467 = vmatpush3.bf16.msra.mxu0 %v24006_v25  ;;  %v7727_v20 = vrot.slane %v28898_v2, %v24684_v41  ;;  %v24041_v2 = vld [vmem:[%s30560_s8 + $0x1ac0] sm:$0xff]  }
 0x687   :  { %22474 = vmatprep.subr.bf16.mxu1 %v24007_v21  ;;  %22496 = vmatprep.subr.bf16.mxu0 %v24008_v26  ;;  %v24037_v21 = vld [vmem:[%s30560_s8 + $0x1938] sm:$0xff]  }
 0x688   :  { %v24038_v26 = vld [vmem:[%s30560_s8 + $0x19b8] sm:$0xff]  }
 0x689   :  { %16118 = vmatmul.mubr.bf16.vlgmr.msra.gmra.mrb[152].mxu1 %v7720_v19  ;;  %16158 = vmatmul.mubr.bf16.vlgmr.msra.gmra.mrb[156].mxu0 %v7742_v16  ;;  %v7761_v19 = vcombine.high %v29011_v28, %v29011_v28  ;;  %v7743_v16 = vcombine.high %v7727_v20, %v7727_v20 }
 0x68a   :  { %22475 = vmatpush3.bf16.msra.mxu1 %v24009_v30  ;;  %22497 = vmatpush3.bf16.msra.mxu0 %v24010_v31  ;;  %v24042_v30 = vld [vmem:[%s30560_s8 + $0x1a00] sm:$0xff]  }
 0x68b   :  { %22476 = vmatprep.subr.bf16.mxu1 %v24011_v22  ;;  %22498 = vmatprep.subr.bf16.mxu0 %v24012_v32  ;;  %v24043_v31 = vld [vmem:[%s30560_s8 + $0x1a80] sm:$0xff]   ;;  %v24044_v22 = vld [vmem:[%s30560_s8 + $0x1a48] sm:$0xff]  }
 0x68c   :  { %16197 = vmatprep.mubr.bf16.mxu1 %v7741_v11  ;;  %16237 = vmatprep.mubr.bf16.mxu0 %v7745_v35  ;;  %v7783_v11 = vrot.slane %v7761_v19, %v24684_v41  ;;  %v24045_v32 = vld [vmem:[%s30560_s8 + $0x1ac8] sm:$0xff]  }
 0x68e   :  { %22477 = vmatpush3.bf16.msra.mxu1 %v24013_v59  ;;  %22499 = vmatpush3.bf16.msra.mxu0 %v24014_v36  ;;  %v7793_v35 = vcombine.high %v7783_v11, %v7783_v11  ;;  %v24046_v59 = vld [vmem:[%s30560_s8 + $0x1a08] sm:$0xff]  }
 0x68f   :  { %22478 = vmatprep.subr.bf16.mxu1 %v24015_v3  ;;  %22500 = vmatprep.subr.bf16.mxu0 %v24016_v39  ;;  %v24047_v36 = vld [vmem:[%s30560_s8 + $0x1a88] sm:$0xff]   ;;  %v24048_v3 = vld [vmem:[%s30560_s8 + $0x1a50] sm:$0xff]  }
 0x690   :  { %v24049_v39 = vld [vmem:[%s30560_s8 + $0x1ad0] sm:$0xff]  }
 0x692   :  { %22479 = vmatpush3.bf16.msra.mxu1 %v24017_v42  ;;  %22501 = vmatpush3.bf16.msra.mxu0 %v24018_v43  ;;  %v24050_v42 = vld [vmem:[%s30560_s8 + $0x1a10] sm:$0xff]  }
 0x693   :  { %22480 = vmatprep.subr.bf16.mxu1 %v24019_v44  ;;  %22502 = vmatprep.subr.bf16.mxu0 %v24020_v45  ;;  %v24051_v43 = vld [vmem:[%s30560_s8 + $0x1a90] sm:$0xff]   ;;  %v24052_v44 = vld [vmem:[%s30560_s8 + $0x1a58] sm:$0xff]  }
 0x694   :  { %v24053_v45 = vld [vmem:[%s30560_s8 + $0x1ad8] sm:$0xff]  }
 0x696   :  { %22481 = vmatpush3.bf16.msra.mxu1 %v24021_v12  ;;  %22503 = vmatpush3.bf16.msra.mxu0 %v24022_v48  ;;  %v24054_v12 = vld [vmem:[%s30560_s8 + $0x1a18] sm:$0xff]  }
 0x697   :  { %22482 = vmatprep.subr.bf16.mxu1 %v24023_v49  ;;  %22504 = vmatprep.subr.bf16.mxu0 %v24024_v51  ;;  %v24055_v48 = vld [vmem:[%s30560_s8 + $0x1a98] sm:$0xff]   ;;  %v24056_v49 = vld [vmem:[%s30560_s8 + $0x1a60] sm:$0xff]  }
 0x698   :  { %v24057_v51 = vld [vmem:[%s30560_s8 + $0x1ae0] sm:$0xff]  }
 0x69a   :  { %22483 = vmatpush3.bf16.msra.mxu1 %v24025_v56  ;;  %22505 = vmatpush3.bf16.msra.mxu0 %v24026_v57  ;;  %v24058_v56 = vld [vmem:[%s30560_s8 + $0x1a20] sm:$0xff]  }
 0x69b   :  { %22484 = vmatprep.subr.bf16.mxu1 %v24027_v38  ;;  %22506 = vmatprep.subr.bf16.mxu0 %v24028_v58  ;;  %v24059_v57 = vld [vmem:[%s30560_s8 + $0x1aa0] sm:$0xff]   ;;  %v24060_v38 = vld [vmem:[%s30560_s8 + $0x1a68] sm:$0xff]  }
 0x69c   :  { %v22182_v29 = vpop.f32.mrb[128].mxu1  ;;  %v22204_v5 = vpop.f32.mrb[132].mxu0  ;;  %v24061_v58 = vld [vmem:[%s30560_s8 + $0x1ae8] sm:$0xff]  }
 0x69d   :  { %v22183_v24 = vpop.f32.mrb[129].mxu1  ;;  %v22205_v47 = vpop.f32.mrb[133].mxu0 }
 0x69e   :  { %v22184_v27 = vadd.f32 %v22183_v24, %v22182_v29  ;;  %v22206_v8 = vadd.f32 %v22205_v47, %v22204_v5  ;;  %v22185_v9 = vpop.f32.mrb[130].mxu1  ;;  %v22207_v13 = vpop.f32.mrb[134].mxu0  ;;  %22485 = vmatpush3.bf16.msra.mxu1 %v24029_v0  ;;  %22507 = vmatpush3.bf16.msra.mxu0 %v24030_v50  ;;  %v7746_v0 = vcombine.high %v28995_v62, %v28995_v62  ;;  %v24062_v50 = vld [vmem:[%s30560_s8 + $0x1a28] sm:$0xff]   ;;  %v24065_v62 = vld [vmem:[%s30560_s8 + $0x1af0] sm:$0xff]  }
 0x69f   :  { %v22186_v14 = vpop.f32.mrb[131].mxu1  ;;  %v22208_v34 = vpop.f32.mrb[135].mxu0  ;;  %22486 = vmatprep.subr.bf16.mxu1 %v24031_v60  ;;  %22508 = vmatprep.subr.bf16.mxu0 %v24032_v33  ;;  %v24063_v60 = vld [vmem:[%s30560_s8 + $0x1aa8] sm:$0xff]   ;;  %v24064_v33 = vld [vmem:[%s30560_s8 + $0x1a70] sm:$0xff]  }
 0x6a0   :  { %v15640_v18 = vadd.f32 %v22184_v27, %v28917_v23  ;;  %v24040_v23 = vld [vmem:[%s30560_s8 + $0x1a40] sm:$0xff]   ;;  %v29120_v24 = vrot.slane %v7746_v0, %v24684_v41  ;;  %v24067_v14 = vld [vmem:[%s30560_s8 + $0x1ab0] sm:$0xff]  }
 0x6a1   :  { %v29217_v0 = vld [vmem:[%s30589_s4 + $0x70] sm:$0xff] }
 0x6a2   :  { %v29030_v25 = vadd.f32 %v22206_v8, %v15640_v18  ;;  %22487 = vmatpush3.bf16.msra.mxu1 %v24033_v63  ;;  %22509 = vmatpush3.bf16.msra.mxu0 %v24034_v1  ;;  %v24066_v1 = vld [vmem:[%s30560_s8 + $0x1a30] sm:$0xff]   ;;  %v24069_v18 = vld [vmem:[%s30560_s8 + $0x1af8] sm:$0xff]  }
 0x6a3   :  { %22488 = vmatprep.subr.bf16.mxu1 %v24035_v15  ;;  %22510 = vmatprep.subr.bf16.mxu0 %v24036_v37  ;;  %v24068_v37 = vld [vmem:[%s30560_s8 + $0x1a78] sm:$0xff]  }
 0x6a6   :  { %22489 = vmatpush3.bf16.msra.mxu1 %v24037_v21  ;;  %22511 = vmatpush3.bf16.msra.mxu0 %v24038_v26  ;;  %v7769_v21 = vrot.slane %v29011_v28, %v24684_v41  ;;  %v24073_v28 = vld [vmem:[%s30560_s8 + $0x1bc0] sm:$0xff]  }
 0x6a7   :  { %22518 = vmatprep.subr.bf16.mxu1 %v24040_v23  ;;  %22540 = vmatprep.subr.bf16.mxu0 %v24041_v2  ;;  %v24070_v23 = vld [vmem:[%s30560_s8 + $0x1a38] sm:$0xff]  }
 0x6a8   :  { %v24071_v2 = vld [vmem:[%s30560_s8 + $0x1ab8] sm:$0xff]  }
 0x6a9   :  { %16198 = vmatmul.mubr.bf16.vlgmr.msra.gmra.mrb[156].mxu1 %v7727_v20  ;;  %16238 = vmatmul.mubr.bf16.vlgmr.msra.gmra.mrb[160].mxu0 %v7743_v16  ;;  %v7762_v20 = vcombine.high %v29120_v24, %v29120_v24  ;;  %v7791_v16 = vcombine.high %v7769_v21, %v7769_v21 }
 0x6aa   :  { %22519 = vmatpush3.bf16.msra.mxu1 %v24042_v30  ;;  %22541 = vmatpush3.bf16.msra.mxu0 %v24043_v31  ;;  %v24074_v30 = vld [vmem:[%s30560_s8 + $0x1b00] sm:$0xff]  }
 0x6ab   :  { %22520 = vmatprep.subr.bf16.mxu1 %v24044_v22  ;;  %22542 = vmatprep.subr.bf16.mxu0 %v24045_v32  ;;  %v24075_v31 = vld [vmem:[%s30560_s8 + $0x1b80] sm:$0xff]   ;;  %v24076_v22 = vld [vmem:[%s30560_s8 + $0x1b48] sm:$0xff]  }
 0x6ac   :  { %16277 = vmatprep.mubr.bf16.mxu1 %v7783_v11  ;;  %16317 = vmatprep.mubr.bf16.mxu0 %v7793_v35  ;;  %v7790_v11 = vrot.slane %v7762_v20, %v24684_v41  ;;  %v24077_v32 = vld [vmem:[%s30560_s8 + $0x1bc8] sm:$0xff]  }
 0x6ae   :  { %22521 = vmatpush3.bf16.msra.mxu1 %v24046_v59  ;;  %22543 = vmatpush3.bf16.msra.mxu0 %v24047_v36  ;;  %v7794_v35 = vcombine.high %v7790_v11, %v7790_v11  ;;  %v24078_v59 = vld [vmem:[%s30560_s8 + $0x1b08] sm:$0xff]  }
 0x6af   :  { %22522 = vmatprep.subr.bf16.mxu1 %v24048_v3  ;;  %22544 = vmatprep.subr.bf16.mxu0 %v24049_v39  ;;  %v24079_v36 = vld [vmem:[%s30560_s8 + $0x1b88] sm:$0xff]   ;;  %v24080_v3 = vld [vmem:[%s30560_s8 + $0x1b50] sm:$0xff]  }
 0x6b0   :  { %v24081_v39 = vld [vmem:[%s30560_s8 + $0x1bd0] sm:$0xff]  }
 0x6b2   :  { %22523 = vmatpush3.bf16.msra.mxu1 %v24050_v42  ;;  %22545 = vmatpush3.bf16.msra.mxu0 %v24051_v43  ;;  %v24082_v42 = vld [vmem:[%s30560_s8 + $0x1b10] sm:$0xff]  }
 0x6b3   :  { %22524 = vmatprep.subr.bf16.mxu1 %v24052_v44  ;;  %22546 = vmatprep.subr.bf16.mxu0 %v24053_v45  ;;  %v24083_v43 = vld [vmem:[%s30560_s8 + $0x1b90] sm:$0xff]   ;;  %v24084_v44 = vld [vmem:[%s30560_s8 + $0x1b58] sm:$0xff]  }
 0x6b4   :  { %v24085_v45 = vld [vmem:[%s30560_s8 + $0x1bd8] sm:$0xff]  }
 0x6b6   :  { %22525 = vmatpush3.bf16.msra.mxu1 %v24054_v12  ;;  %22547 = vmatpush3.bf16.msra.mxu0 %v24055_v48  ;;  %v24086_v12 = vld [vmem:[%s30560_s8 + $0x1b18] sm:$0xff]  }
 0x6b7   :  { %22526 = vmatprep.subr.bf16.mxu1 %v24056_v49  ;;  %22548 = vmatprep.subr.bf16.mxu0 %v24057_v51  ;;  %v24087_v48 = vld [vmem:[%s30560_s8 + $0x1b98] sm:$0xff]   ;;  %v24088_v49 = vld [vmem:[%s30560_s8 + $0x1b60] sm:$0xff]  }
 0x6b8   :  { %v24089_v51 = vld [vmem:[%s30560_s8 + $0x1be0] sm:$0xff]  }
 0x6ba   :  { %22527 = vmatpush3.bf16.msra.mxu1 %v24058_v56  ;;  %22549 = vmatpush3.bf16.msra.mxu0 %v24059_v57  ;;  %v24090_v56 = vld [vmem:[%s30560_s8 + $0x1b20] sm:$0xff]  }
 0x6bb   :  { %22528 = vmatprep.subr.bf16.mxu1 %v24060_v38  ;;  %22550 = vmatprep.subr.bf16.mxu0 %v24061_v58  ;;  %v24091_v57 = vld [vmem:[%s30560_s8 + $0x1ba0] sm:$0xff]   ;;  %v24092_v38 = vld [vmem:[%s30560_s8 + $0x1b68] sm:$0xff]  }
 0x6bc   :  { %v22226_v29 = vpop.f32.mrb[132].mxu1  ;;  %v22248_v5 = vpop.f32.mrb[136].mxu0  ;;  %v24093_v58 = vld [vmem:[%s30560_s8 + $0x1be8] sm:$0xff]  }
 0x6bd   :  { %v22227_v47 = vpop.f32.mrb[133].mxu1  ;;  %v22249_v27 = vpop.f32.mrb[137].mxu0 }
 0x6be   :  { %v22228_v8 = vadd.f32 %v22227_v47, %v22226_v29  ;;  %v22250_v9 = vadd.f32 %v22249_v27, %v22248_v5  ;;  %v22229_v13 = vpop.f32.mrb[134].mxu1  ;;  %v22251_v63 = vpop.f32.mrb[138].mxu0  ;;  %22529 = vmatpush3.bf16.msra.mxu1 %v24062_v50  ;;  %22551 = vmatpush3.bf16.msra.mxu0 %v24063_v60  ;;  %v24094_v50 = vld [vmem:[%s30560_s8 + $0x1b28] sm:$0xff]   ;;  %v29233_v47 = vrot.slane %v29217_v0, %v24684_v41 }
 0x6bf   :  { %v22230_v34 = vpop.f32.mrb[135].mxu1  ;;  %v22252_v15 = vpop.f32.mrb[139].mxu0  ;;  %22530 = vmatprep.subr.bf16.mxu1 %v24064_v33  ;;  %22552 = vmatprep.subr.bf16.mxu0 %v24065_v62  ;;  %v24095_v60 = vld [vmem:[%s30560_s8 + $0x1ba8] sm:$0xff]   ;;  %v24096_v33 = vld [vmem:[%s30560_s8 + $0x1b70] sm:$0xff]  }
 0x6c0   :  { %v15720_v19 = vadd.f32 %v22228_v8, %v29030_v25  ;;  %v24072_v25 = vld [vmem:[%s30560_s8 + $0x1b40] sm:$0xff]   ;;  %v24097_v62 = vld [vmem:[%s30560_s8 + $0x1bf0] sm:$0xff]  }
 0x6c1   :  { %v24099_v34 = vld [vmem:[%s30560_s8 + $0x1bb0] sm:$0xff]  }
 0x6c2   :  { %v29139_v26 = vadd.f32 %v22250_v9, %v15720_v19  ;;  %22531 = vmatpush3.bf16.msra.mxu1 %v24066_v1  ;;  %22553 = vmatpush3.bf16.msra.mxu0 %v24067_v14  ;;  %v24098_v14 = vld [vmem:[%s30560_s8 + $0x1b30] sm:$0xff]   ;;  %v24101_v19 = vld [vmem:[%s30560_s8 + $0x1bf8] sm:$0xff]  }
 0x6c3   :  { %22532 = vmatprep.subr.bf16.mxu1 %v24068_v37  ;;  %22554 = vmatprep.subr.bf16.mxu0 %v24069_v18  ;;  %v24100_v18 = vld [vmem:[%s30560_s8 + $0x1b78] sm:$0xff]  }
 0x6c6   :  { %22533 = vmatpush3.bf16.msra.mxu1 %v24070_v23  ;;  %22555 = vmatpush3.bf16.msra.mxu0 %v24071_v2  ;;  %v7776_v23 = vrot.slane %v29120_v24, %v24684_v41  ;;  %v24106_v24 = vld [vmem:[%s30560_s8 + $0x1cc0] sm:$0xff]  }
 0x6c7   :  { %22562 = vmatprep.subr.bf16.mxu1 %v24072_v25  ;;  %22584 = vmatprep.subr.bf16.mxu0 %v24073_v28  ;;  %v24102_v25 = vld [vmem:[%s30560_s8 + $0x1b38] sm:$0xff]  }
 0x6c8   :  { %v24103_v28 = vld [vmem:[%s30560_s8 + $0x1bb8] sm:$0xff]  }
 0x6c9   :  { %16278 = vmatmul.mubr.bf16.vlgmr.msra.gmra.mrb[160].mxu1 %v7769_v21  ;;  %16318 = vmatmul.mubr.bf16.vlgmr.msra.gmra.mrb[164].mxu0 %v7791_v16  ;;  %v7810_v21 = vcombine.high %v29233_v47, %v29233_v47  ;;  %v7792_v16 = vcombine.high %v7776_v23, %v7776_v23 }
 0x6ca   :  { %22563 = vmatpush3.bf16.msra.mxu1 %v24074_v30  ;;  %22585 = vmatpush3.bf16.msra.mxu0 %v24075_v31  ;;  %v24107_v30 = vld [vmem:[%s30560_s8 + $0x1c00] sm:$0xff]  }
 0x6cb   :  { %22564 = vmatprep.subr.bf16.mxu1 %v24076_v22  ;;  %22586 = vmatprep.subr.bf16.mxu0 %v24077_v32  ;;  %v24108_v31 = vld [vmem:[%s30560_s8 + $0x1c80] sm:$0xff]   ;;  %v24109_v22 = vld [vmem:[%s30560_s8 + $0x1c48] sm:$0xff]  }
 0x6cc   :  { %16357 = vmatprep.mubr.bf16.mxu1 %v7790_v11  ;;  %16397 = vmatprep.mubr.bf16.mxu0 %v7794_v35  ;;  %v7832_v11 = vrot.slane %v7810_v21, %v24684_v41  ;;  %v24110_v32 = vld [vmem:[%s30560_s8 + $0x1cc8] sm:$0xff]  }
 0x6ce   :  { %22565 = vmatpush3.bf16.msra.mxu1 %v24078_v59  ;;  %22587 = vmatpush3.bf16.msra.mxu0 %v24079_v36  ;;  %v7842_v35 = vcombine.high %v7832_v11, %v7832_v11  ;;  %v24111_v59 = vld [vmem:[%s30560_s8 + $0x1c08] sm:$0xff]  }
 0x6cf   :  { %22566 = vmatprep.subr.bf16.mxu1 %v24080_v3  ;;  %22588 = vmatprep.subr.bf16.mxu0 %v24081_v39  ;;  %v24112_v36 = vld [vmem:[%s30560_s8 + $0x1c88] sm:$0xff]   ;;  %v24113_v3 = vld [vmem:[%s30560_s8 + $0x1c50] sm:$0xff]  }
 0x6d0   :  { %v24114_v39 = vld [vmem:[%s30560_s8 + $0x1cd0] sm:$0xff]  }
 0x6d2   :  { %22567 = vmatpush3.bf16.msra.mxu1 %v24082_v42  ;;  %22589 = vmatpush3.bf16.msra.mxu0 %v24083_v43  ;;  %v24115_v42 = vld [vmem:[%s30560_s8 + $0x1c10] sm:$0xff]  }
 0x6d3   :  { %22568 = vmatprep.subr.bf16.mxu1 %v24084_v44  ;;  %22590 = vmatprep.subr.bf16.mxu0 %v24085_v45  ;;  %v24116_v43 = vld [vmem:[%s30560_s8 + $0x1c90] sm:$0xff]   ;;  %v24117_v44 = vld [vmem:[%s30560_s8 + $0x1c58] sm:$0xff]  }
 0x6d4   :  { %v24118_v45 = vld [vmem:[%s30560_s8 + $0x1cd8] sm:$0xff]  }
 0x6d6   :  { %22569 = vmatpush3.bf16.msra.mxu1 %v24086_v12  ;;  %22591 = vmatpush3.bf16.msra.mxu0 %v24087_v48  ;;  %v24119_v12 = vld [vmem:[%s30560_s8 + $0x1c18] sm:$0xff]  }
 0x6d7   :  { %22570 = vmatprep.subr.bf16.mxu1 %v24088_v49  ;;  %22592 = vmatprep.subr.bf16.mxu0 %v24089_v51  ;;  %v24120_v48 = vld [vmem:[%s30560_s8 + $0x1c98] sm:$0xff]   ;;  %v24121_v49 = vld [vmem:[%s30560_s8 + $0x1c60] sm:$0xff]  }
 0x6d8   :  { %v24122_v51 = vld [vmem:[%s30560_s8 + $0x1ce0] sm:$0xff]  }
 0x6da   :  { %22571 = vmatpush3.bf16.msra.mxu1 %v24090_v56  ;;  %22593 = vmatpush3.bf16.msra.mxu0 %v24091_v57  ;;  %v24123_v56 = vld [vmem:[%s30560_s8 + $0x1c20] sm:$0xff]  }
 0x6db   :  { %22572 = vmatprep.subr.bf16.mxu1 %v24092_v38  ;;  %22594 = vmatprep.subr.bf16.mxu0 %v24093_v58  ;;  %v24124_v57 = vld [vmem:[%s30560_s8 + $0x1ca0] sm:$0xff]   ;;  %v24125_v38 = vld [vmem:[%s30560_s8 + $0x1c68] sm:$0xff]  }
 0x6dc   :  { %v22270_v29 = vpop.f32.mrb[136].mxu1  ;;  %v22292_v5 = vpop.f32.mrb[140].mxu0  ;;  %v24126_v58 = vld [vmem:[%s30560_s8 + $0x1ce8] sm:$0xff]  }
 0x6dd   :  { %v22271_v27 = vpop.f32.mrb[137].mxu1  ;;  %v22293_v8 = vpop.f32.mrb[141].mxu0 }
 0x6de   :  { %v22272_v9 = vadd.f32 %v22271_v27, %v22270_v29  ;;  %v22294_v13 = vadd.f32 %v22293_v8, %v22292_v5  ;;  %v22273_v63 = vpop.f32.mrb[138].mxu1  ;;  %v22295_v1 = vpop.f32.mrb[142].mxu0  ;;  %22573 = vmatpush3.bf16.msra.mxu1 %v24094_v50  ;;  %22595 = vmatpush3.bf16.msra.mxu0 %v24095_v60  ;;  %v7795_v50 = vcombine.high %v29217_v0, %v29217_v0  ;;  %v24127_v60 = vld [vmem:[%s30560_s8 + $0x1c28] sm:$0xff]   ;;  %v24130_v0 = vld [vmem:[%s30560_s8 + $0x1cf0] sm:$0xff]  }
 0x6df   :  { %v22274_v15 = vpop.f32.mrb[139].mxu1  ;;  %v22296_v37 = vpop.f32.mrb[143].mxu0  ;;  %22574 = vmatprep.subr.bf16.mxu1 %v24096_v33  ;;  %22596 = vmatprep.subr.bf16.mxu0 %v24097_v62  ;;  %v24128_v33 = vld [vmem:[%s30560_s8 + $0x1ca8] sm:$0xff]   ;;  %v24129_v62 = vld [vmem:[%s30560_s8 + $0x1c70] sm:$0xff]  }
 0x6e0   :  { %v15800_v20 = vadd.f32 %v22272_v9, %v29139_v26  ;;  %v24105_v26 = vld [vmem:[%s30560_s8 + $0x1c40] sm:$0xff]   ;;  %v29342_v27 = vrot.slane %v7795_v50, %v24684_v41  ;;  %v24132_v15 = vld [vmem:[%s30560_s8 + $0x1cb0] sm:$0xff]   ;;  %v29439_v50 = vld [vmem:[%s30589_s4 + $0x78] sm:$0xff] }
 0x6e2   :  { %v29252_v2 = vadd.f32 %v22294_v13, %v15800_v20  ;;  %22575 = vmatpush3.bf16.msra.mxu1 %v24098_v14  ;;  %22597 = vmatpush3.bf16.msra.mxu0 %v24099_v34  ;;  %v24131_v34 = vld [vmem:[%s30560_s8 + $0x1c30] sm:$0xff]   ;;  %v24134_v20 = vld [vmem:[%s30560_s8 + $0x1cf8] sm:$0xff]  }
 0x6e3   :  { %22576 = vmatprep.subr.bf16.mxu1 %v24100_v18  ;;  %22598 = vmatprep.subr.bf16.mxu0 %v24101_v19  ;;  %v24133_v19 = vld [vmem:[%s30560_s8 + $0x1c78] sm:$0xff]  }
 0x6e6   :  { %22577 = vmatpush3.bf16.msra.mxu1 %v24102_v25  ;;  %22599 = vmatpush3.bf16.msra.mxu0 %v24103_v28  ;;  %v7818_v25 = vrot.slane %v29233_v47, %v24684_v41  ;;  %v24138_v47 = vld [vmem:[%s30560_s8 + $0x1dc0] sm:$0xff]  }
 0x6e7   :  { %22606 = vmatprep.subr.bf16.mxu1 %v24105_v26  ;;  %22628 = vmatprep.subr.bf16.mxu0 %v24106_v24  ;;  %v24135_v26 = vld [vmem:[%s30560_s8 + $0x1c38] sm:$0xff]  }
 0x6e8   :  { %v24136_v24 = vld [vmem:[%s30560_s8 + $0x1cb8] sm:$0xff]  }
 0x6e9   :  { %16358 = vmatmul.mubr.bf16.vlgmr.msra.gmra.mrb[164].mxu1 %v7776_v23  ;;  %16398 = vmatmul.mubr.bf16.vlgmr.msra.gmra.mrb[168].mxu0 %v7792_v16  ;;  %v7811_v23 = vcombine.high %v29342_v27, %v29342_v27  ;;  %v7840_v16 = vcombine.high %v7818_v25, %v7818_v25 }
 0x6ea   :  { %22607 = vmatpush3.bf16.msra.mxu1 %v24107_v30  ;;  %22629 = vmatpush3.bf16.msra.mxu0 %v24108_v31  ;;  %v24139_v30 = vld [vmem:[%s30560_s8 + $0x1d00] sm:$0xff]  }
 0x6eb   :  { %22608 = vmatprep.subr.bf16.mxu1 %v24109_v22  ;;  %22630 = vmatprep.subr.bf16.mxu0 %v24110_v32  ;;  %v24140_v31 = vld [vmem:[%s30560_s8 + $0x1d80] sm:$0xff]   ;;  %v24141_v22 = vld [vmem:[%s30560_s8 + $0x1d48] sm:$0xff]  }
 0x6ec   :  { %16437 = vmatprep.mubr.bf16.mxu1 %v7832_v11  ;;  %16477 = vmatprep.mubr.bf16.mxu0 %v7842_v35  ;;  %v7839_v11 = vrot.slane %v7811_v23, %v24684_v41  ;;  %v24142_v32 = vld [vmem:[%s30560_s8 + $0x1dc8] sm:$0xff]  }
 0x6ee   :  { %22609 = vmatpush3.bf16.msra.mxu1 %v24111_v59  ;;  %22631 = vmatpush3.bf16.msra.mxu0 %v24112_v36  ;;  %v7843_v35 = vcombine.high %v7839_v11, %v7839_v11  ;;  %v24143_v59 = vld [vmem:[%s30560_s8 + $0x1d08] sm:$0xff]  }
 0x6ef   :  { %22610 = vmatprep.subr.bf16.mxu1 %v24113_v3  ;;  %22632 = vmatprep.subr.bf16.mxu0 %v24114_v39  ;;  %v24144_v36 = vld [vmem:[%s30560_s8 + $0x1d88] sm:$0xff]   ;;  %v24145_v3 = vld [vmem:[%s30560_s8 + $0x1d50] sm:$0xff]  }
 0x6f0   :  { %v24146_v39 = vld [vmem:[%s30560_s8 + $0x1dd0] sm:$0xff]  }
 0x6f2   :  { %22611 = vmatpush3.bf16.msra.mxu1 %v24115_v42  ;;  %22633 = vmatpush3.bf16.msra.mxu0 %v24116_v43  ;;  %v24147_v42 = vld [vmem:[%s30560_s8 + $0x1d10] sm:$0xff]  }
 0x6f3   :  { %22612 = vmatprep.subr.bf16.mxu1 %v24117_v44  ;;  %22634 = vmatprep.subr.bf16.mxu0 %v24118_v45  ;;  %v24148_v43 = vld [vmem:[%s30560_s8 + $0x1d90] sm:$0xff]   ;;  %v24149_v44 = vld [vmem:[%s30560_s8 + $0x1d58] sm:$0xff]  }
 0x6f4   :  { %v24150_v45 = vld [vmem:[%s30560_s8 + $0x1dd8] sm:$0xff]  }
 0x6f6   :  { %22613 = vmatpush3.bf16.msra.mxu1 %v24119_v12  ;;  %22635 = vmatpush3.bf16.msra.mxu0 %v24120_v48  ;;  %v24151_v12 = vld [vmem:[%s30560_s8 + $0x1d18] sm:$0xff]  }
 0x6f7   :  { %22614 = vmatprep.subr.bf16.mxu1 %v24121_v49  ;;  %22636 = vmatprep.subr.bf16.mxu0 %v24122_v51  ;;  %v24152_v48 = vld [vmem:[%s30560_s8 + $0x1d98] sm:$0xff]   ;;  %v24153_v49 = vld [vmem:[%s30560_s8 + $0x1d60] sm:$0xff]  }
 0x6f8   :  { %v24154_v51 = vld [vmem:[%s30560_s8 + $0x1de0] sm:$0xff]  }
 0x6fa   :  { %22615 = vmatpush3.bf16.msra.mxu1 %v24123_v56  ;;  %22637 = vmatpush3.bf16.msra.mxu0 %v24124_v57  ;;  %v24155_v56 = vld [vmem:[%s30560_s8 + $0x1d20] sm:$0xff]  }
 0x6fb   :  { %22616 = vmatprep.subr.bf16.mxu1 %v24125_v38  ;;  %22638 = vmatprep.subr.bf16.mxu0 %v24126_v58  ;;  %v24156_v57 = vld [vmem:[%s30560_s8 + $0x1da0] sm:$0xff]   ;;  %v24157_v38 = vld [vmem:[%s30560_s8 + $0x1d68] sm:$0xff]  }
 0x6fc   :  { %v22314_v29 = vpop.f32.mrb[140].mxu1  ;;  %v22336_v5 = vpop.f32.mrb[144].mxu0  ;;  %v24158_v58 = vld [vmem:[%s30560_s8 + $0x1de8] sm:$0xff]  }
 0x6fd   :  { %v22315_v8 = vpop.f32.mrb[141].mxu1  ;;  %v22337_v9 = vpop.f32.mrb[145].mxu0 }
 0x6fe   :  { %v22316_v13 = vadd.f32 %v22315_v8, %v22314_v29  ;;  %v22338_v63 = vadd.f32 %v22337_v9, %v22336_v5  ;;  %v22317_v1 = vpop.f32.mrb[142].mxu1  ;;  %v22339_v14 = vpop.f32.mrb[146].mxu0  ;;  %22617 = vmatpush3.bf16.msra.mxu1 %v24127_v60  ;;  %22639 = vmatpush3.bf16.msra.mxu0 %v24128_v33  ;;  %v24159_v60 = vld [vmem:[%s30560_s8 + $0x1d28] sm:$0xff]   ;;  %v29455_v8 = vrot.slane %v29439_v50, %v24684_v41 }
 0x6ff   :  { %v22318_v37 = vpop.f32.mrb[143].mxu1  ;;  %v22340_v18 = vpop.f32.mrb[147].mxu0  ;;  %22618 = vmatprep.subr.bf16.mxu1 %v24129_v62  ;;  %22640 = vmatprep.subr.bf16.mxu0 %v24130_v0  ;;  %v24160_v33 = vld [vmem:[%s30560_s8 + $0x1da8] sm:$0xff]   ;;  %v24161_v62 = vld [vmem:[%s30560_s8 + $0x1d70] sm:$0xff]  }
 0x700   :  { %v15880_v21 = vadd.f32 %v22316_v13, %v29252_v2  ;;  %v24137_v2 = vld [vmem:[%s30560_s8 + $0x1d40] sm:$0xff]   ;;  %v24162_v0 = vld [vmem:[%s30560_s8 + $0x1df0] sm:$0xff]  }
 0x701   :  { %v24164_v37 = vld [vmem:[%s30560_s8 + $0x1db0] sm:$0xff]  }
 0x702   :  { %v29361_v28 = vadd.f32 %v22338_v63, %v15880_v21  ;;  %22619 = vmatpush3.bf16.msra.mxu1 %v24131_v34  ;;  %22641 = vmatpush3.bf16.msra.mxu0 %v24132_v15  ;;  %v24163_v15 = vld [vmem:[%s30560_s8 + $0x1d30] sm:$0xff]   ;;  %v24166_v21 = vld [vmem:[%s30560_s8 + $0x1df8] sm:$0xff]  }
 0x703   :  { %22620 = vmatprep.subr.bf16.mxu1 %v24133_v19  ;;  %22642 = vmatprep.subr.bf16.mxu0 %v24134_v20  ;;  %v24165_v20 = vld [vmem:[%s30560_s8 + $0x1d78] sm:$0xff]  }
 0x706   :  { %22621 = vmatpush3.bf16.msra.mxu1 %v24135_v26  ;;  %22643 = vmatpush3.bf16.msra.mxu0 %v24136_v24  ;;  %v7825_v26 = vrot.slane %v29342_v27, %v24684_v41  ;;  %v24171_v27 = vld [vmem:[%s30560_s8 + $0x1ec0] sm:$0xff]  }
 0x707   :  { %22650 = vmatprep.subr.bf16.mxu1 %v24137_v2  ;;  %22672 = vmatprep.subr.bf16.mxu0 %v24138_v47  ;;  %v24167_v2 = vld [vmem:[%s30560_s8 + $0x1d38] sm:$0xff]  }
 0x708   :  { %v24168_v47 = vld [vmem:[%s30560_s8 + $0x1db8] sm:$0xff]  }
 0x709   :  { %16438 = vmatmul.mubr.bf16.vlgmr.msra.gmra.mrb[168].mxu1 %v7818_v25  ;;  %16478 = vmatmul.mubr.bf16.vlgmr.msra.gmra.mrb[172].mxu0 %v7840_v16  ;;  %v7859_v25 = vcombine.high %v29455_v8, %v29455_v8  ;;  %v7841_v16 = vcombine.high %v7825_v26, %v7825_v26 }
 0x70a   :  { %22651 = vmatpush3.bf16.msra.mxu1 %v24139_v30  ;;  %22673 = vmatpush3.bf16.msra.mxu0 %v24140_v31  ;;  %v24172_v30 = vld [vmem:[%s30560_s8 + $0x1e00] sm:$0xff]  }
 0x70b   :  { %22652 = vmatprep.subr.bf16.mxu1 %v24141_v22  ;;  %22674 = vmatprep.subr.bf16.mxu0 %v24142_v32  ;;  %v24173_v31 = vld [vmem:[%s30560_s8 + $0x1e80] sm:$0xff]   ;;  %v24174_v22 = vld [vmem:[%s30560_s8 + $0x1e48] sm:$0xff]  }
 0x70c   :  { %16517 = vmatprep.mubr.bf16.mxu1 %v7839_v11  ;;  %16557 = vmatprep.mubr.bf16.mxu0 %v7843_v35  ;;  %v7881_v11 = vrot.slane %v7859_v25, %v24684_v41  ;;  %v24175_v32 = vld [vmem:[%s30560_s8 + $0x1ec8] sm:$0xff]  }
 0x70e   :  { %22653 = vmatpush3.bf16.msra.mxu1 %v24143_v59  ;;  %22675 = vmatpush3.bf16.msra.mxu0 %v24144_v36  ;;  %v7891_v35 = vcombine.high %v7881_v11, %v7881_v11  ;;  %v24176_v59 = vld [vmem:[%s30560_s8 + $0x1e08] sm:$0xff]  }
 0x70f   :  { %22654 = vmatprep.subr.bf16.mxu1 %v24145_v3  ;;  %22676 = vmatprep.subr.bf16.mxu0 %v24146_v39  ;;  %v24177_v36 = vld [vmem:[%s30560_s8 + $0x1e88] sm:$0xff]   ;;  %v24178_v3 = vld [vmem:[%s30560_s8 + $0x1e50] sm:$0xff]  }
 0x710   :  { %v24179_v39 = vld [vmem:[%s30560_s8 + $0x1ed0] sm:$0xff]  }
 0x712   :  { %22655 = vmatpush3.bf16.msra.mxu1 %v24147_v42  ;;  %22677 = vmatpush3.bf16.msra.mxu0 %v24148_v43  ;;  %v24180_v42 = vld [vmem:[%s30560_s8 + $0x1e10] sm:$0xff]  }
 0x713   :  { %22656 = vmatprep.subr.bf16.mxu1 %v24149_v44  ;;  %22678 = vmatprep.subr.bf16.mxu0 %v24150_v45  ;;  %v24181_v43 = vld [vmem:[%s30560_s8 + $0x1e90] sm:$0xff]   ;;  %v24182_v44 = vld [vmem:[%s30560_s8 + $0x1e58] sm:$0xff]  }
 0x714   :  { %v24183_v45 = vld [vmem:[%s30560_s8 + $0x1ed8] sm:$0xff]  }
 0x716   :  { %22657 = vmatpush3.bf16.msra.mxu1 %v24151_v12  ;;  %22679 = vmatpush3.bf16.msra.mxu0 %v24152_v48  ;;  %v24184_v12 = vld [vmem:[%s30560_s8 + $0x1e18] sm:$0xff]  }
 0x717   :  { %22658 = vmatprep.subr.bf16.mxu1 %v24153_v49  ;;  %22680 = vmatprep.subr.bf16.mxu0 %v24154_v51  ;;  %v24185_v48 = vld [vmem:[%s30560_s8 + $0x1e98] sm:$0xff]   ;;  %v24186_v49 = vld [vmem:[%s30560_s8 + $0x1e60] sm:$0xff]  }
 0x718   :  { %v24187_v51 = vld [vmem:[%s30560_s8 + $0x1ee0] sm:$0xff]  }
 0x71a   :  { %22659 = vmatpush3.bf16.msra.mxu1 %v24155_v56  ;;  %22681 = vmatpush3.bf16.msra.mxu0 %v24156_v57  ;;  %v24188_v56 = vld [vmem:[%s30560_s8 + $0x1e20] sm:$0xff]  }
 0x71b   :  { %22660 = vmatprep.subr.bf16.mxu1 %v24157_v38  ;;  %22682 = vmatprep.subr.bf16.mxu0 %v24158_v58  ;;  %v24189_v57 = vld [vmem:[%s30560_s8 + $0x1ea0] sm:$0xff]   ;;  %v24190_v38 = vld [vmem:[%s30560_s8 + $0x1e68] sm:$0xff]  }
 0x71c   :  { %v22358_v29 = vpop.f32.mrb[144].mxu1  ;;  %v22380_v5 = vpop.f32.mrb[148].mxu0  ;;  %v24191_v58 = vld [vmem:[%s30560_s8 + $0x1ee8] sm:$0xff]  }
 0x71d   :  { %v22359_v9 = vpop.f32.mrb[145].mxu1  ;;  %v22381_v13 = vpop.f32.mrb[149].mxu0 }
 0x71e   :  { %v22360_v63 = vadd.f32 %v22359_v9, %v22358_v29  ;;  %v22382_v1 = vadd.f32 %v22381_v13, %v22380_v5  ;;  %v22361_v14 = vpop.f32.mrb[146].mxu1  ;;  %v22383_v34 = vpop.f32.mrb[150].mxu0  ;;  %22661 = vmatpush3.bf16.msra.mxu1 %v24159_v60  ;;  %22683 = vmatpush3.bf16.msra.mxu0 %v24160_v33  ;;  %v7844_v60 = vcombine.high %v29439_v50, %v29439_v50  ;;  %v24192_v33 = vld [vmem:[%s30560_s8 + $0x1e28] sm:$0xff]   ;;  %v24195_v50 = vld [vmem:[%s30560_s8 + $0x1ef0] sm:$0xff]  }
 0x71f   :  { %v22362_v18 = vpop.f32.mrb[147].mxu1  ;;  %v22384_v19 = vpop.f32.mrb[151].mxu0  ;;  %22662 = vmatprep.subr.bf16.mxu1 %v24161_v62  ;;  %22684 = vmatprep.subr.bf16.mxu0 %v24162_v0  ;;  %v24193_v62 = vld [vmem:[%s30560_s8 + $0x1ea8] sm:$0xff]   ;;  %v24194_v0 = vld [vmem:[%s30560_s8 + $0x1e70] sm:$0xff]  }
 0x720   :  { %v15960_v23 = vadd.f32 %v22360_v63, %v29361_v28  ;;  %v24170_v28 = vld [vmem:[%s30560_s8 + $0x1e40] sm:$0xff]   ;;  %v29564_v9 = vrot.slane %v7844_v60, %v24684_v41  ;;  %v24197_v18 = vld [vmem:[%s30560_s8 + $0x1eb0] sm:$0xff]   ;;  %v24224_v60 = vld [vmem:[%s30560_s8 + $0x1f28] sm:$0xff]  }
 0x722   :  { %v29474_v24 = vadd.f32 %v22382_v1, %v15960_v23  ;;  %22663 = vmatpush3.bf16.msra.mxu1 %v24163_v15  ;;  %22685 = vmatpush3.bf16.msra.mxu0 %v24164_v37  ;;  %v24196_v37 = vld [vmem:[%s30560_s8 + $0x1e30] sm:$0xff]   ;;  %v24199_v23 = vld [vmem:[%s30560_s8 + $0x1ef8] sm:$0xff]  }
 0x723   :  { %22664 = vmatprep.subr.bf16.mxu1 %v24165_v20  ;;  %22686 = vmatprep.subr.bf16.mxu0 %v24166_v21  ;;  %v24198_v21 = vld [vmem:[%s30560_s8 + $0x1e78] sm:$0xff]  }
 0x726   :  { %22665 = vmatpush3.bf16.msra.mxu1 %v24167_v2  ;;  %22687 = vmatpush3.bf16.msra.mxu0 %v24168_v47  ;;  %v7867_v2 = vrot.slane %v29455_v8, %v24684_v41  ;;  %v24203_v8 = vld [vmem:[%s30560_s8 + $0x1fc0] sm:$0xff]  }
 0x727   :  { %22694 = vmatprep.subr.bf16.mxu1 %v24170_v28  ;;  %22716 = vmatprep.subr.bf16.mxu0 %v24171_v27  ;;  %v24200_v28 = vld [vmem:[%s30560_s8 + $0x1e38] sm:$0xff]  }
 0x728   :  { %v24201_v27 = vld [vmem:[%s30560_s8 + $0x1eb8] sm:$0xff]  }
 0x729   :  { %16518 = vmatmul.mubr.bf16.vlgmr.msra.gmra.mrb[172].mxu1 %v7825_v26  ;;  %16558 = vmatmul.mubr.bf16.vlgmr.msra.gmra.mrb[176].mxu0 %v7841_v16  ;;  %v7860_v26 = vcombine.high %v29564_v9, %v29564_v9  ;;  %v7889_v16 = vcombine.high %v7867_v2, %v7867_v2 }
 0x72a   :  { %22695 = vmatpush3.bf16.msra.mxu1 %v24172_v30  ;;  %22717 = vmatpush3.bf16.msra.mxu0 %v24173_v31  ;;  %v24204_v30 = vld [vmem:[%s30560_s8 + $0x1f00] sm:$0xff]  }
 0x72b   :  { %22696 = vmatprep.subr.bf16.mxu1 %v24174_v22  ;;  %22718 = vmatprep.subr.bf16.mxu0 %v24175_v32  ;;  %v24205_v31 = vld [vmem:[%s30560_s8 + $0x1f80] sm:$0xff]   ;;  %v24206_v22 = vld [vmem:[%s30560_s8 + $0x1f48] sm:$0xff]  }
 0x72c   :  { %16597 = vmatprep.mubr.bf16.mxu1 %v7881_v11  ;;  %16637 = vmatprep.mubr.bf16.mxu0 %v7891_v35  ;;  %v7888_v11 = vrot.slane %v7860_v26, %v24684_v41  ;;  %v24207_v32 = vld [vmem:[%s30560_s8 + $0x1fc8] sm:$0xff]  }
 0x72e   :  { %22697 = vmatpush3.bf16.msra.mxu1 %v24176_v59  ;;  %22719 = vmatpush3.bf16.msra.mxu0 %v24177_v36  ;;  %v7892_v35 = vcombine.high %v7888_v11, %v7888_v11  ;;  %v24208_v59 = vld [vmem:[%s30560_s8 + $0x1f08] sm:$0xff]  }
 0x72f   :  { %22698 = vmatprep.subr.bf16.mxu1 %v24178_v3  ;;  %22720 = vmatprep.subr.bf16.mxu0 %v24179_v39  ;;  %v24209_v36 = vld [vmem:[%s30560_s8 + $0x1f88] sm:$0xff]   ;;  %v24210_v3 = vld [vmem:[%s30560_s8 + $0x1f50] sm:$0xff]  }
 0x730   :  { %v24211_v39 = vld [vmem:[%s30560_s8 + $0x1fd0] sm:$0xff]  }
 0x732   :  { %22699 = vmatpush3.bf16.msra.mxu1 %v24180_v42  ;;  %22721 = vmatpush3.bf16.msra.mxu0 %v24181_v43  ;;  %v24212_v42 = vld [vmem:[%s30560_s8 + $0x1f10] sm:$0xff]  }
 0x733   :  { %22700 = vmatprep.subr.bf16.mxu1 %v24182_v44  ;;  %22722 = vmatprep.subr.bf16.mxu0 %v24183_v45  ;;  %v24213_v43 = vld [vmem:[%s30560_s8 + $0x1f90] sm:$0xff]   ;;  %v24214_v44 = vld [vmem:[%s30560_s8 + $0x1f58] sm:$0xff]  }
 0x734   :  { %v24215_v45 = vld [vmem:[%s30560_s8 + $0x1fd8] sm:$0xff]  }
 0x736   :  { %22701 = vmatpush3.bf16.msra.mxu1 %v24184_v12  ;;  %22723 = vmatpush3.bf16.msra.mxu0 %v24185_v48  ;;  %v24216_v12 = vld [vmem:[%s30560_s8 + $0x1f18] sm:$0xff]  }
 0x737   :  { %22702 = vmatprep.subr.bf16.mxu1 %v24186_v49  ;;  %22724 = vmatprep.subr.bf16.mxu0 %v24187_v51  ;;  %v24217_v48 = vld [vmem:[%s30560_s8 + $0x1f98] sm:$0xff]   ;;  %v24218_v49 = vld [vmem:[%s30560_s8 + $0x1f60] sm:$0xff]  }
 0x738   :  { %v24219_v51 = vld [vmem:[%s30560_s8 + $0x1fe0] sm:$0xff]  }
 0x73a   :  { %22703 = vmatpush3.bf16.msra.mxu1 %v24188_v56  ;;  %22725 = vmatpush3.bf16.msra.mxu0 %v24189_v57  ;;  %v24220_v56 = vld [vmem:[%s30560_s8 + $0x1f20] sm:$0xff]  }
 0x73b   :  { %22704 = vmatprep.subr.bf16.mxu1 %v24190_v38  ;;  %22726 = vmatprep.subr.bf16.mxu0 %v24191_v58  ;;  %v24221_v57 = vld [vmem:[%s30560_s8 + $0x1fa0] sm:$0xff]   ;;  %v24222_v38 = vld [vmem:[%s30560_s8 + $0x1f68] sm:$0xff]  }
 0x73c   :  { %v22402_v29 = vpop.f32.mrb[148].mxu1  ;;  %v22424_v5 = vpop.f32.mrb[152].mxu0  ;;  %v24223_v58 = vld [vmem:[%s30560_s8 + $0x1fe8] sm:$0xff]  }
 0x73d   :  { %v22403_v13 = vpop.f32.mrb[149].mxu1  ;;  %v22425_v63 = vpop.f32.mrb[153].mxu0 }
 0x73e   :  { %v22404_v1 = vadd.f32 %v22403_v13, %v22402_v29  ;;  %v22426_v14 = vadd.f32 %v22425_v63, %v22424_v5  ;;  %v22405_v34 = vpop.f32.mrb[150].mxu1  ;;  %v22427_v15 = vpop.f32.mrb[154].mxu0  ;;  %22705 = vmatpush3.bf16.msra.mxu1 %v24192_v33  ;;  %22727 = vmatpush3.bf16.msra.mxu0 %v24193_v62  ;;  %v24225_v33 = vld [vmem:[%s30560_s8 + $0x1fa8] sm:$0xff]   ;;  %v24226_v62 = vld [vmem:[%s30560_s8 + $0x1f70] sm:$0xff]  }
 0x73f   :  { %v22406_v19 = vpop.f32.mrb[151].mxu1  ;;  %v22428_v20 = vpop.f32.mrb[155].mxu0  ;;  %22706 = vmatprep.subr.bf16.mxu1 %v24194_v0  ;;  %22728 = vmatprep.subr.bf16.mxu0 %v24195_v50  ;;  %v24227_v0 = vld [vmem:[%s30560_s8 + $0x1ff0] sm:$0xff]  }
 0x740   :  { %v16040_v25 = vadd.f32 %v22404_v1, %v29474_v24  ;;  %v24202_v24 = vld [vmem:[%s30560_s8 + $0x1f40] sm:$0xff]   ;;  %v24228_v15 = vld [vmem:[%s30560_s8 + $0x1f30] sm:$0xff]   ;;  %v24230_v20 = vld [vmem:[%s30560_s8 + $0x1f78] sm:$0xff]  }
 0x742   :  { %v29583_v47 = vadd.f32 %v22426_v14, %v16040_v25  ;;  %22707 = vmatpush3.bf16.msra.mxu1 %v24196_v37  ;;  %22729 = vmatpush3.bf16.msra.mxu0 %v24197_v18  ;;  %v24229_v37 = vld [vmem:[%s30560_s8 + $0x1fb0] sm:$0xff]   ;;  %v7874_v25 = vrot.slane %v29564_v9, %v24684_v41 }
 0x743   :  { %22708 = vmatprep.subr.bf16.mxu1 %v24198_v21  ;;  %22730 = vmatprep.subr.bf16.mxu0 %v24199_v23  ;;  %v24231_v21 = vld [vmem:[%s30560_s8 + $0x1ff8] sm:$0xff]  }
 0x746   :  { %22709 = vmatpush3.bf16.msra.mxu1 %v24200_v28  ;;  %22731 = vmatpush3.bf16.msra.mxu0 %v24201_v27  ;;  %v24233_v28 = vld [vmem:[%s30560_s8 + $0x1fb8] sm:$0xff]   ;;  %v7890_v27 = vcombine.high %v7874_v25, %v7874_v25 }
 0x747   :  { %22738 = vmatprep.subr.bf16.mxu1 %v24202_v24  ;;  %22760 = vmatprep.subr.bf16.mxu0 %v24203_v8 }
 0x749   :  { %16598 = vmatmul.mubr.bf16.vlgmr.msra.gmra.mrb[176].mxu1 %v7867_v2  ;;  %16638 = vmatmul.mubr.bf16.vlgmr.msra.gmra.mrb[180].mxu0 %v7889_v16  ;;  %v24232_v2 = vld [vmem:[%s30560_s8 + $0x1f38] sm:$0xff]   ;;  %s19230_s8 = sshll.u32 %s24462_s27, 4  ;;  %s19231_s8 = int_to_ptr.vmem [resolvable:$true] %s19230_s8 }
 0x74a   :  { %22739 = vmatpush3.bf16.msra.mxu1 %v24204_v30  ;;  %22761 = vmatpush3.bf16.msra.mxu0 %v24205_v31  ;;  %s24363_s3 = scalar_lea.vmem %s19231_s8, 768  ;;  %p24368_p1 = scmp.lt.s32.totalorder %s19231_s8, %s19231_s8 }
 0x74b   :  { %22740 = vmatprep.subr.bf16.mxu1 %v24206_v22  ;;  %22762 = vmatprep.subr.bf16.mxu0 %v24207_v32  ;;  %p24364_p0 = scmp.ne.s32.totalorder %s19231_s8, %s24363_s3  ;;  %p24369_p2 = scmp.lt.s32.totalorder %s24363_s3, %s24363_s3 }
 0x74c   :  { %16677 = vmatprep.mubr.bf16.mxu1 %v7888_v11  ;;  %16717 = vmatprep.mubr.bf16.mxu0 %v7892_v35 }
 0x74d   :  { %p24370_p3 = por %p24369_p2, %p24368_p1 }
 0x74e   :  { %22741 = vmatpush3.bf16.msra.mxu1 %v24208_v59  ;;  %22763 = vmatpush3.bf16.msra.mxu0 %v24209_v36 }
 0x74f   :  { %22742 = vmatprep.subr.bf16.mxu1 %v24210_v3  ;;  %22764 = vmatprep.subr.bf16.mxu0 %v24211_v39  ;;  %p24371_p4 = pnand %p24370_p3, %p24364_p0 }
 0x752   :  { %22743 = vmatpush3.bf16.msra.mxu1 %v24212_v42  ;;  %22765 = vmatpush3.bf16.msra.mxu0 %v24213_v43 }
 0x753   :  { %22744 = vmatprep.subr.bf16.mxu1 %v24214_v44  ;;  %22766 = vmatprep.subr.bf16.mxu0 %v24215_v45 }
 0x756   :  { %22745 = vmatpush3.bf16.msra.mxu1 %v24216_v12  ;;  %22767 = vmatpush3.bf16.msra.mxu0 %v24217_v48 }
 0x757   :  { %22746 = vmatprep.subr.bf16.mxu1 %v24218_v49  ;;  %22768 = vmatprep.subr.bf16.mxu0 %v24219_v51 }
 0x75a   :  { %22747 = vmatpush3.bf16.msra.mxu1 %v24220_v56  ;;  %22769 = vmatpush3.bf16.msra.mxu0 %v24221_v57  ;;  %v24235_v56 = vld [vmem:[%s30562_s10] sm:$0xff]   ;;  %v24236_v57 = vld [vmem:[%s30562_s10 + $0x8] sm:$0xff]  }
 0x75b   :  { %22748 = vmatprep.subr.bf16.mxu1 %v24222_v38  ;;  %22770 = vmatprep.subr.bf16.mxu0 %v24223_v58  ;;  %v24237_v38 = vld [vmem:[%s30562_s10 + $0x10] sm:$0xff]   ;;  %v24238_v58 = vld [vmem:[%s30562_s10 + $0x18] sm:$0xff]  }
 0x75c   :  { %v22446_v50 = vpop.f32.mrb[152].mxu1  ;;  %v22468_v29 = vpop.f32.mrb[156].mxu0 }
 0x75d   :  { %v22447_v5 = vpop.f32.mrb[153].mxu1  ;;  %v22469_v13 = vpop.f32.mrb[157].mxu0 }
 0x75e   :  { %v22448_v63 = vadd.f32 %v22447_v5, %v22446_v50  ;;  %v22470_v1 = vadd.f32 %v22469_v13, %v22468_v29  ;;  %v22449_v14 = vpop.f32.mrb[154].mxu1  ;;  %v22471_v34 = vpop.f32.mrb[158].mxu0  ;;  %22749 = vmatpush3.bf16.msra.mxu1 %v24224_v60  ;;  %22771 = vmatpush3.bf16.msra.mxu0 %v24225_v33  ;;  %v24239_v60 = vld [vmem:[%s30562_s10 + $0x20] sm:$0xff]  }
 0x75f   :  { %v22450_v18 = vpop.f32.mrb[155].mxu1  ;;  %v22472_v19 = vpop.f32.mrb[159].mxu0  ;;  %22750 = vmatprep.subr.bf16.mxu1 %v24226_v62  ;;  %22772 = vmatprep.subr.bf16.mxu0 %v24227_v0  ;;  %v24240_v0 = vld [vmem:[%s30562_s10 + $0x28] sm:$0xff]  }
 0x760   :  { %v16120_v23 = vadd.f32 %v22448_v63, %v29583_v47  ;;  %v24242_v19 = vld [vmem:[%s30562_s10 + $0x38] sm:$0xff]  }
 0x762   :  { %v16160_v26 = vadd.f32 %v22470_v1, %v16120_v23  ;;  %22751 = vmatpush3.bf16.msra.mxu1 %v24228_v15  ;;  %22773 = vmatpush3.bf16.msra.mxu0 %v24229_v37  ;;  %v24241_v37 = vld [vmem:[%s30562_s10 + $0x30] sm:$0xff]  }
 0x763   :  { %22752 = vmatprep.subr.bf16.mxu1 %v24230_v20  ;;  %22774 = vmatprep.subr.bf16.mxu0 %v24231_v21  ;;  %v24243_v20 = vld [vmem:[%s30564_s12] sm:$0xff]   ;;  %v24244_v21 = vld [vmem:[%s30564_s12 + $0x8] sm:$0xff]   ;;  %v24245_v23 = vld [vmem:[%s30564_s12 + $0x10] sm:$0xff]  }
 0x766   :  { %22753 = vmatpush3.bf16.msra.mxu1 %v24232_v2  ;;  %22775 = vmatpush3.bf16.msra.mxu0 %v24233_v28  ;;  %v24248_v2 = vld [vmem:[%s30564_s12 + $0x28] sm:$0xff]  }
 0x767   :  { %22838 = vmatprep.subr.bf16.mxu1 %v24458_v46  ;;  %22858 = vmatprep.subr.bf16.mxu0 %v24458_v46 }
 0x769   :  { %16678 = vmatmul.mubr.bf16.vlgmr.msra.gmra.mrb[180].mxu1 %v7874_v25  ;;  %16718 = vmatmul.mubr.bf16.vlgmr.msra.gmra.mrb[184].mxu0 %v7890_v27  ;;  %v24246_v25 = vld [vmem:[%s30564_s12 + $0x18] sm:$0xff]  }
 0x76a   :  { %22854 = vmatprep.mubr.msk.bf16.mxu1 %vm24459_vm0, %v24458_v46  ;;  %22874 = vmatprep.mubr.msk.bf16.mxu0 %vm24459_vm0, %v24458_v46 }
 0x76b   :  { %22839 = vmatpush3.bf16.msra.mxu1 %v24235_v56  ;;  %22859 = vmatpush3.bf16.msra.mxu0 %v24243_v20 }
 0x76c   :  { %22840 = vmatprep.subr.bf16.mxu1 %v24458_v46  ;;  %22860 = vmatprep.subr.bf16.mxu0 %v24458_v46 }
 0x76f   :  { %22841 = vmatpush3.bf16.msra.mxu1 %v24236_v57  ;;  %22861 = vmatpush3.bf16.msra.mxu0 %v24244_v21 }
 0x770   :  { %22842 = vmatprep.subr.bf16.mxu1 %v24458_v46  ;;  %22862 = vmatprep.subr.bf16.mxu0 %v24458_v46 }
 0x773   :  { %22843 = vmatpush3.bf16.msra.mxu1 %v24237_v38  ;;  %22863 = vmatpush3.bf16.msra.mxu0 %v24245_v23 }
 0x774   :  { %22844 = vmatprep.subr.bf16.mxu1 %v24458_v46  ;;  %22864 = vmatprep.subr.bf16.mxu0 %v24458_v46 }
 0x777   :  { %22845 = vmatpush3.bf16.msra.mxu1 %v24238_v58  ;;  %22865 = vmatpush3.bf16.msra.mxu0 %v24246_v25 }
 0x778   :  { %22846 = vmatprep.subr.bf16.mxu1 %v24458_v46  ;;  %22866 = vmatprep.subr.bf16.mxu0 %v24458_v46 }
 0x77b   :  { %22847 = vmatpush3.bf16.msra.mxu1 %v24239_v60 }
 0x77c   :  { %v22490_v41 = vpop.f32.mrb[156].mxu1  ;;  %v22512_v9 = vpop.f32.mrb[160].mxu0  ;;  %22848 = vmatprep.subr.bf16.mxu1 %v24458_v46 }
 0x77d   :  { %v22491_v47 = vpop.f32.mrb[157].mxu1  ;;  %v22513_v24 = vpop.f32.mrb[161].mxu0 }
 0x77e   :  { %v22492_v8 = vadd.f32 %v22491_v47, %v22490_v41  ;;  %v22514_v11 = vadd.f32 %v22513_v24, %v22512_v9  ;;  %v22493_v16 = vpop.f32.mrb[158].mxu1  ;;  %v22515_v30 = vpop.f32.mrb[162].mxu0 }
 0x77f   :  { %v22494_v31 = vpop.f32.mrb[159].mxu1  ;;  %v22516_v22 = vpop.f32.mrb[163].mxu0  ;;  %22849 = vmatpush3.bf16.msra.mxu1 %v24240_v0  ;;  %v24249_v16 = vld [vmem:[%s30564_s12 + $0x30] sm:$0xff]  }
 0x780   :  { %v16200_v32 = vadd.f32 %v22492_v8, %v16160_v26  ;;  %22850 = vmatprep.subr.bf16.mxu1 %v24458_v46  ;;  %v24247_v26 = vld [vmem:[%s30564_s12 + $0x20] sm:$0xff]  }
 0x781   :  { %22867 = vmatpush3.bf16.msra.mxu0 %v24247_v26 }
 0x782   :  { %v16240_v35 = vadd.f32 %v22514_v11, %v16200_v32  ;;  %22868 = vmatprep.subr.bf16.mxu0 %v24458_v46 }
 0x783   :  { %22851 = vmatpush3.bf16.msra.mxu1 %v24241_v37 }
 0x784   :  { %22852 = vmatprep.subr.bf16.mxu1 %v24458_v46 }
 0x785   :  { %22869 = vmatpush3.bf16.msra.mxu0 %v24248_v2  ;;  %v24250_v2 = vld [vmem:[%s30564_s12 + $0x38] sm:$0xff]  }
 0x786   :  { %22870 = vmatprep.subr.bf16.mxu0 %v24458_v46 }
 0x787   :  { %22853 = vmatpush3.bf16.msra.mxu1 %v24242_v19 }
 0x788   :  { %22878 = vmatprep.subr.bf16.mxu1 %v24458_v46 }
 0x789   :  { %22871 = vmatpush3.bf16.msra.mxu0 %v24249_v16 }
 0x78a   :  { %22872 = vmatprep.subr.bf16.mxu0 %v24458_v46 }
 0x78d   :  { %22873 = vmatpush3.bf16.msra.mxu0 %v24250_v2 }
 0x78e   :  { %22898 = vmatprep.subr.bf16.mxu0 %v24458_v46 }
 0x79c   :  { %v22534_v59 = vpop.f32.mrb[160].mxu1  ;;  %v22556_v36 = vpop.f32.mrb[164].mxu0 }
 0x79d   :  { %v22535_v3 = vpop.f32.mrb[161].mxu1  ;;  %v22557_v39 = vpop.f32.mrb[165].mxu0 }
 0x79e   :  { %v22536_v42 = vadd.f32 %v22535_v3, %v22534_v59  ;;  %v22558_v43 = vadd.f32 %v22557_v39, %v22556_v36  ;;  %v22537_v44 = vpop.f32.mrb[162].mxu1  ;;  %v22559_v45 = vpop.f32.mrb[166].mxu0 }
 0x79f   :  { %v22538_v12 = vpop.f32.mrb[163].mxu1  ;;  %v22560_v48 = vpop.f32.mrb[167].mxu0 }
 0x7a0   :  { %v16280_v49 = vadd.f32 %v22536_v42, %v16240_v35 }
 0x7a2   :  { %v16320_v51 = vadd.f32 %v22558_v43, %v16280_v49 }
 0x7bc   :  { %v22578_v33 = vpop.f32.mrb[164].mxu1  ;;  %v22600_v62 = vpop.f32.mrb[168].mxu0 }
 0x7bd   :  { %v22579_v50 = vpop.f32.mrb[165].mxu1  ;;  %v22601_v29 = vpop.f32.mrb[169].mxu0 }
 0x7be   :  { %v22580_v5 = vadd.f32 %v22579_v50, %v22578_v33  ;;  %v22602_v13 = vadd.f32 %v22601_v29, %v22600_v62  ;;  %v22581_v63 = vpop.f32.mrb[166].mxu1  ;;  %v22603_v1 = vpop.f32.mrb[170].mxu0 }
 0x7bf   :  { %v22582_v14 = vpop.f32.mrb[167].mxu1  ;;  %v22604_v34 = vpop.f32.mrb[171].mxu0 }
 0x7c0   :  { %v16360_v15 = vadd.f32 %v22580_v5, %v16320_v51 }
 0x7c2   :  { %v16400_v18 = vadd.f32 %v22602_v13, %v16360_v15 }
 0x7dc   :  { %v22622_v28 = vpop.f32.mrb[168].mxu1  ;;  %v22644_v27 = vpop.f32.mrb[172].mxu0 }
 0x7dd   :  { %v22623_v41 = vpop.f32.mrb[169].mxu1  ;;  %v22645_v9 = vpop.f32.mrb[173].mxu0 }
 0x7de   :  { %v22624_v47 = vadd.f32 %v22623_v41, %v22622_v28  ;;  %v22646_v24 = vadd.f32 %v22645_v9, %v22644_v27  ;;  %v22625_v8 = vpop.f32.mrb[170].mxu1  ;;  %v22647_v11 = vpop.f32.mrb[174].mxu0  ;;  %v24259_v28 = vld [vmem:[%s30566_s14 + $0x40] sm:$0xff]   ;;  %v24260_v27 = vld [vmem:[%s30566_s14 + $0x48] sm:$0xff]   ;;  %v24261_v41 = vld [vmem:[%s30566_s14 + $0x50] sm:$0xff]  }
 0x7df   :  { %v22626_v30 = vpop.f32.mrb[171].mxu1  ;;  %v22648_v31 = vpop.f32.mrb[175].mxu0  ;;  %v24262_v9 = vld [vmem:[%s30566_s14 + $0x58] sm:$0xff]   ;;  %v20762_v8 = vld [vmem:[%s30563_s11] ss:$0 sm:$0xff] }
 0x7e0   :  { %v16440_v22 = vadd.f32 %v22624_v47, %v16400_v18  ;;  %v24263_v47 = vld [vmem:[%s30566_s14 + $0x60] sm:$0xff]  }
 0x7e2   :  { %v16480_v32 = vadd.f32 %v22646_v24, %v16440_v22  ;;  %v24264_v24 = vld [vmem:[%s30566_s14 + $0x68] sm:$0xff]  }
 0x7fc   :  { %v22666_v35 = vpop.f32.mrb[172].mxu1  ;;  %v22688_v59 = vpop.f32.mrb[176].mxu0 }
 0x7fd   :  { %v22667_v36 = vpop.f32.mrb[173].mxu1  ;;  %v22689_v3 = vpop.f32.mrb[177].mxu0 }
 0x7fe   :  { %v22668_v39 = vadd.f32 %v22667_v36, %v22666_v35  ;;  %v22690_v42 = vadd.f32 %v22689_v3, %v22688_v59  ;;  %v22669_v43 = vpop.f32.mrb[174].mxu1  ;;  %v22691_v44 = vpop.f32.mrb[178].mxu0  ;;  %v24251_v35 = vld [vmem:[%s30566_s14] sm:$0xff]   ;;  %v24252_v36 = vld [vmem:[%s30566_s14 + $0x8] sm:$0xff]   ;;  %v24253_v3 = vld [vmem:[%s30566_s14 + $0x10] sm:$0xff]  }
 0x7ff   :  { %v22670_v45 = vpop.f32.mrb[175].mxu1  ;;  %v22692_v12 = vpop.f32.mrb[179].mxu0  ;;  %v24256_v43 = vld [vmem:[%s30566_s14 + $0x28] sm:$0xff]   ;;  %v24257_v44 = vld [vmem:[%s30566_s14 + $0x30] sm:$0xff]  }
 0x800   :  { %v16520_v48 = vadd.f32 %v22668_v39, %v16480_v32  ;;  %v24254_v39 = vld [vmem:[%s30566_s14 + $0x18] sm:$0xff]   ;;  %v24265_v12 = vld [vmem:[%s30566_s14 + $0x70] sm:$0xff]  }
 0x801   :  { %v24258_v45 = vld [vmem:[%s30566_s14 + $0x38] sm:$0xff]  }
 0x802   :  { %v16560_v49 = vadd.f32 %v22690_v42, %v16520_v48  ;;  %v24255_v42 = vld [vmem:[%s30566_s14 + $0x20] sm:$0xff]   ;;  %v24266_v48 = vld [vmem:[%s30566_s14 + $0x78] sm:$0xff]  }
 0x81c   :  { %v22710_v51 = vpop.f32.mrb[176].mxu1  ;;  %v22732_v56 = vpop.f32.mrb[180].mxu0 }
 0x81d   :  { %v22711_v57 = vpop.f32.mrb[177].mxu1  ;;  %v22733_v38 = vpop.f32.mrb[181].mxu0 }
 0x81e   :  { %v22712_v58 = vadd.f32 %v22711_v57, %v22710_v51  ;;  %v22734_v60 = vadd.f32 %v22733_v38, %v22732_v56  ;;  %v22713_v33 = vpop.f32.mrb[178].mxu1  ;;  %v22735_v62 = vpop.f32.mrb[182].mxu0  ;;  %v17173_v51 = vld [vmem:[%s30568_s16 + $0x8] sm:$0xff] }
 0x81f   :  { %v22714_v0 = vpop.f32.mrb[179].mxu1  ;;  %v22736_v50 = vpop.f32.mrb[183].mxu0  ;;  %v17209_v33 = vld [vmem:[%s30568_s16 + $0x128] sm:$0xff] }
 0x820   :  { %v16600_v29 = vadd.f32 %v22712_v58, %v16560_v49  ;;  %v17172_v49 = vld [vmem:[%s30568_s16] sm:$0xff]  ;;  %v17221_v0 = vld [vmem:[%s30568_s16 + $0x188] sm:$0xff] }
 0x821   :  { %v17233_v50 = vld [vmem:[%s30568_s16 + $0x1e8] sm:$0xff] }
 0x822   :  { %v16640_v5 = vadd.f32 %v22734_v60, %v16600_v29  ;;  %v17197_v60 = vld [vmem:[%s30568_s16 + $0xc8] sm:$0xff] }
 0x823   :  { %v20824_v62 = vcombine.high %v17197_v60, %v17209_v33  ;;  %v20823_v29 = vcombine.low %v17197_v60, %v17209_v33  ;;  %v17317_v60 = vld [vmem:[%s30568_s16 + $0x488] sm:$0xff] }
 0x83c   :  { %v22754_v13 = vpop.f32.mrb[180].mxu1  ;;  %v22776_v63 = vpop.f32.mrb[184].mxu0 }
 0x83d   :  { %v22755_v1 = vpop.f32.mrb[181].mxu1  ;;  %v22777_v14 = vpop.f32.mrb[185].mxu0 }
 0x83e   :  { %v22756_v34 = vadd.f32 %v22755_v1, %v22754_v13  ;;  %v22778_v15 = vadd.f32 %v22777_v14, %v22776_v63  ;;  %v22757_v37 = vpop.f32.mrb[182].mxu1  ;;  %v22779_v18 = vpop.f32.mrb[186].mxu0  ;;  %v17245_v13 = vld [vmem:[%s30568_s16 + $0x248] sm:$0xff]  ;;  %v20847_v1 = vcombine.low %v17221_v0, %v17233_v50 }
 0x83f   :  { %v22758_v19 = vpop.f32.mrb[183].mxu1  ;;  %v22780_v20 = vpop.f32.mrb[187].mxu0  ;;  %v17257_v63 = vld [vmem:[%s30568_s16 + $0x2a8] sm:$0xff] }
 0x840   :  { %v16680_v21 = vadd.f32 %v22756_v34, %v16640_v5  ;;  %v20848_v5 = vcombine.high %v17221_v0, %v17233_v50  ;;  %v20872_v14 = vcombine.high %v17245_v13, %v17257_v63  ;;  %v17269_v34 = vld [vmem:[%s30568_s16 + $0x308] sm:$0xff]  ;;  %v20871_v37 = vcombine.low %v17245_v13, %v17257_v63  ;;  %v17352_v13 = vld [vmem:[%s30568_s16 + $0x5a0] sm:$0xff] }
 0x841   :  { %v17293_v19 = vld [vmem:[%s30568_s16 + $0x3c8] sm:$0xff] }
 0x842   :  { %v16720_v23 = vadd.f32 %v22778_v15, %v16680_v21  ;;  %v17281_v15 = vld [vmem:[%s30568_s16 + $0x368] sm:$0xff] }
 0x843   :  { %v20896_v18 = vcombine.high %v17269_v34, %v17281_v15  ;;  %v17305_v20 = vld [vmem:[%s30568_s16 + $0x428] sm:$0xff]  ;;  %v20895_v21 = vcombine.low %v17269_v34, %v17281_v15 }
 0x844   :  { %v16725_v25 = vmax.f32 %v16720_v23, 0.0  ;;  %v20920_v23 = vcombine.high %v17293_v19, %v17305_v20  ;;  %v17341_v63 = vld [vmem:[%s30568_s16 + $0x548] sm:$0xff] }
 0x846   :  { %v16727_v26 = vpack.c.bf16 %v16725_v25, %v16725_v25  ;;  %16726 = vst [vmem:[#allocation7] sm:$0x3] %v16725_v25  ;;  %v20919_v25 = vcombine.low %v17293_v19, %v17305_v20  ;;  %v17186_v19 = vld [vmem:[%s30568_s16 + $0x70] sm:$0xff]  ;;  %v17175_v20 = vld [vmem:[%s30568_s16 + $0x18] sm:$0xff] }
 0x848   :  { %22855 = vmatmul.mubr.bf16.vlgmr.msra.gmra.mrb[184].mxu1 %v16727_v26  ;;  %v20771_v26 = vld [vmem:[%s30565_s13] ss:$0 sm:$0xff] }
 0x849   :  { %22894 = vmatprep.mubr.msk.bf16.mxu1 %vm24459_vm0, %v24458_v46  ;;  %22879 = vmatpush3.bf16.msra.mxu1 %v24259_v28 }
 0x84a   :  { %22880 = vmatprep.subr.bf16.mxu1 %v24458_v46 }
 0x84d   :  { %22881 = vmatpush3.bf16.msra.mxu1 %v24260_v27 }
 0x84e   :  { %22882 = vmatprep.subr.bf16.mxu1 %v24458_v46 }
 0x851   :  { %22883 = vmatpush3.bf16.msra.mxu1 %v24261_v41 }
 0x852   :  { %22884 = vmatprep.subr.bf16.mxu1 %v24458_v46 }
 0x855   :  { %22885 = vmatpush3.bf16.msra.mxu1 %v24262_v9  ;;  %v17196_v9 = vld [vmem:[%s30568_s16 + $0xc0] sm:$0xff] }
 0x856   :  { %22886 = vmatprep.subr.bf16.mxu1 %v24458_v46 }
 0x859   :  { %22887 = vmatpush3.bf16.msra.mxu1 %v24263_v47  ;;  %v17208_v47 = vld [vmem:[%s30568_s16 + $0x120] sm:$0xff] }
 0x85a   :  { %22888 = vmatprep.subr.bf16.mxu1 %v24458_v46 }
 0x85d   :  { %22889 = vmatpush3.bf16.msra.mxu1 %v24264_v24 }
 0x85e   :  { %22890 = vmatprep.subr.bf16.mxu1 %v24458_v46 }
 0x861   :  { %22891 = vmatpush3.bf16.msra.mxu1 %v24265_v12  ;;  %v17304_v12 = vld [vmem:[%s30568_s16 + $0x420] sm:$0xff] }
 0x862   :  { %22892 = vmatprep.subr.bf16.mxu1 %v24458_v46 }
 0x865   :  { %22893 = vmatpush3.bf16.msra.mxu1 %v24266_v48 }
 0x91b   :  { %v16833_v11 = vpop.f32.mrb[184].mxu1 }
 0x91c   :  { %v16834_v16 = vadd.f32 %v20762_v8, %v16833_v11  ;;  %v22856_v30 = vpop.f32.mrb[185].mxu1 }
 0x91d   :  { %v16836_v31 = vpop.f32.mrb[186].mxu1  ;;  %v17220_v30 = vld [vmem:[%s30568_s16 + $0x180] sm:$0xff] }
 0x91e   :  { %v16839_v22 = vmax.f32 %v16834_v16, 0.0  ;;  %v22857_v32 = vpop.f32.mrb[187].mxu1  ;;  %v20822_v16 = vcombine.high %v17196_v9, %v17208_v47  ;;  %v17232_v31 = vld [vmem:[%s30568_s16 + $0x1e0] sm:$0xff] }
 0x91f   :  { %v20846_v32 = vcombine.high %v17220_v30, %v17232_v31 }
 0x920   :  { %v16840_v59 = vpack.c.bf16 %v16839_v22, %v16839_v22  ;;  %v20821_v22 = vcombine.low %v17196_v9, %v17208_v47 }
 0x922   :  { %22875 = vmatmul.mubr.bf16.vlgmr.msra.gmra.mrb[188].mxu0 %v16840_v59  ;;  %v17256_v59 = vld [vmem:[%s30568_s16 + $0x2a0] sm:$0xff] }
 0x923   :  { %22899 = vmatpush3.bf16.msra.mxu0 %v24251_v35  ;;  %22914 = vmatprep.mubr.msk.bf16.mxu0 %vm24459_vm0, %v24458_v46  ;;  %v17244_v35 = vld [vmem:[%s30568_s16 + $0x240] sm:$0xff] }
 0x924   :  { %22900 = vmatprep.subr.bf16.mxu0 %v24458_v46 }
 0x927   :  { %22901 = vmatpush3.bf16.msra.mxu0 %v24252_v36  ;;  %v20845_v36 = vcombine.low %v17220_v30, %v17232_v31  ;;  %v17199_v30 = vld [vmem:[%s30568_s16 + $0xd8] sm:$0xff] }
 0x928   :  { %22902 = vmatprep.subr.bf16.mxu0 %v24458_v46  ;;  %v17211_v31 = vld [vmem:[%s30568_s16 + $0x138] sm:$0xff] }
 0x92b   :  { %22903 = vmatpush3.bf16.msra.mxu0 %v24253_v3  ;;  %v20870_v3 = vcombine.high %v17244_v35, %v17256_v59 }
 0x92c   :  { %22904 = vmatprep.subr.bf16.mxu0 %v24458_v46 }
 0x92f   :  { %22905 = vmatpush3.bf16.msra.mxu0 %v24254_v39  ;;  %v17268_v39 = vld [vmem:[%s30568_s16 + $0x300] sm:$0xff] }
 0x930   :  { %22906 = vmatprep.subr.bf16.mxu0 %v24458_v46 }
 0x933   :  { %22907 = vmatpush3.bf16.msra.mxu0 %v24255_v42  ;;  %v17280_v42 = vld [vmem:[%s30568_s16 + $0x360] sm:$0xff] }
 0x934   :  { %22908 = vmatprep.subr.bf16.mxu0 %v24458_v46  ;;  %v20893_v48 = vcombine.low %v17268_v39, %v17280_v42 }
 0x937   :  { %22909 = vmatpush3.bf16.msra.mxu0 %v24256_v43  ;;  %v20869_v43 = vcombine.low %v17244_v35, %v17256_v59  ;;  %v20828_v59 = vcombine.high %v17199_v30, %v17211_v31 }
 0x938   :  { %22910 = vmatprep.subr.bf16.mxu0 %v24458_v46 }
 0x93b   :  { %22911 = vmatpush3.bf16.msra.mxu0 %v24257_v44  ;;  %v20894_v44 = vcombine.high %v17268_v39, %v17280_v42  ;;  %v17223_v39 = vld [vmem:[%s30568_s16 + $0x198] sm:$0xff] }
 0x93c   :  { %22912 = vmatprep.subr.bf16.mxu0 %v24458_v46  ;;  %v17185_v46 = vld [vmem:[%s30568_s16 + $0x68] sm:$0xff]  ;;  %v17235_v42 = vld [vmem:[%s30568_s16 + $0x1f8] sm:$0xff] }
 0x93d   :  { %v20799_v38 = vcombine.low %v17173_v51, %v17185_v46  ;;  %v20800_v58 = vcombine.high %v17173_v51, %v17185_v46 }
 0x93f   :  { %22913 = vmatpush3.bf16.msra.mxu0 %v24258_v45  ;;  %v17292_v45 = vld [vmem:[%s30568_s16 + $0x3c0] sm:$0xff] }
 0x940   :  { %18491 = vmatprep.subr.bf16.mxu0 %v20800_v58  ;;  %v17328_v58 = vld [vmem:[%s30568_s16 + $0x4e0] sm:$0xff] }
 0x942   :  { %22915 = vmatmul.mubr.bf16.vlgmr.msra.gmra.mrb[192].mxu0 %v25578_v17  ;;  %v17184_v17 = vld [vmem:[%s30568_s16 + $0x60] sm:$0xff] }
 0x943   :  { %18523 = vmatprep.mubr.bf16.mxu0 %v24460_v61  ;;  %v20797_v56 = vcombine.low %v17172_v49, %v17184_v17  ;;  %v20798_v57 = vcombine.high %v17172_v49, %v17184_v17  ;;  %18492 = vmatpush1.bf16.msra.mxu0 %v20799_v38  ;;  %v20918_v49 = vcombine.high %v17292_v45, %v17304_v12  ;;  %v17316_v38 = vld [vmem:[%s30568_s16 + $0x480] sm:$0xff] }
 0x944   :  { %18493 = vmatprep.subr.bf16.mxu0 %v20824_v62  ;;  %v20917_v17 = vcombine.low %v17292_v45, %v17304_v12  ;;  %v20942_v33 = vcombine.high %v17316_v38, %v17328_v58  ;;  %v17329_v62 = vld [vmem:[%s30568_s16 + $0x4e8] sm:$0xff]  ;;  %v20941_v0 = vcombine.low %v17316_v38, %v17328_v58  ;;  %v20852_v12 = vcombine.high %v17223_v39, %v17235_v42  ;;  %v17270_v58 = vld [vmem:[%s30568_s16 + $0x310] sm:$0xff] }
 0x945   :  { %18450 = vmatprep.subr.bf16.mxu1 %v20798_v57  ;;  %v20943_v50 = vcombine.low %v17317_v60, %v17329_v62 }
 0x947   :  { %18494 = vmatpush1.bf16.msra.mxu0 %v20823_v29  ;;  %v20944_v29 = vcombine.high %v17317_v60, %v17329_v62  ;;  %v17282_v60 = vld [vmem:[%s30568_s16 + $0x370] sm:$0xff]  ;;  %v17283_v62 = vld [vmem:[%s30568_s16 + $0x378] sm:$0xff] }
 0x948   :  { %18495 = vmatprep.subr.bf16.mxu0 %v20848_v5  ;;  %v17340_v5 = vld [vmem:[%s30568_s16 + $0x540] sm:$0xff] }
 0x949   :  { %v20965_v34 = vcombine.low %v17340_v5, %v17352_v13 }
 0x94b   :  { %18496 = vmatpush1.bf16.msra.mxu0 %v20847_v1  ;;  %v20966_v1 = vcombine.high %v17340_v5, %v17352_v13  ;;  %v17294_v13 = vld [vmem:[%s30568_s16 + $0x3d0] sm:$0xff] }
 0x94c   :  { %18497 = vmatprep.subr.bf16.mxu0 %v20872_v14  ;;  %v17353_v14 = vld [vmem:[%s30568_s16 + $0x5a8] sm:$0xff] }
 0x94d   :  { %v20967_v15 = vcombine.low %v17341_v63, %v17353_v14 }
 0x94f   :  { %18498 = vmatpush1.bf16.msra.mxu0 %v20871_v37  ;;  %v20968_v37 = vcombine.high %v17341_v63, %v17353_v14  ;;  %v17306_v63 = vld [vmem:[%s30568_s16 + $0x430] sm:$0xff]  ;;  %v17307_v14 = vld [vmem:[%s30568_s16 + $0x438] sm:$0xff] }
 0x950   :  { %18499 = vmatprep.subr.bf16.mxu0 %v20896_v18  ;;  %v17174_v18 = vld [vmem:[%s30568_s16 + $0x10] sm:$0xff] }
 0x953   :  { %18500 = vmatpush1.bf16.msra.mxu0 %v20895_v21  ;;  %v20801_v21 = vcombine.low %v17174_v18, %v17186_v19 }
 0x954   :  { %18501 = vmatprep.subr.bf16.mxu0 %v20920_v23  ;;  %v20802_v23 = vcombine.high %v17174_v18, %v17186_v19  ;;  %v17318_v19 = vld [vmem:[%s30568_s16 + $0x490] sm:$0xff] }
 0x957   :  { %18502 = vmatpush1.bf16.msra.mxu0 %v20919_v25  ;;  %v17187_v25 = vld [vmem:[%s30568_s16 + $0x78] sm:$0xff] }
 0x958   :  { %18503 = vmatprep.subr.bf16.mxu0 %v20944_v29  ;;  %v20898_v29 = vcombine.high %v17270_v58, %v17282_v60 }
 0x95b   :  { %18504 = vmatpush1.bf16.msra.mxu0 %v20943_v50 }
 0x95c   :  { %18505 = vmatprep.subr.bf16.mxu0 %v20968_v37  ;;  %v20922_v37 = vcombine.high %v17294_v13, %v17306_v63 }
 0x95f   :  { %18506 = vmatpush1.bf16.msra.mxu0 %v20967_v15 }
 0x9f5   :  { %v16946_v2 = vpop.f32.mrb[188].mxu0 }
 0x9f6   :  { %v16947_v28 = vadd.f32 %v20771_v26, %v16946_v2  ;;  %v22876_v27 = vpop.f32.mrb[189].mxu0  ;;  %v20803_v26 = vcombine.low %v17175_v20, %v17187_v25  ;;  %v20804_v2 = vcombine.high %v17175_v20, %v17187_v25  ;;  %v17330_v20 = vld [vmem:[%s30568_s16 + $0x4f0] sm:$0xff]  ;;  %v20921_v25 = vcombine.low %v17294_v13, %v17306_v63 }
 0x9f7   :  { %v16949_v41 = vpop.f32.mrb[190].mxu0  ;;  %v20796_v27 = vld [vmem:[%s30567_s15] ss:$0 sm:$0xff] }
 0x9f8   :  { %v16952_v24 = vmax.f32 %v16947_v28, 0.0  ;;  %v22877_v8 = vpop.f32.mrb[191].mxu0  ;;  %18573 = vmatprep.subr.bf16.mxu0 %v20804_v2  ;;  %v20946_v2 = vcombine.high %v17318_v19, %v17330_v20 }
 0x9fa   :  { %v16969_v11 = vpack.c.bf16 %v16952_v24, %v16952_v24 }
 0x9fc   :  { %22895 = vmatmul.mubr.bf16.vlgmr.msra.gmra.mrb[188].mxu1 %v16969_v11  ;;  %v17198_v11 = vld [vmem:[%s30568_s16 + $0xd0] sm:$0xff] }
 0x9fd   :  { %18451 = vmatpush1.bf16.msra.mxu1 %v20797_v56  ;;  %18482 = vmatprep.mubr.bf16.mxu1 %v24460_v61 }
 0x9fe   :  { %18452 = vmatprep.subr.bf16.mxu1 %v20822_v16  ;;  %v17210_v16 = vld [vmem:[%s30568_s16 + $0x130] sm:$0xff] }
 0x9ff   :  { %v20826_v35 = vcombine.high %v17198_v11, %v17210_v16 }
 0xa01   :  { %18453 = vmatpush1.bf16.msra.mxu1 %v20821_v22 }
 0xa02   :  { %18454 = vmatprep.subr.bf16.mxu1 %v20846_v32 }
 0xa05   :  { %18455 = vmatpush1.bf16.msra.mxu1 %v20845_v36  ;;  %v17222_v36 = vld [vmem:[%s30568_s16 + $0x190] sm:$0xff] }
 0xa06   :  { %18456 = vmatprep.subr.bf16.mxu1 %v20870_v3  ;;  %v17234_v3 = vld [vmem:[%s30568_s16 + $0x1f0] sm:$0xff] }
 0xa07   :  { %v20850_v45 = vcombine.high %v17222_v36, %v17234_v3 }
 0xa09   :  { %18457 = vmatpush1.bf16.msra.mxu1 %v20869_v43  ;;  %v20825_v43 = vcombine.low %v17198_v11, %v17210_v16 }
 0xa0a   :  { %18458 = vmatprep.subr.bf16.mxu1 %v20894_v44  ;;  %v20827_v44 = vcombine.low %v17199_v30, %v17211_v31  ;;  %v17176_v30 = vld [vmem:[%s30568_s16 + $0x20] sm:$0xff] }
 0xa0b   :  { %v17188_v31 = vld [vmem:[%s30568_s16 + $0x80] sm:$0xff] }
 0xa0d   :  { %18459 = vmatpush1.bf16.msra.mxu1 %v20893_v48  ;;  %v17246_v48 = vld [vmem:[%s30568_s16 + $0x250] sm:$0xff] }
 0xa0e   :  { %18460 = vmatprep.subr.bf16.mxu1 %v20918_v49  ;;  %v17258_v49 = vld [vmem:[%s30568_s16 + $0x2b0] sm:$0xff] }
 0xa11   :  { %18461 = vmatpush1.bf16.msra.mxu1 %v20917_v17  ;;  %v17247_v17 = vld [vmem:[%s30568_s16 + $0x258] sm:$0xff] }
 0xa12   :  { %18462 = vmatprep.subr.bf16.mxu1 %v20942_v33  ;;  %v17271_v33 = vld [vmem:[%s30568_s16 + $0x318] sm:$0xff] }
 0xa13   :  { %v20900_v5 = vcombine.high %v17271_v33, %v17283_v62  ;;  %v20899_v15 = vcombine.low %v17271_v33, %v17283_v62  ;;  %v17248_v62 = vld [vmem:[%s30568_s16 + $0x260] sm:$0xff] }
 0xa15   :  { %v17156_v51 = vpop.f32.mrb[192].mxu0  ;;  %18463 = vmatpush1.bf16.msra.mxu1 %v20941_v0  ;;  %v20873_v0 = vcombine.low %v17246_v48, %v17258_v49 }
 0xa16   :  { %v22916_v56 = vpop.f32.mrb[193].mxu0  ;;  %18464 = vmatprep.subr.bf16.mxu1 %v20966_v1  ;;  %v17295_v1 = vld [vmem:[%s30568_s16 + $0x3d8] sm:$0xff] }
 0xa17   :  { %v17159_v57 = vpop.f32.mrb[194].mxu0  ;;  %v20849_v56 = vcombine.low %v17222_v36, %v17234_v3  ;;  %v20924_v18 = vcombine.high %v17295_v1, %v17307_v14  ;;  %v20806_v3 = vcombine.high %v17176_v30, %v17188_v31 }
 0xa18   :  { %v22917_v46 = vpop.f32.mrb[195].mxu0  ;;  %v20851_v57 = vcombine.low %v17223_v39, %v17235_v42  ;;  %v17200_v42 = vld [vmem:[%s30568_s16 + $0xe0] sm:$0xff] }
 0xa19   :  { %18465 = vmatpush1.bf16.msra.mxu1 %v20965_v34  ;;  %v20874_v46 = vcombine.high %v17246_v48, %v17258_v49  ;;  %v20897_v34 = vcombine.low %v17270_v58, %v17282_v60 }
 0xa1a   :  { %18532 = vmatprep.subr.bf16.mxu1 %v20802_v23  ;;  %v17331_v23 = vld [vmem:[%s30568_s16 + $0x4f8] sm:$0xff] }
 0xacf   :  { %v17068_v28 = vpop.f32.mrb[188].mxu1 }
 0xad0   :  { %v17157_v41 = vadd.f32 %v17156_v51, %v17068_v28  ;;  %v22896_v9 = vpop.f32.mrb[189].mxu1  ;;  %v17259_v51 = vld [vmem:[%s30568_s16 + $0x2b8] sm:$0xff] }
 0xad1   :  { %v17071_v47 = vpop.f32.mrb[190].mxu1  ;;  %v20876_v38 = vcombine.high %v17247_v17, %v17259_v51  ;;  %v20875_v50 = vcombine.low %v17247_v17, %v17259_v51  ;;  %v17343_v9 = vld [vmem:[%s30568_s16 + $0x558] sm:$0xff]  ;;  %v17224_v51 = vld [vmem:[%s30568_s16 + $0x1a0] sm:$0xff] }
 0xad2   :  { %v17169_v24 = vadd.f32 %v20796_v27, %v17157_v41  ;;  %v22897_v8 = vpop.f32.mrb[191].mxu1  ;;  %v17342_v27 = vld [vmem:[%s30568_s16 + $0x550] sm:$0xff]  ;;  %v17355_v47 = vld [vmem:[%s30568_s16 + $0x5b8] sm:$0xff] }
 0xad3   :  { %v17354_v41 = vld [vmem:[%s30568_s16 + $0x5b0] sm:$0xff]  ;;  %v20972_v16 = vcombine.high %v17343_v9, %v17355_v47  ;;  %v20971_v36 = vcombine.low %v17343_v9, %v17355_v47  ;;  %v17320_v47 = vld [vmem:[%s30568_s16 + $0x4a0] sm:$0xff] }
 0xad4   :  { %v17170_v22 = vmax.f32 %v17169_v24, 0.0  ;;  %v20945_v24 = vcombine.low %v17318_v19, %v17330_v20  ;;  %v20970_v11 = vcombine.high %v17342_v27, %v17354_v41 }
 0xad6   :  { %v29959_v32 = vpack.c.bf16 %v17170_v22, %v17170_v22  ;;  %v17177_v22 = vld [vmem:[%s30568_s16 + $0x28] sm:$0xff] }
 0xad8   :  { %18483 = vmatmul.mubr.bf16.vlgmr.msra.gmra.mrb[192].mxu1 %v29959_v32  ;;  %18524 = vmatmul.mubr.bf16.vlgmr.msra.gmra.mrb[196].mxu0 %v29959_v32 }
 0xad9   :  { %18533 = vmatpush1.bf16.msra.mxu1 %v20801_v21  ;;  %18574 = vmatpush1.bf16.msra.mxu0 %v20803_v26  ;;  %v17319_v21 = vld [vmem:[%s30568_s16 + $0x498] sm:$0xff]  ;;  %v20923_v26 = vcombine.low %v17295_v1, %v17307_v14  ;;  %v17272_v14 = vld [vmem:[%s30568_s16 + $0x320] sm:$0xff] }
 0xada   :  { %18534 = vmatprep.subr.bf16.mxu1 %v20826_v35  ;;  %18575 = vmatprep.subr.bf16.mxu0 %v20828_v59  ;;  %v20948_v28 = vcombine.high %v17319_v21, %v17331_v23  ;;  %v20947_v8 = vcombine.low %v17319_v21, %v17331_v23  ;;  %v17189_v35 = vld [vmem:[%s30568_s16 + $0x88] sm:$0xff]  ;;  %v20969_v59 = vcombine.low %v17342_v27, %v17354_v41  ;;  %v17296_v23 = vld [vmem:[%s30568_s16 + $0x3e0] sm:$0xff] }
 0xadb   :  { %18564 = vmatprep.mubr.bf16.mxu1 %v24460_v61  ;;  %18605 = vmatprep.mubr.bf16.mxu0 %v24460_v61  ;;  %v20808_v39 = vcombine.high %v17177_v22, %v17189_v35  ;;  %v20807_v48 = vcombine.low %v17177_v22, %v17189_v35  ;;  %v17344_v35 = vld [vmem:[%s30568_s16 + $0x560] sm:$0xff] }
 0xadd   :  { %18535 = vmatpush1.bf16.msra.mxu1 %v20825_v43  ;;  %18576 = vmatpush1.bf16.msra.mxu0 %v20827_v44  ;;  %v17212_v43 = vld [vmem:[%s30568_s16 + $0x140] sm:$0xff]  ;;  %v17201_v44 = vld [vmem:[%s30568_s16 + $0xe8] sm:$0xff] }
 0xade   :  { %18536 = vmatprep.subr.bf16.mxu1 %v20850_v45  ;;  %18577 = vmatprep.subr.bf16.mxu0 %v20852_v12  ;;  %v17213_v45 = vld [vmem:[%s30568_s16 + $0x148] sm:$0xff]  ;;  %v20805_v12 = vcombine.low %v17176_v30, %v17188_v31  ;;  %v20830_v49 = vcombine.high %v17200_v42, %v17212_v43 }
 0xadf   :  { %v20832_v17 = vcombine.high %v17201_v44, %v17213_v45  ;;  %v20831_v58 = vcombine.low %v17201_v44, %v17213_v45  ;;  %v17178_v45 = vld [vmem:[%s30568_s16 + $0x30] sm:$0xff] }
 0xae1   :  { %18537 = vmatpush1.bf16.msra.mxu1 %v20849_v56  ;;  %18578 = vmatpush1.bf16.msra.mxu0 %v20851_v57  ;;  %v17236_v56 = vld [vmem:[%s30568_s16 + $0x200] sm:$0xff]  ;;  %v17225_v57 = vld [vmem:[%s30568_s16 + $0x1a8] sm:$0xff] }
 0xae2   :  { %18538 = vmatprep.subr.bf16.mxu1 %v20874_v46  ;;  %18579 = vmatprep.subr.bf16.mxu0 %v20876_v38  ;;  %v17237_v46 = vld [vmem:[%s30568_s16 + $0x208] sm:$0xff]  ;;  %v20829_v38 = vcombine.low %v17200_v42, %v17212_v43  ;;  %v20854_v60 = vcombine.high %v17224_v51, %v17236_v56 }
 0xae3   :  { %v20856_v33 = vcombine.high %v17225_v57, %v17237_v46  ;;  %v20855_v13 = vcombine.low %v17225_v57, %v17237_v46  ;;  %v17202_v46 = vld [vmem:[%s30568_s16 + $0xf0] sm:$0xff] }
 0xae5   :  { %18539 = vmatpush1.bf16.msra.mxu1 %v20873_v0  ;;  %18580 = vmatpush1.bf16.msra.mxu0 %v20875_v50  ;;  %v17260_v0 = vld [vmem:[%s30568_s16 + $0x2c0] sm:$0xff]  ;;  %v17249_v50 = vld [vmem:[%s30568_s16 + $0x268] sm:$0xff] }
 0xae6   :  { %18540 = vmatprep.subr.bf16.mxu1 %v20898_v29  ;;  %18581 = vmatprep.subr.bf16.mxu0 %v20900_v5  ;;  %v17261_v29 = vld [vmem:[%s30568_s16 + $0x2c8] sm:$0xff]  ;;  %v20853_v5 = vcombine.low %v17224_v51, %v17236_v56  ;;  %v20878_v63 = vcombine.high %v17248_v62, %v17260_v0 }
 0xae7   :  { %v20880_v1 = vcombine.high %v17249_v50, %v17261_v29  ;;  %v20879_v19 = vcombine.low %v17249_v50, %v17261_v29  ;;  %v17226_v29 = vld [vmem:[%s30568_s16 + $0x1b0] sm:$0xff] }
 0xae9   :  { %18541 = vmatpush1.bf16.msra.mxu1 %v20897_v34  ;;  %18582 = vmatpush1.bf16.msra.mxu0 %v20899_v15  ;;  %v17284_v34 = vld [vmem:[%s30568_s16 + $0x380] sm:$0xff]  ;;  %v17273_v15 = vld [vmem:[%s30568_s16 + $0x328] sm:$0xff] }
 0xaea   :  { %18542 = vmatprep.subr.bf16.mxu1 %v20922_v37  ;;  %18583 = vmatprep.subr.bf16.mxu0 %v20924_v18  ;;  %v17285_v37 = vld [vmem:[%s30568_s16 + $0x388] sm:$0xff]  ;;  %v20877_v18 = vcombine.low %v17248_v62, %v17260_v0  ;;  %v20902_v20 = vcombine.high %v17272_v14, %v17284_v34 }
 0xaeb   :  { %v20904_v21 = vcombine.high %v17273_v15, %v17285_v37  ;;  %v20903_v27 = vcombine.low %v17273_v15, %v17285_v37  ;;  %v17250_v37 = vld [vmem:[%s30568_s16 + $0x270] sm:$0xff] }
 0xaed   :  { %18543 = vmatpush1.bf16.msra.mxu1 %v20921_v25  ;;  %18584 = vmatpush1.bf16.msra.mxu0 %v20923_v26  ;;  %v17308_v25 = vld [vmem:[%s30568_s16 + $0x440] sm:$0xff]  ;;  %v17297_v26 = vld [vmem:[%s30568_s16 + $0x3e8] sm:$0xff] }
 0xaee   :  { %18544 = vmatprep.subr.bf16.mxu1 %v20946_v2  ;;  %18585 = vmatprep.subr.bf16.mxu0 %v20948_v28  ;;  %v17309_v2 = vld [vmem:[%s30568_s16 + $0x448] sm:$0xff]  ;;  %v20901_v28 = vcombine.low %v17272_v14, %v17284_v34  ;;  %v20926_v41 = vcombine.high %v17296_v23, %v17308_v25 }
 0xaef   :  { %v20928_v9 = vcombine.high %v17297_v26, %v17309_v2  ;;  %v20927_v30 = vcombine.low %v17297_v26, %v17309_v2  ;;  %v17274_v2 = vld [vmem:[%s30568_s16 + $0x330] sm:$0xff] }
 0xaf1   :  { %18545 = vmatpush1.bf16.msra.mxu1 %v20945_v24  ;;  %18586 = vmatpush1.bf16.msra.mxu0 %v20947_v8  ;;  %v17332_v24 = vld [vmem:[%s30568_s16 + $0x500] sm:$0xff]  ;;  %v17321_v8 = vld [vmem:[%s30568_s16 + $0x4a8] sm:$0xff] }
 0xaf2   :  { %18546 = vmatprep.subr.bf16.mxu1 %v20970_v11  ;;  %18587 = vmatprep.subr.bf16.mxu0 %v20972_v16  ;;  %v17333_v11 = vld [vmem:[%s30568_s16 + $0x508] sm:$0xff]  ;;  %v20925_v16 = vcombine.low %v17296_v23, %v17308_v25  ;;  %v20950_v31 = vcombine.high %v17320_v47, %v17332_v24 }
 0xaf3   :  { %v20952_v22 = vcombine.high %v17321_v8, %v17333_v11  ;;  %v20951_v42 = vcombine.low %v17321_v8, %v17333_v11  ;;  %v17298_v11 = vld [vmem:[%s30568_s16 + $0x3f0] sm:$0xff] }
 0xaf5   :  { %18547 = vmatpush1.bf16.msra.mxu1 %v20969_v59  ;;  %18588 = vmatpush1.bf16.msra.mxu0 %v20971_v36  ;;  %v17356_v59 = vld [vmem:[%s30568_s16 + $0x5c0] sm:$0xff]  ;;  %v17345_v36 = vld [vmem:[%s30568_s16 + $0x568] sm:$0xff] }
 0xaf6   :  { %18614 = vmatprep.subr.bf16.mxu1 %v20806_v3  ;;  %18655 = vmatprep.subr.bf16.mxu0 %v20808_v39  ;;  %v17357_v3 = vld [vmem:[%s30568_s16 + $0x5c8] sm:$0xff]  ;;  %v20949_v39 = vcombine.low %v17320_v47, %v17332_v24  ;;  %v20974_v43 = vcombine.high %v17344_v35, %v17356_v59 }
 0xaf7   :  { %v20976_v44 = vcombine.high %v17345_v36, %v17357_v3  ;;  %v20975_v51 = vcombine.low %v17345_v36, %v17357_v3  ;;  %v17322_v3 = vld [vmem:[%s30568_s16 + $0x4b0] sm:$0xff] }
 0xaf8   :  { %18565 = vmatmul.mubr.bf16.vlgmr.msra.gmra.mrb[196].mxu1 %v29959_v32  ;;  %18606 = vmatmul.mubr.bf16.vlgmr.msra.gmra.mrb[200].mxu0 %v29959_v32 }
 0xaf9   :  { %18615 = vmatpush1.bf16.msra.mxu1 %v20805_v12  ;;  %18656 = vmatpush1.bf16.msra.mxu0 %v20807_v48  ;;  %v17190_v12 = vld [vmem:[%s30568_s16 + $0x90] sm:$0xff]  ;;  %v17179_v48 = vld [vmem:[%s30568_s16 + $0x38] sm:$0xff] }
 0xafa   :  { %18616 = vmatprep.subr.bf16.mxu1 %v20830_v49  ;;  %18657 = vmatprep.subr.bf16.mxu0 %v20832_v17  ;;  %v17191_v49 = vld [vmem:[%s30568_s16 + $0x98] sm:$0xff]  ;;  %v20973_v17 = vcombine.low %v17344_v35, %v17356_v59  ;;  %v20810_v56 = vcombine.high %v17178_v45, %v17190_v12 }
 0xafb   :  { %18646 = vmatprep.mubr.bf16.mxu1 %v24460_v61  ;;  %18687 = vmatprep.mubr.bf16.mxu0 %v24460_v61  ;;  %v20812_v57 = vcombine.high %v17179_v48, %v17191_v49  ;;  %v20811_v62 = vcombine.low %v17179_v48, %v17191_v49  ;;  %v17346_v49 = vld [vmem:[%s30568_s16 + $0x570] sm:$0xff] }
 0xafd   :  { %18617 = vmatpush1.bf16.msra.mxu1 %v20829_v38  ;;  %18658 = vmatpush1.bf16.msra.mxu0 %v20831_v58  ;;  %v17214_v38 = vld [vmem:[%s30568_s16 + $0x150] sm:$0xff]  ;;  %v17203_v58 = vld [vmem:[%s30568_s16 + $0xf8] sm:$0xff] }
 0xafe   :  { %18618 = vmatprep.subr.bf16.mxu1 %v20854_v60  ;;  %18659 = vmatprep.subr.bf16.mxu0 %v20856_v33  ;;  %v17215_v60 = vld [vmem:[%s30568_s16 + $0x158] sm:$0xff]  ;;  %v20809_v33 = vcombine.low %v17178_v45, %v17190_v12  ;;  %v20834_v0 = vcombine.high %v17202_v46, %v17214_v38 }
 0xaff   :  { %v20836_v50 = vcombine.high %v17203_v58, %v17215_v60  ;;  %v20835_v14 = vcombine.low %v17203_v58, %v17215_v60  ;;  %v17180_v60 = vld [vmem:[%s30568_s16 + $0x40] sm:$0xff] }
 0xb01   :  { %18619 = vmatpush1.bf16.msra.mxu1 %v20853_v5  ;;  %18660 = vmatpush1.bf16.msra.mxu0 %v20855_v13  ;;  %v17238_v5 = vld [vmem:[%s30568_s16 + $0x210] sm:$0xff]  ;;  %v17227_v13 = vld [vmem:[%s30568_s16 + $0x1b8] sm:$0xff] }
 0xb02   :  { %18620 = vmatprep.subr.bf16.mxu1 %v20878_v63  ;;  %18661 = vmatprep.subr.bf16.mxu0 %v20880_v1  ;;  %v17239_v63 = vld [vmem:[%s30568_s16 + $0x218] sm:$0xff]  ;;  %v20833_v1 = vcombine.low %v17202_v46, %v17214_v38  ;;  %v20858_v34 = vcombine.high %v17226_v29, %v17238_v5 }
 0xb03   :  { %v20860_v15 = vcombine.high %v17227_v13, %v17239_v63  ;;  %v20859_v23 = vcombine.low %v17227_v13, %v17239_v63  ;;  %v17204_v63 = vld [vmem:[%s30568_s16 + $0x100] sm:$0xff] }
 0xb05   :  { %18621 = vmatpush1.bf16.msra.mxu1 %v20877_v18  ;;  %18662 = vmatpush1.bf16.msra.mxu0 %v20879_v19  ;;  %v17262_v18 = vld [vmem:[%s30568_s16 + $0x2d0] sm:$0xff]  ;;  %v17251_v19 = vld [vmem:[%s30568_s16 + $0x278] sm:$0xff] }
 0xb06   :  { %18622 = vmatprep.subr.bf16.mxu1 %v20902_v20  ;;  %18663 = vmatprep.subr.bf16.mxu0 %v20904_v21  ;;  %v17263_v20 = vld [vmem:[%s30568_s16 + $0x2d8] sm:$0xff]  ;;  %v20857_v21 = vcombine.low %v17226_v29, %v17238_v5  ;;  %v20882_v25 = vcombine.high %v17250_v37, %v17262_v18 }
 0xb07   :  { %v20884_v26 = vcombine.high %v17251_v19, %v17263_v20  ;;  %v20883_v47 = vcombine.low %v17251_v19, %v17263_v20  ;;  %v17228_v20 = vld [vmem:[%s30568_s16 + $0x1c0] sm:$0xff] }
 0xb09   :  { %18623 = vmatpush1.bf16.msra.mxu1 %v20901_v28  ;;  %18664 = vmatpush1.bf16.msra.mxu0 %v20903_v27  ;;  %v17286_v28 = vld [vmem:[%s30568_s16 + $0x390] sm:$0xff]  ;;  %v17275_v27 = vld [vmem:[%s30568_s16 + $0x338] sm:$0xff] }
 0xb0a   :  { %18624 = vmatprep.subr.bf16.mxu1 %v20926_v41  ;;  %18665 = vmatprep.subr.bf16.mxu0 %v20928_v9  ;;  %v17287_v41 = vld [vmem:[%s30568_s16 + $0x398] sm:$0xff]  ;;  %v20881_v9 = vcombine.low %v17250_v37, %v17262_v18  ;;  %v20906_v24 = vcombine.high %v17274_v2, %v17286_v28 }
 0xb0b   :  { %v20908_v8 = vcombine.high %v17275_v27, %v17287_v41  ;;  %v20907_v35 = vcombine.low %v17275_v27, %v17287_v41  ;;  %v17252_v41 = vld [vmem:[%s30568_s16 + $0x280] sm:$0xff] }
 0xb0d   :  { %18625 = vmatpush1.bf16.msra.mxu1 %v20925_v16  ;;  %18666 = vmatpush1.bf16.msra.mxu0 %v20927_v30  ;;  %v17310_v16 = vld [vmem:[%s30568_s16 + $0x450] sm:$0xff]  ;;  %v17299_v30 = vld [vmem:[%s30568_s16 + $0x3f8] sm:$0xff] }
 0xb0e   :  { %18626 = vmatprep.subr.bf16.mxu1 %v20950_v31  ;;  %18667 = vmatprep.subr.bf16.mxu0 %v20952_v22  ;;  %v17311_v31 = vld [vmem:[%s30568_s16 + $0x458] sm:$0xff]  ;;  %v20905_v22 = vcombine.low %v17274_v2, %v17286_v28  ;;  %v20930_v59 = vcombine.high %v17298_v11, %v17310_v16 }
 0xb0f   :  { %v20932_v36 = vcombine.high %v17299_v30, %v17311_v31  ;;  %v20931_v45 = vcombine.low %v17299_v30, %v17311_v31  ;;  %v17276_v31 = vld [vmem:[%s30568_s16 + $0x340] sm:$0xff] }
 0xb11   :  { %18627 = vmatpush1.bf16.msra.mxu1 %v20949_v39  ;;  %18668 = vmatpush1.bf16.msra.mxu0 %v20951_v42  ;;  %v17334_v39 = vld [vmem:[%s30568_s16 + $0x510] sm:$0xff]  ;;  %v17323_v42 = vld [vmem:[%s30568_s16 + $0x4b8] sm:$0xff] }
 0xb12   :  { %18628 = vmatprep.subr.bf16.mxu1 %v20974_v43  ;;  %18669 = vmatprep.subr.bf16.mxu0 %v20976_v44  ;;  %v17335_v43 = vld [vmem:[%s30568_s16 + $0x518] sm:$0xff]  ;;  %v20929_v44 = vcombine.low %v17298_v11, %v17310_v16  ;;  %v20954_v12 = vcombine.high %v17322_v3, %v17334_v39 }
 0xb13   :  { %v20956_v48 = vcombine.high %v17323_v42, %v17335_v43  ;;  %v20955_v46 = vcombine.low %v17323_v42, %v17335_v43  ;;  %v17300_v43 = vld [vmem:[%s30568_s16 + $0x400] sm:$0xff] }
 0xb15   :  { %18629 = vmatpush1.bf16.msra.mxu1 %v20973_v17  ;;  %18670 = vmatpush1.bf16.msra.mxu0 %v20975_v51  ;;  %v17358_v17 = vld [vmem:[%s30568_s16 + $0x5d0] sm:$0xff]  ;;  %v17347_v51 = vld [vmem:[%s30568_s16 + $0x578] sm:$0xff] }
 0xb16   :  { %18696 = vmatprep.subr.bf16.mxu1 %v20810_v56  ;;  %18737 = vmatprep.subr.bf16.mxu0 %v20812_v57  ;;  %v17359_v56 = vld [vmem:[%s30568_s16 + $0x5d8] sm:$0xff]  ;;  %v20953_v57 = vcombine.low %v17322_v3, %v17334_v39  ;;  %v20978_v38 = vcombine.high %v17346_v49, %v17358_v17 }
 0xb17   :  { %v20980_v58 = vcombine.high %v17347_v51, %v17359_v56  ;;  %v20979_v29 = vcombine.low %v17347_v51, %v17359_v56  ;;  %v17324_v56 = vld [vmem:[%s30568_s16 + $0x4c0] sm:$0xff] }
 0xb18   :  { %18647 = vmatmul.mubr.bf16.vlgmr.msra.gmra.mrb[200].mxu1 %v29959_v32  ;;  %18688 = vmatmul.mubr.bf16.vlgmr.msra.gmra.mrb[204].mxu0 %v29959_v32 }
 0xb19   :  { %18697 = vmatpush1.bf16.msra.mxu1 %v20809_v33  ;;  %18738 = vmatpush1.bf16.msra.mxu0 %v20811_v62  ;;  %v17192_v33 = vld [vmem:[%s30568_s16 + $0xa0] sm:$0xff]  ;;  %v17181_v62 = vld [vmem:[%s30568_s16 + $0x48] sm:$0xff] }
 0xb1a   :  { %18698 = vmatprep.subr.bf16.mxu1 %v20834_v0  ;;  %18739 = vmatprep.subr.bf16.mxu0 %v20836_v50  ;;  %v17193_v0 = vld [vmem:[%s30568_s16 + $0xa8] sm:$0xff]  ;;  %v20977_v50 = vcombine.low %v17346_v49, %v17358_v17  ;;  %v20814_v5 = vcombine.high %v17180_v60, %v17192_v33 }
 0xb1b   :  { %18728 = vmatprep.mubr.bf16.mxu1 %v24460_v61  ;;  %18769 = vmatprep.mubr.bf16.mxu0 %v24460_v61  ;;  %v20816_v13 = vcombine.high %v17181_v62, %v17193_v0  ;;  %v20815_v37 = vcombine.low %v17181_v62, %v17193_v0  ;;  %v17348_v0 = vld [vmem:[%s30568_s16 + $0x580] sm:$0xff] }
 0xb1d   :  { %18699 = vmatpush1.bf16.msra.mxu1 %v20833_v1  ;;  %18740 = vmatpush1.bf16.msra.mxu0 %v20835_v14  ;;  %v17216_v1 = vld [vmem:[%s30568_s16 + $0x160] sm:$0xff]  ;;  %v17205_v14 = vld [vmem:[%s30568_s16 + $0x108] sm:$0xff] }
 0xb1e   :  { %18700 = vmatprep.subr.bf16.mxu1 %v20858_v34  ;;  %18741 = vmatprep.subr.bf16.mxu0 %v20860_v15  ;;  %v17217_v34 = vld [vmem:[%s30568_s16 + $0x168] sm:$0xff]  ;;  %v20813_v15 = vcombine.low %v17180_v60, %v17192_v33  ;;  %v20838_v18 = vcombine.high %v17204_v63, %v17216_v1 }
 0xb1f   :  { %v20840_v19 = vcombine.high %v17205_v14, %v17217_v34  ;;  %v20839_v2 = vcombine.low %v17205_v14, %v17217_v34  ;;  %v17182_v34 = vld [vmem:[%s30568_s16 + $0x50] sm:$0xff] }
 0xb21   :  { %18701 = vmatpush1.bf16.msra.mxu1 %v20857_v21  ;;  %18742 = vmatpush1.bf16.msra.mxu0 %v20859_v23  ;;  %v17240_v21 = vld [vmem:[%s30568_s16 + $0x220] sm:$0xff]  ;;  %v17229_v23 = vld [vmem:[%s30568_s16 + $0x1c8] sm:$0xff] }
 0xb22   :  { %18702 = vmatprep.subr.bf16.mxu1 %v20882_v25  ;;  %18743 = vmatprep.subr.bf16.mxu0 %v20884_v26  ;;  %v17241_v25 = vld [vmem:[%s30568_s16 + $0x228] sm:$0xff]  ;;  %v20837_v26 = vcombine.low %v17204_v63, %v17216_v1  ;;  %v20862_v28 = vcombine.high %v17228_v20, %v17240_v21 }
 0xb23   :  { %v20864_v27 = vcombine.high %v17229_v23, %v17241_v25  ;;  %v20863_v11 = vcombine.low %v17229_v23, %v17241_v25  ;;  %v17206_v25 = vld [vmem:[%s30568_s16 + $0x110] sm:$0xff] }
 0xb25   :  { %18703 = vmatpush1.bf16.msra.mxu1 %v20881_v9  ;;  %18744 = vmatpush1.bf16.msra.mxu0 %v20883_v47  ;;  %v17264_v9 = vld [vmem:[%s30568_s16 + $0x2e0] sm:$0xff]  ;;  %v17253_v47 = vld [vmem:[%s30568_s16 + $0x288] sm:$0xff] }
 0xb26   :  { %18704 = vmatprep.subr.bf16.mxu1 %v20906_v24  ;;  %18745 = vmatprep.subr.bf16.mxu0 %v20908_v8  ;;  %v17265_v24 = vld [vmem:[%s30568_s16 + $0x2e8] sm:$0xff]  ;;  %v20861_v8 = vcombine.low %v17228_v20, %v17240_v21  ;;  %v20886_v16 = vcombine.high %v17252_v41, %v17264_v9 }
 0xb27   :  { %v20888_v30 = vcombine.high %v17253_v47, %v17265_v24  ;;  %v20887_v3 = vcombine.low %v17253_v47, %v17265_v24  ;;  %v17230_v24 = vld [vmem:[%s30568_s16 + $0x1d0] sm:$0xff] }
 0xb29   :  { %18705 = vmatpush1.bf16.msra.mxu1 %v20905_v22  ;;  %18746 = vmatpush1.bf16.msra.mxu0 %v20907_v35  ;;  %v17288_v22 = vld [vmem:[%s30568_s16 + $0x3a0] sm:$0xff]  ;;  %v17277_v35 = vld [vmem:[%s30568_s16 + $0x348] sm:$0xff] }
 0xb2a   :  { %18706 = vmatprep.subr.bf16.mxu1 %v20930_v59  ;;  %18747 = vmatprep.subr.bf16.mxu0 %v20932_v36  ;;  %v17289_v59 = vld [vmem:[%s30568_s16 + $0x3a8] sm:$0xff]  ;;  %v20885_v36 = vcombine.low %v17252_v41, %v17264_v9  ;;  %v20910_v39 = vcombine.high %v17276_v31, %v17288_v22 }
 0xb2b   :  { %v20912_v42 = vcombine.high %v17277_v35, %v17289_v59  ;;  %v20911_v49 = vcombine.low %v17277_v35, %v17289_v59  ;;  %v17254_v59 = vld [vmem:[%s30568_s16 + $0x290] sm:$0xff] }
 0xb2d   :  { %18707 = vmatpush1.bf16.msra.mxu1 %v20929_v44  ;;  %18748 = vmatpush1.bf16.msra.mxu0 %v20931_v45  ;;  %v17312_v44 = vld [vmem:[%s30568_s16 + $0x460] sm:$0xff]  ;;  %v17301_v45 = vld [vmem:[%s30568_s16 + $0x408] sm:$0xff] }
 0xb2e   :  { %18708 = vmatprep.subr.bf16.mxu1 %v20954_v12  ;;  %18749 = vmatprep.subr.bf16.mxu0 %v20956_v48  ;;  %v17313_v12 = vld [vmem:[%s30568_s16 + $0x468] sm:$0xff]  ;;  %v20909_v48 = vcombine.low %v17276_v31, %v17288_v22  ;;  %v20934_v17 = vcombine.high %v17300_v43, %v17312_v44 }
 0xb2f   :  { %v20936_v51 = vcombine.high %v17301_v45, %v17313_v12  ;;  %v20935_v60 = vcombine.low %v17301_v45, %v17313_v12  ;;  %v17278_v12 = vld [vmem:[%s30568_s16 + $0x350] sm:$0xff] }
 0xb31   :  { %18709 = vmatpush1.bf16.msra.mxu1 %v20953_v57  ;;  %18750 = vmatpush1.bf16.msra.mxu0 %v20955_v46  ;;  %v17336_v57 = vld [vmem:[%s30568_s16 + $0x520] sm:$0xff]  ;;  %v17325_v46 = vld [vmem:[%s30568_s16 + $0x4c8] sm:$0xff] }
 0xb32   :  { %18710 = vmatprep.subr.bf16.mxu1 %v20978_v38  ;;  %18751 = vmatprep.subr.bf16.mxu0 %v20980_v58  ;;  %v17337_v38 = vld [vmem:[%s30568_s16 + $0x528] sm:$0xff]  ;;  %v20933_v58 = vcombine.low %v17300_v43, %v17312_v44  ;;  %v20958_v33 = vcombine.high %v17324_v56, %v17336_v57 }
 0xb33   :  { %v20960_v62 = vcombine.high %v17325_v46, %v17337_v38  ;;  %v20959_v63 = vcombine.low %v17325_v46, %v17337_v38  ;;  %v17302_v46 = vld [vmem:[%s30568_s16 + $0x410] sm:$0xff] }
 0xb34   :  { %v17314_v38 = vld [vmem:[%s30568_s16 + $0x470] sm:$0xff] }
 0xb35   :  { %18711 = vmatpush1.bf16.msra.mxu1 %v20977_v50  ;;  %18752 = vmatpush1.bf16.msra.mxu0 %v20979_v29  ;;  %v17360_v50 = vld [vmem:[%s30568_s16 + $0x5e0] sm:$0xff]  ;;  %v17349_v29 = vld [vmem:[%s30568_s16 + $0x588] sm:$0xff] }
 0xb36   :  { %18778 = vmatprep.subr.bf16.mxu1 %v20814_v5  ;;  %18819 = vmatprep.subr.bf16.mxu0 %v20816_v13  ;;  %v17361_v5 = vld [vmem:[%s30568_s16 + $0x5e8] sm:$0xff]  ;;  %v20957_v13 = vcombine.low %v17324_v56, %v17336_v57  ;;  %v20982_v1 = vcombine.high %v17348_v0, %v17360_v50 }
 0xb37   :  { %v20984_v14 = vcombine.high %v17349_v29, %v17361_v5  ;;  %v20983_v20 = vcombine.low %v17349_v29, %v17361_v5  ;;  %v17326_v29 = vld [vmem:[%s30568_s16 + $0x4d0] sm:$0xff] }
 0xb38   :  { %18729 = vmatmul.mubr.bf16.vlgmr.msra.gmra.mrb[204].mxu1 %v29959_v32  ;;  %18770 = vmatmul.mubr.bf16.vlgmr.msra.gmra.mrb[208].mxu0 %v29959_v32  ;;  %v17338_v5 = vld [vmem:[%s30568_s16 + $0x530] sm:$0xff] }
 0xb39   :  { %18779 = vmatpush1.bf16.msra.mxu1 %v20813_v15  ;;  %18820 = vmatpush1.bf16.msra.mxu0 %v20815_v37  ;;  %v17194_v15 = vld [vmem:[%s30568_s16 + $0xb0] sm:$0xff]  ;;  %v17183_v37 = vld [vmem:[%s30568_s16 + $0x58] sm:$0xff] }
 0xb3a   :  { %18780 = vmatprep.subr.bf16.mxu1 %v20838_v18  ;;  %18821 = vmatprep.subr.bf16.mxu0 %v20840_v19  ;;  %v17195_v18 = vld [vmem:[%s30568_s16 + $0xb8] sm:$0xff]  ;;  %v20981_v19 = vcombine.low %v17348_v0, %v17360_v50  ;;  %v20818_v21 = vcombine.high %v17182_v34, %v17194_v15  ;;  %v20938_v0 = vcombine.high %v17302_v46, %v17314_v38 }
 0xb3b   :  { %18810 = vmatprep.mubr.bf16.mxu1 %v24460_v61  ;;  %18851 = vmatprep.mubr.bf16.mxu0 %v24460_v61  ;;  %v20820_v23 = vcombine.high %v17183_v37, %v17195_v18  ;;  %v20819_v41 = vcombine.low %v17183_v37, %v17195_v18  ;;  %v17350_v37 = vld [vmem:[%s30568_s16 + $0x590] sm:$0xff] }
 0xb3c   :  { %v17362_v18 = vld [vmem:[%s30568_s16 + $0x5f0] sm:$0xff] }
 0xb3d   :  { %18781 = vmatpush1.bf16.msra.mxu1 %v20837_v26  ;;  %18822 = vmatpush1.bf16.msra.mxu0 %v20839_v2  ;;  %v17218_v26 = vld [vmem:[%s30568_s16 + $0x170] sm:$0xff]  ;;  %v17207_v2 = vld [vmem:[%s30568_s16 + $0x118] sm:$0xff] }
 0xb3e   :  { %18782 = vmatprep.subr.bf16.mxu1 %v20862_v28  ;;  %18823 = vmatprep.subr.bf16.mxu0 %v20864_v27  ;;  %v17219_v28 = vld [vmem:[%s30568_s16 + $0x178] sm:$0xff]  ;;  %v20817_v27 = vcombine.low %v17182_v34, %v17194_v15  ;;  %v20842_v9 = vcombine.high %v17206_v25, %v17218_v26  ;;  %v20962_v34 = vcombine.high %v17326_v29, %v17338_v5 }
 0xb3f   :  { %v20844_v47 = vcombine.high %v17207_v2, %v17219_v28  ;;  %v20843_v31 = vcombine.low %v17207_v2, %v17219_v28  ;;  %v20985_v2 = vcombine.low %v17350_v37, %v17362_v18 }
 0xb41   :  { %18783 = vmatpush1.bf16.msra.mxu1 %v20861_v8  ;;  %18824 = vmatpush1.bf16.msra.mxu0 %v20863_v11  ;;  %v17242_v8 = vld [vmem:[%s30568_s16 + $0x230] sm:$0xff]  ;;  %v17231_v11 = vld [vmem:[%s30568_s16 + $0x1d8] sm:$0xff] }
 0xb42   :  { %18784 = vmatprep.subr.bf16.mxu1 %v20886_v16  ;;  %18825 = vmatprep.subr.bf16.mxu0 %v20888_v30  ;;  %v17243_v16 = vld [vmem:[%s30568_s16 + $0x238] sm:$0xff]  ;;  %v20841_v30 = vcombine.low %v17206_v25, %v17218_v26  ;;  %v20866_v22 = vcombine.high %v17230_v24, %v17242_v8  ;;  %v20986_v25 = vcombine.high %v17350_v37, %v17362_v18 }
 0xb43   :  { %v20868_v35 = vcombine.high %v17231_v11, %v17243_v16  ;;  %v20867_v43 = vcombine.low %v17231_v11, %v17243_v16 }
 0xb45   :  { %18785 = vmatpush1.bf16.msra.mxu1 %v20885_v36  ;;  %18826 = vmatpush1.bf16.msra.mxu0 %v20887_v3  ;;  %v17266_v36 = vld [vmem:[%s30568_s16 + $0x2f0] sm:$0xff]  ;;  %v17255_v3 = vld [vmem:[%s30568_s16 + $0x298] sm:$0xff] }
 0xb46   :  { %18786 = vmatprep.subr.bf16.mxu1 %v20910_v39  ;;  %18827 = vmatprep.subr.bf16.mxu0 %v20912_v42  ;;  %v17267_v39 = vld [vmem:[%s30568_s16 + $0x2f8] sm:$0xff]  ;;  %v20865_v42 = vcombine.low %v17230_v24, %v17242_v8  ;;  %v20890_v44 = vcombine.high %v17254_v59, %v17266_v36 }
 0xb47   :  { %v20892_v45 = vcombine.high %v17255_v3, %v17267_v39 }
 0xb49   :  { %18787 = vmatpush1.bf16.msra.mxu1 %v20909_v48  ;;  %18828 = vmatpush1.bf16.msra.mxu0 %v20911_v49  ;;  %v17290_v48 = vld [vmem:[%s30568_s16 + $0x3b0] sm:$0xff]  ;;  %v17291_v49 = vld [vmem:[%s30568_s16 + $0x3b8] sm:$0xff] }
 0xb4a   :  { %18788 = vmatprep.subr.bf16.mxu1 %v20934_v17  ;;  %18829 = vmatprep.subr.bf16.mxu0 %v20936_v51  ;;  %v20889_v17 = vcombine.low %v17254_v59, %v17266_v36  ;;  %v20891_v51 = vcombine.low %v17255_v3, %v17267_v39  ;;  %v20914_v56 = vcombine.high %v17278_v12, %v17290_v48 }
 0xb4d   :  { %18789 = vmatpush1.bf16.msra.mxu1 %v20933_v58  ;;  %18830 = vmatpush1.bf16.msra.mxu0 %v20935_v60  ;;  %v17303_v58 = vld [vmem:[%s30568_s16 + $0x418] sm:$0xff] }
 0xb4e   :  { %18790 = vmatprep.subr.bf16.mxu1 %v20958_v33  ;;  %18831 = vmatprep.subr.bf16.mxu0 %v20960_v62  ;;  %v17315_v60 = vld [vmem:[%s30568_s16 + $0x478] sm:$0xff]  ;;  %v20913_v33 = vcombine.low %v17278_v12, %v17290_v48 }
 0xb4f   :  { %v20940_v50 = vcombine.high %v17303_v58, %v17315_v60 }
 0xb51   :  { %18791 = vmatpush1.bf16.msra.mxu1 %v20957_v13  ;;  %18832 = vmatpush1.bf16.msra.mxu0 %v20959_v63  ;;  %v17327_v13 = vld [vmem:[%s30568_s16 + $0x4d8] sm:$0xff] }
 0xb52   :  { %18792 = vmatprep.subr.bf16.mxu1 %v20982_v1  ;;  %18833 = vmatprep.subr.bf16.mxu0 %v20984_v14  ;;  %v17339_v63 = vld [vmem:[%s30568_s16 + $0x538] sm:$0xff]  ;;  %v20937_v1 = vcombine.low %v17302_v46, %v17314_v38  ;;  %v20939_v14 = vcombine.low %v17303_v58, %v17315_v60 }
 0xb53   :  { %v20964_v15 = vcombine.high %v17327_v13, %v17339_v63 }
 0xb55   :  { %18793 = vmatpush1.bf16.msra.mxu1 %v20981_v19  ;;  %18834 = vmatpush1.bf16.msra.mxu0 %v20983_v20  ;;  %v17351_v19 = vld [vmem:[%s30568_s16 + $0x598] sm:$0xff] }
 0xb56   :  { %18860 = vmatprep.subr.bf16.mxu1 %v20818_v21  ;;  %18901 = vmatprep.subr.bf16.mxu0 %v20820_v23  ;;  %v17363_v20 = vld [vmem:[%s30568_s16 + $0x5f8] sm:$0xff]  ;;  %v20961_v21 = vcombine.low %v17326_v29, %v17338_v5  ;;  %v20963_v23 = vcombine.low %v17327_v13, %v17339_v63 }
 0xb57   :  { %v20988_v26 = vcombine.high %v17351_v19, %v17363_v20  ;;  %v20987_v28 = vcombine.low %v17351_v19, %v17363_v20 }
 0xb58   :  { %18811 = vmatmul.mubr.bf16.vlgmr.msra.gmra.mrb[208].mxu1 %v29959_v32  ;;  %18852 = vmatmul.mubr.bf16.vlgmr.msra.gmra.mrb[212].mxu0 %v29959_v32 }
 0xb59   :  { %18861 = vmatpush1.bf16.msra.mxu1 %v20817_v27  ;;  %18902 = vmatpush1.bf16.msra.mxu0 %v20819_v41  ;;  %v17364_v27 = vld [vmem:[%s30569_s17] sm:$0xff] }
 0xb5a   :  { %18862 = vmatprep.subr.bf16.mxu1 %v20842_v9  ;;  %18903 = vmatprep.subr.bf16.mxu0 %v20844_v47  ;;  %v17373_v41 = vrot.slane %v17364_v27, %v26242_v4  ;;  %v17381_v9 = vrot.slane %v17364_v27, %v26245_v7  ;;  %v17377_v47 = vrot.slane %v17364_v27, %v26248_v10 }
 0xb5b   :  { %18892 = vmatprep.mubr.bf16.mxu1 %v24460_v61  ;;  %18933 = vmatprep.mubr.bf16.mxu0 %v24460_v61  ;;  %v17279_v61 = vld [vmem:[%s30568_s16 + $0x358] sm:$0xff]  ;;  %v17385_v24 = vrot.slane %v17364_v27, %v26251_v40  ;;  %v17389_v58 = vrot.slane %v17364_v27, %v26377_v52  ;;  %v17397_v60 = vrot.slane %v17364_v27, %v26380_v53 }
 0xb5c   :  { %v20916_v57 = vcombine.high %v17279_v61, %v17291_v49  ;;  %v20915_v62 = vcombine.low %v17279_v61, %v17291_v49 }
 0xb5d   :  { %18863 = vmatpush1.bf16.msra.mxu1 %v20841_v30  ;;  %18904 = vmatpush1.bf16.msra.mxu0 %v20843_v31 }
 0xb5e   :  { %18864 = vmatprep.subr.bf16.mxu1 %v20866_v22  ;;  %18905 = vmatprep.subr.bf16.mxu0 %v20868_v35 }
 0xb61   :  { %18865 = vmatpush1.bf16.msra.mxu1 %v20865_v42  ;;  %18906 = vmatpush1.bf16.msra.mxu0 %v20867_v43 }
 0xb62   :  { %18866 = vmatprep.subr.bf16.mxu1 %v20890_v44  ;;  %18907 = vmatprep.subr.bf16.mxu0 %v20892_v45 }
 0xb65   :  { %18867 = vmatpush1.bf16.msra.mxu1 %v20889_v17  ;;  %18908 = vmatpush1.bf16.msra.mxu0 %v20891_v51 }
 0xb66   :  { %18868 = vmatprep.subr.bf16.mxu1 %v20914_v56  ;;  %18909 = vmatprep.subr.bf16.mxu0 %v20916_v57 }
 0xb69   :  { %18869 = vmatpush1.bf16.msra.mxu1 %v20913_v33  ;;  %18910 = vmatpush1.bf16.msra.mxu0 %v20915_v62  ;;  %v17393_v62 = vrot.slane %v17364_v27, %v26383_v54 }
 0xb6a   :  { %18870 = vmatprep.subr.bf16.mxu1 %v20938_v0  ;;  %18911 = vmatprep.subr.bf16.mxu0 %v20940_v50  ;;  %v17401_v0 = vrot.slane %v17364_v27, %v26386_v55 }
 0xb6d   :  { %18871 = vmatpush1.bf16.msra.mxu1 %v20937_v1  ;;  %18912 = vmatpush1.bf16.msra.mxu0 %v20939_v14 }
 0xb6e   :  { %18872 = vmatprep.subr.bf16.mxu1 %v20962_v34  ;;  %18913 = vmatprep.subr.bf16.mxu0 %v20964_v15 }
 0xb71   :  { %18873 = vmatpush1.bf16.msra.mxu1 %v20961_v21  ;;  %18914 = vmatpush1.bf16.msra.mxu0 %v20963_v23 }
 0xb72   :  { %18874 = vmatprep.subr.bf16.mxu1 %v20986_v25  ;;  %18915 = vmatprep.subr.bf16.mxu0 %v20988_v26 }
 0xb75   :  { %18875 = vmatpush1.bf16.msra.mxu1 %v20985_v2  ;;  %18916 = vmatpush1.bf16.msra.mxu0 %v20987_v28 }
 0xb78   :  { %18893 = vmatmul.mubr.bf16.vlgmr.msra.gmra.mrb[212].mxu1 %v29959_v32  ;;  %18934 = vmatmul.mubr.bf16.vlgmr.msra.gmra.mrb[216].mxu0 %v29959_v32 }
 0xbab   :  { %v18484_v8 = vpop.f32.mrb[192].mxu1  ;;  %v18525_v11 = vpop.f32.mrb[196].mxu0 }
 0xbac   :  { %v18485_v16 = vadd.f32 %v18484_v8, %v17373_v41  ;;  %v18526_v30 = vadd.f32 %v18525_v11, %v17381_v9  ;;  %v18486_v31 = vpop.f32.mrb[193].mxu1  ;;  %v18527_v22 = vpop.f32.mrb[197].mxu0 }
 0xbad   :  { %v18487_v35 = vadd.f32 %v18486_v31, %v17377_v47  ;;  %v18528_v32 = vadd.f32 %v18527_v22, %v17385_v24  ;;  %v18488_v59 = vpop.f32.mrb[194].mxu1  ;;  %v18529_v36 = vpop.f32.mrb[198].mxu0 }
 0xbae   :  { %v20989_v3 = vmul.f32 -1.442695, %v18485_v16  ;;  %v20991_v39 = vmul.f32 -1.442695, %v18526_v30  ;;  %v18489_v42 = vpop.f32.mrb[195].mxu1  ;;  %v18530_v43 = vpop.f32.mrb[199].mxu0 }
 0xbaf   :  { %v20990_v44 = vmul.f32 -1.442695, %v18487_v35  ;;  %v20992_v45 = vmul.f32 -1.442695, %v18528_v32  ;;  %v30455_v35 = vld [vmem:[%s30569_s17 + $0x8] sm:$0xff] }
 0xbb0   :  { %24267 = vpow2.f32 %v20989_v3  ;;  %v17405_v36 = vrot.slane %v30455_v35, %v26242_v4  ;;  %v17413_v3 = vrot.slane %v30455_v35, %v26245_v7  ;;  %v17409_v42 = vrot.slane %v30455_v35, %v26248_v10 }
 0xbb1   :  { %24269 = vpow2.f32 %v20991_v39  ;;  %v17417_v43 = vrot.slane %v30455_v35, %v26251_v40 }
 0xbb2   :  { %24271 = vpow2.f32 %v20990_v44 }
 0xbb3   :  { %24273 = vpow2.f32 %v20992_v45 }
 0xbba   :  { %v24268_v12 = vpop.eup %24267 }
 0xbbb   :  { %v24270_v48 = vpop.eup %24269  ;;  %v19014_v61 = vadd.f32 1.0, %v24268_v12 }
 0xbbc   :  { %v24272_v49 = vpop.eup %24271  ;;  %v19016_v17 = vadd.f32 1.0, %v24270_v48 }
 0xbbd   :  { %v24274_v51 = vpop.eup %24273  ;;  %24275 = vrcp.f32 %v19014_v61  ;;  %v19015_v56 = vadd.f32 1.0, %v24272_v49 }
 0xbbe   :  { %24277 = vrcp.f32 %v19016_v17  ;;  %v19017_v57 = vadd.f32 1.0, %v24274_v51 }
 0xbbf   :  { %24279 = vrcp.f32 %v19015_v56 }
 0xbc0   :  { %24281 = vrcp.f32 %v19017_v57 }
 0xbc7   :  { %v24276_v46 = vpop.eup %24275 }
 0xbc8   :  { %v24278_v38 = vpop.eup %24277 }
 0xbc9   :  { %v24280_v33 = vpop.eup %24279 }
 0xbca   :  { %v24282_v50 = vpop.eup %24281  ;;  %v19110_v29 = vcombine.low %v24276_v46, %v24280_v33 }
 0xbcb   :  { %v19111_v5 = vcombine.low %v24278_v38, %v24282_v50  ;;  %v18566_v13 = vpop.f32.mrb[196].mxu1  ;;  %v18607_v63 = vpop.f32.mrb[200].mxu0 }
 0xbcc   :  { %v18567_v1 = vadd.f32 %v18566_v13, %v17389_v58  ;;  %v18608_v14 = vadd.f32 %v18607_v63, %v17397_v60  ;;  %v18568_v34 = vpop.f32.mrb[197].mxu1  ;;  %v18609_v15 = vpop.f32.mrb[201].mxu0  ;;  %v19118_v37 = vrot.slane %v19110_v29, %v26301_v6 }
 0xbcd   :  { %v18569_v18 = vadd.f32 %v18568_v34, %v17393_v62  ;;  %v18610_v19 = vadd.f32 %v18609_v15, %v17401_v0  ;;  %v18570_v20 = vpop.f32.mrb[198].mxu1  ;;  %v18611_v21 = vpop.f32.mrb[202].mxu0  ;;  %v19125_v28 = vrot.slane %v19111_v5, %v26301_v6 }
 0xbce   :  { %v20993_v23 = vmul.f32 -1.442695, %v18567_v1  ;;  %v20995_v25 = vmul.f32 -1.442695, %v18608_v14  ;;  %v18571_v26 = vpop.f32.mrb[199].mxu1  ;;  %v18612_v2 = vpop.f32.mrb[203].mxu0 }
 0xbcf   :  { %v20994_v27 = vmul.f32 -1.442695, %v18569_v18  ;;  %v20996_v41 = vmul.f32 -1.442695, %v18610_v19  ;;  %v19126_v9 = vcombine.low %v19118_v37, %v19125_v28 }
 0xbd0   :  { %24283 = vpow2.f32 %v20993_v23 }
 0xbd1   :  { %24285 = vpow2.f32 %v20995_v25  ;;  %19218 = vst [vmem:[#allocation4] sm:$0xff] %v19126_v9 }
 0xbd2   :  { %24287 = vpow2.f32 %v20994_v27 }
 0xbd3   :  { %24289 = vpow2.f32 %v20996_v41 }
 0xbda   :  { %v24284_v47 = vpop.eup %24283 }
 0xbdb   :  { %v24286_v24 = vpop.eup %24285  ;;  %v19018_v8 = vadd.f32 1.0, %v24284_v47 }
 0xbdc   :  { %v24288_v11 = vpop.eup %24287  ;;  %v19020_v16 = vadd.f32 1.0, %v24286_v24 }
 0xbdd   :  { %v24290_v30 = vpop.eup %24289  ;;  %24291 = vrcp.f32 %v19018_v8  ;;  %v19019_v31 = vadd.f32 1.0, %v24288_v11 }
 0xbde   :  { %24293 = vrcp.f32 %v19020_v16  ;;  %v19021_v22 = vadd.f32 1.0, %v24290_v30 }
 0xbdf   :  { %24295 = vrcp.f32 %v19019_v31 }
 0xbe0   :  { %24297 = vrcp.f32 %v19021_v22 }
 0xbe7   :  { %v24292_v32 = vpop.eup %24291 }
 0xbe8   :  { %v24294_v59 = vpop.eup %24293 }
 0xbe9   :  { %v24296_v39 = vpop.eup %24295 }
 0xbea   :  { %v24298_v44 = vpop.eup %24297  ;;  %v19127_v45 = vcombine.low %v24292_v32, %v24296_v39 }
 0xbeb   :  { %v19128_v12 = vcombine.low %v24294_v59, %v24298_v44  ;;  %v18648_v48 = vpop.f32.mrb[200].mxu1  ;;  %v18689_v61 = vpop.f32.mrb[204].mxu0 }
 0xbec   :  { %v18649_v49 = vadd.f32 %v18648_v48, %v17405_v36  ;;  %v18690_v17 = vadd.f32 %v18689_v61, %v17413_v3  ;;  %v18650_v51 = vpop.f32.mrb[201].mxu1  ;;  %v18691_v56 = vpop.f32.mrb[205].mxu0  ;;  %v19135_v57 = vrot.slane %v19127_v45, %v26301_v6 }
 0xbed   :  { %v18651_v46 = vadd.f32 %v18650_v51, %v17409_v42  ;;  %v18692_v38 = vadd.f32 %v18691_v56, %v17417_v43  ;;  %v18652_v58 = vpop.f32.mrb[202].mxu1  ;;  %v18693_v60 = vpop.f32.mrb[206].mxu0  ;;  %v19142_v33 = vrot.slane %v19128_v12, %v26301_v6 }
 0xbee   :  { %v20997_v62 = vmul.f32 -1.442695, %v18649_v49  ;;  %v20999_v0 = vmul.f32 -1.442695, %v18690_v17  ;;  %v18653_v50 = vpop.f32.mrb[203].mxu1  ;;  %v18694_v29 = vpop.f32.mrb[207].mxu0 }
 0xbef   :  { %v20998_v5 = vmul.f32 -1.442695, %v18651_v46  ;;  %v21000_v13 = vmul.f32 -1.442695, %v18692_v38  ;;  %v19143_v63 = vcombine.low %v19135_v57, %v19142_v33 }
 0xbf0   :  { %24299 = vpow2.f32 %v20997_v62 }
 0xbf1   :  { %24301 = vpow2.f32 %v20999_v0  ;;  %19219 = vst [vmem:[#allocation4 + $0x8] sm:$0xff] %v19143_v63 }
 0xbf2   :  { %24303 = vpow2.f32 %v20998_v5 }
 0xbf3   :  { %24305 = vpow2.f32 %v21000_v13 }
 0xbf4   :  { %24374 = shalt.err (!%p24371_p4)
}
 0xbf5   :  { %s24375_s29 = scalar_lea.hbm %s30570_s18, 768 }
 0xbf6   :  { %p24376_p5 = scmp.ne.s32.totalorder %s30570_s18, %s24375_s29  ;;  %p24379_p6 = scmp.lt.u32.totalorder %s24375_s29, %s30570_s18 }
 0xbf8   :  { %p24381_p7 = pnand %p24379_p6, %p24376_p5 }
 0xbfa   :  { %24384 = shalt.err (!%p24381_p7)
}
 0xbfb   :  { %19233 = dma.vmem_to_hbm [thread:$0]  %s19231_s8, 768, %s30570_s18, [#allocation3]  }
 0xbfc   :  { %s24463_s9 = smov [#allocation7]  }
 0xbfd   :  { %s19260_s14 = sshll.u32 %s24463_s9, 4  ;;  %s19261_s14 = int_to_ptr.vmem [resolvable:$true] %s19260_s14 }
 0xbfe   :  { %s24385_s6 = scalar_lea.vmem %s19261_s14, 32  ;;  %p24390_p9 = scmp.lt.s32.totalorder %s19261_s14, %s19261_s14 }
 0xbff   :  { %p24386_p8 = scmp.ne.s32.totalorder %s19261_s14, %s24385_s6  ;;  %p24391_p10 = scmp.lt.s32.totalorder %s24385_s6, %s24385_s6 }
 0xc01   :  { %p24392_p11 = por %p24391_p10, %p24390_p9 }
 0xc03   :  { %p24393_p12 = pnand %p24392_p11, %p24386_p8 }
 0xc05   :  { %24396 = shalt.err (!%p24393_p12)
}
 0xc06   :  { %s24397_s1 = scalar_lea.hbm %s30573_s21, 32 }
 0xc07   :  { %p24398_p13 = scmp.ne.s32.totalorder %s30573_s21, %s24397_s1  ;;  %p24401_p0 = scmp.lt.u32.totalorder %s24397_s1, %s30573_s21 }
 0xc09   :  { %p24403_p1 = pnand %p24401_p0, %p24398_p13 }
 0xc0b   :  { %24406 = shalt.err (!%p24403_p1)
}
 0xc0c   :  { %19263 = dma.vmem_to_hbm [thread:$0]  %s19261_s14, 32, %s30573_s21, [#allocation8]   ;;  %v24300_v1 = vpop.eup %24299  ;;  %v17421_v25 = vrot.slane %v30455_v35, %v26377_v52  ;;  %v17429_v26 = vrot.slane %v30455_v35, %v26380_v53  ;;  %v17425_v28 = vrot.slane %v30455_v35, %v26383_v54  ;;  %v17433_v27 = vrot.slane %v30455_v35, %v26386_v55  ;;  %v18730_v24 = vpop.f32.mrb[204].mxu1  ;;  %v30504_v58 = vld [vmem:[%s30569_s17 + $0x10] sm:$0xff] }
 0xc0d   :  { %v24302_v14 = vpop.eup %24301  ;;  %v19022_v34 = vadd.f32 1.0, %v24300_v1  ;;  %v18771_v8 = vpop.f32.mrb[208].mxu0  ;;  %v17437_v62 = vrot.slane %v30504_v58, %v26242_v4  ;;  %v17445_v0 = vrot.slane %v30504_v58, %v26245_v7  ;;  %v17441_v29 = vrot.slane %v30504_v58, %v26248_v10  ;;  %s24464_s17 = smov [#allocation4]   ;;  %s24465_s12 = smov [#allocation6]  }
 0xc0e   :  { %v24304_v15 = vpop.eup %24303  ;;  %v19024_v37 = vadd.f32 1.0, %v24302_v14  ;;  %v18731_v11 = vadd.f32 %v18730_v24, %v17421_v25  ;;  %v18772_v16 = vadd.f32 %v18771_v8, %v17429_v26  ;;  %v18732_v30 = vpop.f32.mrb[205].mxu1  ;;  %v17449_v5 = vrot.slane %v30504_v58, %v26251_v40  ;;  %s19240_s22 = sshll.u32 %s24464_s17, 4  ;;  %s19250_s27 = sshll.u32 %s24465_s12, 4  ;;  %s19241_s22 = int_to_ptr.vmem [resolvable:$true] %s19240_s22  ;;  %s19251_s27 = int_to_ptr.vmem [resolvable:$true] %s19250_s27 }
 0xc0f   :  { %v24306_v18 = vpop.eup %24305  ;;  %24307 = vrcp.f32 %v19022_v34  ;;  %v19023_v19 = vadd.f32 1.0, %v24304_v15  ;;  %v18773_v31 = vpop.f32.mrb[209].mxu0  ;;  %v18733_v32 = vadd.f32 %v18732_v30, %v17425_v28  ;;  %s24407_s8 = scalar_lea.vmem %s19241_s22, 768  ;;  %p24412_p3 = scmp.lt.s32.totalorder %s19241_s22, %s19241_s22 }
 0xc10   :  { %24309 = vrcp.f32 %v19024_v37  ;;  %v19025_v20 = vadd.f32 1.0, %v24306_v18  ;;  %v18774_v59 = vadd.f32 %v18773_v31, %v17433_v27  ;;  %v18734_v36 = vpop.f32.mrb[206].mxu1  ;;  %v18775_v3 = vpop.f32.mrb[210].mxu0  ;;  %v21001_v42 = vmul.f32 -1.442695, %v18731_v11  ;;  %p24408_p2 = scmp.ne.s32.totalorder %s19241_s22, %s24407_s8  ;;  %p24413_p4 = scmp.lt.s32.totalorder %s24407_s8, %s24407_s8 }
 0xc11   :  { %24311 = vrcp.f32 %v19023_v19  ;;  %v21003_v43 = vmul.f32 -1.442695, %v18772_v16  ;;  %v18735_v35 = vpop.f32.mrb[207].mxu1  ;;  %v18776_v44 = vpop.f32.mrb[211].mxu0  ;;  %v21002_v45 = vmul.f32 -1.442695, %v18733_v32  ;;  %v17461_v36 = vrot.slane %v30504_v58, %v26380_v53 }
 0xc12   :  { %24313 = vrcp.f32 %v19025_v20  ;;  %v21004_v12 = vmul.f32 -1.442695, %v18774_v59  ;;  %v17453_v59 = vrot.slane %v30504_v58, %v26377_v52  ;;  %p24414_p5 = por %p24413_p4, %p24412_p3 }
 0xc13   :  { %24315 = vpow2.f32 %v21001_v42  ;;  %v17465_v42 = vrot.slane %v30504_v58, %v26386_v55 }
 0xc14   :  { %24317 = vpow2.f32 %v21003_v43  ;;  %p24415_p6 = pnand %p24414_p5, %p24408_p2 }
 0xc15   :  { %24319 = vpow2.f32 %v21002_v45 }
 0xc16   :  { %24321 = vpow2.f32 %v21004_v12 }
 0xc19   :  { %v24308_v21 = vpop.eup %24307 }
 0xc1a   :  { %v24310_v23 = vpop.eup %24309 }
 0xc1b   :  { %v24312_v2 = vpop.eup %24311 }
 0xc1c   :  { %v24314_v41 = vpop.eup %24313  ;;  %v19144_v9 = vcombine.low %v24308_v21, %v24312_v2 }
 0xc1d   :  { %v19145_v47 = vcombine.low %v24310_v23, %v24314_v41  ;;  %v24316_v61 = vpop.eup %24315 }
 0xc1e   :  { %v19152_v22 = vrot.slane %v19144_v9, %v26301_v6  ;;  %v24318_v49 = vpop.eup %24317  ;;  %v19026_v17 = vadd.f32 1.0, %v24316_v61 }
 0xc1f   :  { %v19159_v39 = vrot.slane %v19145_v47, %v26301_v6  ;;  %v24320_v51 = vpop.eup %24319  ;;  %v19028_v56 = vadd.f32 1.0, %v24318_v49 }
 0xc20   :  { %v24322_v57 = vpop.eup %24321  ;;  %24323 = vrcp.f32 %v19026_v17  ;;  %v19027_v46 = vadd.f32 1.0, %v24320_v51 }
 0xc21   :  { %v19160_v48 = vcombine.low %v19152_v22, %v19159_v39  ;;  %24325 = vrcp.f32 %v19028_v56  ;;  %v19029_v38 = vadd.f32 1.0, %v24322_v57  ;;  %v17457_v39 = vrot.slane %v30504_v58, %v26383_v54 }
 0xc22   :  { %24327 = vrcp.f32 %v19027_v46 }
 0xc23   :  { %19220 = vst [vmem:[#allocation4 + $0x10] sm:$0xff] %v19160_v48  ;;  %24329 = vrcp.f32 %v19029_v38 }
 0xc2a   :  { %v24324_v60 = vpop.eup %24323 }
 0xc2b   :  { %v24326_v33 = vpop.eup %24325  ;;  %v18812_v14 = vpop.f32.mrb[208].mxu1 }
 0xc2c   :  { %v24328_v50 = vpop.eup %24327  ;;  %v18853_v34 = vpop.f32.mrb[212].mxu0  ;;  %v18813_v15 = vadd.f32 %v18812_v14, %v17437_v62 }
 0xc2d   :  { %v24330_v13 = vpop.eup %24329  ;;  %v19161_v63 = vcombine.low %v24324_v60, %v24328_v50  ;;  %v18854_v37 = vadd.f32 %v18853_v34, %v17445_v0  ;;  %v18814_v18 = vpop.f32.mrb[209].mxu1 }
 0xc2e   :  { %v19162_v1 = vcombine.low %v24326_v33, %v24330_v13  ;;  %v18855_v19 = vpop.f32.mrb[213].mxu0  ;;  %v18815_v20 = vadd.f32 %v18814_v18, %v17441_v29  ;;  %v18816_v21 = vpop.f32.mrb[210].mxu1  ;;  %v21005_v25 = vmul.f32 -1.442695, %v18813_v15 }
 0xc2f   :  { %v19169_v4 = vrot.slane %v19161_v63, %v26301_v6  ;;  %v18856_v7 = vadd.f32 %v18855_v19, %v17449_v5  ;;  %v18857_v23 = vpop.f32.mrb[214].mxu0  ;;  %v21007_v26 = vmul.f32 -1.442695, %v18854_v37  ;;  %v18817_v40 = vpop.f32.mrb[211].mxu1 }
 0xc30   :  { %v19176_v10 = vrot.slane %v19162_v1, %v26301_v6  ;;  %v18858_v2 = vpop.f32.mrb[215].mxu0  ;;  %v21006_v28 = vmul.f32 -1.442695, %v18815_v20  ;;  %24331 = vpow2.f32 %v21005_v25 }
 0xc31   :  { %v21008_v27 = vmul.f32 -1.442695, %v18856_v7  ;;  %24333 = vpow2.f32 %v21007_v26 }
 0xc32   :  { %v19177_v41 = vcombine.low %v19169_v4, %v19176_v10  ;;  %24335 = vpow2.f32 %v21006_v28 }
 0xc33   :  { %24337 = vpow2.f32 %v21008_v27 }
 0xc34   :  { %19221 = vst [vmem:[#allocation4 + $0x18] sm:$0xff] %v19177_v41 }
 0xc3a   :  { %v24332_v9 = vpop.eup %24331 }
 0xc3b   :  { %v24334_v47 = vpop.eup %24333  ;;  %v19030_v24 = vadd.f32 1.0, %v24332_v9 }
 0xc3c   :  { %v24336_v8 = vpop.eup %24335  ;;  %v19032_v11 = vadd.f32 1.0, %v24334_v47 }
 0xc3d   :  { %v24338_v16 = vpop.eup %24337  ;;  %24339 = vrcp.f32 %v19030_v24  ;;  %v19031_v30 = vadd.f32 1.0, %v24336_v8 }
 0xc3e   :  { %24341 = vrcp.f32 %v19032_v11  ;;  %v19033_v31 = vadd.f32 1.0, %v24338_v16 }
 0xc3f   :  { %24343 = vrcp.f32 %v19031_v30 }
 0xc40   :  { %24345 = vrcp.f32 %v19033_v31 }
 0xc47   :  { %v24340_v22 = vpop.eup %24339 }
 0xc48   :  { %v24342_v32 = vpop.eup %24341 }
 0xc49   :  { %v24344_v3 = vpop.eup %24343 }
 0xc4a   :  { %v24346_v43 = vpop.eup %24345  ;;  %v19178_v35 = vcombine.low %v24340_v22, %v24344_v3 }
 0xc4b   :  { %v19179_v44 = vcombine.low %v24342_v32, %v24346_v43  ;;  %v18894_v45 = vpop.f32.mrb[212].mxu1  ;;  %v18935_v12 = vpop.f32.mrb[216].mxu0 }
 0xc4c   :  { %v18895_v48 = vadd.f32 %v18894_v45, %v17453_v59  ;;  %v18936_v61 = vadd.f32 %v18935_v12, %v17461_v36  ;;  %v18896_v49 = vpop.f32.mrb[213].mxu1  ;;  %v18937_v17 = vpop.f32.mrb[217].mxu0  ;;  %v19186_v52 = vrot.slane %v19178_v35, %v26301_v6 }
 0xc4d   :  { %v18897_v51 = vadd.f32 %v18896_v49, %v17457_v39  ;;  %v18938_v53 = vadd.f32 %v18937_v17, %v17465_v42  ;;  %v18898_v56 = vpop.f32.mrb[214].mxu1  ;;  %v18939_v57 = vpop.f32.mrb[218].mxu0  ;;  %v19193_v54 = vrot.slane %v19179_v44, %v26301_v6 }
 0xc4e   :  { %v21009_v46 = vmul.f32 -1.442695, %v18895_v48  ;;  %v21011_v38 = vmul.f32 -1.442695, %v18936_v61  ;;  %v18899_v55 = vpop.f32.mrb[215].mxu1  ;;  %v18940_v58 = vpop.f32.mrb[219].mxu0 }
 0xc4f   :  { %v21010_v60 = vmul.f32 -1.442695, %v18897_v51  ;;  %v21012_v33 = vmul.f32 -1.442695, %v18938_v53  ;;  %v19194_v62 = vcombine.low %v19186_v52, %v19193_v54 }
 0xc50   :  { %24347 = vpow2.f32 %v21009_v46 }
 0xc51   :  { %24349 = vpow2.f32 %v21011_v38  ;;  %19222 = vst [vmem:[#allocation4 + $0x20] sm:$0xff] %v19194_v62 }
 0xc52   :  { %24351 = vpow2.f32 %v21010_v60 }
 0xc53   :  { %24353 = vpow2.f32 %v21012_v33 }
 0xc5a   :  { %v24348_v0 = vpop.eup %24347 }
 0xc5b   :  { %v24350_v50 = vpop.eup %24349  ;;  %v19034_v29 = vadd.f32 1.0, %v24348_v0 }
 0xc5c   :  { %v24352_v5 = vpop.eup %24351  ;;  %v19036_v13 = vadd.f32 1.0, %v24350_v50 }
 0xc5d   :  { %v24354_v63 = vpop.eup %24353  ;;  %24355 = vrcp.f32 %v19034_v29  ;;  %v19035_v1 = vadd.f32 1.0, %v24352_v5 }
 0xc5e   :  { %24357 = vrcp.f32 %v19036_v13  ;;  %v19037_v14 = vadd.f32 1.0, %v24354_v63 }
 0xc5f   :  { %24359 = vrcp.f32 %v19035_v1 }
 0xc60   :  { %24361 = vrcp.f32 %v19037_v14 }
 0xc67   :  { %v24356_v34 = vpop.eup %24355 }
 0xc68   :  { %v24358_v15 = vpop.eup %24357 }
 0xc69   :  { %v24360_v37 = vpop.eup %24359 }
 0xc6a   :  { %v24362_v18 = vpop.eup %24361  ;;  %v19195_v19 = vcombine.low %v24356_v34, %v24360_v37 }
 0xc6b   :  { %v19196_v4 = vcombine.low %v24358_v15, %v24362_v18 }
 0xc6c   :  { %v19203_v20 = vrot.slane %v19195_v19, %v26301_v6 }
 0xc6d   :  { %v19210_v7 = vrot.slane %v19196_v4, %v26301_v6 }
 0xc6f   :  { %v19211_v21 = vcombine.low %v19203_v20, %v19210_v7 }
 0xc71   :  { %19223 = vst [vmem:[#allocation4 + $0x28] sm:$0xff] %v19211_v21 }
 0xc72   :  { %24418 = shalt.err (!%p24415_p6)
}
 0xc73   :  { %s24419_s10 = scalar_lea.hbm %s30571_s19, 768 }
 0xc74   :  { %p24420_p7 = scmp.ne.s32.totalorder %s30571_s19, %s24419_s10  ;;  %p24423_p8 = scmp.lt.u32.totalorder %s24419_s10, %s30571_s19 }
 0xc76   :  { %p24425_p9 = pnand %p24423_p8, %p24420_p7 }
 0xc78   :  { %24428 = shalt.err (!%p24425_p9)
}
 0xc79   :  { %19243 = dma.vmem_to_hbm [thread:$0]  %s19241_s22, 768, %s30571_s19, [#allocation5]  }
 0xc7a   :  { %s24429_s11 = scalar_lea.vmem %s19251_s27, 32  ;;  %p24434_p11 = scmp.lt.s32.totalorder %s19251_s27, %s19251_s27 }
 0xc7b   :  { %p24430_p10 = scmp.ne.s32.totalorder %s19251_s27, %s24429_s11  ;;  %p24435_p12 = scmp.lt.s32.totalorder %s24429_s11, %s24429_s11 }
 0xc7d   :  { %p24436_p13 = por %p24435_p12, %p24434_p11 }
 0xc7f   :  { %p24437_p0 = pnand %p24436_p13, %p24430_p10 }
 0xc81   :  { %24440 = shalt.err (!%p24437_p0)
}
 0xc82   :  { %s24441_s6 = scalar_lea.hbm %s30572_s20, 32 }
 0xc83   :  { %p24442_p1 = scmp.ne.s32.totalorder %s30572_s20, %s24441_s6  ;;  %p24445_p2 = scmp.lt.u32.totalorder %s24441_s6, %s30572_s20 }
 0xc85   :  { %p24447_p3 = pnand %p24445_p2, %p24442_p1 }
 0xc87   :  { %24450 = shalt.err (!%p24447_p3)
}
 0xc88   :  { %19253 = dma.vmem_to_hbm [thread:$0]  %s19251_s27, 32, %s30572_s20, [#allocation5]  }
 0xc89   :  { %24451 = dma.done.wait [#allocation3], 768  }
 0xc8a   :  { %24452 = vsyncadd [#allocation3], 4294966528 }
 0xc8b   :  { %24453 = dma.done.wait [#allocation5], 800  }
 0xc8c   :  { %24454 = vsyncadd [#allocation5], 4294966496 }
 0xc8d   :  { %24455 = dma.done.wait [#allocation8], 32  }
 0xc8e   :  { %24456 = vsyncadd [#allocation8], 4294967264 }
 0xc8f   :  { %19276 = vsyncpa [#allocation3], 1 }
 0xc90   :  { %19277 = vsyncpa [#allocation5], 1 }
 0xc91   :  { %19278 = vsyncpa [#allocation8], 1 }

</bundles_post_ra>
